<compile_context>
chip_gen: v5e
topology: v5e:2x2
jax: 0.10.0
libtpu: 0.0.40
codegen_flags: <defaults>
</compile_context>

<pallas_src>
import math

import jax
import jax.numpy as jnp
from jax.experimental import pallas as pl
from jax.experimental.pallas import tpu as pltpu

NF = 32               # nf
UP = 2                # upscale ('SxN')
K = 5                 # SRNet unfold kernel
P = K - 1
NPOS = K * K          # 25 RC heads
WIN = 6               # 6x6 window = 5x5 patch + 2x2 shift halo
NWIN = WIN * WIN      # 36
NROWS = NWIN + 2      # window rows + 2 edge-flag rows
TM = 2048             # pixels per grid step (lane dimension inside the kernel)


# ------------------------- fused SRNet forward kernel ------------------------
def _srnet_kernel(win_ref, a4_ref, wn_ref, w2_ref, w3_ref, w4_ref, w5_ref,
                  w6_ref, b_ref, o_ref, feats_ref):
    # ---- RC_Module (collapsed to affine) for the 4 shifted 5x5 positions -----
    # a4 is (4, 38) bf16 with zeros over the two flag rows, so one bf16 MXU dot
    # against the full window slab covers all four shifts.
    m = jnp.dot(a4_ref[...], win_ref[...],
                preferred_element_type=jnp.float32) + b_ref[0:1, 6:7]   # (4, TM)
    # quantization chain (RC tanh -> round*127 -> +127/clamp -> /255 -> MuLUT tanh)
    t = jnp.tanh(m)
    r = jnp.clip(jnp.round(t * 127.0) + 127.0, 0.0, 255.0) * (1.0 / 255.0)
    s = jnp.tanh(r)                                                     # (4, TM) f32

    # ---- replicate-pad 2x2 gather: fix right/bottom edges of the RC map ------
    lc = win_ref[NWIN:NWIN + 1, :] > 0.5          # last-column flag (1, TM)
    lr = win_ref[NWIN + 1:NWIN + 2, :] > 0.5      # last-row flag    (1, TM)
    s0, s1, s2, s3 = s[0:1], s[1:2], s[2:3], s[3:4]
    s1f = jnp.where(lc, s0, s1)
    s2f = jnp.where(lr, s0, s2)
    s3f = jnp.where(lr, s1f, jnp.where(lc, s2, s3))
    sq = jnp.concatenate([s0, s1f, s2f, s3f], axis=0).astype(jnp.bfloat16)

    # ---- conv_naive (2x2 -> NF) + ReLU, on the MXU ----------------------------
    f0 = jnp.maximum(
        jnp.dot(wn_ref[...], sq, preferred_element_type=jnp.float32)
        + b_ref[:, 0:1], 0.0)
    feats_ref[0:NF, :] = f0.astype(jnp.bfloat16)

    # ---- DenseConv chain: one full-K bf16 dot per layer into the concat scratch
    for li, w_ref in enumerate((w2_ref, w3_ref, w4_ref, w5_ref)):       # conv2..5
        kdim = (li + 1) * NF
        f = jnp.maximum(
            jnp.dot(w_ref[...], feats_ref[0:kdim, :],
                    preferred_element_type=jnp.float32)
            + b_ref[:, li + 1:li + 2], 0.0)
        feats_ref[kdim:kdim + NF, :] = f.astype(jnp.bfloat16)

    # ---- conv6 (5*NF -> 4) + tanh ---------------------------------------------
    out = jnp.dot(w6_ref[...], feats_ref[0:5 * NF, :],
                  preferred_element_type=jnp.float32) + b_ref[0:4, 5:6]
    o_ref[...] = jnp.tanh(out)                                          # (4, TM)


# ------------------------------ parameter packing ----------------------------
def _pack_weights(params):
    """RC collapse + per-layer bf16 weights; biases / RC constant stay f32."""
    rw1, rb1, rw2, rb2 = params["rc"]              # (25,NF),(25,NF),(25,NF),(25,)
    # Linear(1,nf)->Linear(nf,1) has no nonlinearity in between -> affine collapse.
    a = jnp.sum(rw1 * rw2, axis=1) / float(NPOS)                 # (25,)
    c = (jnp.sum(rb1 * rw2) + jnp.sum(rb2)) / float(NPOS)        # scalar (kept f32)
    a55 = a.reshape(K, K)
    a4 = jnp.zeros((4, WIN, WIN), jnp.float32)
    for n, (dh, dw) in enumerate(((0, 0), (0, 1), (1, 0), (1, 1))):
        a4 = a4.at[n, dh:dh + K, dw:dw + K].set(a55)
    a4 = a4.reshape(4, NWIN)
    a4 = jnp.pad(a4, ((0, 0), (0, 2))).astype(jnp.bfloat16)      # zeros on flag rows

    (wn, bn, wc2, bc2, wc3, bc3, wc4, bc4, wc5, bc5, wc6, bc6) = params["mlp"]
    bpack = jnp.zeros((NF, 8), jnp.float32)
    bpack = bpack.at[:, 0].set(bn)
    bpack = bpack.at[:, 1].set(bc2)
    bpack = bpack.at[:, 2].set(bc3)
    bpack = bpack.at[:, 3].set(bc4)
    bpack = bpack.at[:, 4].set(bc5)
    bpack = bpack.at[0:4, 5].set(bc6)
    bpack = bpack.at[0, 6].set(c)
    bf = lambda w: w.astype(jnp.bfloat16)
    return a4, bf(wn), bf(wc2), bf(wc3), bf(wc4), bf(wc5), bf(wc6), bpack


# ----------------------------------- wrapper ----------------------------------
def srnet_forward(x, params):
    B, C, H, W = x.shape
    Hd, Wd = H - P, W - P
    BC = B * C
    N = BC * Hd * Wd
    n_pad = ((N + TM - 1) // TM) * TM

    # 6x6 window per output pixel (covers the 5x5 patches of the own/right/down/
    # down-right shifted positions).  Layout (36, N) bf16: pixels on lanes.
    xr = x.reshape(BC, H, W).astype(jnp.bfloat16)
    xp = jnp.pad(xr, ((0, 0), (0, 1), (0, 1)), mode="edge")
    win = jnp.stack([xp[:, i:i + Hd, j:j + Wd]
                     for i in range(WIN) for j in range(WIN)], axis=0)
    win = win.reshape(NWIN, N)

    # replicate-pad flags for the 2x2 gather, folded in as two extra bf16 rows
    lc = jnp.broadcast_to((jnp.arange(Wd) == Wd - 1)[None, None, :],
                          (BC, Hd, Wd)).reshape(1, N)
    lr = jnp.broadcast_to((jnp.arange(Hd) == Hd - 1)[None, :, None],
                          (BC, Hd, Wd)).reshape(1, N)
    flags = jnp.concatenate([lc, lr], axis=0).astype(jnp.bfloat16)
    win = jnp.concatenate([win, flags], axis=0)                  # (38, N)
    win = jnp.pad(win, ((0, 0), (0, n_pad - N)))

    a4, wn, w2, w3, w4, w5, w6, bpack = _pack_weights(params)

    const = lambda i: (0, 0)
    out = pl.pallas_call(
        _srnet_kernel,
        out_shape=jax.ShapeDtypeStruct((4, n_pad), jnp.float32),
        grid=(n_pad // TM,),
        in_specs=[
            pl.BlockSpec((NROWS, TM), lambda i: (0, i)),   # window + edge flags
            pl.BlockSpec(a4.shape, const),                 # collapsed RC (4, 38)
            pl.BlockSpec(wn.shape, const),                 # conv_naive  (NF, 4)
            pl.BlockSpec(w2.shape, const),                 # conv2 (NF, NF)
            pl.BlockSpec(w3.shape, const),                 # conv3 (NF, 2NF)
            pl.BlockSpec(w4.shape, const),                 # conv4 (NF, 3NF)
            pl.BlockSpec(w5.shape, const),                 # conv5 (NF, 4NF)
            pl.BlockSpec(w6.shape, const),                 # conv6 (4, 5NF)
            pl.BlockSpec(bpack.shape, const),              # biases + RC constant
        ],
        out_specs=pl.BlockSpec((4, TM), lambda i: (0, i)),
        scratch_shapes=[pltpu.VMEM((5 * NF, TM), jnp.bfloat16)],
        # TODO(synk): on v7x confirm the 'parallel' pixel axis is split across both
        # TensorCores; if the profile shows one idle TC, switch to CORE_PARALLEL.
        compiler_params=pltpu.CompilerParams(
            dimension_semantics=("parallel",)),
    )(win, a4, wn, w2, w3, w4, w5, w6, bpack)

    # PixelShuffle(2) + F.fold(kernel=2, stride=2)
    out4 = out[:, :N].T                                          # (N, 4)
    out4 = out4.reshape(B, C, Hd, Wd, UP, UP).transpose(0, 1, 2, 4, 3, 5)
    return out4.reshape(B, C, Hd * UP, Wd * UP)


# ------------------------- pure-JAX f32 reference (un-collapsed) --------------
def srnet_reference(x, params):
    B, C, H, W = x.shape
    Hd, Wd = H - P, W - P
    xr = x.reshape(B * C, H, W)
    pat = jnp.stack([xr[:, i:i + Hd, j:j + Wd]
                     for i in range(K) for j in range(K)], axis=-1)
    pat = pat.reshape(-1, NPOS)
    rw1, rb1, rw2, rb2 = params["rc"]
    h = pat[:, :, None] * rw1[None, :, :] + rb1[None, :, :]     # 25x Linear(1,nf)
    o = jnp.sum(h * rw2[None, :, :], axis=-1) + rb2[None, :]    # 25x Linear(nf,1)
    m = jnp.mean(o, axis=1)
    t = jnp.tanh(m)
    r = jnp.round(t * 127.0)
    r = jnp.round(jnp.clip(r + 127.0, 0.0, 255.0)) / 255.0
    s = jnp.tanh(r)
    smap = s.reshape(B * C, Hd, Wd)
    sp = jnp.pad(smap, ((0, 0), (0, 1), (0, 1)), mode="edge")
    v = jnp.stack([sp[:, :Hd, :Wd], sp[:, :Hd, 1:Wd + 1],
                   sp[:, 1:Hd + 1, :Wd], sp[:, 1:Hd + 1, 1:Wd + 1]],
                  axis=-1).reshape(-1, 4)
    (wn, bn, wc2, bc2, wc3, bc3, wc4, bc4, wc5, bc5, wc6, bc6) = params["mlp"]
    feats = jnp.maximum(v @ wn.T + bn, 0.0)
    for wgt, bia in ((wc2, bc2), (wc3, bc3), (wc4, bc4), (wc5, bc5)):
        f = jnp.maximum(feats @ wgt.T + bia, 0.0)
        feats = jnp.concatenate([feats, f], axis=1)
    out4 = jnp.tanh(feats @ wc6.T + bc6)
    out4 = out4.reshape(B, C, Hd, Wd, UP, UP).transpose(0, 1, 2, 4, 3, 5)
    return out4.reshape(B, C, Hd * UP, Wd * UP)


# ----------------------------------- params -----------------------------------
def init_params(key):
    ks = jax.random.split(key, 10)
    uni = lambda k, shape, b: jax.random.uniform(k, shape, jnp.float32, -b, b)
    kaiming = lambda k, shape, fan_in: (
        jax.random.normal(k, shape, jnp.float32) * math.sqrt(2.0 / fan_in))
    zeros = lambda shape: jnp.zeros(shape, jnp.float32)
    rc = (uni(ks[0], (NPOS, NF), 1.0),                       # linear{i}.weight
          uni(ks[1], (NPOS, NF), 1.0),                       # linear{i}.bias
          uni(ks[2], (NPOS, NF), 1.0 / math.sqrt(NF)),       # out{i}.weight
          uni(ks[3], (NPOS,), 1.0 / math.sqrt(NF)))          # out{i}.bias
    mlp = (kaiming(ks[4], (NF, 4), 4), zeros((NF,)),               # conv_naive
           kaiming(ks[5], (NF, NF), NF), zeros((NF,)),             # conv2
           kaiming(ks[6], (NF, 2 * NF), 2 * NF), zeros((NF,)),     # conv3
           kaiming(ks[7], (NF, 3 * NF), 3 * NF), zeros((NF,)),     # conv4
           kaiming(ks[8], (NF, 4 * NF), 4 * NF), zeros((NF,)),     # conv5
           kaiming(ks[9], (4, 5 * NF), 5 * NF), zeros((4,)))       # conv6
    return {"rc": rc, "mlp": mlp}


if __name__ == "__main__":
    key = jax.random.PRNGKey(0)
    kp, kx = jax.random.split(key)
    params = init_params(kp)
    x = jax.random.uniform(kx, (2, 1, 16, 16), dtype=jnp.float32)  # NCHW in [0,1]
    y = jax.jit(srnet_forward)(x, params)
    jax.block_until_ready(y)
    assert y.shape == (2, 1, (16 - P) * UP, (16 - P) * UP), y.shape
    assert y.dtype == jnp.float32
    # Sanity check against the un-collapsed pure-f32 reference.  Tolerance covers
    # the bf16 MXU path (bf16 weights/activations, f32 accumulation) and the hard
    # round/clip quantization, which can flip on ulp-level matmul differences.
    y_ref = srnet_reference(x, params)
    mean_err = float(jnp.mean(jnp.abs(y - y_ref)))
    assert mean_err < 1.5e-2, mean_err
    print("KERNEL_OK")
</pallas_src>

<mosaic_0001>
module attributes {stable_mosaic.version = 11 : i64} {
  func.func @_srnet_kernel(%arg0: i32, %arg1: memref<38x2048xbf16, #tpu.memory_space<vmem>>, %arg2: memref<4x38xbf16, #tpu.memory_space<vmem>>, %arg3: memref<32x4xbf16, #tpu.memory_space<vmem>>, %arg4: memref<32x32xbf16, #tpu.memory_space<vmem>>, %arg5: memref<32x64xbf16, #tpu.memory_space<vmem>>, %arg6: memref<32x96xbf16, #tpu.memory_space<vmem>>, %arg7: memref<32x128xbf16, #tpu.memory_space<vmem>>, %arg8: memref<4x160xbf16, #tpu.memory_space<vmem>>, %arg9: memref<32x8xf32, #tpu.memory_space<vmem>>, %arg10: memref<4x2048xf32, #tpu.memory_space<vmem>>, %arg11: memref<160x2048xbf16, #tpu.memory_space<vmem>>) attributes {dimension_semantics = [#tpu.dimension_semantics<parallel>], iteration_bounds = array<i64: 1>, scalar_prefetch = 0 : i64, scratch_operands = 1 : i64, tpu.core_type = #tpu.core_type<tc>, window_params = [{transform_indices = @transform_0, window_bounds = array<i64: 38, 2048>}, {pipeline_mode = #tpu.pipeline_mode<synchronous>, transform_indices = @transform_1, window_bounds = array<i64: 4, 38>}, {pipeline_mode = #tpu.pipeline_mode<synchronous>, transform_indices = @transform_2, window_bounds = array<i64: 32, 4>}, {pipeline_mode = #tpu.pipeline_mode<synchronous>, transform_indices = @transform_3, window_bounds = array<i64: 32, 32>}, {pipeline_mode = #tpu.pipeline_mode<synchronous>, transform_indices = @transform_4, window_bounds = array<i64: 32, 64>}, {pipeline_mode = #tpu.pipeline_mode<synchronous>, transform_indices = @transform_5, window_bounds = array<i64: 32, 96>}, {pipeline_mode = #tpu.pipeline_mode<synchronous>, transform_indices = @transform_6, window_bounds = array<i64: 32, 128>}, {pipeline_mode = #tpu.pipeline_mode<synchronous>, transform_indices = @transform_7, window_bounds = array<i64: 4, 160>}, {pipeline_mode = #tpu.pipeline_mode<synchronous>, transform_indices = @transform_8, window_bounds = array<i64: 32, 8>}, {transform_indices = @transform_9, window_bounds = array<i64: 4, 2048>}]} {
    %c0 = arith.constant 0 : index
    %c0_0 = arith.constant 0 : index
    %0 = vector.load %arg2[%c0, %c0_0] : memref<4x38xbf16, #tpu.memory_space<vmem>>, vector<4x38xbf16>
    %c0_1 = arith.constant 0 : index
    %c0_2 = arith.constant 0 : index
    %1 = vector.load %arg1[%c0_1, %c0_2] : memref<38x2048xbf16, #tpu.memory_space<vmem>>, vector<38x2048xbf16>
    %cst = arith.constant dense<0.000000e+00> : vector<4x2048xf32>
    %2 = tpu.matmul %0, %1, %cst {dimension_numbers = #tpu.dot_dimension_numbers<[1], [0], [0], [1], [0, 0, 1, 1], [], []>} : vector<4x38xbf16>, vector<38x2048xbf16>, vector<4x2048xf32> -> vector<4x2048xf32>
    %c0_3 = arith.constant 0 : index
    %c6 = arith.constant 6 : index
    %3 = vector.load %arg9[%c0_3, %c6] : memref<32x8xf32, #tpu.memory_space<vmem>>, vector<1x1xf32>
    %4 = vector.broadcast %3 : vector<1x1xf32> to vector<4x2048xf32>
    %5 = arith.addf %2, %4 : vector<4x2048xf32>
    %6 = math.tanh %5 : vector<4x2048xf32>
    %cst_4 = arith.constant 1.270000e+02 : f32
    %7 = vector.broadcast %cst_4 : f32 to vector<4x2048xf32>
    %8 = arith.mulf %6, %7 : vector<4x2048xf32>
    %9 = math.roundeven %8 : vector<4x2048xf32>
    %cst_5 = arith.constant 1.270000e+02 : f32
    %10 = vector.broadcast %cst_5 : f32 to vector<4x2048xf32>
    %11 = arith.addf %9, %10 : vector<4x2048xf32>
    %cst_6 = arith.constant 0.000000e+00 : f32
    %cst_7 = arith.constant 2.550000e+02 : f32
    %12 = vector.broadcast %cst_6 : f32 to vector<4x2048xf32>
    %13 = arith.maximumf %12, %11 : vector<4x2048xf32>
    %14 = vector.broadcast %cst_7 : f32 to vector<4x2048xf32>
    %15 = arith.minimumf %14, %13 : vector<4x2048xf32>
    %cst_8 = arith.constant 0.00392156886 : f32
    %16 = vector.broadcast %cst_8 : f32 to vector<4x2048xf32>
    %17 = arith.mulf %15, %16 : vector<4x2048xf32>
    %18 = math.tanh %17 : vector<4x2048xf32>
    %c36 = arith.constant 36 : index
    %c0_9 = arith.constant 0 : index
    %19 = vector.load %arg1[%c36, %c0_9] : memref<38x2048xbf16, #tpu.memory_space<vmem>>, vector<1x2048xbf16>
    %cst_10 = arith.constant 5.000000e-01 : bf16
    %20 = vector.broadcast %cst_10 : bf16 to vector<1x2048xbf16>
    %21 = arith.cmpf ogt, %19, %20 : vector<1x2048xbf16>
    %c37 = arith.constant 37 : index
    %c0_11 = arith.constant 0 : index
    %22 = vector.load %arg1[%c37, %c0_11] : memref<38x2048xbf16, #tpu.memory_space<vmem>>, vector<1x2048xbf16>
    %cst_12 = arith.constant 5.000000e-01 : bf16
    %23 = vector.broadcast %cst_12 : bf16 to vector<1x2048xbf16>
    %24 = arith.cmpf ogt, %22, %23 : vector<1x2048xbf16>
    %25 = vector.extract_strided_slice %18 {offsets = [0, 0], sizes = [1, 2048], strides = [1, 1]} : vector<4x2048xf32> to vector<1x2048xf32>
    %26 = vector.extract_strided_slice %18 {offsets = [1, 0], sizes = [1, 2048], strides = [1, 1]} : vector<4x2048xf32> to vector<1x2048xf32>
    %27 = vector.extract_strided_slice %18 {offsets = [2, 0], sizes = [1, 2048], strides = [1, 1]} : vector<4x2048xf32> to vector<1x2048xf32>
    %28 = vector.extract_strided_slice %18 {offsets = [3, 0], sizes = [1, 2048], strides = [1, 1]} : vector<4x2048xf32> to vector<1x2048xf32>
    %29 = arith.select %21, %25, %26 : vector<1x2048xi1>, vector<1x2048xf32>
    %30 = arith.select %24, %25, %27 : vector<1x2048xi1>, vector<1x2048xf32>
    %31 = arith.select %21, %27, %28 : vector<1x2048xi1>, vector<1x2048xf32>
    %32 = arith.select %24, %29, %31 : vector<1x2048xi1>, vector<1x2048xf32>
    %33 = tpu.concatenate %25, %29, %30, %32 in 0 : vector<1x2048xf32>, vector<1x2048xf32>, vector<1x2048xf32>, vector<1x2048xf32> -> vector<4x2048xf32>
    %34 = arith.truncf %33 : vector<4x2048xf32> to vector<4x2048xbf16>
    %c0_13 = arith.constant 0 : index
    %c0_14 = arith.constant 0 : index
    %35 = vector.load %arg3[%c0_13, %c0_14] : memref<32x4xbf16, #tpu.memory_space<vmem>>, vector<32x4xbf16>
    %cst_15 = arith.constant dense<0.000000e+00> : vector<32x2048xf32>
    %36 = tpu.matmul %35, %34, %cst_15 {dimension_numbers = #tpu.dot_dimension_numbers<[1], [0], [0], [1], [0, 0, 1, 1], [], []>} : vector<32x4xbf16>, vector<4x2048xbf16>, vector<32x2048xf32> -> vector<32x2048xf32>
    %c0_16 = arith.constant 0 : index
    %c0_17 = arith.constant 0 : index
    %37 = vector.load %arg9[%c0_16, %c0_17] : memref<32x8xf32, #tpu.memory_space<vmem>>, vector<32x1xf32>
    %38 = vector.broadcast %37 : vector<32x1xf32> to vector<32x2048xf32>
    %39 = arith.addf %36, %38 : vector<32x2048xf32>
    %cst_18 = arith.constant 0.000000e+00 : f32
    %40 = vector.broadcast %cst_18 : f32 to vector<32x2048xf32>
    %41 = arith.maximumf %39, %40 : vector<32x2048xf32>
    %42 = arith.truncf %41 : vector<32x2048xf32> to vector<32x2048xbf16>
    %c0_19 = arith.constant 0 : index
    %c0_20 = arith.constant 0 : index
    %43 = vector.load %arg11[%c0_19, %c0_20] : memref<160x2048xbf16, #tpu.memory_space<vmem>>, vector<32x2048xbf16>
    tpu.vector_store %arg11[%c0_19, %c0_20], %42 {strides = array<i32>} : memref<160x2048xbf16, #tpu.memory_space<vmem>>, vector<32x2048xbf16>,
    %c0_21 = arith.constant 0 : index
    %c0_22 = arith.constant 0 : index
    %44 = vector.load %arg4[%c0_21, %c0_22] : memref<32x32xbf16, #tpu.memory_space<vmem>>, vector<32x32xbf16>
    %c0_23 = arith.constant 0 : index
    %c0_24 = arith.constant 0 : index
    %45 = vector.load %arg11[%c0_23, %c0_24] : memref<160x2048xbf16, #tpu.memory_space<vmem>>, vector<32x2048xbf16>
    %cst_25 = arith.constant dense<0.000000e+00> : vector<32x2048xf32>
    %46 = tpu.matmul %44, %45, %cst_25 {dimension_numbers = #tpu.dot_dimension_numbers<[1], [0], [0], [1], [0, 0, 1, 1], [], []>} : vector<32x32xbf16>, vector<32x2048xbf16>, vector<32x2048xf32> -> vector<32x2048xf32>
    %c0_26 = arith.constant 0 : index
    %c1 = arith.constant 1 : index
    %47 = vector.load %arg9[%c0_26, %c1] : memref<32x8xf32, #tpu.memory_space<vmem>>, vector<32x1xf32>
    %48 = vector.broadcast %47 : vector<32x1xf32> to vector<32x2048xf32>
    %49 = arith.addf %46, %48 : vector<32x2048xf32>
    %cst_27 = arith.constant 0.000000e+00 : f32
    %50 = vector.broadcast %cst_27 : f32 to vector<32x2048xf32>
    %51 = arith.maximumf %49, %50 : vector<32x2048xf32>
    %52 = arith.truncf %51 : vector<32x2048xf32> to vector<32x2048xbf16>
    %c32 = arith.constant 32 : index
    %c0_28 = arith.constant 0 : index
    %53 = vector.load %arg11[%c32, %c0_28] : memref<160x2048xbf16, #tpu.memory_space<vmem>>, vector<32x2048xbf16>
    tpu.vector_store %arg11[%c32, %c0_28], %52 {strides = array<i32>} : memref<160x2048xbf16, #tpu.memory_space<vmem>>, vector<32x2048xbf16>,
    %c0_29 = arith.constant 0 : index
    %c0_30 = arith.constant 0 : index
    %54 = vector.load %arg5[%c0_29, %c0_30] : memref<32x64xbf16, #tpu.memory_space<vmem>>, vector<32x64xbf16>
    %c0_31 = arith.constant 0 : index
    %c0_32 = arith.constant 0 : index
    %55 = vector.load %arg11[%c0_31, %c0_32] : memref<160x2048xbf16, #tpu.memory_space<vmem>>, vector<64x2048xbf16>
    %cst_33 = arith.constant dense<0.000000e+00> : vector<32x2048xf32>
    %56 = tpu.matmul %54, %55, %cst_33 {dimension_numbers = #tpu.dot_dimension_numbers<[1], [0], [0], [1], [0, 0, 1, 1], [], []>} : vector<32x64xbf16>, vector<64x2048xbf16>, vector<32x2048xf32> -> vector<32x2048xf32>
    %c0_34 = arith.constant 0 : index
    %c2 = arith.constant 2 : index
    %57 = vector.load %arg9[%c0_34, %c2] : memref<32x8xf32, #tpu.memory_space<vmem>>, vector<32x1xf32>
    %58 = vector.broadcast %57 : vector<32x1xf32> to vector<32x2048xf32>
    %59 = arith.addf %56, %58 : vector<32x2048xf32>
    %cst_35 = arith.constant 0.000000e+00 : f32
    %60 = vector.broadcast %cst_35 : f32 to vector<32x2048xf32>
    %61 = arith.maximumf %59, %60 : vector<32x2048xf32>
    %62 = arith.truncf %61 : vector<32x2048xf32> to vector<32x2048xbf16>
    %c64 = arith.constant 64 : index
    %c0_36 = arith.constant 0 : index
    %63 = vector.load %arg11[%c64, %c0_36] : memref<160x2048xbf16, #tpu.memory_space<vmem>>, vector<32x2048xbf16>
    tpu.vector_store %arg11[%c64, %c0_36], %62 {strides = array<i32>} : memref<160x2048xbf16, #tpu.memory_space<vmem>>, vector<32x2048xbf16>,
    %c0_37 = arith.constant 0 : index
    %c0_38 = arith.constant 0 : index
    %64 = vector.load %arg6[%c0_37, %c0_38] : memref<32x96xbf16, #tpu.memory_space<vmem>>, vector<32x96xbf16>
    %c0_39 = arith.constant 0 : index
    %c0_40 = arith.constant 0 : index
    %65 = vector.load %arg11[%c0_39, %c0_40] : memref<160x2048xbf16, #tpu.memory_space<vmem>>, vector<96x2048xbf16>
    %cst_41 = arith.constant dense<0.000000e+00> : vector<32x2048xf32>
    %66 = tpu.matmul %64, %65, %cst_41 {dimension_numbers = #tpu.dot_dimension_numbers<[1], [0], [0], [1], [0, 0, 1, 1], [], []>} : vector<32x96xbf16>, vector<96x2048xbf16>, vector<32x2048xf32> -> vector<32x2048xf32>
    %c0_42 = arith.constant 0 : index
    %c3 = arith.constant 3 : index
    %67 = vector.load %arg9[%c0_42, %c3] : memref<32x8xf32, #tpu.memory_space<vmem>>, vector<32x1xf32>
    %68 = vector.broadcast %67 : vector<32x1xf32> to vector<32x2048xf32>
    %69 = arith.addf %66, %68 : vector<32x2048xf32>
    %cst_43 = arith.constant 0.000000e+00 : f32
    %70 = vector.broadcast %cst_43 : f32 to vector<32x2048xf32>
    %71 = arith.maximumf %69, %70 : vector<32x2048xf32>
    %72 = arith.truncf %71 : vector<32x2048xf32> to vector<32x2048xbf16>
    %c96 = arith.constant 96 : index
    %c0_44 = arith.constant 0 : index
    %73 = vector.load %arg11[%c96, %c0_44] : memref<160x2048xbf16, #tpu.memory_space<vmem>>, vector<32x2048xbf16>
    tpu.vector_store %arg11[%c96, %c0_44], %72 {strides = array<i32>} : memref<160x2048xbf16, #tpu.memory_space<vmem>>, vector<32x2048xbf16>,
    %c0_45 = arith.constant 0 : index
    %c0_46 = arith.constant 0 : index
    %74 = vector.load %arg7[%c0_45, %c0_46] : memref<32x128xbf16, #tpu.memory_space<vmem>>, vector<32x128xbf16>
    %c0_47 = arith.constant 0 : index
    %c0_48 = arith.constant 0 : index
    %75 = vector.load %arg11[%c0_47, %c0_48] : memref<160x2048xbf16, #tpu.memory_space<vmem>>, vector<128x2048xbf16>
    %cst_49 = arith.constant dense<0.000000e+00> : vector<32x2048xf32>
    %76 = tpu.matmul %74, %75, %cst_49 {dimension_numbers = #tpu.dot_dimension_numbers<[1], [0], [0], [1], [0, 0, 1, 1], [], []>} : vector<32x128xbf16>, vector<128x2048xbf16>, vector<32x2048xf32> -> vector<32x2048xf32>
    %c0_50 = arith.constant 0 : index
    %c4 = arith.constant 4 : index
    %77 = vector.load %arg9[%c0_50, %c4] : memref<32x8xf32, #tpu.memory_space<vmem>>, vector<32x1xf32>
    %78 = vector.broadcast %77 : vector<32x1xf32> to vector<32x2048xf32>
    %79 = arith.addf %76, %78 : vector<32x2048xf32>
    %cst_51 = arith.constant 0.000000e+00 : f32
    %80 = vector.broadcast %cst_51 : f32 to vector<32x2048xf32>
    %81 = arith.maximumf %79, %80 : vector<32x2048xf32>
    %82 = arith.truncf %81 : vector<32x2048xf32> to vector<32x2048xbf16>
    %c128 = arith.constant 128 : index
    %c0_52 = arith.constant 0 : index
    %83 = vector.load %arg11[%c128, %c0_52] : memref<160x2048xbf16, #tpu.memory_space<vmem>>, vector<32x2048xbf16>
    tpu.vector_store %arg11[%c128, %c0_52], %82 {strides = array<i32>} : memref<160x2048xbf16, #tpu.memory_space<vmem>>, vector<32x2048xbf16>,
    %c0_53 = arith.constant 0 : index
    %c0_54 = arith.constant 0 : index
    %84 = vector.load %arg8[%c0_53, %c0_54] : memref<4x160xbf16, #tpu.memory_space<vmem>>, vector<4x160xbf16>
    %c0_55 = arith.constant 0 : index
    %c0_56 = arith.constant 0 : index
    %85 = vector.load %arg11[%c0_55, %c0_56] : memref<160x2048xbf16, #tpu.memory_space<vmem>>, vector<160x2048xbf16>
    %cst_57 = arith.constant dense<0.000000e+00> : vector<4x2048xf32>
    %86 = tpu.matmul %84, %85, %cst_57 {dimension_numbers = #tpu.dot_dimension_numbers<[1], [0], [0], [1], [0, 0, 1, 1], [], []>} : vector<4x160xbf16>, vector<160x2048xbf16>, vector<4x2048xf32> -> vector<4x2048xf32>
    %c0_58 = arith.constant 0 : index
    %c5 = arith.constant 5 : index
    %87 = vector.load %arg9[%c0_58, %c5] : memref<32x8xf32, #tpu.memory_space<vmem>>, vector<4x1xf32>
    %88 = vector.broadcast %87 : vector<4x1xf32> to vector<4x2048xf32>
    %89 = arith.addf %86, %88 : vector<4x2048xf32>
    %90 = math.tanh %89 : vector<4x2048xf32>
    %c0_59 = arith.constant 0 : index
    %c0_60 = arith.constant 0 : index
    %91 = vector.load %arg10[%c0_59, %c0_60] : memref<4x2048xf32, #tpu.memory_space<vmem>>, vector<4x2048xf32>
    tpu.vector_store %arg10[%c0_59, %c0_60], %90 {strides = array<i32>} : memref<4x2048xf32, #tpu.memory_space<vmem>>, vector<4x2048xf32>,
    return
  }
  func.func @transform_0(%arg0: i32) -> (i32, i32) {
    %c0_i32 = arith.constant 0 : i32
    %c0_i32_0 = arith.constant 0 : i32
    return %c0_i32, %arg0 : i32, i32
  }
  func.func @transform_1(%arg0: i32) -> (i32, i32) {
    %c0_i32 = arith.constant 0 : i32
    %c0_i32_0 = arith.constant 0 : i32
    %c0_i32_1 = arith.constant 0 : i32
    return %c0_i32, %c0_i32_0 : i32, i32
  }
  func.func @transform_2(%arg0: i32) -> (i32, i32) {
    %c0_i32 = arith.constant 0 : i32
    %c0_i32_0 = arith.constant 0 : i32
    %c0_i32_1 = arith.constant 0 : i32
    return %c0_i32, %c0_i32_0 : i32, i32
  }
  func.func @transform_3(%arg0: i32) -> (i32, i32) {
    %c0_i32 = arith.constant 0 : i32
    %c0_i32_0 = arith.constant 0 : i32
    %c0_i32_1 = arith.constant 0 : i32
    return %c0_i32, %c0_i32_0 : i32, i32
  }
  func.func @transform_4(%arg0: i32) -> (i32, i32) {
    %c0_i32 = arith.constant 0 : i32
    %c0_i32_0 = arith.constant 0 : i32
    %c0_i32_1 = arith.constant 0 : i32
    return %c0_i32, %c0_i32_0 : i32, i32
  }
  func.func @transform_5(%arg0: i32) -> (i32, i32) {
    %c0_i32 = arith.constant 0 : i32
    %c0_i32_0 = arith.constant 0 : i32
    %c0_i32_1 = arith.constant 0 : i32
    return %c0_i32, %c0_i32_0 : i32, i32
  }
  func.func @transform_6(%arg0: i32) -> (i32, i32) {
    %c0_i32 = arith.constant 0 : i32
    %c0_i32_0 = arith.constant 0 : i32
    %c0_i32_1 = arith.constant 0 : i32
    return %c0_i32, %c0_i32_0 : i32, i32
  }
  func.func @transform_7(%arg0: i32) -> (i32, i32) {
    %c0_i32 = arith.constant 0 : i32
    %c0_i32_0 = arith.constant 0 : i32
    %c0_i32_1 = arith.constant 0 : i32
    return %c0_i32, %c0_i32_0 : i32, i32
  }
  func.func @transform_8(%arg0: i32) -> (i32, i32) {
    %c0_i32 = arith.constant 0 : i32
    %c0_i32_0 = arith.constant 0 : i32
    %c0_i32_1 = arith.constant 0 : i32
    return %c0_i32, %c0_i32_0 : i32, i32
  }
  func.func @transform_9(%arg0: i32) -> (i32, i32) {
    %c0_i32 = arith.constant 0 : i32
    %c0_i32_0 = arith.constant 0 : i32
    return %c0_i32, %arg0 : i32, i32
  }
}

</mosaic_0001>

<bundles_post_ra>
// kernel: srnet_forward.1
= control target key start
LH: loop header
LB: loop body
LE: loop exit
PB: predicated region body
PF: predicated region fallthrough
CT: control target
= control target key end

     0   :  { %s10070_s15 = smov 122   ;;  %vm285_vm0 = vcmask 1042432   ;;  %vm281_vm1 = vcmask 310272   ;;  %s11845_s8 = inlined_call_operand.vmem [shape: f32[32,8], index: 8, kind: input, shape index: {}]   ;;  %s11846_s0 = inlined_call_operand.vmem [shape: bf16[38,2048], index: 0, kind: input, shape index: {}]   ;;  %s11847_s1 = inlined_call_operand.vmem [shape: bf16[4,38], index: 1, kind: input, shape index: {}]   ;;  %s11848_s2 = inlined_call_operand.vmem [shape: bf16[32,4], index: 2, kind: input, shape index: {}]   ;;  %s11849_s3 = inlined_call_operand.vmem [shape: bf16[32,32], index: 3, kind: input, shape index: {}]   ;;  %s11850_s4 = inlined_call_operand.vmem [shape: bf16[32,64], index: 4, kind: input, shape index: {}]   ;;  %s11851_s5 = inlined_call_operand.vmem [shape: bf16[32,96], index: 5, kind: input, shape index: {}]   ;;  %s11852_s6 = inlined_call_operand.vmem [shape: bf16[32,128], index: 6, kind: input, shape index: {}]   ;;  %s11853_s7 = inlined_call_operand.vmem [shape: bf16[4,160], index: 7, kind: input, shape index: {}]   ;;  %s11854_s9 = inlined_call_operand.vmem [shape: f32[4,2048], index: 9, kind: output, shape index: {}]  }
   0x1   :  { %v74_v0 = vld [vmem:[%s11845_s8] sm:$0x1]  ;;  %v67_v2 = vld [vmem:[%s11846_s0 + $0x108] sm:$0x77]  ;;  %v9311_v13 = vld [vmem:[%s11846_s0 + $0x84] sm:$0xf] }
   0x2   :  { %v66_v1 = vld [vmem:[%s11846_s0 + $0x100] sm:$0x77]  ;;  %76 = vrot.lane.b32.xlu0 %v74_v0, %s10070_s15  ;;  %v187_v5 = vunpack.c.l.b16 %v67_v2  ;;  %v188_v6 = vunpack.c.h.b16 %v67_v2  ;;  %v7121_v15 = vld [vmem:[%s11846_s0 + $0x88] sm:$0xf]  ;;  %v9312_v17 = vld [vmem:[%s11846_s0 + $0x8c] sm:$0xf] }
   0x3   :  { %v185_v3 = vunpack.c.l.b16 %v66_v1  ;;  %v186_v4 = vunpack.c.h.b16 %v66_v1  ;;  %v7113_v7 = vld [vmem:[%s11846_s0 + $0x80] sm:$0xf]  ;;  %v7115_v14 = vld [vmem:[%s11846_s0 + $0xc0] sm:$0xf0]  ;;  %v9320_v16 = vld [vmem:[%s11846_s0 + $0xc4] sm:$0xf0] }
   0x4   :  { %v9319_v8 = vld [vmem:[%s11846_s0 + $0xbc] sm:$0xf0]  ;;  %v235_v11 = vpack.c.b16 %v187_v5, %v187_v5  ;;  %v236_v12 = vpack.c.b16 %v188_v6, %v188_v6  ;;  %v7123_v18 = vld [vmem:[%s11846_s0 + $0xc8] sm:$0xf0]  ;;  %v7118_v25 = vor.u32 %v9311_v13, %v7115_v14  ;;  %v9295_v27 = vld [vmem:[%s11846_s0 + $0x4] sm:$0xf]  ;;  %v7122_v29 = vor.u32 %v9320_v16, %v7121_v15 }
   0x5   :  { %v233_v9 = vpack.c.b16 %v185_v3, %v185_v3  ;;  %v234_v10 = vpack.c.b16 %v186_v4, %v186_v4  ;;  %v7049_v23 = vld [vmem:[%s11846_s0] sm:$0xf]  ;;  %v7114_v24 = vor.u32 %v9319_v8, %v7113_v7  ;;  %v7051_v28 = vld [vmem:[%s11846_s0 + $0x40] sm:$0xf0]  ;;  %v7126_v30 = vor.u32 %v9312_v17, %v7123_v18  ;;  %v7057_v31 = vld [vmem:[%s11846_s0 + $0x8] sm:$0xf] }
   0x6   :  { %v293_v21 = vsel %vm285_vm0, %v235_v11, 0  ;;  %v296_v22 = vsel %vm285_vm0, %v236_v12, 0  ;;  %v9303_v26 = vld [vmem:[%s11846_s0 + $0x3c] sm:$0xf0]  ;;  %v68_v32 = vld [vmem:[%s11846_s0 + $0x110] sm:$0x77]  ;;  %v7054_v42 = vor.u32 %v9295_v27, %v7051_v28 }
   0x7   :  { %v287_v19 = vsel %vm285_vm0, %v233_v9, 0  ;;  %v290_v20 = vsel %vm285_vm0, %v234_v10, 0  ;;  %365 = vmatpush.bf16.msra.mxu2 %v293_v21  ;;  %378 = vmatpush.bf16.msra.mxu3 %v296_v22  ;;  %v69_v33 = vld [vmem:[%s11846_s0 + $0x118] sm:$0x77]  ;;  %v9304_v34 = vld [vmem:[%s11846_s0 + $0x44] sm:$0xf0]  ;;  %v189_v37 = vunpack.c.l.b16 %v68_v32  ;;  %v190_v38 = vunpack.c.h.b16 %v68_v32 }
   0x8   :  { %339 = vmatpush.bf16.msra.mxu0 %v287_v19  ;;  %352 = vmatpush.bf16.msra.mxu1 %v290_v20  ;;  %v9296_v35 = vld [vmem:[%s11846_s0 + $0xc] sm:$0xf]  ;;  %v191_v39 = vunpack.c.l.b16 %v69_v33  ;;  %v192_v40 = vunpack.c.h.b16 %v69_v33  ;;  %v7050_v41 = vor.u32 %v9303_v26, %v7049_v23  ;;  %v7058_v45 = vor.u32 %v9304_v34, %v7057_v31  ;;  %v7129_v49 = vld [vmem:[%s11846_s0 + $0x90] sm:$0xf]  ;;  %v9313_v53 = vld [vmem:[%s11846_s0 + $0x94] sm:$0xf] }
   0x9   :  { %v7059_v36 = vld [vmem:[%s11846_s0 + $0x48] sm:$0xf0]  ;;  %v237_v43 = vpack.c.b16 %v189_v37, %v189_v37  ;;  %v238_v44 = vpack.c.b16 %v190_v38, %v190_v38  ;;  %v9321_v50 = vld [vmem:[%s11846_s0 + $0xcc] sm:$0xf0]  ;;  %v7131_v54 = vld [vmem:[%s11846_s0 + $0xd0] sm:$0xf0] }
   0xa   :  { %v7062_v46 = vor.u32 %v9296_v35, %v7059_v36  ;;  %v239_v47 = vpack.c.b16 %v191_v39, %v191_v39  ;;  %v240_v48 = vpack.c.b16 %v192_v40, %v192_v40  ;;  %v10211_v55 = vld [vmem:[%s11847_s1] sm:$0x3]  ;;  %v71_v57 = vld [vmem:[%s11846_s0 + $0x128] sm:$0x77]  ;;  %v7137_v58 = vld [vmem:[%s11846_s0 + $0x98] sm:$0xf]  ;;  %v7130_v1 = vor.u32 %v9321_v50, %v7129_v49 }
   0xb   :  { %366 = vmatpush.bf16.msra.mxu2 %v7122_v29  ;;  %379 = vmatpush.bf16.msra.mxu3 %v7126_v30  ;;  %v299_v51 = vsel %vm285_vm0, %v237_v43, 0  ;;  %v302_v52 = vsel %vm285_vm0, %v238_v44, 0  ;;  %v70_v56 = vld [vmem:[%s11846_s0 + $0x120] sm:$0x77]  ;;  %v9322_v59 = vld [vmem:[%s11846_s0 + $0xd4] sm:$0xf0]  ;;  %v7134_v2 = vor.u32 %v9313_v53, %v7131_v54  ;;  %v195_v8 = vunpack.c.l.b16 %v71_v57 }
   0xc   :  { %340 = vmatpush.bf16.msra.mxu0 %v7114_v24  ;;  %353 = vmatpush.bf16.msra.mxu1 %v7118_v25  ;;  %v9314_v60 = vld [vmem:[%s11846_s0 + $0x9c] sm:$0xf]  ;;  %v193_v61 = vunpack.c.l.b16 %v70_v56  ;;  %v194_v62 = vunpack.c.h.b16 %v70_v56  ;;  %v305_v63 = vsel %vm285_vm0, %v239_v47, 0  ;;  %v308_v0 = vsel %vm285_vm0, %v240_v48, 0  ;;  %v7065_v4 = vld [vmem:[%s11846_s0 + $0x10] sm:$0xf] }
   0xd   :  { %v7139_v3 = vld [vmem:[%s11846_s0 + $0xd8] sm:$0xf0]  ;;  %v9305_v5 = vld [vmem:[%s11846_s0 + $0x4c] sm:$0xf0]  ;;  %v9297_v6 = vld [vmem:[%s11846_s0 + $0x14] sm:$0xf]  ;;  %v196_v9 = vunpack.c.h.b16 %v71_v57  ;;  %v7138_v12 = vor.u32 %v9322_v59, %v7137_v58  ;;  %v243_v20 = vpack.c.b16 %v195_v8, %v195_v8 }
   0xe   :  { %v7067_v7 = vld [vmem:[%s11846_s0 + $0x50] sm:$0xf0]  ;;  %v241_v10 = vpack.c.b16 %v193_v61, %v193_v61  ;;  %v242_v11 = vpack.c.b16 %v194_v62, %v194_v62  ;;  %v7142_v13 = vor.u32 %v9314_v60, %v7139_v3  ;;  %v7073_v14 = vld [vmem:[%s11846_s0 + $0x18] sm:$0xf]  ;;  %v7066_v15 = vor.u32 %v9305_v5, %v7065_v4  ;;  %v9298_v18 = vld [vmem:[%s11846_s0 + $0x1c] sm:$0xf] }
   0xf   :  { %367 = vmatpush.bf16.msra.mxu2 %v7058_v45  ;;  %380 = vmatpush.bf16.msra.mxu3 %v7062_v46  ;;  %v7070_v16 = vor.u32 %v9297_v6, %v7067_v7  ;;  %v9306_v17 = vld [vmem:[%s11846_s0 + $0x54] sm:$0xf0]  ;;  %v7075_v19 = vld [vmem:[%s11846_s0 + $0x58] sm:$0xf0]  ;;  %v244_v21 = vpack.c.b16 %v196_v9, %v196_v9  ;;  %v7145_v22 = vld [vmem:[%s11846_s0 + $0xa0] sm:$0xf] }
  0x10   :  { %341 = vmatpush.bf16.msra.mxu0 %v7050_v41  ;;  %354 = vmatpush.bf16.msra.mxu1 %v7054_v42  ;;  %v9323_v23 = vld [vmem:[%s11846_s0 + $0xdc] sm:$0xf0]  ;;  %v311_v24 = vsel %vm285_vm0, %v241_v10, 0  ;;  %v314_v25 = vsel %vm285_vm0, %v242_v11, 0  ;;  %v9315_v26 = vld [vmem:[%s11846_s0 + $0xa4] sm:$0xf]  ;;  %v7074_v28 = vor.u32 %v9306_v17, %v7073_v14  ;;  %v7078_v29 = vor.u32 %v9298_v18, %v7075_v19 }
  0x11   :  { %v7147_v27 = vld [vmem:[%s11846_s0 + $0xe0] sm:$0xf0]  ;;  %v72_v30 = vld [vmem:[%s11846_s0 + $0x130] sm:$0x77]  ;;  %v7153_v31 = vld [vmem:[%s11846_s0 + $0xa8] sm:$0xf]  ;;  %v7146_v36 = vor.u32 %v9323_v23, %v7145_v22 }
  0x12   :  { %7177 = vmatmul.msk.bf16.vlgmr.msra.gmra.mxu2 %vm281_vm1, %v10211_v55  ;;  %7178 = vmatmul.msk.bf16.vlgmr.msra.gmra.mxu3 %vm281_vm1, %v10211_v55  ;;  %v9324_v32 = vld [vmem:[%s11846_s0 + $0xe4] sm:$0xf0]  ;;  %v73_v33 = vld [vmem:[%s11846_s0 + $0x138] sm:$0x77]  ;;  %v317_v34 = vsel %vm285_vm0, %v243_v20, 0  ;;  %v320_v35 = vsel %vm285_vm0, %v244_v21, 0  ;;  %v7150_v37 = vor.u32 %v9315_v26, %v7147_v27  ;;  %v197_v40 = vunpack.c.l.b16 %v72_v30 }
  0x13   :  { %7175 = vmatmul.msk.bf16.vlgmr.msra.gmra.mxu0 %vm281_vm1, %v10211_v55  ;;  %7176 = vmatmul.msk.bf16.vlgmr.msra.gmra.mxu1 %vm281_vm1, %v10211_v55  ;;  %v9316_v38 = vld [vmem:[%s11846_s0 + $0xac] sm:$0xf]  ;;  %v198_v41 = vunpack.c.h.b16 %v72_v30  ;;  %v7081_v42 = vld [vmem:[%s11846_s0 + $0x20] sm:$0xf]  ;;  %v199_v44 = vunpack.c.l.b16 %v73_v33  ;;  %v200_v45 = vunpack.c.h.b16 %v73_v33  ;;  %v7154_v46 = vor.u32 %v9324_v32, %v7153_v31  ;;  %v9299_v48 = vld [vmem:[%s11846_s0 + $0x24] sm:$0xf] }
  0x14   :  { %391 = vmatpush.bf16.msrb.mxu0 %v299_v51  ;;  %404 = vmatpush.bf16.msrb.mxu1 %v302_v52  ;;  %v7155_v39 = vld [vmem:[%s11846_s0 + $0xe8] sm:$0xf0]  ;;  %v9307_v43 = vld [vmem:[%s11846_s0 + $0x5c] sm:$0xf0]  ;;  %v7083_v49 = vld [vmem:[%s11846_s0 + $0x60] sm:$0xf0]  ;;  %v245_v54 = vpack.c.b16 %v197_v40, %v197_v40 }
  0x15   :  { %417 = vmatpush.bf16.msrb.mxu2 %v305_v63  ;;  %430 = vmatpush.bf16.msrb.mxu3 %v308_v0  ;;  %v7158_v47 = vor.u32 %v9316_v38, %v7155_v39  ;;  %v7089_v50 = vld [vmem:[%s11846_s0 + $0x28] sm:$0xf]  ;;  %v9300_v52 = vld [vmem:[%s11846_s0 + $0x2c] sm:$0xf]  ;;  %v246_v56 = vpack.c.b16 %v198_v41, %v198_v41  ;;  %v7082_v57 = vor.u32 %v9307_v43, %v7081_v42  ;;  %v7161_v63 = vld [vmem:[%s11846_s0 + $0xb0] sm:$0xf] }
  0x16   :  { %v9308_v51 = vld [vmem:[%s11846_s0 + $0x64] sm:$0xf0]  ;;  %v7091_v53 = vld [vmem:[%s11846_s0 + $0x68] sm:$0xf0]  ;;  %v7086_v58 = vor.u32 %v9299_v48, %v7083_v49  ;;  %v247_v59 = vpack.c.b16 %v199_v44, %v199_v44  ;;  %v248_v60 = vpack.c.b16 %v200_v45, %v200_v45  ;;  %v9325_v0 = vld [vmem:[%s11846_s0 + $0xec] sm:$0xf0] }
  0x17   :  { %v7090_v61 = vor.u32 %v9308_v51, %v7089_v50  ;;  %v7094_v62 = vor.u32 %v9300_v52, %v7091_v53  ;;  %v323_v3 = vsel %vm285_vm0, %v245_v54, 0  ;;  %v326_v4 = vsel %vm285_vm0, %v246_v56, 0  ;;  %v7169_v5 = vld [vmem:[%s11846_s0 + $0xb8] sm:$0xf]  ;;  %v9318_v9 = vld [vmem:[%s11846_s0 + $0xbc] sm:$0xf] }
  0x18   :  { %392 = vmatpush.bf16.msrb.mxu0 %v7130_v1  ;;  %405 = vmatpush.bf16.msrb.mxu1 %v7134_v2  ;;  %v9317_v1 = vld [vmem:[%s11846_s0 + $0xb4] sm:$0xf]  ;;  %v9326_v6 = vld [vmem:[%s11846_s0 + $0xf4] sm:$0xf0]  ;;  %v329_v7 = vsel %vm285_vm0, %v247_v59, 0  ;;  %v332_v8 = vsel %vm285_vm0, %v248_v60, 0  ;;  %v7162_v11 = vor.u32 %v9325_v0, %v7161_v63 }
  0x19   :  { %418 = vmatpush.bf16.msrb.mxu2 %v7138_v12  ;;  %431 = vmatpush.bf16.msrb.mxu3 %v7142_v13  ;;  %v7163_v2 = vld [vmem:[%s11846_s0 + $0xf0] sm:$0xf0]  ;;  %v7171_v10 = vld [vmem:[%s11846_s0 + $0xf8] sm:$0xf0]  ;;  %v7097_v13 = vld [vmem:[%s11846_s0 + $0x30] sm:$0xf] }
  0x1a   :  { %v7166_v12 = vor.u32 %v9317_v1, %v7163_v2  ;;  %v9309_v14 = vld [vmem:[%s11846_s0 + $0x6c] sm:$0xf0]  ;;  %v9301_v17 = vld [vmem:[%s11846_s0 + $0x34] sm:$0xf]  ;;  %v7105_v19 = vld [vmem:[%s11846_s0 + $0x38] sm:$0xf] }
  0x1b   :  { %v7099_v18 = vld [vmem:[%s11846_s0 + $0x70] sm:$0xf0]  ;;  %v9310_v20 = vld [vmem:[%s11846_s0 + $0x74] sm:$0xf0]  ;;  %v9302_v21 = vld [vmem:[%s11846_s0 + $0x3c] sm:$0xf]  ;;  %v7098_v23 = vor.u32 %v9309_v14, %v7097_v13 }
  0x1c   :  { %393 = vmatpush.bf16.msrb.mxu0 %v7066_v15  ;;  %406 = vmatpush.bf16.msrb.mxu1 %v7070_v16  ;;  %v7170_v15 = vor.u32 %v9326_v6, %v7169_v5  ;;  %v7174_v16 = vor.u32 %v9318_v9, %v7171_v10  ;;  %v7107_v22 = vld [vmem:[%s11846_s0 + $0x78] sm:$0xf0] }
  0x1d   :  { %419 = vmatpush.bf16.msrb.mxu2 %v7074_v28  ;;  %432 = vmatpush.bf16.msrb.mxu3 %v7078_v29  ;;  %v7110_v26 = vor.u32 %v9302_v21, %v7107_v22 }
  0x20   :  { %443 = vmatpush.bf16.msra.mxu0 %v311_v24  ;;  %456 = vmatpush.bf16.msra.mxu1 %v314_v25  ;;  %v7102_v24 = vor.u32 %v9301_v17, %v7099_v18  ;;  %v7106_v25 = vor.u32 %v9310_v20, %v7105_v19 }
  0x21   :  { %469 = vmatpush.bf16.msra.mxu2 %v317_v34  ;;  %482 = vmatpush.bf16.msra.mxu3 %v320_v35 }
  0x22   :  { %7181 = vmatmul.msk.bf16.vlgmr.msrb.gmra.mxu2 %vm281_vm1, %v10211_v55  ;;  %7182 = vmatmul.msk.bf16.vlgmr.msrb.gmra.mxu3 %vm281_vm1, %v10211_v55 }
  0x23   :  { %7179 = vmatmul.msk.bf16.vlgmr.msrb.gmra.mxu0 %vm281_vm1, %v10211_v55  ;;  %7180 = vmatmul.msk.bf16.vlgmr.msrb.gmra.mxu1 %vm281_vm1, %v10211_v55 }
  0x24   :  { %444 = vmatpush.bf16.msra.mxu0 %v7146_v36  ;;  %457 = vmatpush.bf16.msra.mxu1 %v7150_v37 }
  0x25   :  { %470 = vmatpush.bf16.msra.mxu2 %v7154_v46  ;;  %483 = vmatpush.bf16.msra.mxu3 %v7158_v47 }
  0x28   :  { %445 = vmatpush.bf16.msra.mxu0 %v7082_v57  ;;  %458 = vmatpush.bf16.msra.mxu1 %v7086_v58 }
  0x29   :  { %471 = vmatpush.bf16.msra.mxu2 %v7090_v61  ;;  %484 = vmatpush.bf16.msra.mxu3 %v7094_v62 }
  0x2c   :  { %495 = vmatpush.bf16.msrb.mxu0 %v323_v3  ;;  %508 = vmatpush.bf16.msrb.mxu1 %v326_v4 }
  0x2d   :  { %521 = vmatpush.bf16.msrb.mxu2 %v329_v7  ;;  %534 = vmatpush.bf16.msrb.mxu3 %v332_v8 }
  0x30   :  { %496 = vmatpush.bf16.msrb.mxu0 %v7162_v11  ;;  %509 = vmatpush.bf16.msrb.mxu1 %v7166_v12 }
  0x31   :  { %522 = vmatpush.bf16.msrb.mxu2 %v7170_v15  ;;  %535 = vmatpush.bf16.msrb.mxu3 %v7174_v16 }
  0x32   :  { %7185 = vmatmul.msk.bf16.vlgmr.msra.gmra.mxu2 %vm281_vm1, %v10211_v55  ;;  %7186 = vmatmul.msk.bf16.vlgmr.msra.gmra.mxu3 %vm281_vm1, %v10211_v55 }
  0x33   :  { %7183 = vmatmul.msk.bf16.vlgmr.msra.gmra.mxu0 %vm281_vm1, %v10211_v55  ;;  %7184 = vmatmul.msk.bf16.vlgmr.msra.gmra.mxu1 %vm281_vm1, %v10211_v55 }
  0x34   :  { %497 = vmatpush.bf16.msrb.mxu0 %v7098_v23  ;;  %510 = vmatpush.bf16.msrb.mxu1 %v7102_v24 }
  0x35   :  { %523 = vmatpush.bf16.msrb.mxu2 %v7106_v25  ;;  %536 = vmatpush.bf16.msrb.mxu3 %v7110_v26 }
  0x42   :  { %7189 = vmatmul.msk.bf16.vlgmr.msrb.gmra.mxu2 %vm281_vm1, %v10211_v55  ;;  %7190 = vmatmul.msk.bf16.vlgmr.msrb.gmra.mxu3 %vm281_vm1, %v10211_v55 }
  0x43   :  { %7187 = vmatmul.msk.bf16.vlgmr.msrb.gmra.mxu0 %vm281_vm1, %v10211_v55  ;;  %7188 = vmatmul.msk.bf16.vlgmr.msrb.gmra.mxu1 %vm281_vm1, %v10211_v55 }
  0x74   :  { %v77_v27 = vpop.permute.xlu0 %76 }
  0x75   :  { %9817 = vpush %v77_v27 }
  0x90   :  { %v343_v28 = vpop.f32.mrf.mxu0  ;;  %v356_v29 = vpop.f32.mrf.mxu1 }
  0x95   :  { %v369_v30 = vpop.f32.mrf.mxu2  ;;  %v382_v31 = vpop.f32.mrf.mxu3 }
  0x98   :  { %v345_v32 = vpop.f32.mrf.mxu0  ;;  %v358_v33 = vpop.f32.mrf.mxu1 }
  0x9d   :  { %v371_v34 = vpop.f32.mrf.mxu2  ;;  %v384_v35 = vpop.f32.mrf.mxu3 }
  0xa0   :  { %v395_v36 = vpop.f32.mrf.mxu0  ;;  %v408_v37 = vpop.f32.mrf.mxu1 }
  0xa5   :  { %v421_v38 = vpop.f32.mrf.mxu2  ;;  %v434_v39 = vpop.f32.mrf.mxu3 }
  0xa6   :  { %s9818_s1 = spop %9817 }
  0xa7   :  { %v10399_v40 = vstv %s9818_s1 }
  0xa8   :  { %v397_v41 = vpop.f32.mrf.mxu0  ;;  %v410_v42 = vpop.f32.mrf.mxu1  ;;  %v344_v55 = vadd.f32 %v343_v28, %v10399_v40  ;;  %v357_v43 = vadd.f32 %v356_v29, %v10399_v40  ;;  %v370_v44 = vadd.f32 %v369_v30, %v10399_v40  ;;  %v383_v45 = vadd.f32 %v382_v31, %v10399_v40 }
  0xa9   :  { %v396_v46 = vadd.f32 %v395_v36, %v10399_v40  ;;  %v409_v47 = vadd.f32 %v408_v37, %v10399_v40  ;;  %v422_v48 = vadd.f32 %v421_v38, %v10399_v40  ;;  %v435_v49 = vadd.f32 %v434_v39, %v10399_v40 }
  0xaa   :  { %9970 = vtanh.f32 %v344_v55 }
  0xab   :  { %9972 = vtanh.f32 %v357_v43 }
  0xac   :  { %9974 = vtanh.f32 %v370_v44 }
  0xad   :  { %9976 = vtanh.f32 %v383_v45  ;;  %v423_v50 = vpop.f32.mrf.mxu2  ;;  %v436_v51 = vpop.f32.mrf.mxu3 }
  0xae   :  { %9978 = vtanh.f32 %v396_v46 }
  0xaf   :  { %9980 = vtanh.f32 %v409_v47 }
  0xb0   :  { %v447_v52 = vpop.f32.mrf.mxu0  ;;  %v460_v53 = vpop.f32.mrf.mxu1  ;;  %9982 = vtanh.f32 %v422_v48 }
  0xb1   :  { %v9971_v54 = vpop.eup %9970  ;;  %9984 = vtanh.f32 %v435_v49  ;;  %v448_v63 = vadd.f32 %v447_v52, %v10399_v40  ;;  %v10423_v7 = vadd.f32 %v460_v53, %v10399_v40 }
  0xb2   :  { %v9973_v56 = vpop.eup %9972  ;;  %v10409_v57 = vmul.f32 127.0, %v9971_v54 }
  0xb3   :  { %v9975_v58 = vpop.eup %9974  ;;  %v10411_v59 = vmul.f32 127.0, %v9973_v56  ;;  %9986 = vtanh.f32 %v448_v63 }
  0xb4   :  { %v9977_v60 = vpop.eup %9976  ;;  %v10413_v61 = vmul.f32 127.0, %v9975_v58  ;;  %v9821_v62 = vcvt.f32.s32 %v10409_v57  ;;  %v9819_v2 = vand.u32 2147483647, %v10409_v57  ;;  %v9824_v16 = vand.u32 2147483648, %v10409_v57 }
  0xb5   :  { %v9979_v0 = vpop.eup %9978  ;;  %v10417_v1 = vmul.f32 127.0, %v9977_v60  ;;  %v9829_v3 = vcvt.f32.s32 %v10411_v59  ;;  %v9827_v6 = vand.u32 2147483647, %v10411_v59  ;;  %v10429_v13 = vpop.f32.mrf.mxu2  ;;  %v9832_v17 = vand.u32 2147483648, %v10411_v59 }
  0xb6   :  { %v9981_v4 = vpop.eup %9980  ;;  %v9822_v5 = vcvt.s32.f32 %v9821_v62  ;;  %v10425_v9 = vmul.f32 127.0, %v9979_v0  ;;  %v9835_v11 = vand.u32 2147483647, %v10413_v61  ;;  %v9837_v12 = vcvt.f32.s32 %v10413_v61  ;;  %v10431_v14 = vpop.f32.mrf.mxu3 }
  0xb7   :  { %v9983_v8 = vpop.eup %9982  ;;  %v9830_v10 = vcvt.s32.f32 %v9829_v3  ;;  %vm10435_vm2 = vcmp.lt.f32.partialorder %v9819_v2, 8388608.0  ;;  %v9843_v24 = vand.u32 2147483647, %v10417_v1  ;;  %v10440_v25 = vmul.f32 127.0, %v9981_v4 }
  0xb8   :  { %v9823_v15 = vand.u32 2147483647, %v9822_v5  ;;  %v449_v18 = vpop.f32.mrf.mxu0  ;;  %v462_v19 = vpop.f32.mrf.mxu1  ;;  %v9838_v23 = vcvt.s32.f32 %v9837_v12  ;;  %v10442_v26 = vmul.f32 127.0, %v9983_v8  ;;  %vm10444_vm3 = vcmp.lt.f32.partialorder %v9827_v6, 8388608.0 }
  0xb9   :  { %v9985_v20 = vpop.eup %9984  ;;  %v9831_v22 = vand.u32 2147483647, %v9830_v10  ;;  %v9845_v28 = vcvt.f32.s32 %v10417_v1  ;;  %vm10449_vm4 = vcmp.lt.f32.partialorder %v9835_v11, 8388608.0  ;;  %v9840_v31 = vand.u32 2147483648, %v10413_v61 }
  0xba   :  { %v9839_v30 = vand.u32 2147483647, %v9838_v23  ;;  %v9853_v32 = vcvt.f32.s32 %v10425_v9  ;;  %v10455_v33 = vmul.f32 127.0, %v9985_v20  ;;  %v9825_v34 = vor.u32 %v9824_v16, %v9823_v15  ;;  %v9987_v42 = vpop.eup %9986 }
  0xbb   :  { %v9846_v35 = vcvt.s32.f32 %v9845_v28  ;;  %v9851_v36 = vand.u32 2147483647, %v10425_v9  ;;  %v9833_v37 = vor.u32 %v9832_v17, %v9831_v22  ;;  %vm10458_vm5 = vcmp.lt.f32.partialorder %v9843_v24, 8388608.0 }
  0xbc   :  { %v9848_v39 = vand.u32 2147483648, %v10417_v1  ;;  %v9854_v41 = vcvt.s32.f32 %v9853_v32  ;;  %v9841_v55 = vor.u32 %v9840_v31, %v9839_v30  ;;  %v9859_v44 = vand.u32 2147483647, %v10440_v25 }
  0xbd   :  { %v9847_v43 = vand.u32 2147483647, %v9846_v35  ;;  %v9861_v45 = vcvt.f32.s32 %v10440_v25  ;;  %v9856_v47 = vand.u32 2147483648, %v10425_v9  ;;  %v9867_v48 = vand.u32 2147483647, %v10442_v26  ;;  %v475_v50 = vpop.f32.mrf.mxu2 }
  0xbe   :  { %v9855_v46 = vand.u32 2147483647, %v9854_v41  ;;  %v9869_v49 = vcvt.f32.s32 %v10442_v26  ;;  %v488_v51 = vpop.f32.mrf.mxu3  ;;  %v9826_v52 = vsel %vm10435_vm2, %v9825_v34, %v10409_v57  ;;  %vm10471_vm6 = vcmp.lt.f32.partialorder %v9851_v36, 8388608.0 }
  0xbf   :  { %v9849_v53 = vor.u32 %v9848_v39, %v9847_v43  ;;  %v9862_v56 = vcvt.s32.f32 %v9861_v45  ;;  %v9834_v62 = vsel %vm10444_vm3, %v9833_v37, %v10411_v59  ;;  %v9877_v2 = vcvt.f32.s32 %v10455_v33 }
  0xc0   :  { %v499_v58 = vpop.f32.mrf.mxu0  ;;  %v512_v60 = vpop.f32.mrf.mxu1  ;;  %v9857_v63 = vor.u32 %v9856_v47, %v9855_v46  ;;  %v9870_v0 = vcvt.s32.f32 %v9869_v49  ;;  %v9842_v57 = vsel %vm10449_vm4, %v9841_v55, %v10413_v61  ;;  %vm10482_vm7 = vcmp.lt.f32.partialorder %v9859_v44, 8388608.0 }
  0xc1   :  { %v9863_v4 = vand.u32 2147483647, %v9862_v56  ;;  %v9864_v5 = vand.u32 2147483648, %v10440_v25  ;;  %vm10487_vm8 = vcmp.lt.f32.partialorder %v9867_v48, 8388608.0  ;;  %v9875_v8 = vand.u32 2147483647, %v10455_v33 }
  0xc2   :  { %v9871_v59 = vand.u32 2147483647, %v9870_v0  ;;  %v9878_v10 = vcvt.s32.f32 %v9877_v2  ;;  %v9850_v11 = vsel %vm10458_vm5, %v9849_v53, %v10417_v1  ;;  %v9872_v61 = vand.u32 2147483648, %v10442_v26 }
  0xc3   :  { %v9880_v12 = vand.u32 2147483648, %v10455_v33  ;;  %v590_v15 = vadd.f32 127.0, %v9826_v52  ;;  %v9858_v16 = vsel %vm10471_vm6, %v9857_v63, %v10425_v9  ;;  %v9865_v17 = vor.u32 %v9864_v5, %v9863_v4 }
  0xc4   :  { %v9879_v18 = vand.u32 2147483647, %v9878_v10  ;;  %v566_v19 = vmul.f32 127.0, %v9987_v42  ;;  %v9873_v20 = vor.u32 %v9872_v61, %v9871_v59  ;;  %9988 = vtanh.f32 %v10423_v7 }
  0xc5   :  { %v474_v21 = vadd.f32 %v10429_v13, %v10399_v40  ;;  %v487_v1 = vadd.f32 %v10431_v14, %v10399_v40  ;;  %vm10505_vm9 = vcmp.lt.f32.partialorder %v9875_v8, 8388608.0  ;;  %v591_v24 = vadd.f32 127.0, %v9834_v62  ;;  %v525_v9 = vpop.f32.mrf.mxu2 }
  0xc6   :  { %v9881_v23 = vor.u32 %v9880_v12, %v9879_v18  ;;  %v10509_v27 = vadd.f32 127.0, %v9842_v57  ;;  %v538_v28 = vpop.f32.mrf.mxu3  ;;  %v10511_v29 = vadd.f32 127.0, %v9850_v11  ;;  %v10513_v30 = vadd.f32 127.0, %v9858_v16 }
  0xc7   :  { %v9885_v7 = vcvt.f32.s32 %v566_v19  ;;  %9990 = vtanh.f32 %v474_v21  ;;  %v9866_v14 = vsel %vm10482_vm7, %v9865_v17, %v10440_v25  ;;  %v9883_v32 = vand.u32 2147483647, %v566_v19 }
  0xc8   :  { %v501_v13 = vpop.f32.mrf.mxu0  ;;  %v514_v31 = vpop.f32.mrf.mxu1  ;;  %9992 = vtanh.f32 %v487_v1  ;;  %v500_v34 = vadd.f32 %v499_v58, %v10399_v40  ;;  %v9874_v35 = vsel %vm10487_vm8, %v9873_v20, %v10442_v26  ;;  %v513_v37 = vadd.f32 %v512_v60, %v10399_v40  ;;  %v10533_v26 = vld [vmem:[%s11846_s0 + $0x100] sm:$0x44] }
  0xc9   :  { %v9886_v36 = vcvt.s32.f32 %v9885_v7  ;;  %v526_v38 = vadd.f32 %v525_v9, %v10399_v40  ;;  %v9882_v39 = vsel %vm10505_vm9, %v9881_v23, %v10455_v33  ;;  %v539_v25 = vadd.f32 %v538_v28, %v10399_v40 }
  0xca   :  { %9994 = vtanh.f32 %v500_v34  ;;  %v606_v41 = vmax.f32 %v590_v15, 0.0  ;;  %v9989_v42 = vpop.eup %9988  ;;  %v10528_v55 = vadd.f32 127.0, %v9866_v14  ;;  %v9888_v44 = vand.u32 2147483648, %v566_v19 }
  0xcb   :  { %v9887_v43 = vand.u32 2147483647, %v9886_v36  ;;  %9996 = vtanh.f32 %v513_v37  ;;  %v10535_v45 = vadd.f32 127.0, %v9874_v35  ;;  %vm10537_vm10 = vcmp.lt.f32.partialorder %v9883_v32, 8388608.0 }
  0xcc   :  { %v567_v33 = vmul.f32 127.0, %v9989_v42  ;;  %v607_v40 = vmax.f32 %v591_v24, 0.0  ;;  %v10541_v48 = vadd.f32 127.0, %v9882_v39  ;;  %9998 = vtanh.f32 %v526_v38 }
  0xcd   :  { %v9991_v47 = vpop.eup %9990  ;;  %v9889_v49 = vor.u32 %v9888_v44, %v9887_v43  ;;  %v622_v50 = vmin.f32 %v606_v41, 255.0  ;;  %v678_v56 = vunpack.c.l.bf16 %v10533_v26  ;;  %v527_v58 = vpop.f32.mrf.mxu2  ;;  %10000 = vtanh.f32 %v539_v25 }
  0xce   :  { %v9993_v51 = vpop.eup %9992  ;;  %v9891_v52 = vand.u32 2147483647, %v567_v33  ;;  %v9893_v53 = vcvt.f32.s32 %v567_v33  ;;  %v568_v54 = vmul.f32 127.0, %v9991_v47  ;;  %v540_v60 = vpop.f32.mrf.mxu3  ;;  %v679_v0 = vunpack.c.h.bf16 %v10533_v26 }
  0xcf   :  { %v9890_v62 = vsel %vm10537_vm10, %v9889_v49, %v566_v19  ;;  %v569_v63 = vmul.f32 127.0, %v9993_v51  ;;  %v9896_v4 = vand.u32 2147483648, %v567_v33  ;;  %v10547_v5 = vmin.f32 %v607_v40, 255.0 }
  0xd0   :  { %v9995_v2 = vpop.eup %9994  ;;  %v598_v57 = vadd.f32 127.0, %v9890_v62  ;;  %v9894_v3 = vcvt.s32.f32 %v9893_v53  ;;  %v9899_v59 = vand.u32 2147483647, %v568_v54  ;;  %v9901_v8 = vcvt.f32.s32 %v568_v54 }
  0xd1   :  { %v9997_v6 = vpop.eup %9996  ;;  %v9909_v10 = vcvt.f32.s32 %v569_v63  ;;  %v10549_v11 = vmul.f32 0.003921569, %v622_v50  ;;  %vm10551_vm11 = vcmp.lt.f32.partialorder %v9891_v52, 8388608.0  ;;  %v9907_v16 = vand.u32 2147483647, %v569_v63 }
  0xd2   :  { %v614_v61 = vmax.f32 %v598_v57, 0.0  ;;  %v9895_v15 = vand.u32 2147483647, %v9894_v3  ;;  %v9999_v17 = vpop.eup %9998  ;;  %v9902_v18 = vcvt.s32.f32 %v9901_v8  ;;  %v9904_v19 = vand.u32 2147483648, %v568_v54 }
  0xd3   :  { %v9910_v20 = vcvt.s32.f32 %v9909_v10  ;;  %v570_v21 = vmul.f32 127.0, %v9995_v2  ;;  %v9912_v23 = vand.u32 2147483648, %v569_v63  ;;  %v571_v24 = vmul.f32 127.0, %v9997_v6  ;;  %v10001_v9 = vpop.eup %10000 }
  0xd4   :  { %v630_v1 = vmin.f32 %v614_v61, 255.0  ;;  %v9897_v22 = vor.u32 %v9896_v4, %v9895_v15  ;;  %v9903_v28 = vand.u32 2147483647, %v9902_v18  ;;  %vm9900_vm12 = vcmp.lt.f32.partialorder %v9899_v59, 8388608.0 }
  0xd5   :  { %v9911_v7 = vand.u32 2147483647, %v9910_v20  ;;  %v9915_v13 = vand.u32 2147483647, %v570_v21  ;;  %v9917_v31 = vcvt.f32.s32 %v570_v21  ;;  %vm9908_vm13 = vcmp.lt.f32.partialorder %v9907_v16, 8388608.0 }
  0xd6   :  { %v9898_v14 = vsel %vm10551_vm11, %v9897_v22, %v567_v33  ;;  %v572_v32 = vmul.f32 127.0, %v9999_v17  ;;  %v9905_v35 = vor.u32 %v9904_v19, %v9903_v28  ;;  %v9923_v37 = vand.u32 2147483647, %v571_v24 }
  0xd7   :  { %v599_v34 = vadd.f32 127.0, %v9898_v14  ;;  %v9913_v36 = vor.u32 %v9912_v23, %v9911_v7  ;;  %v646_v38 = vmul.f32 0.003921569, %v630_v1  ;;  %v9918_v39 = vcvt.s32.f32 %v9917_v31 }
  0xd8   :  { %v9920_v25 = vand.u32 2147483648, %v570_v21  ;;  %v9925_v41 = vcvt.f32.s32 %v571_v24  ;;  %v9906_v43 = vsel %vm9900_vm12, %v9905_v35, %v568_v54  ;;  %vm10557_vm14 = vcmp.lt.f32.partialorder %v9915_v13, 8388608.0 }
  0xd9   :  { %v615_v42 = vmax.f32 %v599_v34, 0.0  ;;  %v9914_v44 = vsel %vm9908_vm13, %v9913_v36, %v569_v63  ;;  %v600_v40 = vadd.f32 127.0, %v9906_v43  ;;  %v9919_v47 = vand.u32 2147483647, %v9918_v39 }
  0xda   :  { %v601_v33 = vadd.f32 127.0, %v9914_v44  ;;  %v9926_v49 = vcvt.s32.f32 %v9925_v41  ;;  %vm10561_vm15 = vcmp.lt.f32.partialorder %v9923_v37, 8388608.0  ;;  %v9928_v52 = vand.u32 2147483648, %v571_v24 }
  0xdb   :  { %v631_v50 = vmin.f32 %v615_v42, 255.0  ;;  %v9933_v53 = vcvt.f32.s32 %v572_v32  ;;  %v616_v58 = vmax.f32 %v600_v40, 0.0  ;;  %v9921_v62 = vor.u32 %v9920_v25, %v9919_v47 }
  0xdc   :  { %v617_v60 = vmax.f32 %v601_v33, 0.0  ;;  %v9927_v54 = vand.u32 2147483647, %v9926_v49  ;;  %v9931_v2 = vand.u32 2147483647, %v572_v32  ;;  %v573_v3 = vmul.f32 127.0, %v10001_v9 }
  0xdd   :  { %v647_v63 = vmul.f32 0.003921569, %v631_v50  ;;  %v9934_v57 = vcvt.s32.f32 %v9933_v53  ;;  %v632_v4 = vmin.f32 %v616_v58, 255.0  ;;  %v9922_v59 = vsel %vm10557_vm14, %v9921_v62, %v570_v21 }
  0xde   :  { %v633_v6 = vmin.f32 %v617_v60, 255.0  ;;  %v9929_v8 = vor.u32 %v9928_v52, %v9927_v54  ;;  %v602_v10 = vadd.f32 127.0, %v9922_v59  ;;  %v9936_v12 = vand.u32 2147483648, %v572_v32 }
  0xdf   :  { %v9935_v61 = vand.u32 2147483647, %v9934_v57  ;;  %v9939_v15 = vand.u32 2147483647, %v573_v3  ;;  %10002 = vtanh.f32 %v646_v38  ;;  %v9941_v17 = vcvt.f32.s32 %v573_v3 }
  0xe0   :  { %v9930_v16 = vsel %vm10561_vm15, %v9929_v8, %v571_v24  ;;  %v639_v18 = vmul.f32 0.003921569, %v10547_v5  ;;  %v618_v19 = vmax.f32 %v602_v10, 0.0  ;;  %vm9932_vm1 = vcmp.lt.f32.partialorder %v9931_v2, 8388608.0 }
  0xe1   :  { %v603_v20 = vadd.f32 127.0, %v9930_v16  ;;  %v9937_v1 = vor.u32 %v9936_v12, %v9935_v61  ;;  %10004 = vtanh.f32 %v647_v63  ;;  %v648_v22 = vmul.f32 0.003921569, %v632_v4 }
  0xe2   :  { %v649_v23 = vmul.f32 0.003921569, %v633_v6  ;;  %v9942_v21 = vcvt.s32.f32 %v9941_v17  ;;  %vm10572_vm2 = vcmp.gt.f32.partialorder %v678_v56, 0.5  ;;  %v634_v28 = vmin.f32 %v618_v19, 255.0 }
  0xe3   :  { %v619_v7 = vmax.f32 %v603_v20, 0.0  ;;  %v9938_v24 = vsel %vm9932_vm1, %v9937_v1, %v572_v32  ;;  %vm10576_vm3 = vcmp.lt.f32.partialorder %v9939_v15, 8388608.0  ;;  %v9944_v14 = vand.u32 2147483648, %v573_v3 }
  0xe4   :  { %v604_v5 = vadd.f32 127.0, %v9938_v24  ;;  %v9943_v31 = vand.u32 2147483647, %v9942_v21  ;;  %10006 = vtanh.f32 %v10549_v11  ;;  %vm10583_vm4 = vcmp.gt.f32.partialorder %v679_v0, 0.5  ;;  %v10593_v11 = vld [vmem:[%s11846_s0 + $0x108] sm:$0x44] }
  0xe5   :  { %v650_v56 = vmul.f32 0.003921569, %v634_v28  ;;  %v635_v35 = vmin.f32 %v619_v7, 255.0  ;;  %10008 = vtanh.f32 %v639_v18  ;;  %v608_v32 = vmax.f32 %v10509_v27, 0.0  ;;  %v10588_v36 = vpop.eup %10002 }
  0xe6   :  { %10010 = vtanh.f32 %v648_v22  ;;  %v620_v37 = vmax.f32 %v604_v5, 0.0  ;;  %v9945_v38 = vor.u32 %v9944_v14, %v9943_v31  ;;  %v609_v26 = vmax.f32 %v10511_v29, 0.0  ;;  %v10623_v22 = vld [vmem:[%s11846_s0 + $0x110] sm:$0x44] }
  0xe7   :  { %10012 = vtanh.f32 %v649_v23  ;;  %v651_v0 = vmul.f32 0.003921569, %v635_v35  ;;  %vm1174_vm5 = vcmask 1040384   ;;  %v624_v39 = vmin.f32 %v608_v32, 255.0  ;;  %v10596_v25 = vpop.eup %10004 }
  0xe8   :  { %v636_v41 = vmin.f32 %v620_v37, 255.0  ;;  %v9946_v27 = vsel %vm10576_vm3, %v9945_v38, %v573_v3  ;;  %vm1191_vm6 = vcmask 1041408   ;;  %v625_v42 = vmin.f32 %v609_v26, 255.0 }
  0xe9   :  { %10014 = vtanh.f32 %v650_v56  ;;  %v605_v43 = vadd.f32 127.0, %v9946_v27  ;;  %v680_v44 = vunpack.c.l.bf16 %v10593_v11  ;;  %v681_v46 = vunpack.c.h.bf16 %v10593_v11 }
  0xea   :  { %v10007_v40 = vpop.eup %10006  ;;  %10016 = vtanh.f32 %v651_v0  ;;  %v652_v29 = vmul.f32 0.003921569, %v636_v41  ;;  %v640_v33 = vmul.f32 0.003921569, %v624_v39  ;;  %v641_v47 = vmul.f32 0.003921569, %v625_v42 }
  0xeb   :  { %v10009_v49 = vpop.eup %10008  ;;  %v621_v50 = vmax.f32 %v605_v43, 0.0  ;;  %v726_v51 = vrot.slane %v10007_v40, 4  ;;  %v758_v52 = vrot.slane %v10007_v40, 5  ;;  %v806_v53 = vrot.slane %v10007_v40, 3  ;;  %v10648_v42 = vld [vmem:[%s11846_s0 + $0x118] sm:$0x44] }
  0xec   :  { %v10602_v58 = vpop.eup %10010  ;;  %v854_v60 = vrot.slane %v10007_v40, 6  ;;  %v886_v62 = vrot.slane %v10007_v40, 7  ;;  %v727_v54 = vrot.slane %v10009_v49, 4  ;;  %v610_v63 = vmax.f32 %v10513_v30, 0.0 }
  0xed   :  { %v10605_v2 = vpop.eup %10012  ;;  %v637_v57 = vmin.f32 %v621_v50, 255.0  ;;  %v790_v3 = vsel %vm10572_vm2, %v726_v51, %v758_v52  ;;  %v838_v4 = vsel %vm10572_vm2, %v806_v53, %v758_v52  ;;  %v759_v6 = vrot.slane %v10009_v49, 5 }
  0xee   :  { %v918_v59 = vsel %vm10572_vm2, %v854_v60, %v886_v62  ;;  %v950_v8 = vrot.slane %v790_v3, 7  ;;  %v1046_v10 = vrot.slane %v790_v3, 3  ;;  %v1094_v61 = vrot.slane %v838_v4, 3 }
  0xef   :  { %v10613_v12 = vpop.eup %10014  ;;  %10018 = vtanh.f32 %v652_v29  ;;  %v998_v30 = vrot.slane %v918_v59, 7  ;;  %v791_v15 = vsel %vm10583_vm4, %v727_v54, %v759_v6  ;;  %v807_v16 = vrot.slane %v10009_v49, 3 }
  0xf0   :  { %v10617_v17 = vpop.eup %10016  ;;  %v653_v18 = vmul.f32 0.003921569, %v637_v57  ;;  %v1175_v19 = vsel %vm1174_vm5, %v10007_v40, %v1046_v10  ;;  %v855_v20 = vrot.slane %v10009_v49, 6  ;;  %v887_v1 = vrot.slane %v10009_v49, 7 }
  0xf1   :  { %v1030_v23 = vsel %vm10572_vm2, %v950_v8, %v998_v30  ;;  %v1192_v21 = vsel %vm1191_vm6, %v1175_v19, %v1094_v61  ;;  %v839_v28 = vsel %vm10583_vm4, %v807_v16, %v759_v6  ;;  %v951_v7 = vrot.slane %v791_v15, 7 }
  0xf2   :  { %vm10630_vm7 = vcmp.gt.f32.partialorder %v680_v44, 0.5  ;;  %v1142_v13 = vrot.slane %v1030_v23, 2  ;;  %v919_v5 = vsel %vm10583_vm4, %v855_v20, %v887_v1  ;;  %v1047_v31 = vrot.slane %v791_v15, 3 }
  0xf3   :  { %v1095_v14 = vrot.slane %v839_v28, 3  ;;  %v999_v56 = vrot.slane %v919_v5, 7  ;;  %10020 = vtanh.f32 %v640_v33  ;;  %v626_v9 = vmin.f32 %v610_v63, 255.0 }
  0xf4   :  { %v682_v35 = vunpack.c.l.bf16 %v10623_v22  ;;  %v1208_v32 = vsel %vm285_vm0, %v1192_v21, %v1142_v13  ;;  %v1176_v37 = vsel %vm1174_vm5, %v10009_v49, %v1047_v31  ;;  %10022 = vtanh.f32 %v641_v47 }
  0xf5   :  { %v611_v38 = vmax.f32 %v10528_v55, 0.0  ;;  %v10640_v26 = vpop.eup %10018  ;;  %v1224_v0 = vpack.c.bf16 %v1208_v32, %v1208_v32  ;;  %v1031_v39 = vsel %vm10583_vm4, %v951_v7, %v999_v56  ;;  %v1193_v41 = vsel %vm1191_vm6, %v1176_v37, %v1095_v14 }
  0xf6   :  { %v642_v27 = vmul.f32 0.003921569, %v626_v9  ;;  %10024 = vtanh.f32 %v653_v18  ;;  %v1143_v43 = vrot.slane %v1031_v39, 2  ;;  %v612_v40 = vmax.f32 %v10535_v45, 0.0 }
  0xf7   :  { %v627_v44 = vmin.f32 %v611_v38, 255.0  ;;  %v1286_v55 = vsel %vm1191_vm6, %v1224_v0, 0  ;;  %vm10654_vm8 = vcmp.gt.f32.partialorder %v681_v46, 0.5  ;;  %v613_v29 = vmax.f32 %v10541_v48, 0.0 }
  0xf8   :  { %10026 = vtanh.f32 %v642_v27  ;;  %1340 = vmatpush.bf16.msra.mxu0 %v1286_v55  ;;  %v1209_v33 = vsel %vm285_vm0, %v1193_v41, %v1143_v43  ;;  %vm10660_vm9 = vcmp.gt.f32.partialorder %v682_v35, 0.5  ;;  %v683_v45 = vunpack.c.h.bf16 %v10623_v22 }
  0xf9   :  { %v643_v49 = vmul.f32 0.003921569, %v627_v44  ;;  %v684_v50 = vunpack.c.l.bf16 %v10648_v42  ;;  %v10021_v11 = vpop.eup %10020  ;;  %v1225_v46 = vpack.c.bf16 %v1209_v33, %v1209_v33  ;;  %v628_v51 = vmin.f32 %v612_v40, 255.0 }
  0xfa   :  { %v629_v52 = vmin.f32 %v613_v29, 255.0  ;;  %v685_v53 = vunpack.c.h.bf16 %v10648_v42  ;;  %v10023_v60 = vpop.eup %10022  ;;  %v728_v48 = vrot.slane %v10021_v11, 4  ;;  %v760_v62 = vrot.slane %v10021_v11, 5 }
  0xfb   :  { %v808_v54 = vrot.slane %v10021_v11, 3  ;;  %v856_v63 = vrot.slane %v10021_v11, 6  ;;  %v1289_v57 = vsel %vm1191_vm6, %v1225_v46, 0  ;;  %v888_v3 = vrot.slane %v10021_v11, 7 }
  0xfc   :  { %v729_v4 = vrot.slane %v10023_v60, 4  ;;  %v761_v6 = vrot.slane %v10023_v60, 5  ;;  %v10668_v59 = vpop.eup %10024  ;;  %1359 = vmatpush.bf16.msra.mxu1 %v1289_v57  ;;  %v792_v8 = vsel %vm10630_vm7, %v728_v48, %v760_v62  ;;  %v809_v61 = vrot.slane %v10023_v60, 3 }
  0xfd   :  { %v840_v10 = vsel %vm10630_vm7, %v808_v54, %v760_v62  ;;  %v857_v30 = vrot.slane %v10023_v60, 6  ;;  %v920_v16 = vsel %vm10630_vm7, %v856_v63, %v888_v3  ;;  %v952_v18 = vrot.slane %v792_v8, 7 }
  0xfe   :  { %v10027_v15 = vpop.eup %10026  ;;  %v1048_v19 = vrot.slane %v792_v8, 3  ;;  %v1096_v20 = vrot.slane %v840_v10, 3  ;;  %v1000_v1 = vrot.slane %v920_v16, 7  ;;  %v793_v22 = vsel %vm10654_vm8, %v729_v4, %v761_v6 }
  0xff   :  { %v841_v23 = vsel %vm10654_vm8, %v809_v61, %v761_v6  ;;  %v889_v21 = vrot.slane %v10023_v60, 7  ;;  %v953_v7 = vrot.slane %v793_v22, 7  ;;  %v1049_v13 = vrot.slane %v793_v22, 3 }
 0x100   :  { %v1177_v28 = vsel %vm1174_vm5, %v10021_v11, %v1048_v19  ;;  %v1097_v5 = vrot.slane %v841_v23, 3  ;;  %v1032_v31 = vsel %vm10630_vm7, %v952_v18, %v1000_v1  ;;  %v730_v9 = vrot.slane %v10027_v15, 4  ;;  %v10704_v11 = vld [vmem:[%s11846_s0 + $0x120] sm:$0x44] }
 0x101   :  { %v1194_v14 = vsel %vm1191_vm6, %v1177_v28, %v1096_v20  ;;  %v921_v56 = vsel %vm10654_vm8, %v857_v30, %v889_v21  ;;  %v1144_v35 = vrot.slane %v1032_v31, 2  ;;  %v1178_v37 = vsel %vm1174_vm5, %v10023_v60, %v1049_v13 }
 0x102   :  { %v1001_v32 = vrot.slane %v921_v56, 7  ;;  %v762_v38 = vrot.slane %v10027_v15, 5  ;;  %vm10687_vm10 = vcmp.gt.f32.partialorder %v683_v45, 0.5  ;;  %v1195_v39 = vsel %vm1191_vm6, %v1178_v37, %v1097_v5 }
 0x103   :  { %v810_v41 = vrot.slane %v10027_v15, 3  ;;  %v858_v24 = vrot.slane %v10027_v15, 6  ;;  %v890_v27 = vrot.slane %v10027_v15, 7  ;;  %v1210_v43 = vsel %vm285_vm0, %v1194_v14, %v1144_v35 }
 0x104   :  { %v1033_v44 = vsel %vm10654_vm8, %v953_v7, %v1001_v32  ;;  %v794_v40 = vsel %vm10660_vm9, %v730_v9, %v762_v38  ;;  %10028 = vtanh.f32 %v643_v49  ;;  %v1226_v55 = vpack.c.bf16 %v1210_v43, %v1210_v43  ;;  %v10709_v49 = vld [vmem:[%s11848_s2] sm:$0xff] }
 0x105   :  { %v1145_v29 = vrot.slane %v1033_v44, 2  ;;  %v842_v33 = vsel %vm10660_vm9, %v810_v41, %v762_v38  ;;  %v922_v45 = vsel %vm10660_vm9, %v858_v24, %v890_v27  ;;  %v954_v46 = vrot.slane %v794_v40, 7 }
 0x106   :  { %v1002_v34 = vrot.slane %v922_v45, 7  ;;  %v1050_v60 = vrot.slane %v794_v40, 3  ;;  %v1098_v48 = vrot.slane %v842_v33, 3  ;;  %v1292_v62 = vsel %vm1191_vm6, %v1226_v55, 0 }
 0x107   :  { %v1211_v54 = vsel %vm285_vm0, %v1195_v39, %v1145_v29  ;;  %v644_v63 = vmul.f32 0.003921569, %v628_v51  ;;  %v645_v57 = vmul.f32 0.003921569, %v629_v52  ;;  %1378 = vmatpush.bf16.msra.mxu2 %v1292_v62  ;;  %vm10718_vm11 = vcmp.gt.f32.partialorder %v684_v50, 0.5 }
 0x108   :  { %v1227_v3 = vpack.c.bf16 %v1211_v54, %v1211_v54  ;;  %v1034_v4 = vsel %vm10660_vm9, %v954_v46, %v1002_v34  ;;  %v1179_v6 = vsel %vm1174_vm5, %v10027_v15, %v1050_v60  ;;  %vm1278_vm12 = vcmask 31744  }
 0x109   :  { %v1146_v10 = vrot.slane %v1034_v4, 2  ;;  %v1196_v61 = vsel %vm1191_vm6, %v1179_v6, %v1098_v48  ;;  %10030 = vtanh.f32 %v644_v63  ;;  %7199 = vmatmul.msk.bf16.vlgmr.msra.gmra.mxu0 %vm1278_vm12, %v10709_v49  ;;  %7201 = vmatmul.msk.bf16.vlgmr.msra.gmra.mxu1 %vm1278_vm12, %v10709_v49  ;;  %v686_v47 = vunpack.c.l.bf16 %v10704_v11 }
 0x10a   :  { %v10029_v51 = vpop.eup %10028  ;;  %v1295_v52 = vsel %vm1191_vm6, %v1227_v3, 0  ;;  %10032 = vtanh.f32 %v645_v57  ;;  %v734_v50 = vrot.slane %v10588_v36, 4  ;;  %vm10733_vm13 = vcmp.gt.f32.partialorder %v685_v53, 0.5  ;;  %7203 = vmatmul.msk.bf16.vlgmr.msra.gmra.mxu2 %vm1278_vm12, %v10709_v49 }
 0x10b   :  { %1397 = vmatpush.bf16.msra.mxu3 %v1295_v52  ;;  %v1212_v30 = vsel %vm285_vm0, %v1196_v61, %v1146_v10  ;;  %v731_v15 = vrot.slane %v10029_v51, 4  ;;  %v763_v16 = vrot.slane %v10029_v51, 5  ;;  %v811_v18 = vrot.slane %v10029_v51, 3 }
 0x10c   :  { %v1228_v20 = vpack.c.bf16 %v1212_v30, %v1212_v30  ;;  %v859_v1 = vrot.slane %v10029_v51, 6  ;;  %v891_v22 = vrot.slane %v10029_v51, 7  ;;  %vm10739_vm14 = vcmp.gt.f32.partialorder %v686_v47, 0.5  ;;  %v10782_v47 = vld [vmem:[%s11848_s2 + $0x8] sm:$0xff] }
 0x10d   :  { %v795_v21 = vsel %vm10687_vm10, %v731_v15, %v763_v16  ;;  %v843_v42 = vsel %vm10687_vm10, %v811_v18, %v763_v16  ;;  %v766_v53 = vrot.slane %v10588_v36, 5  ;;  %v814_v28 = vrot.slane %v10588_v36, 3 }
 0x10e   :  { %v1298_v7 = vsel %vm1191_vm6, %v1228_v20, 0  ;;  %v923_v13 = vsel %vm10687_vm10, %v859_v1, %v891_v22  ;;  %v955_v5 = vrot.slane %v795_v21, 7  ;;  %v1051_v31 = vrot.slane %v795_v21, 3  ;;  %7205 = vmatmul.msk.bf16.vlgmr.msra.gmra.mxu3 %vm1278_vm12, %v10709_v49 }
 0x10f   :  { %v10031_v14 = vpop.eup %10030  ;;  %1416 = vmatpush.bf16.msrb.mxu0 %v1298_v7  ;;  %v1003_v56 = vrot.slane %v923_v13, 7  ;;  %v1099_v9 = vrot.slane %v843_v42, 3  ;;  %v10756_v35 = vsel %vm10739_vm14, %v734_v50, %v766_v53  ;;  %v846_v32 = vsel %vm10739_vm14, %v814_v28, %v766_v53 }
 0x110   :  { %v10033_v37 = vpop.eup %10032  ;;  %v1180_v38 = vsel %vm1174_vm5, %v10029_v51, %v1051_v31  ;;  %v732_v39 = vrot.slane %v10031_v14, 4  ;;  %v764_v41 = vrot.slane %v10031_v14, 5  ;;  %v812_v24 = vrot.slane %v10031_v14, 3 }
 0x111   :  { %v1035_v27 = vsel %vm10687_vm10, %v955_v5, %v1003_v56  ;;  %v1197_v43 = vsel %vm1191_vm6, %v1180_v38, %v1099_v9  ;;  %v860_v44 = vrot.slane %v10031_v14, 6  ;;  %v892_v40 = vrot.slane %v10031_v14, 7 }
 0x112   :  { %v1147_v55 = vrot.slane %v1035_v27, 2  ;;  %v796_v29 = vsel %vm10718_vm11, %v732_v39, %v764_v41  ;;  %v844_v33 = vsel %vm10718_vm11, %v812_v24, %v764_v41  ;;  %v733_v45 = vrot.slane %v10033_v37, 4 }
 0x113   :  { %v924_v46 = vsel %vm10718_vm11, %v860_v44, %v892_v40  ;;  %v956_v34 = vrot.slane %v796_v29, 7  ;;  %v1052_v60 = vrot.slane %v796_v29, 3  ;;  %v1100_v48 = vrot.slane %v844_v33, 3 }
 0x114   :  { %v1213_v0 = vsel %vm285_vm0, %v1197_v43, %v1147_v55  ;;  %v1004_v62 = vrot.slane %v924_v46, 7  ;;  %v765_v54 = vrot.slane %v10033_v37, 5  ;;  %v813_v63 = vrot.slane %v10033_v37, 3 }
 0x115   :  { %v1229_v57 = vpack.c.bf16 %v1213_v0, %v1213_v0  ;;  %v1181_v3 = vsel %vm1174_vm5, %v10031_v14, %v1052_v60  ;;  %v861_v4 = vrot.slane %v10033_v37, 6  ;;  %v893_v6 = vrot.slane %v10033_v37, 7  ;;  %v10834_v60 = vld [vmem:[%s11845_s8 + $0x18] sm:$0xff] }
 0x116   :  { %v1036_v10 = vsel %vm10718_vm11, %v956_v34, %v1004_v62  ;;  %v1198_v61 = vsel %vm1191_vm6, %v1181_v3, %v1100_v48  ;;  %v797_v51 = vsel %vm10733_vm13, %v733_v45, %v765_v54  ;;  %v845_v52 = vsel %vm10733_vm13, %v813_v63, %v765_v54 }
 0x117   :  { %v1301_v50 = vsel %vm1191_vm6, %v1229_v57, 0  ;;  %v1148_v30 = vrot.slane %v1036_v10, 2  ;;  %v925_v8 = vsel %vm10733_vm13, %v861_v4, %v893_v6  ;;  %v957_v15 = vrot.slane %v797_v51, 7 }
 0x118   :  { %1435 = vmatpush.bf16.msrb.mxu1 %v1301_v50  ;;  %v1005_v16 = vrot.slane %v925_v8, 7  ;;  %v1053_v18 = vrot.slane %v797_v51, 3  ;;  %v1101_v20 = vrot.slane %v845_v52, 3  ;;  %v862_v1 = vrot.slane %v10588_v36, 6 }
 0x119   :  { %v1214_v22 = vsel %vm285_vm0, %v1198_v61, %v1148_v30  ;;  %v894_v21 = vrot.slane %v10588_v36, 7  ;;  %v958_v42 = vrot.slane %v10756_v35, 7  ;;  %v1054_v53 = vrot.slane %v10756_v35, 3  ;;  %7200 = vmatmul.msk.bf16.gmra.mxu0 %vm1278_vm12, %v10782_v47  ;;  %7202 = vmatmul.msk.bf16.gmra.mxu1 %vm1278_vm12, %v10782_v47 }
 0x11a   :  { %v1230_v28 = vpack.c.bf16 %v1214_v22, %v1214_v22  ;;  %v1037_v7 = vsel %vm10733_vm13, %v957_v15, %v1005_v16  ;;  %v1182_v13 = vsel %vm1174_vm5, %v10033_v37, %v1053_v18  ;;  %v1102_v5 = vrot.slane %v846_v32, 3  ;;  %7204 = vmatmul.msk.bf16.gmra.mxu2 %vm1278_vm12, %v10782_v47 }
 0x11b   :  { %v1149_v31 = vrot.slane %v1037_v7, 2  ;;  %v1199_v14 = vsel %vm1191_vm6, %v1182_v13, %v1101_v20  ;;  %v926_v56 = vsel %vm10739_vm14, %v862_v1, %v894_v21  ;;  %v1183_v9 = vsel %vm1174_vm5, %v10588_v36, %v1054_v53 }
 0x11c   :  { %v1304_v19 = vsel %vm1191_vm6, %v1230_v28, 0  ;;  %v1006_v35 = vrot.slane %v926_v56, 7  ;;  %v1200_v32 = vsel %vm1191_vm6, %v1183_v9, %v1102_v5  ;;  %v687_v37 = vunpack.c.h.bf16 %v10704_v11  ;;  %v675_v11 = vld [vmem:[%s11846_s0 + $0x128] sm:$0x44]  ;;  %v10874_v56 = vld [vmem:[%s11845_s8] sm:$0xff] }
 0x11d   :  { %1454 = vmatpush.bf16.msrb.mxu2 %v1304_v19  ;;  %v1215_v38 = vsel %vm285_vm0, %v1199_v14, %v1149_v31  ;;  %v735_v39 = vrot.slane %v10596_v25, 4  ;;  %v767_v41 = vrot.slane %v10596_v25, 5  ;;  %v815_v24 = vrot.slane %v10596_v25, 3 }
 0x11e   :  { %v1231_v36 = vpack.c.bf16 %v1215_v38, %v1215_v38  ;;  %v1038_v27 = vsel %vm10739_vm14, %v958_v42, %v1006_v35  ;;  %vm10815_vm15 = vcmp.gt.f32.partialorder %v687_v37, 0.5  ;;  %v863_v44 = vrot.slane %v10596_v25, 6  ;;  %7206 = vmatmul.msk.bf16.gmra.mxu3 %vm1278_vm12, %v10782_v47 }
 0x11f   :  { %v1150_v40 = vrot.slane %v1038_v27, 2  ;;  %v799_v55 = vsel %vm10815_vm15, %v735_v39, %v767_v41  ;;  %v847_v23 = vsel %vm10815_vm15, %v815_v24, %v767_v41  ;;  %v895_v29 = vrot.slane %v10596_v25, 7  ;;  %v10896_v24 = vld [vmem:[%s11845_s8 + $0x10] sm:$0xff] }
 0x120   :  { %v1307_v33 = vsel %vm1191_vm6, %v1231_v36, 0  ;;  %v959_v45 = vrot.slane %v799_v55, 7  ;;  %v1055_v46 = vrot.slane %v799_v55, 3  ;;  %v1103_v34 = vrot.slane %v847_v23, 3  ;;  %v10901_v36 = vld [vmem:[%s11845_s8 + $0x8] sm:$0xff] }
 0x121   :  { %1473 = vmatpush.bf16.msrb.mxu3 %v1307_v33  ;;  %v1216_v48 = vsel %vm285_vm0, %v1200_v32, %v1150_v40  ;;  %v927_v0 = vsel %vm10815_vm15, %v863_v44, %v895_v29  ;;  %v688_v62 = vunpack.c.l.bf16 %v675_v11  ;;  %v10071_v3 = vmov 0  }
 0x122   :  { %v1232_v54 = vpack.c.bf16 %v1216_v48, %v1216_v48  ;;  %v1007_v63 = vrot.slane %v927_v0, 7  ;;  %v1184_v57 = vsel %vm1174_vm5, %v10596_v25, %v1055_v46  ;;  %9955 = vset.pattern.permute.xlu1 %v10071_v3  ;;  %v736_v4 = vrot.slane %v10602_v58, 4  ;;  %9954 = vset.pattern.permute.xlu0 %v10071_v3 }
 0x123   :  { %v1201_v6 = vsel %vm1191_vm6, %v1184_v57, %v1103_v34  ;;  %1265 = vperm.xlu1 %9955, %v10834_v60   ;;  %vm10844_vm1 = vcmp.gt.f32.partialorder %v688_v62, 0.5  ;;  %v768_v61 = vrot.slane %v10602_v58, 5  ;;  %v816_v51 = vrot.slane %v10602_v58, 3  ;;  %9956 = vset.pattern.permute.xlu2 %v10071_v3 }
 0x124   :  { %v1310_v25 = vsel %vm1191_vm6, %v1232_v54, 0  ;;  %v1039_v52 = vsel %vm10815_vm15, %v959_v45, %v1007_v63  ;;  %v864_v50 = vrot.slane %v10602_v58, 6  ;;  %v896_v30 = vrot.slane %v10602_v58, 7  ;;  %1260 = vperm.xlu0 %9954, %v10896_v24   ;;  %1255 = vperm.xlu2 %9956, %v10901_v36  }
 0x125   :  { %1492 = vmatpush.bf16.msra.mxu0 %v1310_v25  ;;  %v1151_v8 = vrot.slane %v1039_v52, 2  ;;  %v800_v15 = vsel %vm10844_vm1, %v736_v4, %v768_v61  ;;  %v848_v16 = vsel %vm10844_vm1, %v816_v51, %v768_v61  ;;  %v689_v18 = vunpack.c.h.bf16 %v675_v11 }
 0x126   :  { %v928_v20 = vsel %vm10844_vm1, %v864_v50, %v896_v30  ;;  %v960_v1 = vrot.slane %v800_v15, 7  ;;  %v1056_v22 = vrot.slane %v800_v15, 3  ;;  %v1104_v21 = vrot.slane %v848_v16, 3 }
 0x127   :  { %v1217_v42 = vsel %vm285_vm0, %v1201_v6, %v1151_v8  ;;  %v1008_v53 = vrot.slane %v928_v20, 7  ;;  %vm10862_vm2 = vcmp.gt.f32.partialorder %v689_v18, 0.5  ;;  %v737_v7 = vrot.slane %v10605_v2, 4 }
 0x128   :  { %v1233_v13 = vpack.c.bf16 %v1217_v42, %v1217_v42  ;;  %v1185_v5 = vsel %vm1174_vm5, %v10602_v58, %v1056_v22  ;;  %v769_v31 = vrot.slane %v10605_v2, 5  ;;  %v817_v14 = vrot.slane %v10605_v2, 3  ;;  %v676_v58 = vld [vmem:[%s11846_s0 + $0x130] sm:$0x44] }
 0x129   :  { %v1040_v9 = vsel %vm10844_vm1, %v960_v1, %v1008_v53  ;;  %v1202_v19 = vsel %vm1191_vm6, %v1185_v5, %v1104_v21  ;;  %v865_v35 = vrot.slane %v10605_v2, 6  ;;  %v897_v32 = vrot.slane %v10605_v2, 7  ;;  %7207 = vmatmul.msk.bf16.vlgmr.msrb.gmra.mxu0 %vm1278_vm12, %v10709_v49  ;;  %7209 = vmatmul.msk.bf16.vlgmr.msrb.gmra.mxu1 %vm1278_vm12, %v10709_v49  ;;  %v677_v21 = vld [vmem:[%s11846_s0 + $0x138] sm:$0x44] }
 0x12a   :  { %v1313_v37 = vsel %vm1191_vm6, %v1233_v13, 0  ;;  %v1152_v38 = vrot.slane %v1040_v9, 2  ;;  %v801_v39 = vsel %vm10862_vm2, %v737_v7, %v769_v31  ;;  %v849_v41 = vsel %vm10862_vm2, %v817_v14, %v769_v31  ;;  %7211 = vmatmul.msk.bf16.vlgmr.msrb.gmra.mxu2 %vm1278_vm12, %v10709_v49 }
 0x12b   :  { %1511 = vmatpush.bf16.msra.mxu1 %v1313_v37  ;;  %v929_v27 = vsel %vm10862_vm2, %v865_v35, %v897_v32  ;;  %v961_v43 = vrot.slane %v801_v39, 7  ;;  %v1057_v44 = vrot.slane %v801_v39, 3  ;;  %v1105_v11 = vrot.slane %v849_v41, 3  ;;  %1250 = vperm.xlu1 %9955, %v10874_v56  }
 0x12c   :  { %v1218_v40 = vsel %vm285_vm0, %v1202_v19, %v1152_v38  ;;  %v1009_v55 = vrot.slane %v929_v27, 7  ;;  %v690_v23 = vunpack.c.l.bf16 %v676_v58  ;;  %v738_v29 = vrot.slane %v10613_v12, 4 }
 0x12d   :  { %v1234_v33 = vpack.c.bf16 %v1218_v40, %v1218_v40  ;;  %v1186_v45 = vsel %vm1174_vm5, %v10605_v2, %v1057_v44  ;;  %v770_v46 = vrot.slane %v10613_v12, 5  ;;  %v818_v34 = vrot.slane %v10613_v12, 3 }
 0x12e   :  { %v1041_v48 = vsel %vm10862_vm2, %v961_v43, %v1009_v55  ;;  %v1203_v0 = vsel %vm1191_vm6, %v1186_v45, %v1105_v11  ;;  %7213 = vmatmul.msk.bf16.vlgmr.msrb.gmra.mxu3 %vm1278_vm12, %v10709_v49  ;;  %vm10921_vm3 = vcmp.gt.f32.partialorder %v690_v23, 0.5  ;;  %v866_v2 = vrot.slane %v10613_v12, 6 }
 0x12f   :  { %v1316_v54 = vsel %vm1191_vm6, %v1234_v33, 0  ;;  %v1153_v63 = vrot.slane %v1041_v48, 2  ;;  %v802_v57 = vsel %vm10921_vm3, %v738_v29, %v770_v46  ;;  %v850_v3 = vsel %vm10921_vm3, %v818_v34, %v770_v46 }
 0x130   :  { %1530 = vmatpush.bf16.msra.mxu2 %v1316_v54  ;;  %v898_v4 = vrot.slane %v10613_v12, 7  ;;  %v962_v6 = vrot.slane %v802_v57, 7  ;;  %v1058_v10 = vrot.slane %v802_v57, 3  ;;  %v1106_v61 = vrot.slane %v850_v3, 3 }
 0x131   :  { %v1219_v51 = vsel %vm285_vm0, %v1203_v0, %v1153_v63  ;;  %v691_v25 = vunpack.c.h.bf16 %v676_v58  ;;  %v739_v52 = vrot.slane %v10617_v17, 4  ;;  %v771_v50 = vrot.slane %v10617_v17, 5 }
 0x132   :  { %v1235_v30 = vpack.c.bf16 %v1219_v51, %v1219_v51  ;;  %v930_v8 = vsel %vm10921_vm3, %v866_v2, %v898_v4  ;;  %v1187_v15 = vsel %vm1174_vm5, %v10613_v12, %v1058_v10  ;;  %v819_v16 = vrot.slane %v10617_v17, 3 }
 0x133   :  { %v1010_v18 = vrot.slane %v930_v8, 7  ;;  %v1204_v20 = vsel %vm1191_vm6, %v1187_v15, %v1106_v61  ;;  %vm10941_vm4 = vcmp.gt.f32.partialorder %v691_v25, 0.5  ;;  %v867_v22 = vrot.slane %v10617_v17, 6 }
 0x134   :  { %v1319_v42 = vsel %vm1191_vm6, %v1235_v30, 0  ;;  %v803_v12 = vsel %vm10941_vm4, %v739_v52, %v771_v50  ;;  %v851_v53 = vsel %vm10941_vm4, %v819_v16, %v771_v50  ;;  %v899_v28 = vrot.slane %v10617_v17, 7 }
 0x135   :  { %1549 = vmatpush.bf16.msra.mxu3 %v1319_v42  ;;  %v1042_v7 = vsel %vm10921_vm3, %v962_v6, %v1010_v18  ;;  %v963_v13 = vrot.slane %v803_v12, 7  ;;  %v1059_v5 = vrot.slane %v803_v12, 3  ;;  %v1107_v31 = vrot.slane %v851_v53, 3 }
 0x136   :  { %v1154_v14 = vrot.slane %v1042_v7, 2  ;;  %v931_v9 = vsel %vm10941_vm4, %v867_v22, %v899_v28  ;;  %v692_v19 = vunpack.c.l.bf16 %v677_v21  ;;  %v740_v35 = vrot.slane %v10640_v26, 4 }
 0x137   :  { %v1011_v32 = vrot.slane %v931_v9, 7  ;;  %v1188_v58 = vsel %vm1174_vm5, %v10617_v17, %v1059_v5  ;;  %v772_v37 = vrot.slane %v10640_v26, 5  ;;  %v820_v38 = vrot.slane %v10640_v26, 3 }
 0x138   :  { %v1220_v39 = vsel %vm285_vm0, %v1204_v20, %v1154_v14  ;;  %v1205_v41 = vsel %vm1191_vm6, %v1188_v58, %v1107_v31  ;;  %vm10966_vm7 = vcmp.gt.f32.partialorder %v692_v19, 0.5  ;;  %v868_v43 = vrot.slane %v10640_v26, 6 }
 0x139   :  { %v1236_v44 = vpack.c.bf16 %v1220_v39, %v1220_v39  ;;  %v1043_v11 = vsel %vm10941_vm4, %v963_v13, %v1011_v32  ;;  %v804_v17 = vsel %vm10966_vm7, %v740_v35, %v772_v37  ;;  %v852_v40 = vsel %vm10966_vm7, %v820_v38, %v772_v37  ;;  %7208 = vmatmul.msk.bf16.gmra.mxu0 %vm1278_vm12, %v10782_v47 }
 0x13a   :  { %v1155_v55 = vrot.slane %v1043_v11, 2  ;;  %v900_v23 = vrot.slane %v10640_v26, 7  ;;  %v964_v29 = vrot.slane %v804_v17, 7  ;;  %v1060_v33 = vrot.slane %v804_v17, 3  ;;  %7210 = vmatmul.msk.bf16.gmra.mxu1 %vm1278_vm12, %v10782_v47  ;;  %7212 = vmatmul.msk.bf16.gmra.mxu2 %vm1278_vm12, %v10782_v47 }
 0x13b   :  { %v1322_v45 = vsel %vm1191_vm6, %v1236_v44, 0  ;;  %v1108_v46 = vrot.slane %v852_v40, 3  ;;  %v693_v34 = vunpack.c.h.bf16 %v677_v21  ;;  %v741_v48 = vrot.slane %v10668_v59, 4 }
 0x13c   :  { %1568 = vmatpush.bf16.msrb.mxu0 %v1322_v45  ;;  %v1221_v0 = vsel %vm285_vm0, %v1205_v41, %v1155_v55  ;;  %v932_v62 = vsel %vm10966_vm7, %v868_v43, %v900_v23  ;;  %v1189_v2 = vsel %vm1174_vm5, %v10640_v26, %v1060_v33  ;;  %v773_v54 = vrot.slane %v10668_v59, 5 }
 0x13d   :  { %v1237_v63 = vpack.c.bf16 %v1221_v0, %v1221_v0  ;;  %v1012_v57 = vrot.slane %v932_v62, 7  ;;  %v1206_v3 = vsel %vm1191_vm6, %v1189_v2, %v1108_v46  ;;  %vm10993_vm8 = vcmp.gt.f32.partialorder %v693_v34, 0.5 }
 0x13e   :  { %v805_v6 = vsel %vm10993_vm8, %v741_v48, %v773_v54  ;;  %v821_v10 = vrot.slane %v10668_v59, 3  ;;  %v869_v26 = vrot.slane %v10668_v59, 6  ;;  %v901_v61 = vrot.slane %v10668_v59, 7  ;;  %7214 = vmatmul.msk.bf16.gmra.mxu3 %vm1278_vm12, %v10782_v47 }
 0x13f   :  { %v1325_v51 = vsel %vm1191_vm6, %v1237_v63, 0  ;;  %v1044_v25 = vsel %vm10966_vm7, %v964_v29, %v1012_v57  ;;  %v965_v52 = vrot.slane %v805_v6, 7  ;;  %v1061_v50 = vrot.slane %v805_v6, 3 }
 0x140   :  { %1587 = vmatpush.bf16.msrb.mxu1 %v1325_v51  ;;  %v1156_v30 = vrot.slane %v1044_v25, 2  ;;  %v853_v8 = vsel %vm10993_vm8, %v821_v10, %v773_v54  ;;  %v933_v15 = vsel %vm10993_vm8, %v869_v26, %v901_v61  ;;  %vm7018_vm9 = vcmask 1043456  }
 0x141   :  { %v1013_v16 = vrot.slane %v933_v15, 7  ;;  %v1109_v18 = vrot.slane %v853_v8, 3  ;;  %v1190_v20 = vsel %vm1174_vm5, %v10668_v59, %v1061_v50  ;;  %vm2856_vm5 = vcmask 523264  }
 0x142   :  { %v1222_v1 = vsel %vm285_vm0, %v1206_v3, %v1156_v30 }
 0x143   :  { %v1238_v22 = vpack.c.bf16 %v1222_v1, %v1222_v1  ;;  %v1045_v21 = vsel %vm10993_vm8, %v965_v52, %v1013_v16  ;;  %v1207_v42 = vsel %vm1191_vm6, %v1190_v20, %v1109_v18 }
 0x144   :  { %v1157_v12 = vrot.slane %v1045_v21, 2 }
 0x145   :  { %v1328_v53 = vsel %vm1191_vm6, %v1238_v22, 0 }
 0x146   :  { %1606 = vmatpush.bf16.msrb.mxu2 %v1328_v53  ;;  %v1223_v28 = vsel %vm285_vm0, %v1207_v42, %v1157_v12  ;;  %vm1995_vm0 = vcmask 261120  }
 0x147   :  { %v1239_v7 = vpack.c.bf16 %v1223_v28, %v1223_v28 }
 0x149   :  { %v1331_v13 = vsel %vm1191_vm6, %v1239_v7, 0  ;;  %7215 = vmatmul.msk.bf16.vlgmr.msra.gmra.mxu0 %vm1278_vm12, %v10709_v49  ;;  %vm3909_vm6 = vcmask 785408  }
 0x14a   :  { %1625 = vmatpush.bf16.msrb.mxu3 %v1331_v13  ;;  %7217 = vmatmul.msk.bf16.vlgmr.msra.gmra.mxu1 %vm1278_vm12, %v10709_v49 }
 0x14b   :  { %7219 = vmatmul.msk.bf16.vlgmr.msra.gmra.mxu2 %vm1278_vm12, %v10709_v49 }
 0x14e   :  { %7221 = vmatmul.msk.bf16.vlgmr.msra.gmra.mxu3 %vm1278_vm12, %v10709_v49 }
 0x159   :  { %7216 = vmatmul.msk.bf16.gmra.mxu0 %vm1278_vm12, %v10782_v47 }
 0x15a   :  { %7218 = vmatmul.msk.bf16.gmra.mxu1 %vm1278_vm12, %v10782_v47 }
 0x15b   :  { %7220 = vmatmul.msk.bf16.gmra.mxu2 %vm1278_vm12, %v10782_v47 }
 0x15e   :  { %7222 = vmatmul.msk.bf16.gmra.mxu3 %vm1278_vm12, %v10782_v47 }
 0x169   :  { %7223 = vmatmul.msk.bf16.vlgmr.msrb.gmra.mxu0 %vm1278_vm12, %v10709_v49 }
 0x16a   :  { %7225 = vmatmul.msk.bf16.vlgmr.msrb.gmra.mxu1 %vm1278_vm12, %v10709_v49 }
 0x16b   :  { %7227 = vmatmul.msk.bf16.vlgmr.msrb.gmra.mxu2 %vm1278_vm12, %v10709_v49 }
 0x16e   :  { %7229 = vmatmul.msk.bf16.vlgmr.msrb.gmra.mxu3 %vm1278_vm12, %v10709_v49 }
 0x179   :  { %7224 = vmatmul.msk.bf16.gmra.mxu0 %vm1278_vm12, %v10782_v47 }
 0x17a   :  { %7226 = vmatmul.msk.bf16.gmra.mxu1 %vm1278_vm12, %v10782_v47 }
 0x17b   :  { %7228 = vmatmul.msk.bf16.gmra.mxu2 %vm1278_vm12, %v10782_v47 }
 0x17e   :  { %7230 = vmatmul.msk.bf16.gmra.mxu3 %vm1278_vm12, %v10782_v47  ;;  %v11052_v35 = vpop.permute.xlu2 %1255 }
 0x186   :  { %v1342_v59 = vpop.f32.mrf.mxu0  ;;  %v1361_v5 = vpop.f32.mrf.mxu1 }
 0x18d   :  { %v1380_v31 = vpop.f32.mrf.mxu2 }
 0x18e   :  { %v1344_v14 = vpop.f32.mrf.mxu0  ;;  %v1363_v9 = vpop.f32.mrf.mxu1 }
 0x18f   :  { %v1345_v32 = vadd.f32 %v1344_v14, %v11052_v35  ;;  %v1364_v58 = vadd.f32 %v1363_v9, %v11052_v35 }
 0x191   :  { %v1399_v19 = vpop.f32.mrf.mxu3  ;;  %v1653_v47 = vmax.f32 %v1345_v32, 0.0  ;;  %v1654_v27 = vmax.f32 %v1364_v58, 0.0 }
 0x193   :  { %v1709_v44 = vpack.c.bf16 %v1654_v27, %v1653_v47 }
 0x195   :  { %v11054_v49 = vpop.permute.xlu1 %1265  ;;  %v1382_v37 = vpop.f32.mrf.mxu2  ;;  %1741 = vst [vmem:[#allocation2 + $0x40] sm:$0xff] %v1709_v44 }
 0x196   :  { %v1383_v38 = vadd.f32 %v1382_v37, %v11052_v35  ;;  %v1347_v39 = vpop.f32.mrf.mxu0  ;;  %v1366_v41 = vpop.f32.mrf.mxu1 }
 0x197   :  { %v11064_v45 = vpop.permute.xlu0 %1260 }
 0x198   :  { %v1655_v11 = vmax.f32 %v1383_v38, 0.0  ;;  %v1348_v2 = vadd.f32 %v1347_v39, %v11064_v45  ;;  %v1367_v54 = vadd.f32 %v1366_v41, %v11064_v45 }
 0x199   :  { %v1401_v43 = vpop.f32.mrf.mxu3 }
 0x19a   :  { %v1402_v17 = vadd.f32 %v1401_v43, %v11052_v35  ;;  %v1669_v61 = vmax.f32 %v1348_v2, 0.0  ;;  %v1670_v51 = vmax.f32 %v1367_v54, 0.0 }
 0x19c   :  { %v1656_v40 = vmax.f32 %v1402_v17, 0.0  ;;  %v1717_v15 = vpack.c.bf16 %v1670_v51, %v1669_v61  ;;  %v9339_v27 = vld [vmem:[#allocation2 + $0x3c] sm:$0xf0] }
 0x19d   :  { %v11060_v55 = vpop.permute.xlu1 %1250  ;;  %v1385_v46 = vpop.f32.mrf.mxu2 }
 0x19e   :  { %v1381_v23 = vadd.f32 %v1380_v31, %v11060_v55  ;;  %v1400_v29 = vadd.f32 %v1399_v19, %v11060_v55  ;;  %v1710_v33 = vpack.c.bf16 %v1656_v40, %v1655_v11  ;;  %v1343_v34 = vadd.f32 %v1342_v59, %v11060_v55  ;;  %v1349_v0 = vpop.f32.mrf.mxu0  ;;  %v1368_v62 = vpop.f32.mrf.mxu1  ;;  %1749 = vst [vmem:[#allocation2 + $0x80] sm:$0xff] %v1717_v15  ;;  %v7243_v11 = vld [vmem:[#allocation2 + $0x40] sm:$0xf0] }
 0x19f   :  { %v1386_v48 = vadd.f32 %v1385_v46, %v11064_v45  ;;  %v1362_v63 = vadd.f32 %v1361_v5, %v11060_v55  ;;  %v1350_v4 = vadd.f32 %v1349_v0, %v11054_v49  ;;  %v1369_v6 = vadd.f32 %v1368_v62, %v11054_v49 }
 0x1a0   :  { %v1639_v57 = vmax.f32 %v1381_v23, 0.0  ;;  %v1640_v3 = vmax.f32 %v1400_v29, 0.0  ;;  %1742 = vst [vmem:[#allocation2 + $0x48] sm:$0xff] %v1710_v33  ;;  %v1637_v25 = vmax.f32 %v1343_v34, 0.0 }
 0x1a1   :  { %v1671_v10 = vmax.f32 %v1386_v48, 0.0  ;;  %v1404_v26 = vpop.f32.mrf.mxu3  ;;  %v1685_v30 = vmax.f32 %v1350_v4, 0.0  ;;  %v1686_v8 = vmax.f32 %v1369_v6, 0.0  ;;  %v1638_v16 = vmax.f32 %v1362_v63, 0.0 }
 0x1a2   :  { %v1702_v52 = vpack.c.bf16 %v1640_v3, %v1639_v57  ;;  %v1405_v50 = vadd.f32 %v1404_v26, %v11064_v45  ;;  %v11085_v57 = vld [vmem:[%s11849_s3] sm:$0xff] }
 0x1a3   :  { %v1725_v20 = vpack.c.bf16 %v1686_v8, %v1685_v30  ;;  %v1701_v1 = vpack.c.bf16 %v1638_v16, %v1637_v25 }
 0x1a4   :  { %1734 = vst [vmem:[#allocation2 + $0x8] sm:$0xff] %v1702_v52  ;;  %v1672_v18 = vmax.f32 %v1405_v50, 0.0 }
 0x1a5   :  { %1757 = vst [vmem:[#allocation2 + $0xc0] sm:$0xff] %v1725_v20  ;;  %v1387_v21 = vpop.f32.mrf.mxu2  ;;  %v7305_v32 = vld [vmem:[#allocation2 + $0x80] sm:$0xf]  ;;  %v9347_v37 = vld [vmem:[#allocation2 + $0x84] sm:$0xf] }
 0x1a6   :  { %v1718_v22 = vpack.c.bf16 %v1672_v18, %v1671_v10  ;;  %v1388_v42 = vadd.f32 %v1387_v21, %v11054_v49  ;;  %v1418_v12 = vpop.f32.mrf.mxu0  ;;  %v1437_v53 = vpop.f32.mrf.mxu1  ;;  %1733 = vst [vmem:[#allocation2] sm:$0xff] %v1701_v1 }
 0x1a7   :  { %v1419_v28 = vadd.f32 %v1418_v12, %v11060_v55  ;;  %v1438_v7 = vadd.f32 %v1437_v53, %v11060_v55  ;;  %v9340_v1 = vld [vmem:[#allocation2 + $0x44] sm:$0xf0] }
 0x1a8   :  { %1750 = vst [vmem:[#allocation2 + $0x88] sm:$0xff] %v1718_v22  ;;  %v1687_v59 = vmax.f32 %v1388_v42, 0.0  ;;  %v7251_v22 = vld [vmem:[#allocation2 + $0x48] sm:$0xf0] }
 0x1a9   :  { %v1406_v13 = vpop.f32.mrf.mxu3  ;;  %v1641_v31 = vmax.f32 %v1419_v28, 0.0  ;;  %v1642_v14 = vmax.f32 %v1438_v7, 0.0 }
 0x1aa   :  { %v1407_v5 = vadd.f32 %v1406_v13, %v11054_v49  ;;  %v10072_v13 = vmov 1  }
 0x1ab   :  { %v1703_v19 = vpack.c.bf16 %v1642_v14, %v1641_v31  ;;  %v7249_v28 = vld [vmem:[#allocation2 + $0x8] sm:$0xf]  ;;  %v9332_v7 = vld [vmem:[#allocation2 + $0xc] sm:$0xf]  ;;  %9959 = vset.pattern.permute.xlu0 %v10072_v13  ;;  %9958 = vset.pattern.permute.xlu1 %v10072_v13 }
 0x1ac   :  { %v1688_v9 = vmax.f32 %v1407_v5, 0.0  ;;  %v9355_v58 = vld [vmem:[#allocation2 + $0xbc] sm:$0xf0]  ;;  %v7307_v38 = vld [vmem:[#allocation2 + $0xc0] sm:$0xf0]  ;;  %v7250_v5 = vor.u32 %v9340_v1, %v7249_v28  ;;  %v7254_v31 = vor.u32 %v9332_v7, %v7251_v22  ;;  %1812 = vperm.xlu0 %9959, %v10901_v36   ;;  %1822 = vperm.xlu1 %9958, %v10834_v60  }
 0x1ad   :  { %1735 = vst [vmem:[#allocation2 + $0x10] sm:$0xff] %v1703_v19  ;;  %v7306_v41 = vor.u32 %v9355_v58, %v7305_v32  ;;  %v7310_v47 = vor.u32 %v9347_v37, %v7307_v38  ;;  %v1456_v43 = vpop.f32.mrf.mxu2  ;;  %v7241_v29 = vld [vmem:[#allocation2] sm:$0xf]  ;;  %v9331_v48 = vld [vmem:[#allocation2 + $0x4] sm:$0xf]  ;;  %9957 = vset.pattern.permute.xlu2 %v10072_v13 }
 0x1ae   :  { %v1726_v39 = vpack.c.bf16 %v1688_v9, %v1687_v59  ;;  %v1420_v44 = vpop.f32.mrf.mxu0  ;;  %v1457_v17 = vadd.f32 %v1456_v43, %v11060_v55  ;;  %v1439_v23 = vpop.f32.mrf.mxu1  ;;  %v7242_v34 = vor.u32 %v9339_v27, %v7241_v29  ;;  %v7246_v54 = vor.u32 %v9331_v48, %v7243_v11  ;;  %1817 = vperm.xlu2 %9957, %v10896_v24   ;;  %v11109_v27 = vld [vmem:[%s11849_s3 + $0x8] sm:$0xff] }
 0x1af   :  { %v1421_v40 = vadd.f32 %v1420_v44, %v11052_v35  ;;  %2008 = vmatpush.bf16.msra.mxu0 %v7306_v41  ;;  %2027 = vmatpush.bf16.msra.mxu1 %v7310_v47  ;;  %v1440_v46 = vadd.f32 %v1439_v23, %v11052_v35  ;;  %v7313_v10 = vld [vmem:[#allocation2 + $0x88] sm:$0xf]  ;;  %v9348_v26 = vld [vmem:[#allocation2 + $0x8c] sm:$0xf] }
 0x1b0   :  { %1758 = vst [vmem:[#allocation2 + $0xc8] sm:$0xff] %v1726_v39  ;;  %v1643_v0 = vmax.f32 %v1457_v17, 0.0 }
 0x1b1   :  { %v1475_v33 = vpop.f32.mrf.mxu3  ;;  %v1657_v2 = vmax.f32 %v1421_v40, 0.0  ;;  %v1658_v63 = vmax.f32 %v1440_v46, 0.0 }
 0x1b2   :  { %v1476_v62 = vadd.f32 %v1475_v33, %v11060_v55 }
 0x1b3   :  { %2009 = vmatpush.bf16.msra.mxu0 %v7242_v34  ;;  %2028 = vmatpush.bf16.msra.mxu1 %v7246_v54  ;;  %v1711_v4 = vpack.c.bf16 %v1658_v63, %v1657_v2 }
 0x1b4   :  { %v1644_v3 = vmax.f32 %v1476_v62, 0.0 }
 0x1b5   :  { %1743 = vst [vmem:[#allocation2 + $0x50] sm:$0xff] %v1711_v4  ;;  %v1458_v61 = vpop.f32.mrf.mxu2 }
 0x1b6   :  { %v1704_v6 = vpack.c.bf16 %v1644_v3, %v1643_v0  ;;  %v1423_v52 = vpop.f32.mrf.mxu0  ;;  %7367 = vmatmul.msk.bf16.vlgmr.msra.gmra.mxu0 %vm1995_vm0, %v11085_v57  ;;  %7369 = vmatmul.msk.bf16.vlgmr.msra.gmra.mxu1 %vm1995_vm0, %v11085_v57  ;;  %v1459_v50 = vadd.f32 %v1458_v61, %v11052_v35 }
 0x1b7   :  { %v9356_v51 = vld [vmem:[#allocation2 + $0xc4] sm:$0xf0]  ;;  %v7315_v25 = vld [vmem:[#allocation2 + $0xc8] sm:$0xf0]  ;;  %v1424_v15 = vadd.f32 %v1423_v52, %v11064_v45  ;;  %v1442_v16 = vpop.f32.mrf.mxu1  ;;  %1807 = vperm.xlu2 %9957, %v10874_v56  }
 0x1b8   :  { %1736 = vst [vmem:[#allocation2 + $0x18] sm:$0xff] %v1704_v6  ;;  %v7314_v30 = vor.u32 %v9356_v51, %v7313_v10  ;;  %v7318_v8 = vor.u32 %v9348_v26, %v7315_v25  ;;  %v1443_v20 = vadd.f32 %v1442_v16, %v11064_v45  ;;  %v1659_v21 = vmax.f32 %v1459_v50, 0.0 }
 0x1b9   :  { %v1477_v18 = vpop.f32.mrf.mxu3  ;;  %v1673_v12 = vmax.f32 %v1424_v15, 0.0 }
 0x1ba   :  { %v1478_v42 = vadd.f32 %v1477_v18, %v11052_v35  ;;  %2046 = vmatpush.bf16.msra.mxu2 %v7314_v30  ;;  %2065 = vmatpush.bf16.msra.mxu3 %v7318_v8  ;;  %v1674_v53 = vmax.f32 %v1443_v20, 0.0 }
 0x1bc   :  { %v1660_v59 = vmax.f32 %v1478_v42, 0.0  ;;  %v1719_v14 = vpack.c.bf16 %v1674_v53, %v1673_v12  ;;  %v9341_v16 = vld [vmem:[#allocation2 + $0x4c] sm:$0xf0]  ;;  %v7259_v18 = vld [vmem:[#allocation2 + $0x50] sm:$0xf0] }
 0x1bd   :  { %v1461_v19 = vpop.f32.mrf.mxu2  ;;  %v7257_v42 = vld [vmem:[#allocation2 + $0x10] sm:$0xf]  ;;  %v9333_v12 = vld [vmem:[#allocation2 + $0x14] sm:$0xf] }
 0x1be   :  { %v1712_v9 = vpack.c.bf16 %v1660_v59, %v1659_v21  ;;  %2047 = vmatpush.bf16.msra.mxu2 %v7250_v5  ;;  %2066 = vmatpush.bf16.msra.mxu3 %v7254_v31  ;;  %1751 = vst [vmem:[#allocation2 + $0x90] sm:$0xff] %v1719_v14  ;;  %v1425_v32 = vpop.f32.mrf.mxu0  ;;  %v1462_v58 = vadd.f32 %v1461_v19, %v11064_v45 }
 0x1bf   :  { %v1426_v37 = vadd.f32 %v1425_v32, %v11054_v49  ;;  %v1444_v38 = vpop.f32.mrf.mxu1  ;;  %v7258_v28 = vor.u32 %v9341_v16, %v7257_v42  ;;  %v7262_v7 = vor.u32 %v9333_v12, %v7259_v18 }
 0x1c0   :  { %1744 = vst [vmem:[#allocation2 + $0x58] sm:$0xff] %v1712_v9  ;;  %v1445_v60 = vadd.f32 %v1444_v38, %v11054_v49  ;;  %v1675_v36 = vmax.f32 %v1462_v58, 0.0 }
 0x1c1   :  { %v1480_v39 = vpop.f32.mrf.mxu3  ;;  %7371 = vmatmul.msk.bf16.vlgmr.msra.gmra.mxu2 %vm1995_vm0, %v11085_v57  ;;  %7373 = vmatmul.msk.bf16.vlgmr.msra.gmra.mxu3 %vm1995_vm0, %v11085_v57  ;;  %v1689_v47 = vmax.f32 %v1426_v37, 0.0 }
 0x1c2   :  { %v1481_v41 = vadd.f32 %v1480_v39, %v11064_v45  ;;  %v1690_v24 = vmax.f32 %v1445_v60, 0.0 }
 0x1c4   :  { %v1676_v43 = vmax.f32 %v1481_v41, 0.0  ;;  %v1727_v44 = vpack.c.bf16 %v1690_v24, %v1689_v47 }
 0x1c5   :  { %v1463_v17 = vpop.f32.mrf.mxu2  ;;  %v7321_v3 = vld [vmem:[#allocation2 + $0x90] sm:$0xf]  ;;  %v9349_v10 = vld [vmem:[#allocation2 + $0x94] sm:$0xf] }
 0x1c6   :  { %v1720_v11 = vpack.c.bf16 %v1676_v43, %v1675_v36  ;;  %1759 = vst [vmem:[#allocation2 + $0xd0] sm:$0xff] %v1727_v44  ;;  %v1494_v40 = vpop.f32.mrf.mxu0  ;;  %7368 = vmatmul.msk.bf16.gmra.mxu0 %vm1995_vm0, %v11109_v27  ;;  %7370 = vmatmul.msk.bf16.gmra.mxu1 %vm1995_vm0, %v11109_v27  ;;  %v1464_v23 = vadd.f32 %v1463_v17, %v11054_v49 }
 0x1c7   :  { %v1495_v29 = vadd.f32 %v1494_v40, %v11060_v55  ;;  %v1513_v33 = vpop.f32.mrf.mxu1  ;;  %v9342_v47 = vld [vmem:[#allocation2 + $0x54] sm:$0xf0]  ;;  %v7267_v24 = vld [vmem:[#allocation2 + $0x58] sm:$0xf0] }
 0x1c8   :  { %1752 = vst [vmem:[#allocation2 + $0x98] sm:$0xff] %v1720_v11  ;;  %v1514_v34 = vadd.f32 %v1513_v33, %v11060_v55  ;;  %v1691_v48 = vmax.f32 %v1464_v23, 0.0  ;;  %v7265_v40 = vld [vmem:[#allocation2 + $0x18] sm:$0xf]  ;;  %v9334_v23 = vld [vmem:[#allocation2 + $0x1c] sm:$0xf] }
 0x1c9   :  { %v1482_v46 = vpop.f32.mrf.mxu3  ;;  %v1645_v62 = vmax.f32 %v1495_v29, 0.0  ;;  %v7266_v33 = vor.u32 %v9342_v47, %v7265_v40 }
 0x1ca   :  { %v1483_v0 = vadd.f32 %v1482_v46, %v11054_v49  ;;  %v1646_v2 = vmax.f32 %v1514_v34, 0.0  ;;  %v7270_v46 = vor.u32 %v9334_v23, %v7267_v24 }
 0x1cc   :  { %v1692_v54 = vmax.f32 %v1483_v0, 0.0  ;;  %v1705_v63 = vpack.c.bf16 %v1646_v2, %v1645_v62 }
 0x1cd   :  { %v9357_v6 = vld [vmem:[#allocation2 + $0xcc] sm:$0xf0]  ;;  %v7323_v26 = vld [vmem:[#allocation2 + $0xd0] sm:$0xf0] }
 0x1ce   :  { %v1728_v4 = vpack.c.bf16 %v1692_v54, %v1691_v48  ;;  %1737 = vst [vmem:[#allocation2 + $0x20] sm:$0xff] %v1705_v63  ;;  %v1532_v61 = vpop.f32.mrf.mxu2  ;;  %v1496_v51 = vpop.f32.mrf.mxu0  ;;  %v7322_v25 = vor.u32 %v9357_v6, %v7321_v3  ;;  %v7326_v52 = vor.u32 %v9349_v10, %v7323_v26 }
 0x1cf   :  { %v1533_v56 = vadd.f32 %v1532_v61, %v11060_v55  ;;  %v1497_v50 = vadd.f32 %v1496_v51, %v11052_v35  ;;  %v1515_v30 = vpop.f32.mrf.mxu1  ;;  %v7329_v5 = vld [vmem:[#allocation2 + $0x98] sm:$0xf]  ;;  %v9350_v31 = vld [vmem:[#allocation2 + $0x9c] sm:$0xf] }
 0x1d0   :  { %1760 = vst [vmem:[#allocation2 + $0xd8] sm:$0xff] %v1728_v4  ;;  %v1516_v15 = vadd.f32 %v1515_v30, %v11052_v35  ;;  %2084 = vmatpush.bf16.msrb.mxu0 %v7322_v25  ;;  %2103 = vmatpush.bf16.msrb.mxu1 %v7326_v52 }
 0x1d1   :  { %v1551_v8 = vpop.f32.mrf.mxu3  ;;  %7372 = vmatmul.msk.bf16.gmra.mxu2 %vm1995_vm0, %v11109_v27  ;;  %7374 = vmatmul.msk.bf16.gmra.mxu3 %vm1995_vm0, %v11109_v27  ;;  %v1647_v20 = vmax.f32 %v1533_v56, 0.0  ;;  %v1661_v22 = vmax.f32 %v1497_v50, 0.0 }
 0x1d2   :  { %v1552_v1 = vadd.f32 %v1551_v8, %v11060_v55  ;;  %v1662_v21 = vmax.f32 %v1516_v15, 0.0 }
 0x1d4   :  { %v1648_v53 = vmax.f32 %v1552_v1, 0.0  ;;  %v1713_v13 = vpack.c.bf16 %v1662_v21, %v1661_v22  ;;  %2085 = vmatpush.bf16.msrb.mxu0 %v7258_v28  ;;  %2104 = vmatpush.bf16.msrb.mxu1 %v7262_v7 }
 0x1d6   :  { %v1706_v59 = vpack.c.bf16 %v1648_v53, %v1647_v20  ;;  %1745 = vst [vmem:[#allocation2 + $0x60] sm:$0xff] %v1713_v13  ;;  %v1534_v14 = vpop.f32.mrf.mxu2  ;;  %v1499_v32 = vpop.f32.mrf.mxu0 }
 0x1d7   :  { %v9358_v9 = vld [vmem:[#allocation2 + $0xd4] sm:$0xf0]  ;;  %v7331_v19 = vld [vmem:[#allocation2 + $0xd8] sm:$0xf0]  ;;  %v1535_v58 = vadd.f32 %v1534_v14, %v11052_v35  ;;  %v1500_v39 = vadd.f32 %v1499_v32, %v11064_v45  ;;  %v1518_v60 = vpop.f32.mrf.mxu1  ;;  %7375 = vmatmul.msk.bf16.vlgmr.msrb.gmra.mxu0 %vm1995_vm0, %v11085_v57  ;;  %7377 = vmatmul.msk.bf16.vlgmr.msrb.gmra.mxu1 %vm1995_vm0, %v11085_v57 }
 0x1d8   :  { %1738 = vst [vmem:[#allocation2 + $0x28] sm:$0xff] %v1706_v59  ;;  %v7330_v37 = vor.u32 %v9358_v9, %v7329_v5  ;;  %v7334_v38 = vor.u32 %v9350_v31, %v7331_v19  ;;  %v1519_v41 = vadd.f32 %v1518_v60, %v11064_v45 }
 0x1d9   :  { %v1553_v36 = vpop.f32.mrf.mxu3  ;;  %v1663_v43 = vmax.f32 %v1535_v58, 0.0  ;;  %v1677_v11 = vmax.f32 %v1500_v39, 0.0 }
 0x1da   :  { %v1554_v44 = vadd.f32 %v1553_v36, %v11052_v35  ;;  %2122 = vmatpush.bf16.msrb.mxu2 %v7330_v37  ;;  %2141 = vmatpush.bf16.msrb.mxu3 %v7334_v38  ;;  %v1678_v17 = vmax.f32 %v1519_v41, 0.0 }
 0x1dc   :  { %v1664_v29 = vmax.f32 %v1554_v44, 0.0  ;;  %v1721_v34 = vpack.c.bf16 %v1678_v17, %v1677_v11  ;;  %v9335_v44 = vld [vmem:[#allocation2 + $0x24] sm:$0xf] }
 0x1dd   :  { %v9343_v39 = vld [vmem:[#allocation2 + $0x5c] sm:$0xf0]  ;;  %v7275_v60 = vld [vmem:[#allocation2 + $0x60] sm:$0xf0] }
 0x1de   :  { %v1714_v48 = vpack.c.bf16 %v1664_v29, %v1663_v43  ;;  %2123 = vmatpush.bf16.msrb.mxu2 %v7266_v33  ;;  %2142 = vmatpush.bf16.msrb.mxu3 %v7270_v46  ;;  %1753 = vst [vmem:[#allocation2 + $0xa0] sm:$0xff] %v1721_v34  ;;  %v1537_v0 = vpop.f32.mrf.mxu2  ;;  %v1501_v62 = vpop.f32.mrf.mxu0  ;;  %v7273_v43 = vld [vmem:[#allocation2 + $0x20] sm:$0xf]  ;;  %v7278_v40 = vor.u32 %v9335_v44, %v7275_v60 }
 0x1df   :  { %v1538_v2 = vadd.f32 %v1537_v0, %v11064_v45  ;;  %v1502_v54 = vadd.f32 %v1501_v62, %v11054_v49  ;;  %v1520_v63 = vpop.f32.mrf.mxu1  ;;  %v7274_v17 = vor.u32 %v9343_v39, %v7273_v43 }
 0x1e0   :  { %1746 = vst [vmem:[#allocation2 + $0x68] sm:$0xff] %v1714_v48  ;;  %v1521_v4 = vadd.f32 %v1520_v63, %v11054_v49 }
 0x1e1   :  { %v1556_v3 = vpop.f32.mrf.mxu3  ;;  %7379 = vmatmul.msk.bf16.vlgmr.msrb.gmra.mxu2 %vm1995_vm0, %v11085_v57  ;;  %7381 = vmatmul.msk.bf16.vlgmr.msrb.gmra.mxu3 %vm1995_vm0, %v11085_v57  ;;  %v1679_v6 = vmax.f32 %v1538_v2, 0.0  ;;  %v1693_v26 = vmax.f32 %v1502_v54, 0.0 }
 0x1e2   :  { %v1557_v10 = vadd.f32 %v1556_v3, %v11064_v45  ;;  %v1694_v61 = vmax.f32 %v1521_v4, 0.0 }
 0x1e4   :  { %v1680_v51 = vmax.f32 %v1557_v10, 0.0  ;;  %v1729_v25 = vpack.c.bf16 %v1694_v61, %v1693_v26 }
 0x1e5   :  { %v7337_v53 = vld [vmem:[#allocation2 + $0xa0] sm:$0xf]  ;;  %v9351_v13 = vld [vmem:[#allocation2 + $0xa4] sm:$0xf] }
 0x1e6   :  { %v1722_v52 = vpack.c.bf16 %v1680_v51, %v1679_v6  ;;  %1761 = vst [vmem:[#allocation2 + $0xe0] sm:$0xff] %v1729_v25  ;;  %v1539_v56 = vpop.f32.mrf.mxu2  ;;  %v1570_v50 = vpop.f32.mrf.mxu0 }
 0x1e7   :  { %v1540_v30 = vadd.f32 %v1539_v56, %v11054_v49  ;;  %v1571_v8 = vadd.f32 %v1570_v50, %v11060_v55  ;;  %v1589_v15 = vpop.f32.mrf.mxu1  ;;  %7376 = vmatmul.msk.bf16.gmra.mxu0 %vm1995_vm0, %v11109_v27  ;;  %7378 = vmatmul.msk.bf16.gmra.mxu1 %vm1995_vm0, %v11109_v27  ;;  %v9344_v10 = vld [vmem:[#allocation2 + $0x64] sm:$0xf0]  ;;  %v7283_v26 = vld [vmem:[#allocation2 + $0x68] sm:$0xf0] }
 0x1e8   :  { %1754 = vst [vmem:[#allocation2 + $0xa8] sm:$0xff] %v1722_v52  ;;  %v1590_v18 = vadd.f32 %v1589_v15, %v11060_v55  ;;  %v7281_v56 = vld [vmem:[#allocation2 + $0x28] sm:$0xf]  ;;  %v9336_v50 = vld [vmem:[#allocation2 + $0x2c] sm:$0xf] }
 0x1e9   :  { %v1558_v16 = vpop.f32.mrf.mxu3  ;;  %v1695_v20 = vmax.f32 %v1540_v30, 0.0  ;;  %v1649_v22 = vmax.f32 %v1571_v8, 0.0  ;;  %v7282_v8 = vor.u32 %v9344_v10, %v7281_v56  ;;  %v7286_v15 = vor.u32 %v9336_v50, %v7283_v26 }
 0x1ea   :  { %v1559_v1 = vadd.f32 %v1558_v16, %v11054_v49  ;;  %v1650_v21 = vmax.f32 %v1590_v18, 0.0 }
 0x1ec   :  { %v1696_v42 = vmax.f32 %v1559_v1, 0.0  ;;  %v1707_v12 = vpack.c.bf16 %v1650_v21, %v1649_v22 }
 0x1ed   :  { %v9359_v7 = vld [vmem:[#allocation2 + $0xdc] sm:$0xf0]  ;;  %v7339_v59 = vld [vmem:[#allocation2 + $0xe0] sm:$0xf0] }
 0x1ee   :  { %v1730_v28 = vpack.c.bf16 %v1696_v42, %v1695_v20  ;;  %1739 = vst [vmem:[#allocation2 + $0x30] sm:$0xff] %v1707_v12  ;;  %v1608_v5 = vpop.f32.mrf.mxu2  ;;  %v1572_v31 = vpop.f32.mrf.mxu0  ;;  %v7338_v14 = vor.u32 %v9359_v7, %v7337_v53  ;;  %v7342_v9 = vor.u32 %v9351_v13, %v7339_v59 }
 0x1ef   :  { %v1609_v19 = vadd.f32 %v1608_v5, %v11060_v55  ;;  %v1573_v32 = vadd.f32 %v1572_v31, %v11052_v35  ;;  %v1591_v58 = vpop.f32.mrf.mxu1  ;;  %v7345_v33 = vld [vmem:[#allocation2 + $0xa8] sm:$0xf]  ;;  %v9352_v46 = vld [vmem:[#allocation2 + $0xac] sm:$0xf] }
 0x1f0   :  { %1762 = vst [vmem:[#allocation2 + $0xe8] sm:$0xff] %v1730_v28  ;;  %v1592_v38 = vadd.f32 %v1591_v58, %v11052_v35  ;;  %2160 = vmatpush.bf16.msra.mxu0 %v7338_v14  ;;  %2179 = vmatpush.bf16.msra.mxu1 %v7342_v9 }
 0x1f1   :  { %v1627_v37 = vpop.f32.mrf.mxu3  ;;  %7380 = vmatmul.msk.bf16.gmra.mxu2 %vm1995_vm0, %v11109_v27  ;;  %7382 = vmatmul.msk.bf16.gmra.mxu3 %vm1995_vm0, %v11109_v27  ;;  %v1651_v36 = vmax.f32 %v1609_v19, 0.0  ;;  %v1665_v47 = vmax.f32 %v1573_v32, 0.0 }
 0x1f2   :  { %v1628_v41 = vadd.f32 %v1627_v37, %v11060_v55  ;;  %v1666_v24 = vmax.f32 %v1592_v38, 0.0 }
 0x1f4   :  { %v1652_v11 = vmax.f32 %v1628_v41, 0.0  ;;  %v1715_v23 = vpack.c.bf16 %v1666_v24, %v1665_v47  ;;  %2161 = vmatpush.bf16.msra.mxu0 %v7274_v17  ;;  %2180 = vmatpush.bf16.msra.mxu1 %v7278_v40 }
 0x1f5   :  { %v9337_v44 = vld [vmem:[#allocation2 + $0x34] sm:$0xf] }
 0x1f6   :  { %v1708_v29 = vpack.c.bf16 %v1652_v11, %v1651_v36  ;;  %1747 = vst [vmem:[#allocation2 + $0x70] sm:$0xff] %v1715_v23  ;;  %v1610_v34 = vpop.f32.mrf.mxu2  ;;  %v1575_v55 = vpop.f32.mrf.mxu0 }
 0x1f7   :  { %v9360_v48 = vld [vmem:[#allocation2 + $0xe4] sm:$0xf0]  ;;  %v7347_v0 = vld [vmem:[#allocation2 + $0xe8] sm:$0xf0]  ;;  %v1611_v62 = vadd.f32 %v1610_v34, %v11052_v35  ;;  %v1576_v63 = vadd.f32 %v1575_v55, %v11064_v45  ;;  %v1594_v3 = vpop.f32.mrf.mxu1  ;;  %7383 = vmatmul.msk.bf16.vlgmr.msra.gmra.mxu0 %vm1995_vm0, %v11085_v57  ;;  %7385 = vmatmul.msk.bf16.vlgmr.msra.gmra.mxu1 %vm1995_vm0, %v11085_v57 }
 0x1f8   :  { %1740 = vst [vmem:[#allocation2 + $0x38] sm:$0xff] %v1708_v29  ;;  %v7346_v2 = vor.u32 %v9360_v48, %v7345_v33  ;;  %v7350_v54 = vor.u32 %v9352_v46, %v7347_v0  ;;  %v1595_v6 = vadd.f32 %v1594_v3, %v11064_v45 }
 0x1f9   :  { %v1629_v4 = vpop.f32.mrf.mxu3  ;;  %v1667_v61 = vmax.f32 %v1611_v62, 0.0  ;;  %v1681_v25 = vmax.f32 %v1576_v63, 0.0 }
 0x1fa   :  { %v1630_v51 = vadd.f32 %v1629_v4, %v11052_v35  ;;  %2198 = vmatpush.bf16.msra.mxu2 %v7346_v2  ;;  %2217 = vmatpush.bf16.msra.mxu3 %v7350_v54  ;;  %v1682_v52 = vmax.f32 %v1595_v6, 0.0 }
 0x1fc   :  { %v1668_v30 = vmax.f32 %v1630_v51, 0.0  ;;  %v1723_v16 = vpack.c.bf16 %v1682_v52, %v1681_v25 }
 0x1fd   :  { %v9345_v24 = vld [vmem:[#allocation2 + $0x6c] sm:$0xf0]  ;;  %v7291_v43 = vld [vmem:[#allocation2 + $0x70] sm:$0xf0] }
 0x1fe   :  { %v1716_v18 = vpack.c.bf16 %v1668_v30, %v1667_v61  ;;  %2199 = vmatpush.bf16.msra.mxu2 %v7282_v8  ;;  %2218 = vmatpush.bf16.msra.mxu3 %v7286_v15  ;;  %1755 = vst [vmem:[#allocation2 + $0xb0] sm:$0xff] %v1723_v16  ;;  %v1613_v20 = vpop.f32.mrf.mxu2  ;;  %v1577_v1 = vpop.f32.mrf.mxu0  ;;  %v7294_v17 = vor.u32 %v9337_v44, %v7291_v43 }
 0x1ff   :  { %v1614_v22 = vadd.f32 %v1613_v20, %v11064_v45  ;;  %v1578_v35 = vadd.f32 %v1577_v1, %v11054_v49  ;;  %v1596_v21 = vpop.f32.mrf.mxu1  ;;  %v7297_v55 = vld [vmem:[#allocation2 + $0x38] sm:$0xf]  ;;  %v9338_v62 = vld [vmem:[#allocation2 + $0x3c] sm:$0xf] }
 0x200   :  { %1748 = vst [vmem:[#allocation2 + $0x78] sm:$0xff] %v1716_v18  ;;  %v1597_v12 = vadd.f32 %v1596_v21, %v11054_v49 }
 0x201   :  { %v1632_v42 = vpop.f32.mrf.mxu3  ;;  %7387 = vmatmul.msk.bf16.vlgmr.msra.gmra.mxu2 %vm1995_vm0, %v11085_v57  ;;  %7389 = vmatmul.msk.bf16.vlgmr.msra.gmra.mxu3 %vm1995_vm0, %v11085_v57  ;;  %v1683_v53 = vmax.f32 %v1614_v22, 0.0  ;;  %v1697_v7 = vmax.f32 %v1578_v35, 0.0 }
 0x202   :  { %v1633_v28 = vadd.f32 %v1632_v42, %v11064_v45  ;;  %v1698_v13 = vmax.f32 %v1597_v12, 0.0 }
 0x204   :  { %v1684_v59 = vmax.f32 %v1633_v28, 0.0  ;;  %v1731_v5 = vpack.c.bf16 %v1698_v13, %v1697_v7 }
 0x205   :  { %v7353_v37 = vld [vmem:[#allocation2 + $0xb0] sm:$0xf]  ;;  %v9353_v60 = vld [vmem:[#allocation2 + $0xb4] sm:$0xf] }
 0x206   :  { %v1724_v31 = vpack.c.bf16 %v1684_v59, %v1683_v53  ;;  %1763 = vst [vmem:[#allocation2 + $0xf0] sm:$0xff] %v1731_v5  ;;  %v1615_v14 = vpop.f32.mrf.mxu2 }
 0x207   :  { %v1616_v9 = vadd.f32 %v1615_v14, %v11054_v49  ;;  %7384 = vmatmul.msk.bf16.gmra.mxu0 %vm1995_vm0, %v11109_v27  ;;  %7386 = vmatmul.msk.bf16.gmra.mxu1 %vm1995_vm0, %v11109_v27  ;;  %v9346_v48 = vld [vmem:[#allocation2 + $0x74] sm:$0xf0]  ;;  %v7299_v0 = vld [vmem:[#allocation2 + $0x78] sm:$0xf0] }
 0x208   :  { %1756 = vst [vmem:[#allocation2 + $0xb8] sm:$0xff] %v1724_v31  ;;  %v7298_v2 = vor.u32 %v9346_v48, %v7297_v55  ;;  %v7302_v54 = vor.u32 %v9338_v62, %v7299_v0  ;;  %v11202_v63 = vpop.permute.xlu2 %1817 }
 0x209   :  { %v1634_v19 = vpop.f32.mrf.mxu3  ;;  %v1699_v32 = vmax.f32 %v1616_v9, 0.0 }
 0x20a   :  { %v1635_v45 = vadd.f32 %v1634_v19, %v11054_v49  ;;  %v7289_v49 = vld [vmem:[#allocation2 + $0x30] sm:$0xf] }
 0x20b   :  { %v7290_v11 = vor.u32 %v9345_v24, %v7289_v49 }
 0x20c   :  { %v1700_v58 = vmax.f32 %v1635_v45, 0.0 }
 0x20d   :  { %v9361_v39 = vld [vmem:[#allocation2 + $0xec] sm:$0xf0]  ;;  %v7355_v36 = vld [vmem:[#allocation2 + $0xf0] sm:$0xf0] }
 0x20e   :  { %v1732_v38 = vpack.c.bf16 %v1700_v58, %v1699_v32  ;;  %v7354_v41 = vor.u32 %v9361_v39, %v7353_v37  ;;  %v7358_v47 = vor.u32 %v9353_v60, %v7355_v36 }
 0x20f   :  { %v7361_v40 = vld [vmem:[#allocation2 + $0xb8] sm:$0xf]  ;;  %v9354_v29 = vld [vmem:[#allocation2 + $0xbc] sm:$0xf] }
 0x210   :  { %1764 = vst [vmem:[#allocation2 + $0xf8] sm:$0xff] %v1732_v38  ;;  %2236 = vmatpush.bf16.msrb.mxu0 %v7354_v41  ;;  %2255 = vmatpush.bf16.msrb.mxu1 %v7358_v47 }
 0x211   :  { %7388 = vmatmul.msk.bf16.gmra.mxu2 %vm1995_vm0, %v11109_v27  ;;  %7390 = vmatmul.msk.bf16.gmra.mxu3 %vm1995_vm0, %v11109_v27  ;;  %v11204_v6 = vpop.permute.xlu2 %1807 }
 0x214   :  { %2237 = vmatpush.bf16.msrb.mxu0 %v7290_v11  ;;  %2256 = vmatpush.bf16.msrb.mxu1 %v7294_v17 }
 0x217   :  { %v9362_v23 = vld [vmem:[#allocation2 + $0xf4] sm:$0xf0]  ;;  %v7363_v33 = vld [vmem:[#allocation2 + $0xf8] sm:$0xf0]  ;;  %7391 = vmatmul.msk.bf16.vlgmr.msrb.gmra.mxu0 %vm1995_vm0, %v11085_v57  ;;  %7393 = vmatmul.msk.bf16.vlgmr.msrb.gmra.mxu1 %vm1995_vm0, %v11085_v57 }
 0x218   :  { %v7362_v46 = vor.u32 %v9362_v23, %v7361_v40  ;;  %v7366_v34 = vor.u32 %v9354_v29, %v7363_v33 }
 0x21a   :  { %2274 = vmatpush.bf16.msrb.mxu2 %v7362_v46  ;;  %2293 = vmatpush.bf16.msrb.mxu3 %v7366_v34 }
 0x21e   :  { %2275 = vmatpush.bf16.msrb.mxu2 %v7298_v2  ;;  %2294 = vmatpush.bf16.msrb.mxu3 %v7302_v54  ;;  %v11208_v51 = vpop.permute.xlu0 %1812  ;;  %v11216_v59 = vpop.permute.xlu1 %1822 }
 0x221   :  { %7395 = vmatmul.msk.bf16.vlgmr.msrb.gmra.mxu2 %vm1995_vm0, %v11085_v57  ;;  %7397 = vmatmul.msk.bf16.vlgmr.msrb.gmra.mxu3 %vm1995_vm0, %v11085_v57 }
 0x227   :  { %7392 = vmatmul.msk.bf16.gmra.mxu0 %vm1995_vm0, %v11109_v27  ;;  %7394 = vmatmul.msk.bf16.gmra.mxu1 %vm1995_vm0, %v11109_v27 }
 0x231   :  { %7396 = vmatmul.msk.bf16.gmra.mxu2 %vm1995_vm0, %v11109_v27  ;;  %7398 = vmatmul.msk.bf16.gmra.mxu3 %vm1995_vm0, %v11109_v27 }
 0x233   :  { %v2011_v3 = vpop.f32.mrf.mxu0  ;;  %v2030_v4 = vpop.f32.mrf.mxu1 }
 0x234   :  { %v2012_v26 = vadd.f32 %v2011_v3, %v11204_v6  ;;  %v2031_v61 = vadd.f32 %v2030_v4, %v11204_v6 }
 0x236   :  { %v2306_v25 = vmax.f32 %v2012_v26, 0.0  ;;  %v2307_v52 = vmax.f32 %v2031_v61, 0.0 }
 0x238   :  { %v2370_v50 = vpack.c.bf16 %v2307_v52, %v2306_v25 }
 0x23a   :  { %2402 = vst [vmem:[#allocation2 + $0x100] sm:$0xff] %v2370_v50 }
 0x23b   :  { %v2013_v10 = vpop.f32.mrf.mxu0  ;;  %v2032_v57 = vpop.f32.mrf.mxu1 }
 0x23c   :  { %v2014_v56 = vadd.f32 %v2013_v10, %v11208_v51  ;;  %v2033_v27 = vadd.f32 %v2032_v57, %v11208_v51 }
 0x23e   :  { %v2322_v15 = vmax.f32 %v2014_v56, 0.0  ;;  %v2323_v16 = vmax.f32 %v2033_v27, 0.0 }
 0x240   :  { %v2378_v35 = vpack.c.bf16 %v2323_v16, %v2322_v15 }
 0x241   :  { %v7537_v16 = vld [vmem:[#allocation2 + $0x100] sm:$0xf] }
 0x242   :  { %2410 = vst [vmem:[#allocation2 + $0x140] sm:$0xff] %v2378_v35 }
 0x243   :  { %v2016_v18 = vpop.f32.mrf.mxu0  ;;  %v2035_v20 = vpop.f32.mrf.mxu1 }
 0x244   :  { %v2049_v30 = vpop.f32.mrf.mxu2  ;;  %v2068_v8 = vpop.f32.mrf.mxu3  ;;  %v2017_v1 = vadd.f32 %v2016_v18, %v11202_v63  ;;  %v2036_v22 = vadd.f32 %v2035_v20, %v11202_v63  ;;  %v9397_v18 = vld [vmem:[#allocation2 + $0x104] sm:$0xf] }
 0x245   :  { %v2050_v21 = vadd.f32 %v2049_v30, %v11204_v6  ;;  %v2069_v42 = vadd.f32 %v2068_v8, %v11204_v6 }
 0x246   :  { %v2338_v12 = vmax.f32 %v2017_v1, 0.0  ;;  %v2339_v53 = vmax.f32 %v2036_v22, 0.0 }
 0x247   :  { %v2308_v28 = vmax.f32 %v2050_v21, 0.0  ;;  %v2309_v7 = vmax.f32 %v2069_v42, 0.0  ;;  %v9389_v42 = vld [vmem:[#allocation2 + $0xbc] sm:$0xf0] }
 0x248   :  { %v2386_v13 = vpack.c.bf16 %v2339_v53, %v2338_v12  ;;  %v7475_v12 = vld [vmem:[#allocation2 + $0xc0] sm:$0xf0] }
 0x249   :  { %v2371_v5 = vpack.c.bf16 %v2309_v7, %v2308_v28  ;;  %v9405_v25 = vld [vmem:[#allocation2 + $0x13c] sm:$0xf0]  ;;  %v7539_v52 = vld [vmem:[#allocation2 + $0x140] sm:$0xf0] }
 0x24a   :  { %2418 = vst [vmem:[#allocation2 + $0x180] sm:$0xff] %v2386_v13  ;;  %v7538_v20 = vor.u32 %v9405_v25, %v7537_v16  ;;  %v7542_v1 = vor.u32 %v9397_v18, %v7539_v52  ;;  %v7473_v28 = vld [vmem:[#allocation2 + $0x80] sm:$0xf]  ;;  %v9381_v7 = vld [vmem:[#allocation2 + $0x84] sm:$0xf] }
 0x24b   :  { %v2018_v32 = vpop.f32.mrf.mxu0  ;;  %v2037_v45 = vpop.f32.mrf.mxu1  ;;  %2403 = vst [vmem:[#allocation2 + $0x108] sm:$0xff] %v2371_v5  ;;  %v9390_v16 = vld [vmem:[#allocation2 + $0xc4] sm:$0xf0]  ;;  %v7483_v18 = vld [vmem:[#allocation2 + $0xc8] sm:$0xf0] }
 0x24c   :  { %v2051_v31 = vpop.f32.mrf.mxu2  ;;  %v2070_v14 = vpop.f32.mrf.mxu3  ;;  %v2019_v58 = vadd.f32 %v2018_v32, %v11216_v59  ;;  %v2038_v37 = vadd.f32 %v2037_v45, %v11216_v59  ;;  %v9373_v45 = vld [vmem:[#allocation2 + $0x3c] sm:$0xf0] }
 0x24d   :  { %v2052_v9 = vadd.f32 %v2051_v31, %v11208_v51  ;;  %v2071_v19 = vadd.f32 %v2070_v14, %v11208_v51  ;;  %v7474_v31 = vor.u32 %v9389_v42, %v7473_v28  ;;  %v7478_v14 = vor.u32 %v9381_v7, %v7475_v12  ;;  %v9374_v28 = vld [vmem:[#allocation2 + $0x44] sm:$0xf0]  ;;  %v7419_v7 = vld [vmem:[#allocation2 + $0x48] sm:$0xf0] }
 0x24e   :  { %v2354_v60 = vmax.f32 %v2019_v58, 0.0  ;;  %v2355_v36 = vmax.f32 %v2038_v37, 0.0  ;;  %v7411_v58 = vld [vmem:[#allocation2 + $0x40] sm:$0xf0]  ;;  %v2504_v37 = vld [vmem:[%s11845_s8 + $0x10] sm:$0xff] }
 0x24f   :  { %v2324_v38 = vmax.f32 %v2052_v9, 0.0  ;;  %v2325_v39 = vmax.f32 %v2071_v19, 0.0  ;;  %v10073_v9 = vmov 2  }
 0x250   :  { %v2394_v47 = vpack.c.bf16 %v2355_v36, %v2354_v60  ;;  %9960 = vset.pattern.permute.xlu1 %v10073_v9  ;;  %9961 = vset.pattern.permute.xlu2 %v10073_v9  ;;  %v7417_v9 = vld [vmem:[#allocation2 + $0x8] sm:$0xf] }
 0x251   :  { %v2379_v41 = vpack.c.bf16 %v2325_v39, %v2324_v38  ;;  %v7601_v0 = vld [vmem:[#allocation2 + $0x180] sm:$0xf]  ;;  %v9413_v55 = vld [vmem:[#allocation2 + $0x184] sm:$0xf]  ;;  %2518 = vperm.xlu1 %9960, %v2504_v37  }
 0x252   :  { %2426 = vst [vmem:[#allocation2 + $0x1c0] sm:$0xff] %v2394_v47 }
 0x253   :  { %2411 = vst [vmem:[#allocation2 + $0x148] sm:$0xff] %v2379_v41 }
 0x254   :  { %v2054_v24 = vpop.f32.mrf.mxu2  ;;  %v2073_v43 = vpop.f32.mrf.mxu3 }
 0x255   :  { %v2055_v49 = vadd.f32 %v2054_v24, %v11202_v63  ;;  %v2074_v44 = vadd.f32 %v2073_v43, %v11202_v63  ;;  %v2087_v11 = vpop.f32.mrf.mxu0  ;;  %v2106_v17 = vpop.f32.mrf.mxu1  ;;  %v7409_v24 = vld [vmem:[#allocation2] sm:$0xf]  ;;  %v9365_v43 = vld [vmem:[#allocation2 + $0x4] sm:$0xf] }
 0x256   :  { %v2088_v29 = vadd.f32 %v2087_v11, %v11204_v6  ;;  %v2107_v33 = vadd.f32 %v2106_v17, %v11204_v6 }
 0x257   :  { %v2340_v40 = vmax.f32 %v2055_v49, 0.0  ;;  %v2341_v23 = vmax.f32 %v2074_v44, 0.0  ;;  %v7410_v49 = vor.u32 %v9373_v45, %v7409_v24  ;;  %v7414_v44 = vor.u32 %v9365_v43, %v7411_v58  ;;  %v11260_v43 = vld [vmem:[%s11850_s4 + $0x8] sm:$0xff] }
 0x258   :  { %v2310_v34 = vmax.f32 %v2088_v29, 0.0  ;;  %v2311_v48 = vmax.f32 %v2107_v33, 0.0  ;;  %v11240_v29 = vld [vmem:[%s11850_s4] sm:$0xff]  ;;  %v7418_v58 = vor.u32 %v9374_v28, %v7417_v9  ;;  %v2503_v28 = vld [vmem:[%s11845_s8 + $0x8] sm:$0xff] }
 0x259   :  { %v2387_v46 = vpack.c.bf16 %v2341_v23, %v2340_v40  ;;  %v9421_v2 = vld [vmem:[#allocation2 + $0x1bc] sm:$0xf0]  ;;  %v7603_v54 = vld [vmem:[#allocation2 + $0x1c0] sm:$0xf0] }
 0x25a   :  { %v2372_v62 = vpack.c.bf16 %v2311_v48, %v2310_v34  ;;  %v7602_v10 = vor.u32 %v9421_v2, %v7601_v0  ;;  %v7606_v57 = vor.u32 %v9413_v55, %v7603_v54  ;;  %v7547_v2 = vld [vmem:[#allocation2 + $0x148] sm:$0xf0] }
 0x25b   :  { %2419 = vst [vmem:[#allocation2 + $0x188] sm:$0xff] %v2387_v46 }
 0x25c   :  { %v2056_v3 = vpop.f32.mrf.mxu2  ;;  %v2075_v4 = vpop.f32.mrf.mxu3  ;;  %2404 = vst [vmem:[#allocation2 + $0x110] sm:$0xff] %v2372_v62  ;;  %2867 = vmatpush.bf16.msra.mxu0 %v7602_v10  ;;  %2886 = vmatpush.bf16.msra.mxu1 %v7606_v57  ;;  %v9406_v62 = vld [vmem:[#allocation2 + $0x144] sm:$0xf0] }
 0x25d   :  { %v2057_v26 = vadd.f32 %v2056_v3, %v11216_v59  ;;  %v2076_v61 = vadd.f32 %v2075_v4, %v11216_v59  ;;  %v2089_v56 = vpop.f32.mrf.mxu0  ;;  %v2108_v27 = vpop.f32.mrf.mxu1  ;;  %v7545_v57 = vld [vmem:[#allocation2 + $0x108] sm:$0xf] }
 0x25e   :  { %v2090_v8 = vadd.f32 %v2089_v56, %v11208_v51  ;;  %v2109_v15 = vadd.f32 %v2108_v27, %v11208_v51  ;;  %v7546_v56 = vor.u32 %v9406_v62, %v7545_v57  ;;  %v11271_v62 = vld [vmem:[%s11845_s8 + $0x18] sm:$0xff] }
 0x25f   :  { %v2356_v50 = vmax.f32 %v2057_v26, 0.0  ;;  %v2357_v30 = vmax.f32 %v2076_v61, 0.0  ;;  %v9398_v26 = vld [vmem:[#allocation2 + $0x10c] sm:$0xf]  ;;  %v2502_v61 = vld [vmem:[%s11845_s8] sm:$0xff]  ;;  %2523 = vperm.xlu2 %9961, %v11271_v62  }
 0x260   :  { %v2326_v35 = vmax.f32 %v2090_v8, 0.0  ;;  %v2327_v21 = vmax.f32 %v2109_v15, 0.0  ;;  %2868 = vmatpush.bf16.msra.mxu0 %v7538_v20  ;;  %2887 = vmatpush.bf16.msra.mxu1 %v7542_v1  ;;  %v7550_v27 = vor.u32 %v9398_v26, %v7547_v2 }
 0x261   :  { %v2395_v22 = vpack.c.bf16 %v2357_v30, %v2356_v50  ;;  %2508 = vperm.xlu1 %9960, %v2502_v61  }
 0x262   :  { %v2380_v53 = vpack.c.bf16 %v2327_v21, %v2326_v35  ;;  %v7609_v23 = vld [vmem:[#allocation2 + $0x188] sm:$0xf]  ;;  %v9414_v46 = vld [vmem:[#allocation2 + $0x18c] sm:$0xf] }
 0x263   :  { %2427 = vst [vmem:[#allocation2 + $0x1c8] sm:$0xff] %v2395_v22  ;;  %v7481_v35 = vld [vmem:[#allocation2 + $0x88] sm:$0xf]  ;;  %v9382_v21 = vld [vmem:[#allocation2 + $0x8c] sm:$0xf] }
 0x264   :  { %v2125_v13 = vpop.f32.mrf.mxu2  ;;  %v2144_v5 = vpop.f32.mrf.mxu3  ;;  %2412 = vst [vmem:[#allocation2 + $0x150] sm:$0xff] %v2380_v53  ;;  %2869 = vmatpush.bf16.msra.mxu0 %v7474_v31  ;;  %2888 = vmatpush.bf16.msra.mxu1 %v7478_v14  ;;  %v7482_v12 = vor.u32 %v9390_v16, %v7481_v35  ;;  %v7486_v53 = vor.u32 %v9382_v21, %v7483_v18  ;;  %v7553_v61 = vld [vmem:[#allocation2 + $0x110] sm:$0xf] }
 0x265   :  { %v2126_v19 = vadd.f32 %v2125_v13, %v11204_v6  ;;  %v2145_v32 = vadd.f32 %v2144_v5, %v11204_v6  ;;  %v2092_v38 = vpop.f32.mrf.mxu0  ;;  %v2111_v39 = vpop.f32.mrf.mxu1 }
 0x266   :  { %v2093_v41 = vadd.f32 %v2092_v38, %v11202_v63  ;;  %v2112_v47 = vadd.f32 %v2111_v39, %v11202_v63 }
 0x267   :  { %v2312_v60 = vmax.f32 %v2126_v19, 0.0  ;;  %v2313_v36 = vmax.f32 %v2145_v32, 0.0  ;;  %v9366_v19 = vld [vmem:[#allocation2 + $0xc] sm:$0xf]  ;;  %2513 = vperm.xlu2 %9961, %v2503_v28  }
 0x268   :  { %v2342_v17 = vmax.f32 %v2093_v41, 0.0  ;;  %v2343_v40 = vmax.f32 %v2112_v47, 0.0  ;;  %2870 = vmatpush.bf16.msra.mxu0 %v7410_v49  ;;  %2889 = vmatpush.bf16.msra.mxu1 %v7414_v44  ;;  %v7422_v37 = vor.u32 %v9366_v19, %v7419_v7 }
 0x269   :  { %v2373_v11 = vpack.c.bf16 %v2313_v36, %v2312_v60 }
 0x26a   :  { %v9422_v33 = vld [vmem:[#allocation2 + $0x1c4] sm:$0xf0]  ;;  %v7611_v34 = vld [vmem:[#allocation2 + $0x1c8] sm:$0xf0]  ;;  %v2388_v48 = vpack.c.bf16 %v2343_v40, %v2342_v17 }
 0x26b   :  { %2405 = vst [vmem:[#allocation2 + $0x118] sm:$0xff] %v2373_v11  ;;  %v7610_v0 = vor.u32 %v9422_v33, %v7609_v23  ;;  %v7614_v55 = vor.u32 %v9414_v46, %v7611_v34  ;;  %7663 = vmatmul.msk.bf16.vlgmr.msra.gmra.mxu0 %vm2856_vm5, %v11240_v29  ;;  %7665 = vmatmul.msk.bf16.vlgmr.msra.gmra.mxu1 %vm2856_vm5, %v11240_v29 }
 0x26c   :  { %v2127_v54 = vpop.f32.mrf.mxu2  ;;  %v2146_v3 = vpop.f32.mrf.mxu3  ;;  %2420 = vst [vmem:[#allocation2 + $0x190] sm:$0xff] %v2388_v48 }
 0x26d   :  { %v2128_v4 = vadd.f32 %v2127_v54, %v11208_v51  ;;  %v2147_v10 = vadd.f32 %v2146_v3, %v11208_v51  ;;  %2905 = vmatpush.bf16.msra.mxu2 %v7610_v0  ;;  %2924 = vmatpush.bf16.msra.mxu3 %v7614_v55  ;;  %v2094_v25 = vpop.f32.mrf.mxu0  ;;  %v2113_v52 = vpop.f32.mrf.mxu1  ;;  %v9407_v55 = vld [vmem:[#allocation2 + $0x14c] sm:$0xf0]  ;;  %v7555_v3 = vld [vmem:[#allocation2 + $0x150] sm:$0xf0] }
 0x26e   :  { %v2095_v8 = vadd.f32 %v2094_v25, %v11216_v59  ;;  %v2114_v15 = vadd.f32 %v2113_v52, %v11216_v59  ;;  %v7554_v25 = vor.u32 %v9407_v55, %v7553_v61  ;;  %v9399_v52 = vld [vmem:[#allocation2 + $0x114] sm:$0xf]  ;;  %v9392_v61 = vld [vmem:[#allocation2 + $0xd4] sm:$0xf0] }
 0x26f   :  { %v2328_v50 = vmax.f32 %v2128_v4, 0.0  ;;  %v2329_v30 = vmax.f32 %v2147_v10, 0.0 }
 0x270   :  { %v2358_v1 = vmax.f32 %v2095_v8, 0.0  ;;  %v2359_v22 = vmax.f32 %v2114_v15, 0.0  ;;  %v9391_v8 = vld [vmem:[#allocation2 + $0xcc] sm:$0xf0]  ;;  %v7491_v15 = vld [vmem:[#allocation2 + $0xd0] sm:$0xf0] }
 0x271   :  { %v2381_v20 = vpack.c.bf16 %v2329_v30, %v2328_v50  ;;  %2906 = vmatpush.bf16.msra.mxu2 %v7546_v56  ;;  %2925 = vmatpush.bf16.msra.mxu3 %v7550_v27  ;;  %v7558_v30 = vor.u32 %v9399_v52, %v7555_v3 }
 0x272   :  { %v2396_v42 = vpack.c.bf16 %v2359_v22, %v2358_v1  ;;  %v7489_v1 = vld [vmem:[#allocation2 + $0x90] sm:$0xf]  ;;  %v9383_v22 = vld [vmem:[#allocation2 + $0x94] sm:$0xf] }
 0x273   :  { %2413 = vst [vmem:[#allocation2 + $0x158] sm:$0xff] %v2381_v20  ;;  %v7617_v44 = vld [vmem:[#allocation2 + $0x190] sm:$0xf]  ;;  %v9415_v23 = vld [vmem:[#allocation2 + $0x194] sm:$0xf] }
 0x274   :  { %v2130_v13 = vpop.f32.mrf.mxu2  ;;  %v2149_v5 = vpop.f32.mrf.mxu3  ;;  %2428 = vst [vmem:[#allocation2 + $0x1d0] sm:$0xff] %v2396_v42  ;;  %v7490_v42 = vor.u32 %v9391_v8, %v7489_v1 }
 0x275   :  { %v2131_v31 = vadd.f32 %v2130_v13, %v11202_v63  ;;  %v2150_v14 = vadd.f32 %v2149_v5, %v11202_v63  ;;  %2907 = vmatpush.bf16.msra.mxu2 %v7482_v12  ;;  %2926 = vmatpush.bf16.msra.mxu3 %v7486_v53  ;;  %v2163_v32 = vpop.f32.mrf.mxu0  ;;  %v2182_v45 = vpop.f32.mrf.mxu1  ;;  %v7494_v12 = vor.u32 %v9383_v22, %v7491_v15  ;;  %v9375_v53 = vld [vmem:[#allocation2 + $0x4c] sm:$0xf0]  ;;  %v7427_v5 = vld [vmem:[#allocation2 + $0x50] sm:$0xf0] }
 0x276   :  { %v2164_v60 = vadd.f32 %v2163_v32, %v11204_v6  ;;  %v2183_v36 = vadd.f32 %v2182_v45, %v11204_v6  ;;  %v7425_v32 = vld [vmem:[#allocation2 + $0x10] sm:$0xf] }
 0x277   :  { %v2344_v38 = vmax.f32 %v2131_v31, 0.0  ;;  %v2345_v39 = vmax.f32 %v2150_v14, 0.0  ;;  %v7426_v45 = vor.u32 %v9375_v53, %v7425_v32 }
 0x278   :  { %v2314_v47 = vmax.f32 %v2164_v60, 0.0  ;;  %v2315_v24 = vmax.f32 %v2183_v36, 0.0 }
 0x279   :  { %v2389_v41 = vpack.c.bf16 %v2345_v39, %v2344_v38  ;;  %2908 = vmatpush.bf16.msra.mxu2 %v7418_v58  ;;  %2927 = vmatpush.bf16.msra.mxu3 %v7422_v37  ;;  %v9367_v58 = vld [vmem:[#allocation2 + $0x14] sm:$0xf] }
 0x27a   :  { %v2374_v49 = vpack.c.bf16 %v2315_v24, %v2314_v47  ;;  %v7430_v60 = vor.u32 %v9367_v58, %v7427_v5 }
 0x27b   :  { %2421 = vst [vmem:[#allocation2 + $0x198] sm:$0xff] %v2389_v41  ;;  %v9423_v40 = vld [vmem:[#allocation2 + $0x1cc] sm:$0xf0]  ;;  %v7619_v33 = vld [vmem:[#allocation2 + $0x1d0] sm:$0xf0]  ;;  %7664 = vmatmul.msk.bf16.gmra.mxu0 %vm2856_vm5, %v11260_v43  ;;  %7666 = vmatmul.msk.bf16.gmra.mxu1 %vm2856_vm5, %v11260_v43 }
 0x27c   :  { %v2132_v11 = vpop.f32.mrf.mxu2  ;;  %v2151_v17 = vpop.f32.mrf.mxu3  ;;  %7667 = vmatmul.msk.bf16.vlgmr.msra.gmra.mxu2 %vm2856_vm5, %v11240_v29  ;;  %7669 = vmatmul.msk.bf16.vlgmr.msra.gmra.mxu3 %vm2856_vm5, %v11240_v29  ;;  %2406 = vst [vmem:[#allocation2 + $0x120] sm:$0xff] %v2374_v49  ;;  %v7618_v48 = vor.u32 %v9423_v40, %v7617_v44  ;;  %v7622_v0 = vor.u32 %v9415_v23, %v7619_v33  ;;  %v7563_v40 = vld [vmem:[#allocation2 + $0x158] sm:$0xf0] }
 0x27d   :  { %v2133_v46 = vadd.f32 %v2132_v11, %v11216_v59  ;;  %v2152_v34 = vadd.f32 %v2151_v17, %v11216_v59  ;;  %v2165_v2 = vpop.f32.mrf.mxu0  ;;  %v2184_v54 = vpop.f32.mrf.mxu1  ;;  %v9408_v17 = vld [vmem:[#allocation2 + $0x154] sm:$0xf0] }
 0x27e   :  { %v2166_v57 = vadd.f32 %v2165_v2, %v11208_v51  ;;  %v2185_v26 = vadd.f32 %v2184_v54, %v11208_v51  ;;  %2943 = vmatpush.bf16.msrb.mxu0 %v7618_v48  ;;  %2962 = vmatpush.bf16.msrb.mxu1 %v7622_v0  ;;  %v7561_v48 = vld [vmem:[#allocation2 + $0x118] sm:$0xf]  ;;  %v9400_v0 = vld [vmem:[#allocation2 + $0x11c] sm:$0xf] }
 0x27f   :  { %v2360_v4 = vmax.f32 %v2133_v46, 0.0  ;;  %v2361_v10 = vmax.f32 %v2152_v34, 0.0  ;;  %v7562_v54 = vor.u32 %v9408_v17, %v7561_v48  ;;  %v7566_v3 = vor.u32 %v9400_v0, %v7563_v40 }
 0x280   :  { %v2330_v27 = vmax.f32 %v2166_v57, 0.0  ;;  %v2331_v50 = vmax.f32 %v2185_v26, 0.0 }
 0x281   :  { %v2397_v56 = vpack.c.bf16 %v2361_v10, %v2360_v4 }
 0x282   :  { %v2382_v16 = vpack.c.bf16 %v2331_v50, %v2330_v27  ;;  %2944 = vmatpush.bf16.msrb.mxu0 %v7554_v25  ;;  %2963 = vmatpush.bf16.msrb.mxu1 %v7558_v30  ;;  %v7625_v36 = vld [vmem:[#allocation2 + $0x198] sm:$0xf]  ;;  %v9416_v47 = vld [vmem:[#allocation2 + $0x19c] sm:$0xf] }
 0x283   :  { %2429 = vst [vmem:[#allocation2 + $0x1d8] sm:$0xff] %v2397_v56  ;;  %v7499_v25 = vld [vmem:[#allocation2 + $0xd8] sm:$0xf0]  ;;  %v7497_v50 = vld [vmem:[#allocation2 + $0x98] sm:$0xf] }
 0x284   :  { %v2201_v18 = vpop.f32.mrf.mxu2  ;;  %v2220_v20 = vpop.f32.mrf.mxu3  ;;  %2414 = vst [vmem:[#allocation2 + $0x160] sm:$0xff] %v2382_v16  ;;  %v9384_v30 = vld [vmem:[#allocation2 + $0x9c] sm:$0xf]  ;;  %v7498_v15 = vor.u32 %v9392_v61, %v7497_v50  ;;  %v7569_v0 = vld [vmem:[#allocation2 + $0x120] sm:$0xf] }
 0x285   :  { %v2202_v35 = vadd.f32 %v2201_v18, %v11204_v6  ;;  %v2221_v21 = vadd.f32 %v2220_v20, %v11204_v6  ;;  %v2168_v7 = vpop.f32.mrf.mxu0  ;;  %v2187_v13 = vpop.f32.mrf.mxu1  ;;  %v7502_v16 = vor.u32 %v9384_v30, %v7499_v25  ;;  %v9376_v18 = vld [vmem:[#allocation2 + $0x54] sm:$0xf0]  ;;  %v7435_v20 = vld [vmem:[#allocation2 + $0x58] sm:$0xf0] }
 0x286   :  { %v2169_v9 = vadd.f32 %v2168_v7, %v11202_v63  ;;  %v2188_v19 = vadd.f32 %v2187_v13, %v11202_v63  ;;  %2945 = vmatpush.bf16.msrb.mxu0 %v7490_v42  ;;  %2964 = vmatpush.bf16.msrb.mxu1 %v7494_v12  ;;  %v7433_v42 = vld [vmem:[#allocation2 + $0x18] sm:$0xf]  ;;  %v9368_v12 = vld [vmem:[#allocation2 + $0x1c] sm:$0xf] }
 0x287   :  { %v2316_v31 = vmax.f32 %v2202_v35, 0.0  ;;  %v2317_v14 = vmax.f32 %v2221_v21, 0.0  ;;  %v7434_v7 = vor.u32 %v9376_v18, %v7433_v42  ;;  %v7438_v13 = vor.u32 %v9368_v12, %v7435_v20  ;;  %v7441_v12 = vld [vmem:[#allocation2 + $0x20] sm:$0xf] }
 0x288   :  { %v2346_v38 = vmax.f32 %v2169_v9, 0.0  ;;  %v2347_v39 = vmax.f32 %v2188_v19, 0.0 }
 0x289   :  { %v2375_v37 = vpack.c.bf16 %v2317_v14, %v2316_v31 }
 0x28a   :  { %v9424_v41 = vld [vmem:[#allocation2 + $0x1d4] sm:$0xf0]  ;;  %v7627_v24 = vld [vmem:[#allocation2 + $0x1d8] sm:$0xf0]  ;;  %v2390_v49 = vpack.c.bf16 %v2347_v39, %v2346_v38  ;;  %2946 = vmatpush.bf16.msrb.mxu0 %v7426_v45  ;;  %2965 = vmatpush.bf16.msrb.mxu1 %v7430_v60 }
 0x28b   :  { %2407 = vst [vmem:[#allocation2 + $0x128] sm:$0xff] %v2375_v37  ;;  %v7626_v44 = vor.u32 %v9424_v41, %v7625_v36  ;;  %v7630_v11 = vor.u32 %v9416_v47, %v7627_v24 }
 0x28c   :  { %v2203_v23 = vpop.f32.mrf.mxu2  ;;  %v2222_v33 = vpop.f32.mrf.mxu3  ;;  %7668 = vmatmul.msk.bf16.gmra.mxu2 %vm2856_vm5, %v11260_v43  ;;  %7670 = vmatmul.msk.bf16.gmra.mxu3 %vm2856_vm5, %v11260_v43  ;;  %2422 = vst [vmem:[#allocation2 + $0x1a0] sm:$0xff] %v2390_v49 }
 0x28d   :  { %v2204_v46 = vadd.f32 %v2203_v23, %v11208_v51  ;;  %v2223_v34 = vadd.f32 %v2222_v33, %v11208_v51  ;;  %2981 = vmatpush.bf16.msrb.mxu2 %v7626_v44  ;;  %3000 = vmatpush.bf16.msrb.mxu3 %v7630_v11  ;;  %v2170_v55 = vpop.f32.mrf.mxu0  ;;  %v2189_v2 = vpop.f32.mrf.mxu1  ;;  %v9409_v11 = vld [vmem:[#allocation2 + $0x15c] sm:$0xf0]  ;;  %v7571_v23 = vld [vmem:[#allocation2 + $0x160] sm:$0xf0] }
 0x28e   :  { %7671 = vmatmul.msk.bf16.vlgmr.msrb.gmra.mxu0 %vm2856_vm5, %v11240_v29  ;;  %7673 = vmatmul.msk.bf16.vlgmr.msrb.gmra.mxu1 %vm2856_vm5, %v11240_v29  ;;  %v2171_v57 = vadd.f32 %v2170_v55, %v11216_v59  ;;  %v2190_v26 = vadd.f32 %v2189_v2, %v11216_v59  ;;  %v7570_v55 = vor.u32 %v9409_v11, %v7569_v0  ;;  %v9401_v2 = vld [vmem:[#allocation2 + $0x124] sm:$0xf] }
 0x28f   :  { %v2332_v4 = vmax.f32 %v2204_v46, 0.0  ;;  %v2333_v10 = vmax.f32 %v2223_v34, 0.0 }
 0x290   :  { %v2362_v56 = vmax.f32 %v2171_v57, 0.0  ;;  %v2363_v27 = vmax.f32 %v2190_v26, 0.0  ;;  %v9393_v57 = vld [vmem:[#allocation2 + $0xdc] sm:$0xf0]  ;;  %v7507_v26 = vld [vmem:[#allocation2 + $0xe0] sm:$0xf0] }
 0x291   :  { %v2383_v52 = vpack.c.bf16 %v2333_v10, %v2332_v4  ;;  %2982 = vmatpush.bf16.msrb.mxu2 %v7562_v54  ;;  %3001 = vmatpush.bf16.msrb.mxu3 %v7566_v3  ;;  %v7574_v10 = vor.u32 %v9401_v2, %v7571_v23  ;;  %v7513_v2 = vld [vmem:[#allocation2 + $0xa8] sm:$0xf] }
 0x292   :  { %v2398_v8 = vpack.c.bf16 %v2363_v27, %v2362_v56  ;;  %v7505_v56 = vld [vmem:[#allocation2 + $0xa0] sm:$0xf]  ;;  %v9385_v27 = vld [vmem:[#allocation2 + $0xa4] sm:$0xf] }
 0x293   :  { %2415 = vst [vmem:[#allocation2 + $0x168] sm:$0xff] %v2383_v52  ;;  %v7633_v37 = vld [vmem:[#allocation2 + $0x1a0] sm:$0xf]  ;;  %v9417_v36 = vld [vmem:[#allocation2 + $0x1a4] sm:$0xf] }
 0x294   :  { %v2206_v1 = vpop.f32.mrf.mxu2  ;;  %v2225_v22 = vpop.f32.mrf.mxu3  ;;  %2430 = vst [vmem:[#allocation2 + $0x1e0] sm:$0xff] %v2398_v8  ;;  %v7506_v8 = vor.u32 %v9393_v57, %v7505_v56 }
 0x295   :  { %v2207_v35 = vadd.f32 %v2206_v1, %v11202_v63  ;;  %v2226_v21 = vadd.f32 %v2225_v22, %v11202_v63  ;;  %2983 = vmatpush.bf16.msrb.mxu2 %v7498_v15  ;;  %3002 = vmatpush.bf16.msrb.mxu3 %v7502_v16  ;;  %v2239_v53 = vpop.f32.mrf.mxu0  ;;  %v2258_v28 = vpop.f32.mrf.mxu1  ;;  %v7510_v15 = vor.u32 %v9385_v27, %v7507_v26  ;;  %v9377_v16 = vld [vmem:[#allocation2 + $0x5c] sm:$0xf0]  ;;  %v7443_v1 = vld [vmem:[#allocation2 + $0x60] sm:$0xf0]  ;;  %v7449_v27 = vld [vmem:[#allocation2 + $0x28] sm:$0xf] }
 0x296   :  { %v2240_v14 = vadd.f32 %v2239_v53, %v11204_v6  ;;  %v2259_v9 = vadd.f32 %v2258_v28, %v11204_v6  ;;  %v7442_v53 = vor.u32 %v9377_v16, %v7441_v12  ;;  %v9369_v28 = vld [vmem:[#allocation2 + $0x24] sm:$0xf] }
 0x297   :  { %v2348_v5 = vmax.f32 %v2207_v35, 0.0  ;;  %v2349_v31 = vmax.f32 %v2226_v21, 0.0 }
 0x298   :  { %v2318_v32 = vmax.f32 %v2240_v14, 0.0  ;;  %v2319_v45 = vmax.f32 %v2259_v9, 0.0 }
 0x299   :  { %v2391_v19 = vpack.c.bf16 %v2349_v31, %v2348_v5  ;;  %2984 = vmatpush.bf16.msrb.mxu2 %v7434_v7  ;;  %3003 = vmatpush.bf16.msrb.mxu3 %v7438_v13  ;;  %v7446_v5 = vor.u32 %v9369_v28, %v7443_v1 }
 0x29a   :  { %v2376_v58 = vpack.c.bf16 %v2319_v45, %v2318_v32 }
 0x29b   :  { %2423 = vst [vmem:[#allocation2 + $0x1a8] sm:$0xff] %v2391_v19  ;;  %v9425_v60 = vld [vmem:[#allocation2 + $0x1dc] sm:$0xf0]  ;;  %v7635_v41 = vld [vmem:[#allocation2 + $0x1e0] sm:$0xf0] }
 0x29c   :  { %v2208_v38 = vpop.f32.mrf.mxu2  ;;  %v2227_v39 = vpop.f32.mrf.mxu3  ;;  %7675 = vmatmul.msk.bf16.vlgmr.msrb.gmra.mxu2 %vm2856_vm5, %v11240_v29  ;;  %7677 = vmatmul.msk.bf16.vlgmr.msrb.gmra.mxu3 %vm2856_vm5, %v11240_v29  ;;  %2408 = vst [vmem:[#allocation2 + $0x130] sm:$0xff] %v2376_v58  ;;  %v7634_v49 = vor.u32 %v9425_v60, %v7633_v37  ;;  %v7638_v44 = vor.u32 %v9417_v36, %v7635_v41  ;;  %v9410_v37 = vld [vmem:[#allocation2 + $0x164] sm:$0xf0] }
 0x29d   :  { %v2209_v47 = vadd.f32 %v2208_v38, %v11216_v59  ;;  %v2228_v24 = vadd.f32 %v2227_v39, %v11216_v59  ;;  %v2241_v17 = vpop.f32.mrf.mxu0  ;;  %v2260_v40 = vpop.f32.mrf.mxu1  ;;  %v7579_v38 = vld [vmem:[#allocation2 + $0x168] sm:$0xf0] }
 0x29e   :  { %7672 = vmatmul.msk.bf16.gmra.mxu0 %vm2856_vm5, %v11260_v43  ;;  %7674 = vmatmul.msk.bf16.gmra.mxu1 %vm2856_vm5, %v11260_v43  ;;  %v2242_v34 = vadd.f32 %v2241_v17, %v11208_v51  ;;  %v2261_v48 = vadd.f32 %v2260_v40, %v11208_v51 }
 0x29f   :  { %v2364_v33 = vmax.f32 %v2209_v47, 0.0  ;;  %v2365_v46 = vmax.f32 %v2228_v24, 0.0  ;;  %3019 = vmatpush.bf16.msra.mxu0 %v7634_v49  ;;  %3038 = vmatpush.bf16.msra.mxu1 %v7638_v44  ;;  %v7577_v47 = vld [vmem:[#allocation2 + $0x128] sm:$0xf]  ;;  %v9402_v24 = vld [vmem:[#allocation2 + $0x12c] sm:$0xf] }
 0x2a0   :  { %v2334_v3 = vmax.f32 %v2242_v34, 0.0  ;;  %v2335_v4 = vmax.f32 %v2261_v48, 0.0  ;;  %v7578_v11 = vor.u32 %v9410_v37, %v7577_v47  ;;  %v7582_v17 = vor.u32 %v9402_v24, %v7579_v38  ;;  %v7515_v34 = vld [vmem:[#allocation2 + $0xe8] sm:$0xf0]  ;;  %v9387_v37 = vld [vmem:[#allocation2 + $0xb4] sm:$0xf] }
 0x2a1   :  { %v2399_v54 = vpack.c.bf16 %v2365_v46, %v2364_v33  ;;  %v9394_v46 = vld [vmem:[#allocation2 + $0xe4] sm:$0xf0]  ;;  %v9371_v47 = vld [vmem:[#allocation2 + $0x34] sm:$0xf] }
 0x2a2   :  { %v2384_v61 = vpack.c.bf16 %v2335_v4, %v2334_v3  ;;  %v7641_v31 = vld [vmem:[#allocation2 + $0x1a8] sm:$0xf]  ;;  %v9418_v9 = vld [vmem:[#allocation2 + $0x1ac] sm:$0xf]  ;;  %v7514_v4 = vor.u32 %v9394_v46, %v7513_v2  ;;  %v9396_v2 = vld [vmem:[#allocation2 + $0xf4] sm:$0xf0] }
 0x2a3   :  { %2431 = vst [vmem:[#allocation2 + $0x1e8] sm:$0xff] %v2399_v54  ;;  %3020 = vmatpush.bf16.msra.mxu0 %v7570_v55  ;;  %3039 = vmatpush.bf16.msra.mxu1 %v7574_v10  ;;  %v9386_v54 = vld [vmem:[#allocation2 + $0xac] sm:$0xf] }
 0x2a4   :  { %v2277_v25 = vpop.f32.mrf.mxu2  ;;  %v2296_v52 = vpop.f32.mrf.mxu3  ;;  %2416 = vst [vmem:[#allocation2 + $0x170] sm:$0xff] %v2384_v61  ;;  %v7518_v10 = vor.u32 %v9386_v54, %v7515_v34  ;;  %v9378_v61 = vld [vmem:[#allocation2 + $0x64] sm:$0xf0]  ;;  %v7531_v54 = vld [vmem:[#allocation2 + $0xf8] sm:$0xf0] }
 0x2a5   :  { %v2278_v50 = vadd.f32 %v2277_v25, %v11204_v6  ;;  %v2297_v30 = vadd.f32 %v2296_v52, %v11204_v6  ;;  %v2244_v18 = vpop.f32.mrf.mxu0  ;;  %v2263_v20 = vpop.f32.mrf.mxu1  ;;  %v7451_v25 = vld [vmem:[#allocation2 + $0x68] sm:$0xf0] }
 0x2a6   :  { %v2245_v21 = vadd.f32 %v2244_v18, %v11202_v63  ;;  %v2264_v42 = vadd.f32 %v2263_v20, %v11202_v63 }
 0x2a7   :  { %v2320_v22 = vmax.f32 %v2278_v50, 0.0  ;;  %v2321_v35 = vmax.f32 %v2297_v30, 0.0  ;;  %3021 = vmatpush.bf16.msra.mxu0 %v7506_v8  ;;  %3040 = vmatpush.bf16.msra.mxu1 %v7510_v15  ;;  %v9370_v50 = vld [vmem:[#allocation2 + $0x2c] sm:$0xf]  ;;  %v7450_v15 = vor.u32 %v9378_v61, %v7449_v27  ;;  %v7467_v61 = vld [vmem:[#allocation2 + $0x78] sm:$0xf0] }
 0x2a8   :  { %v2350_v13 = vmax.f32 %v2245_v21, 0.0  ;;  %v2351_v6 = vmax.f32 %v2264_v42, 0.0  ;;  %v7454_v16 = vor.u32 %v9370_v50, %v7451_v25  ;;  %v7465_v25 = vld [vmem:[#allocation2 + $0x38] sm:$0xf] }
 0x2a9   :  { %v2377_v7 = vpack.c.bf16 %v2321_v35, %v2320_v22 }
 0x2aa   :  { %v9426_v14 = vld [vmem:[#allocation2 + $0x1e4] sm:$0xf0]  ;;  %v7643_v19 = vld [vmem:[#allocation2 + $0x1e8] sm:$0xf0]  ;;  %v2392_v32 = vpack.c.bf16 %v2351_v6, %v2350_v13 }
 0x2ab   :  { %2409 = vst [vmem:[#allocation2 + $0x138] sm:$0xff] %v2377_v7  ;;  %3022 = vmatpush.bf16.msra.mxu0 %v7442_v53  ;;  %3041 = vmatpush.bf16.msra.mxu1 %v7446_v5  ;;  %v7642_v45 = vor.u32 %v9426_v14, %v7641_v31  ;;  %v7646_v58 = vor.u32 %v9418_v9, %v7643_v19  ;;  %v9411_v7 = vld [vmem:[#allocation2 + $0x16c] sm:$0xf0]  ;;  %v7587_v13 = vld [vmem:[#allocation2 + $0x170] sm:$0xf0] }
 0x2ac   :  { %v2279_v39 = vpop.f32.mrf.mxu2  ;;  %v2298_v60 = vpop.f32.mrf.mxu3  ;;  %7676 = vmatmul.msk.bf16.gmra.mxu2 %vm2856_vm5, %v11260_v43  ;;  %7678 = vmatmul.msk.bf16.gmra.mxu3 %vm2856_vm5, %v11260_v43  ;;  %2424 = vst [vmem:[#allocation2 + $0x1b0] sm:$0xff] %v2392_v32  ;;  %v7585_v31 = vld [vmem:[#allocation2 + $0x130] sm:$0xf]  ;;  %v9403_v14 = vld [vmem:[#allocation2 + $0x134] sm:$0xf] }
 0x2ad   :  { %v2280_v36 = vadd.f32 %v2279_v39, %v11208_v51  ;;  %v2299_v41 = vadd.f32 %v2298_v60, %v11208_v51  ;;  %3057 = vmatpush.bf16.msra.mxu2 %v7642_v45  ;;  %3076 = vmatpush.bf16.msra.mxu3 %v7646_v58  ;;  %v2246_v49 = vpop.f32.mrf.mxu0  ;;  %v2265_v44 = vpop.f32.mrf.mxu1  ;;  %v7586_v19 = vor.u32 %v9411_v7, %v7585_v31  ;;  %v7523_v45 = vld [vmem:[#allocation2 + $0xf0] sm:$0xf0]  ;;  %v7521_v58 = vld [vmem:[#allocation2 + $0xb0] sm:$0xf] }
 0x2ae   :  { %7679 = vmatmul.msk.bf16.vlgmr.msra.gmra.mxu0 %vm2856_vm5, %v11240_v29  ;;  %7681 = vmatmul.msk.bf16.vlgmr.msra.gmra.mxu1 %vm2856_vm5, %v11240_v29  ;;  %v2247_v33 = vadd.f32 %v2246_v49, %v11216_v59  ;;  %v2266_v51 = vadd.f32 %v2265_v44, %v11216_v59  ;;  %v7590_v32 = vor.u32 %v9403_v14, %v7587_v13  ;;  %v9379_v60 = vld [vmem:[#allocation2 + $0x6c] sm:$0xf0] }
 0x2af   :  { %v2336_v40 = vmax.f32 %v2280_v36, 0.0  ;;  %v2337_v23 = vmax.f32 %v2299_v41, 0.0  ;;  %v7526_v39 = vor.u32 %v9387_v37, %v7523_v45  ;;  %v7459_v36 = vld [vmem:[#allocation2 + $0x70] sm:$0xf0]  ;;  %v7457_v41 = vld [vmem:[#allocation2 + $0x30] sm:$0xf] }
 0x2b0   :  { %v2366_v0 = vmax.f32 %v2247_v33, 0.0  ;;  %v2367_v55 = vmax.f32 %v2266_v51, 0.0  ;;  %v7458_v24 = vor.u32 %v9379_v60, %v7457_v41  ;;  %v7462_v49 = vor.u32 %v9371_v47, %v7459_v36 }
 0x2b1   :  { %v2385_v48 = vpack.c.bf16 %v2337_v23, %v2336_v40  ;;  %3058 = vmatpush.bf16.msra.mxu2 %v7578_v11  ;;  %3077 = vmatpush.bf16.msra.mxu3 %v7582_v17 }
 0x2b2   :  { %v2400_v3 = vpack.c.bf16 %v2367_v55, %v2366_v0  ;;  %v7593_v34 = vld [vmem:[#allocation2 + $0x138] sm:$0xf] }
 0x2b3   :  { %2417 = vst [vmem:[#allocation2 + $0x178] sm:$0xff] %v2385_v48  ;;  %v7649_v20 = vld [vmem:[#allocation2 + $0x1b0] sm:$0xf]  ;;  %v9419_v35 = vld [vmem:[#allocation2 + $0x1b4] sm:$0xf] }
 0x2b4   :  { %v2282_v57 = vpop.f32.mrf.mxu2  ;;  %v2301_v26 = vpop.f32.mrf.mxu3  ;;  %2432 = vst [vmem:[#allocation2 + $0x1f0] sm:$0xff] %v2400_v3  ;;  %v9404_v48 = vld [vmem:[#allocation2 + $0x13c] sm:$0xf]  ;;  %v7529_v3 = vld [vmem:[#allocation2 + $0xb8] sm:$0xf] }
 0x2b5   :  { %v2283_v52 = vadd.f32 %v2282_v57, %v11202_v63  ;;  %v2302_v56 = vadd.f32 %v2301_v26, %v11202_v63  ;;  %3059 = vmatpush.bf16.msra.mxu2 %v7514_v4  ;;  %3078 = vmatpush.bf16.msra.mxu3 %v7518_v10  ;;  %v9388_v4 = vld [vmem:[#allocation2 + $0xbc] sm:$0xf]  ;;  %v7530_v10 = vor.u32 %v9396_v2, %v7529_v3  ;;  %v9380_v26 = vld [vmem:[#allocation2 + $0x74] sm:$0xf0] }
 0x2b6   :  { %v7534_v57 = vor.u32 %v9388_v4, %v7531_v54 }
 0x2b7   :  { %v2352_v30 = vmax.f32 %v2283_v52, 0.0  ;;  %v2353_v8 = vmax.f32 %v2302_v56, 0.0  ;;  %v9372_v52 = vld [vmem:[#allocation2 + $0x3c] sm:$0xf]  ;;  %v7466_v56 = vor.u32 %v9380_v26, %v7465_v25 }
 0x2b8   :  { %v7470_v27 = vor.u32 %v9372_v52, %v7467_v61 }
 0x2b9   :  { %v2393_v18 = vpack.c.bf16 %v2353_v8, %v2352_v30  ;;  %3060 = vmatpush.bf16.msra.mxu2 %v7450_v15  ;;  %3079 = vmatpush.bf16.msra.mxu3 %v7454_v16  ;;  %v11361_v30 = vpop.permute.xlu2 %2523 }
 0x2ba   :  { %v9412_v51 = vld [vmem:[#allocation2 + $0x174] sm:$0xf0]  ;;  %v7595_v46 = vld [vmem:[#allocation2 + $0x178] sm:$0xf0] }
 0x2bb   :  { %2425 = vst [vmem:[#allocation2 + $0x1b8] sm:$0xff] %v2393_v18  ;;  %v9427_v63 = vld [vmem:[#allocation2 + $0x1ec] sm:$0xf0]  ;;  %v7651_v21 = vld [vmem:[#allocation2 + $0x1f0] sm:$0xf0]  ;;  %v7594_v0 = vor.u32 %v9412_v51, %v7593_v34  ;;  %v7598_v55 = vor.u32 %v9404_v48, %v7595_v46 }
 0x2bc   :  { %v2284_v1 = vpop.f32.mrf.mxu2  ;;  %v2303_v22 = vpop.f32.mrf.mxu3  ;;  %7683 = vmatmul.msk.bf16.vlgmr.msra.gmra.mxu2 %vm2856_vm5, %v11240_v29  ;;  %7685 = vmatmul.msk.bf16.vlgmr.msra.gmra.mxu3 %vm2856_vm5, %v11240_v29  ;;  %v7650_v53 = vor.u32 %v9427_v63, %v7649_v20  ;;  %v7654_v28 = vor.u32 %v9419_v35, %v7651_v21 }
 0x2bd   :  { %v2285_v42 = vadd.f32 %v2284_v1, %v11216_v59  ;;  %v2304_v12 = vadd.f32 %v2303_v22, %v11216_v59  ;;  %v9395_v59 = vld [vmem:[#allocation2 + $0xec] sm:$0xf0] }
 0x2be   :  { %7680 = vmatmul.msk.bf16.gmra.mxu0 %vm2856_vm5, %v11260_v43  ;;  %7682 = vmatmul.msk.bf16.gmra.mxu1 %vm2856_vm5, %v11260_v43  ;;  %v7522_v38 = vor.u32 %v9395_v59, %v7521_v58 }
 0x2bf   :  { %v2368_v6 = vmax.f32 %v2285_v42, 0.0  ;;  %v2369_v5 = vmax.f32 %v2304_v12, 0.0  ;;  %3095 = vmatpush.bf16.msrb.mxu0 %v7650_v53  ;;  %3114 = vmatpush.bf16.msrb.mxu1 %v7654_v28 }
 0x2c1   :  { %v2401_v9 = vpack.c.bf16 %v2369_v5, %v2368_v6  ;;  %v11371_v22 = vpop.permute.xlu2 %2513 }
 0x2c2   :  { %v7657_v44 = vld [vmem:[#allocation2 + $0x1b8] sm:$0xf]  ;;  %v9420_v17 = vld [vmem:[#allocation2 + $0x1bc] sm:$0xf] }
 0x2c3   :  { %2433 = vst [vmem:[#allocation2 + $0x1f8] sm:$0xff] %v2401_v9  ;;  %3096 = vmatpush.bf16.msrb.mxu0 %v7586_v19  ;;  %3115 = vmatpush.bf16.msrb.mxu1 %v7590_v32  ;;  %v11359_v50 = vpop.permute.xlu1 %2518 }
 0x2c7   :  { %3097 = vmatpush.bf16.msrb.mxu0 %v7522_v38  ;;  %3116 = vmatpush.bf16.msrb.mxu1 %v7526_v39 }
 0x2ca   :  { %v9428_v11 = vld [vmem:[#allocation2 + $0x1f4] sm:$0xf0]  ;;  %v7659_v40 = vld [vmem:[#allocation2 + $0x1f8] sm:$0xf0] }
 0x2cb   :  { %3098 = vmatpush.bf16.msrb.mxu0 %v7458_v24  ;;  %3117 = vmatpush.bf16.msrb.mxu1 %v7462_v49  ;;  %v7658_v23 = vor.u32 %v9428_v11, %v7657_v44  ;;  %v7662_v33 = vor.u32 %v9420_v17, %v7659_v40 }
 0x2cc   :  { %7684 = vmatmul.msk.bf16.gmra.mxu2 %vm2856_vm5, %v11260_v43  ;;  %7686 = vmatmul.msk.bf16.gmra.mxu3 %vm2856_vm5, %v11260_v43 }
 0x2cd   :  { %3133 = vmatpush.bf16.msrb.mxu2 %v7658_v23  ;;  %3152 = vmatpush.bf16.msrb.mxu3 %v7662_v33 }
 0x2ce   :  { %7687 = vmatmul.msk.bf16.vlgmr.msrb.gmra.mxu0 %vm2856_vm5, %v11240_v29  ;;  %7689 = vmatmul.msk.bf16.vlgmr.msrb.gmra.mxu1 %vm2856_vm5, %v11240_v29 }
 0x2d1   :  { %3134 = vmatpush.bf16.msrb.mxu2 %v7594_v0  ;;  %3153 = vmatpush.bf16.msrb.mxu3 %v7598_v55 }
 0x2d3   :  { %v11367_v16 = vpop.permute.xlu1 %2508 }
 0x2d5   :  { %3135 = vmatpush.bf16.msrb.mxu2 %v7530_v10  ;;  %3154 = vmatpush.bf16.msrb.mxu3 %v7534_v57 }
 0x2d9   :  { %3136 = vmatpush.bf16.msrb.mxu2 %v7466_v56  ;;  %3155 = vmatpush.bf16.msrb.mxu3 %v7470_v27 }
 0x2dc   :  { %7691 = vmatmul.msk.bf16.vlgmr.msrb.gmra.mxu2 %vm2856_vm5, %v11240_v29  ;;  %7693 = vmatmul.msk.bf16.vlgmr.msrb.gmra.mxu3 %vm2856_vm5, %v11240_v29 }
 0x2de   :  { %7688 = vmatmul.msk.bf16.gmra.mxu0 %vm2856_vm5, %v11260_v43  ;;  %7690 = vmatmul.msk.bf16.gmra.mxu1 %vm2856_vm5, %v11260_v43 }
 0x2e8   :  { %v2872_v8 = vpop.f32.mrf.mxu0  ;;  %v2891_v15 = vpop.f32.mrf.mxu1 }
 0x2e9   :  { %v2873_v20 = vadd.f32 %v2872_v8, %v11367_v16  ;;  %v2892_v1 = vadd.f32 %v2891_v15, %v11367_v16 }
 0x2eb   :  { %v3167_v63 = vmax.f32 %v2873_v20, 0.0  ;;  %v3168_v35 = vmax.f32 %v2892_v1, 0.0 }
 0x2ec   :  { %7692 = vmatmul.msk.bf16.gmra.mxu2 %vm2856_vm5, %v11260_v43  ;;  %7694 = vmatmul.msk.bf16.gmra.mxu3 %vm2856_vm5, %v11260_v43 }
 0x2ed   :  { %v3231_v12 = vpack.c.bf16 %v3168_v35, %v3167_v63 }
 0x2ef   :  { %3263 = vst [vmem:[#allocation2 + $0x200] sm:$0xff] %v3231_v12 }
 0x2f0   :  { %v2874_v29 = vpop.f32.mrf.mxu0  ;;  %v2893_v18 = vpop.f32.mrf.mxu1 }
 0x2f1   :  { %v2875_v21 = vadd.f32 %v2874_v29, %v11371_v22  ;;  %v2894_v42 = vadd.f32 %v2893_v18, %v11371_v22 }
 0x2f3   :  { %v3183_v53 = vmax.f32 %v2875_v21, 0.0  ;;  %v3184_v28 = vmax.f32 %v2894_v42, 0.0 }
 0x2f5   :  { %v3239_v13 = vpack.c.bf16 %v3184_v28, %v3183_v53 }
 0x2f6   :  { %v7961_v42 = vld [vmem:[#allocation2 + $0x200] sm:$0xf]  ;;  %v9495_v12 = vld [vmem:[#allocation2 + $0x204] sm:$0xf] }
 0x2f7   :  { %3271 = vst [vmem:[#allocation2 + $0x240] sm:$0xff] %v3239_v13 }
 0x2f8   :  { %v2877_v43 = vpop.f32.mrf.mxu0  ;;  %v2896_v7 = vpop.f32.mrf.mxu1 }
 0x2f9   :  { %v2878_v6 = vadd.f32 %v2877_v43, %v11359_v50  ;;  %v2897_v5 = vadd.f32 %v2896_v7, %v11359_v50 }
 0x2fb   :  { %v3199_v31 = vmax.f32 %v2878_v6, 0.0  ;;  %v3200_v14 = vmax.f32 %v2897_v5, 0.0  ;;  %v9487_v5 = vld [vmem:[#allocation2 + $0x1bc] sm:$0xf0] }
 0x2fd   :  { %v3247_v32 = vpack.c.bf16 %v3200_v14, %v3199_v31  ;;  %v7899_v31 = vld [vmem:[#allocation2 + $0x1c0] sm:$0xf0] }
 0x2fe   :  { %v9503_v20 = vld [vmem:[#allocation2 + $0x23c] sm:$0xf0]  ;;  %v7963_v1 = vld [vmem:[#allocation2 + $0x240] sm:$0xf0] }
 0x2ff   :  { %v2910_v9 = vpop.f32.mrf.mxu2  ;;  %v2929_v19 = vpop.f32.mrf.mxu3  ;;  %3279 = vst [vmem:[#allocation2 + $0x280] sm:$0xff] %v3247_v32  ;;  %v7962_v43 = vor.u32 %v9503_v20, %v7961_v42  ;;  %v7966_v7 = vor.u32 %v9495_v12, %v7963_v1  ;;  %v7897_v32 = vld [vmem:[#allocation2 + $0x180] sm:$0xf]  ;;  %v7707_v20 = vld [vmem:[#allocation2 + $0x40] sm:$0xf0] }
 0x300   :  { %v2911_v59 = vadd.f32 %v2910_v9, %v11367_v16  ;;  %v2930_v45 = vadd.f32 %v2929_v19, %v11367_v16  ;;  %v2879_v38 = vpop.f32.mrf.mxu0  ;;  %v2898_v39 = vpop.f32.mrf.mxu1 }
 0x301   :  { %v2880_v36 = vadd.f32 %v2879_v38, %v11361_v30  ;;  %v2899_v41 = vadd.f32 %v2898_v39, %v11361_v30  ;;  %v9471_v39 = vld [vmem:[#allocation2 + $0x13c] sm:$0xf0] }
 0x302   :  { %v3169_v58 = vmax.f32 %v2911_v59, 0.0  ;;  %v3170_v37 = vmax.f32 %v2930_v45, 0.0  ;;  %v9479_v59 = vld [vmem:[#allocation2 + $0x184] sm:$0xf] }
 0x303   :  { %v3215_v47 = vmax.f32 %v2880_v36, 0.0  ;;  %v3216_v24 = vmax.f32 %v2899_v41, 0.0  ;;  %v7902_v38 = vor.u32 %v9479_v59, %v7899_v31  ;;  %v7835_v41 = vld [vmem:[#allocation2 + $0x140] sm:$0xf0]  ;;  %v11403_v59 = vld [vmem:[%s11851_s5] sm:$0xff] }
 0x304   :  { %v3232_v60 = vpack.c.bf16 %v3170_v37, %v3169_v58  ;;  %v7898_v37 = vor.u32 %v9487_v5, %v7897_v32 }
 0x305   :  { %v3255_v11 = vpack.c.bf16 %v3216_v24, %v3215_v47 }
 0x306   :  { %3264 = vst [vmem:[#allocation2 + $0x208] sm:$0xff] %v3232_v60  ;;  %v8025_v26 = vld [vmem:[#allocation2 + $0x280] sm:$0xf]  ;;  %v9511_v25 = vld [vmem:[#allocation2 + $0x284] sm:$0xf] }
 0x307   :  { %v2912_v49 = vpop.f32.mrf.mxu2  ;;  %v2931_v44 = vpop.f32.mrf.mxu3  ;;  %3287 = vst [vmem:[#allocation2 + $0x2c0] sm:$0xff] %v3255_v11 }
 0x308   :  { %v2913_v17 = vadd.f32 %v2912_v49, %v11371_v22  ;;  %v2932_v40 = vadd.f32 %v2931_v44, %v11371_v22  ;;  %v7833_v44 = vld [vmem:[#allocation2 + $0x100] sm:$0xf] }
 0x309   :  { %v7834_v11 = vor.u32 %v9471_v39, %v7833_v44  ;;  %v3396_v39 = vld [vmem:[%s11845_s8 + $0x8] sm:$0xff] }
 0x30a   :  { %v3185_v23 = vmax.f32 %v2913_v17, 0.0  ;;  %v3186_v33 = vmax.f32 %v2932_v40, 0.0  ;;  %v9463_v17 = vld [vmem:[#allocation2 + $0x104] sm:$0xf] }
 0x30b   :  { %v2948_v51 = vpop.f32.mrf.mxu0  ;;  %v2967_v46 = vpop.f32.mrf.mxu1 }
 0x30c   :  { %v3240_v34 = vpack.c.bf16 %v3186_v33, %v3185_v23  ;;  %v2949_v48 = vadd.f32 %v2948_v51, %v11367_v16  ;;  %v2968_v0 = vadd.f32 %v2967_v46, %v11367_v16  ;;  %v7838_v33 = vor.u32 %v9463_v17, %v7835_v41  ;;  %v9488_v41 = vld [vmem:[#allocation2 + $0x1c4] sm:$0xf0]  ;;  %v9480_v17 = vld [vmem:[#allocation2 + $0x18c] sm:$0xf] }
 0x30d   :  { %v9496_v32 = vld [vmem:[#allocation2 + $0x20c] sm:$0xf] }
 0x30e   :  { %3272 = vst [vmem:[#allocation2 + $0x248] sm:$0xff] %v3240_v34  ;;  %v3171_v55 = vmax.f32 %v2949_v48, 0.0  ;;  %v3172_v2 = vmax.f32 %v2968_v0, 0.0  ;;  %v9519_v61 = vld [vmem:[#allocation2 + $0x2bc] sm:$0xf0]  ;;  %v10074_v0 = vmov 3  }
 0x30f   :  { %v2915_v54 = vpop.f32.mrf.mxu2  ;;  %v2934_v3 = vpop.f32.mrf.mxu3  ;;  %v8027_v52 = vld [vmem:[#allocation2 + $0x2c0] sm:$0xf0]  ;;  %v8026_v8 = vor.u32 %v9519_v61, %v8025_v26  ;;  %v9455_v34 = vld [vmem:[#allocation2 + $0xbc] sm:$0xf0]  ;;  %9963 = vset.pattern.permute.xlu1 %v10074_v0  ;;  %9962 = vset.pattern.permute.xlu0 %v10074_v0 }
 0x310   :  { %v3233_v4 = vpack.c.bf16 %v3172_v2, %v3171_v55  ;;  %v2916_v10 = vadd.f32 %v2915_v54, %v11359_v50  ;;  %v2935_v57 = vadd.f32 %v2934_v3, %v11359_v50  ;;  %v8030_v15 = vor.u32 %v9511_v25, %v8027_v52  ;;  %v7771_v48 = vld [vmem:[#allocation2 + $0xc0] sm:$0xf0]  ;;  %v7769_v3 = vld [vmem:[#allocation2 + $0x80] sm:$0xf]  ;;  %3416 = vperm.xlu1 %9963, %v11271_v62  }
 0x311   :  { %3918 = vmatpush.bf16.msra.mxu0 %v8026_v8  ;;  %9964 = vset.pattern.permute.xlu2 %v10074_v0  ;;  %v7770_v26 = vor.u32 %v9455_v34, %v7769_v3  ;;  %v7843_v34 = vld [vmem:[#allocation2 + $0x148] sm:$0xf0]  ;;  %v7841_v3 = vld [vmem:[#allocation2 + $0x108] sm:$0xf] }
 0x312   :  { %3265 = vst [vmem:[#allocation2 + $0x210] sm:$0xff] %v3233_v4  ;;  %v3201_v56 = vmax.f32 %v2916_v10, 0.0  ;;  %v3202_v27 = vmax.f32 %v2935_v57, 0.0  ;;  %3937 = vmatpush.bf16.msra.mxu1 %v8030_v15  ;;  %v9447_v4 = vld [vmem:[#allocation2 + $0x84] sm:$0xf] }
 0x313   :  { %v2950_v29 = vpop.f32.mrf.mxu0  ;;  %v2969_v18 = vpop.f32.mrf.mxu1  ;;  %v7774_v61 = vor.u32 %v9447_v4, %v7771_v48  ;;  %v9464_v4 = vld [vmem:[#allocation2 + $0x10c] sm:$0xf] }
 0x314   :  { %v3248_v63 = vpack.c.bf16 %v3202_v27, %v3201_v56  ;;  %v2951_v35 = vadd.f32 %v2950_v29, %v11371_v22  ;;  %v2970_v21 = vadd.f32 %v2969_v18, %v11371_v22  ;;  %v9439_v56 = vld [vmem:[#allocation2 + $0x3c] sm:$0xf0] }
 0x315   :  { %3919 = vmatpush.bf16.msra.mxu0 %v7962_v43  ;;  %v7705_v18 = vld [vmem:[#allocation2] sm:$0xf]  ;;  %v7971_v5 = vld [vmem:[#allocation2 + $0x248] sm:$0xf0] }
 0x316   :  { %3280 = vst [vmem:[#allocation2 + $0x288] sm:$0xff] %v3248_v63  ;;  %v3187_v53 = vmax.f32 %v2951_v35, 0.0  ;;  %v3188_v28 = vmax.f32 %v2970_v21, 0.0  ;;  %3938 = vmatpush.bf16.msra.mxu1 %v7966_v7  ;;  %v7706_v7 = vor.u32 %v9439_v56, %v7705_v18 }
 0x317   :  { %v2917_v13 = vpop.f32.mrf.mxu2  ;;  %v2936_v6 = vpop.f32.mrf.mxu3 }
 0x318   :  { %v3241_v14 = vpack.c.bf16 %v3188_v28, %v3187_v53  ;;  %v2918_v9 = vadd.f32 %v2917_v13, %v11361_v30  ;;  %v2937_v19 = vadd.f32 %v2936_v6, %v11361_v30  ;;  %v9431_v53 = vld [vmem:[#allocation2 + $0x4] sm:$0xf]  ;;  %v9504_v6 = vld [vmem:[#allocation2 + $0x244] sm:$0xf0]  ;;  %3406 = vperm.xlu1 %9963, %v3396_v39  }
 0x319   :  { %3920 = vmatpush.bf16.msra.mxu0 %v7898_v37  ;;  %v7710_v13 = vor.u32 %v9431_v53, %v7707_v20  ;;  %v9456_v20 = vld [vmem:[#allocation2 + $0xc4] sm:$0xf0]  ;;  %v9448_v53 = vld [vmem:[#allocation2 + $0x8c] sm:$0xf] }
 0x31a   :  { %3273 = vst [vmem:[#allocation2 + $0x250] sm:$0xff] %v3241_v14  ;;  %v3217_v45 = vmax.f32 %v2918_v9, 0.0  ;;  %v3218_v58 = vmax.f32 %v2937_v19, 0.0  ;;  %3939 = vmatpush.bf16.msra.mxu1 %v7902_v38  ;;  %v7969_v19 = vld [vmem:[#allocation2 + $0x208] sm:$0xf]  ;;  %v7974_v38 = vor.u32 %v9496_v32, %v7971_v5 }
 0x31b   :  { %v2953_v60 = vpop.f32.mrf.mxu0  ;;  %v2972_v36 = vpop.f32.mrf.mxu1  ;;  %v7970_v37 = vor.u32 %v9504_v6, %v7969_v19  ;;  %v9497_v5 = vld [vmem:[#allocation2 + $0x214] sm:$0xf] }
 0x31c   :  { %v3256_v47 = vpack.c.bf16 %v3218_v58, %v3217_v45  ;;  %v2954_v24 = vadd.f32 %v2953_v60, %v11359_v50  ;;  %v2973_v49 = vadd.f32 %v2972_v36, %v11359_v50 }
 0x31d   :  { %3921 = vmatpush.bf16.msra.mxu0 %v7834_v11  ;;  %v8033_v29 = vld [vmem:[#allocation2 + $0x288] sm:$0xf]  ;;  %v9512_v1 = vld [vmem:[#allocation2 + $0x28c] sm:$0xf] }
 0x31e   :  { %3288 = vst [vmem:[#allocation2 + $0x2c8] sm:$0xff] %v3256_v47  ;;  %v3203_v40 = vmax.f32 %v2954_v24, 0.0  ;;  %v3204_v23 = vmax.f32 %v2973_v49, 0.0  ;;  %3940 = vmatpush.bf16.msra.mxu1 %v7838_v33  ;;  %v7907_v47 = vld [vmem:[#allocation2 + $0x1c8] sm:$0xf0] }
 0x31f   :  { %v2986_v51 = vpop.f32.mrf.mxu2  ;;  %v3005_v46 = vpop.f32.mrf.mxu3  ;;  %v7905_v11 = vld [vmem:[#allocation2 + $0x188] sm:$0xf] }
 0x320   :  { %v3249_v55 = vpack.c.bf16 %v3204_v23, %v3203_v40  ;;  %v2987_v2 = vadd.f32 %v2986_v51, %v11367_v16  ;;  %v3006_v54 = vadd.f32 %v3005_v46, %v11367_v16  ;;  %v9472_v40 = vld [vmem:[#allocation2 + $0x144] sm:$0xf0]  ;;  %v7906_v51 = vor.u32 %v9488_v41, %v7905_v11  ;;  %v7915_v41 = vld [vmem:[#allocation2 + $0x1d0] sm:$0xf0] }
 0x321   :  { %3922 = vmatpush.bf16.msra.mxu0 %v7770_v26  ;;  %v7910_v46 = vor.u32 %v9480_v17, %v7907_v47  ;;  %v7846_v26 = vor.u32 %v9464_v4, %v7843_v34  ;;  %v9432_v47 = vld [vmem:[#allocation2 + $0xc] sm:$0xf] }
 0x322   :  { %3281 = vst [vmem:[#allocation2 + $0x290] sm:$0xff] %v3249_v55  ;;  %v3173_v10 = vmax.f32 %v2987_v2, 0.0  ;;  %v3174_v57 = vmax.f32 %v3006_v54, 0.0  ;;  %3941 = vmatpush.bf16.msra.mxu1 %v7774_v61 }
 0x323   :  { %v2955_v25 = vpop.f32.mrf.mxu0  ;;  %v2974_v52 = vpop.f32.mrf.mxu1 }
 0x324   :  { %v3234_v27 = vpack.c.bf16 %v3174_v57, %v3173_v10  ;;  %v2956_v8 = vadd.f32 %v2955_v25, %v11361_v30  ;;  %v2975_v15 = vadd.f32 %v2974_v52, %v11361_v30  ;;  %v7842_v57 = vor.u32 %v9472_v40, %v7841_v3 }
 0x325   :  { %v9520_v62 = vld [vmem:[#allocation2 + $0x2c4] sm:$0xf0]  ;;  %v8035_v63 = vld [vmem:[#allocation2 + $0x2c8] sm:$0xf0]  ;;  %3923 = vmatpush.bf16.msra.mxu0 %v7706_v7 }
 0x326   :  { %3266 = vst [vmem:[#allocation2 + $0x218] sm:$0xff] %v3234_v27  ;;  %v3219_v35 = vmax.f32 %v2956_v8, 0.0  ;;  %v3220_v21 = vmax.f32 %v2975_v15, 0.0  ;;  %v8034_v42 = vor.u32 %v9520_v62, %v8033_v29  ;;  %v8038_v12 = vor.u32 %v9512_v1, %v8035_v63  ;;  %3942 = vmatpush.bf16.msra.mxu1 %v7710_v13  ;;  %v7779_v62 = vld [vmem:[#allocation2 + $0xc8] sm:$0xf0] }
 0x327   :  { %v2988_v28 = vpop.f32.mrf.mxu2  ;;  %v3007_v43 = vpop.f32.mrf.mxu3  ;;  %v7782_v6 = vor.u32 %v9448_v53, %v7779_v62  ;;  %v7785_v62 = vld [vmem:[#allocation2 + $0x90] sm:$0xf] }
 0x328   :  { %v3257_v31 = vpack.c.bf16 %v3220_v21, %v3219_v35  ;;  %v2989_v14 = vadd.f32 %v2988_v28, %v11371_v22  ;;  %v3008_v9 = vadd.f32 %v3007_v43, %v11371_v22  ;;  %3956 = vmatpush.bf16.msra.mxu2 %v8034_v42  ;;  %3975 = vmatpush.bf16.msra.mxu3 %v8038_v12  ;;  %v9505_v21 = vld [vmem:[#allocation2 + $0x24c] sm:$0xf0]  ;;  %v7979_v42 = vld [vmem:[#allocation2 + $0x250] sm:$0xf0]  ;;  %v7777_v12 = vld [vmem:[#allocation2 + $0x88] sm:$0xf] }
 0x329   :  { %8087 = vmatmul.msk.bf16.vlgmr.msra.gmra.mxu0 %vm3909_vm6, %v11403_v59  ;;  %8089 = vmatmul.msk.bf16.vlgmr.msra.gmra.mxu1 %vm3909_vm6, %v11403_v59  ;;  %v8041_v10 = vld [vmem:[#allocation2 + $0x290] sm:$0xf]  ;;  %v9513_v25 = vld [vmem:[#allocation2 + $0x294] sm:$0xf]  ;;  %v7778_v13 = vor.u32 %v9456_v20, %v7777_v12  ;;  %v7982_v32 = vor.u32 %v9497_v5, %v7979_v42 }
 0x32a   :  { %3289 = vst [vmem:[#allocation2 + $0x2d0] sm:$0xff] %v3257_v31  ;;  %v3189_v45 = vmax.f32 %v2989_v14, 0.0  ;;  %v3190_v58 = vmax.f32 %v3008_v9, 0.0  ;;  %v7977_v28 = vld [vmem:[#allocation2 + $0x210] sm:$0xf]  ;;  %v3397_v31 = vld [vmem:[%s11845_s8 + $0x10] sm:$0xff] }
 0x32b   :  { %v3024_v60 = vpop.f32.mrf.mxu0  ;;  %v3043_v36 = vpop.f32.mrf.mxu1  ;;  %v7978_v19 = vor.u32 %v9505_v21, %v7977_v28  ;;  %3411 = vperm.xlu0 %9962, %v3397_v31   ;;  %v9449_v42 = vld [vmem:[#allocation2 + $0x94] sm:$0xf] }
 0x32c   :  { %v3242_v24 = vpack.c.bf16 %v3190_v58, %v3189_v45  ;;  %3957 = vmatpush.bf16.msra.mxu2 %v7970_v37  ;;  %3976 = vmatpush.bf16.msra.mxu3 %v7974_v38  ;;  %v3025_v49 = vadd.f32 %v3024_v60, %v11367_v16  ;;  %v3044_v44 = vadd.f32 %v3043_v36, %v11367_v16  ;;  %v9440_v45 = vld [vmem:[#allocation2 + $0x44] sm:$0xf0]  ;;  %v7715_v58 = vld [vmem:[#allocation2 + $0x48] sm:$0xf0]  ;;  %v9489_v36 = vld [vmem:[#allocation2 + $0x1cc] sm:$0xf0] }
 0x32d   :  { %v7713_v60 = vld [vmem:[#allocation2 + $0x8] sm:$0xf]  ;;  %v7718_v40 = vor.u32 %v9432_v47, %v7715_v58  ;;  %v7723_v5 = vld [vmem:[#allocation2 + $0x50] sm:$0xf0] }
 0x32e   :  { %3274 = vst [vmem:[#allocation2 + $0x258] sm:$0xff] %v3242_v24  ;;  %v3175_v23 = vmax.f32 %v3025_v49, 0.0  ;;  %v3176_v33 = vmax.f32 %v3044_v44, 0.0  ;;  %v11426_v24 = vld [vmem:[%s11851_s5 + $0x8] sm:$0xff]  ;;  %v7913_v49 = vld [vmem:[#allocation2 + $0x190] sm:$0xf]  ;;  %v7714_v17 = vor.u32 %v9440_v45, %v7713_v60 }
 0x32f   :  { %v2991_v48 = vpop.f32.mrf.mxu2  ;;  %v3010_v0 = vpop.f32.mrf.mxu3 }
 0x330   :  { %v3235_v55 = vpack.c.bf16 %v3176_v33, %v3175_v23  ;;  %v2992_v2 = vadd.f32 %v2991_v48, %v11359_v50  ;;  %v3011_v54 = vadd.f32 %v3010_v0, %v11359_v50  ;;  %3958 = vmatpush.bf16.msra.mxu2 %v7906_v51  ;;  %3977 = vmatpush.bf16.msra.mxu3 %v7910_v46  ;;  %v9481_v23 = vld [vmem:[#allocation2 + $0x194] sm:$0xf] }
 0x331   :  { %v9521_v61 = vld [vmem:[#allocation2 + $0x2cc] sm:$0xf0]  ;;  %v8043_v52 = vld [vmem:[#allocation2 + $0x2d0] sm:$0xf0]  ;;  %v7914_v46 = vor.u32 %v9489_v36, %v7913_v49  ;;  %v7918_v34 = vor.u32 %v9481_v23, %v7915_v41 }
 0x332   :  { %3267 = vst [vmem:[#allocation2 + $0x220] sm:$0xff] %v3235_v55  ;;  %v3205_v56 = vmax.f32 %v2992_v2, 0.0  ;;  %v3206_v27 = vmax.f32 %v3011_v54, 0.0  ;;  %v8042_v8 = vor.u32 %v9521_v61, %v8041_v10  ;;  %v8046_v15 = vor.u32 %v9513_v25, %v8043_v52  ;;  %v9473_v2 = vld [vmem:[#allocation2 + $0x14c] sm:$0xf0] }
 0x333   :  { %v3026_v29 = vpop.f32.mrf.mxu0  ;;  %v3045_v18 = vpop.f32.mrf.mxu1  ;;  %v7851_v54 = vld [vmem:[#allocation2 + $0x150] sm:$0xf0]  ;;  %v7849_v10 = vld [vmem:[#allocation2 + $0x110] sm:$0xf] }
 0x334   :  { %v3250_v1 = vpack.c.bf16 %v3206_v27, %v3205_v56  ;;  %3959 = vmatpush.bf16.msra.mxu2 %v7842_v57  ;;  %3978 = vmatpush.bf16.msra.mxu3 %v7846_v26  ;;  %v3027_v63 = vadd.f32 %v3026_v29, %v11371_v22  ;;  %v3046_v35 = vadd.f32 %v3045_v18, %v11371_v22  ;;  %v9465_v25 = vld [vmem:[#allocation2 + $0x114] sm:$0xf] }
 0x335   :  { %3994 = vmatpush.bf16.msrb.mxu0 %v8042_v8  ;;  %4013 = vmatpush.bf16.msrb.mxu1 %v8046_v15  ;;  %v7850_v61 = vor.u32 %v9473_v2, %v7849_v10  ;;  %v7854_v8 = vor.u32 %v9465_v25, %v7851_v54  ;;  %v9457_v15 = vld [vmem:[#allocation2 + $0xcc] sm:$0xf0]  ;;  %v7787_v29 = vld [vmem:[#allocation2 + $0xd0] sm:$0xf0]  ;;  %v9506_v41 = vld [vmem:[#allocation2 + $0x254] sm:$0xf0] }
 0x336   :  { %3282 = vst [vmem:[#allocation2 + $0x298] sm:$0xff] %v3250_v1  ;;  %v3191_v43 = vmax.f32 %v3027_v63, 0.0  ;;  %v3192_v7 = vmax.f32 %v3046_v35, 0.0  ;;  %v3395_v1 = vld [vmem:[%s11845_s8] sm:$0xff]  ;;  %v7786_v21 = vor.u32 %v9457_v15, %v7785_v62 }
 0x337   :  { %v2993_v14 = vpop.f32.mrf.mxu2  ;;  %v3012_v9 = vpop.f32.mrf.mxu3  ;;  %3401 = vperm.xlu2 %9964, %v3395_v1   ;;  %v7987_v47 = vld [vmem:[#allocation2 + $0x258] sm:$0xf0] }
 0x338   :  { %v3243_v37 = vpack.c.bf16 %v3192_v7, %v3191_v43  ;;  %v2994_v38 = vadd.f32 %v2993_v14, %v11361_v30  ;;  %v3013_v39 = vadd.f32 %v3012_v9, %v11361_v30  ;;  %3960 = vmatpush.bf16.msra.mxu2 %v7778_v13  ;;  %3979 = vmatpush.bf16.msra.mxu3 %v7782_v6  ;;  %v7721_v13 = vld [vmem:[#allocation2 + $0x10] sm:$0xf]  ;;  %v9482_v10 = vld [vmem:[#allocation2 + $0x19c] sm:$0xf] }
 0x339   :  { %3995 = vmatpush.bf16.msrb.mxu0 %v7978_v19  ;;  %4014 = vmatpush.bf16.msrb.mxu1 %v7982_v32  ;;  %v7790_v43 = vor.u32 %v9449_v42, %v7787_v29  ;;  %v9441_v6 = vld [vmem:[#allocation2 + $0x4c] sm:$0xf0]  ;;  %v9466_v62 = vld [vmem:[#allocation2 + $0x11c] sm:$0xf] }
 0x33a   :  { %3275 = vst [vmem:[#allocation2 + $0x260] sm:$0xff] %v3243_v37  ;;  %v3221_v44 = vmax.f32 %v2994_v38, 0.0  ;;  %v3222_v11 = vmax.f32 %v3013_v39, 0.0  ;;  %8088 = vmatmul.msk.bf16.gmra.mxu0 %vm3909_vm6, %v11426_v24  ;;  %8090 = vmatmul.msk.bf16.gmra.mxu1 %vm3909_vm6, %v11426_v24  ;;  %v9433_v37 = vld [vmem:[#allocation2 + $0x14] sm:$0xf]  ;;  %v7722_v60 = vor.u32 %v9441_v6, %v7721_v13 }
 0x33b   :  { %v3029_v33 = vpop.f32.mrf.mxu0  ;;  %v3048_v51 = vpop.f32.mrf.mxu1  ;;  %v7726_v36 = vor.u32 %v9433_v37, %v7723_v5  ;;  %v9458_v5 = vld [vmem:[#allocation2 + $0xd4] sm:$0xf0]  ;;  %v9450_v37 = vld [vmem:[#allocation2 + $0x9c] sm:$0xf] }
 0x33c   :  { %v3258_v48 = vpack.c.bf16 %v3222_v11, %v3221_v44  ;;  %3961 = vmatpush.bf16.msra.mxu2 %v7714_v17  ;;  %3980 = vmatpush.bf16.msra.mxu3 %v7718_v40  ;;  %v3030_v0 = vadd.f32 %v3029_v33, %v11359_v50  ;;  %v3049_v55 = vadd.f32 %v3048_v51, %v11359_v50  ;;  %v7985_v17 = vld [vmem:[#allocation2 + $0x218] sm:$0xf]  ;;  %v9498_v40 = vld [vmem:[#allocation2 + $0x21c] sm:$0xf] }
 0x33d   :  { %3996 = vmatpush.bf16.msrb.mxu0 %v7914_v46  ;;  %4015 = vmatpush.bf16.msrb.mxu1 %v7918_v34  ;;  %v8049_v7 = vld [vmem:[#allocation2 + $0x298] sm:$0xf]  ;;  %v9514_v14 = vld [vmem:[#allocation2 + $0x29c] sm:$0xf]  ;;  %v7986_v51 = vor.u32 %v9506_v41, %v7985_v17  ;;  %v7990_v46 = vor.u32 %v9498_v40, %v7987_v47  ;;  %v9499_v47 = vld [vmem:[#allocation2 + $0x224] sm:$0xf] }
 0x33e   :  { %3290 = vst [vmem:[#allocation2 + $0x2d8] sm:$0xff] %v3258_v48  ;;  %v3207_v3 = vmax.f32 %v3030_v0, 0.0  ;;  %v3208_v4 = vmax.f32 %v3049_v55, 0.0  ;;  %v9490_v0 = vld [vmem:[#allocation2 + $0x1d4] sm:$0xf0] }
 0x33f   :  { %v3062_v57 = vpop.f32.mrf.mxu2  ;;  %v3081_v26 = vpop.f32.mrf.mxu3  ;;  %8091 = vmatmul.msk.bf16.vlgmr.msra.gmra.mxu2 %vm3909_vm6, %v11403_v59  ;;  %8093 = vmatmul.msk.bf16.vlgmr.msra.gmra.mxu3 %vm3909_vm6, %v11403_v59  ;;  %v7923_v55 = vld [vmem:[#allocation2 + $0x1d8] sm:$0xf0]  ;;  %v9442_v40 = vld [vmem:[#allocation2 + $0x54] sm:$0xf0] }
 0x340   :  { %v3251_v52 = vpack.c.bf16 %v3208_v4, %v3207_v3  ;;  %v3063_v56 = vadd.f32 %v3062_v57, %v11367_v16  ;;  %v3082_v27 = vadd.f32 %v3081_v26, %v11367_v16  ;;  %v7921_v4 = vld [vmem:[#allocation2 + $0x198] sm:$0xf] }
 0x341   :  { %3997 = vmatpush.bf16.msrb.mxu0 %v7850_v61  ;;  %4016 = vmatpush.bf16.msrb.mxu1 %v7854_v8  ;;  %v9474_v57 = vld [vmem:[#allocation2 + $0x154] sm:$0xf0]  ;;  %v7922_v25 = vor.u32 %v9490_v0, %v7921_v4 }
 0x342   :  { %3283 = vst [vmem:[#allocation2 + $0x2a0] sm:$0xff] %v3251_v52  ;;  %v3177_v18 = vmax.f32 %v3063_v56, 0.0  ;;  %v3178_v20 = vmax.f32 %v3082_v27, 0.0  ;;  %v7926_v52 = vor.u32 %v9482_v10, %v7923_v55  ;;  %v7859_v56 = vld [vmem:[#allocation2 + $0x158] sm:$0xf0] }
 0x343   :  { %v3031_v63 = vpop.f32.mrf.mxu0  ;;  %v3050_v35 = vpop.f32.mrf.mxu1  ;;  %v7729_v0 = vld [vmem:[#allocation2 + $0x18] sm:$0xf]  ;;  %v9434_v55 = vld [vmem:[#allocation2 + $0x1c] sm:$0xf] }
 0x344   :  { %v3236_v12 = vpack.c.bf16 %v3178_v20, %v3177_v18  ;;  %v3032_v53 = vadd.f32 %v3031_v63, %v11361_v30  ;;  %v3051_v28 = vadd.f32 %v3050_v35, %v11361_v30  ;;  %v7857_v20 = vld [vmem:[#allocation2 + $0x118] sm:$0xf]  ;;  %v7862_v35 = vor.u32 %v9466_v62, %v7859_v56  ;;  %v7865_v62 = vld [vmem:[#allocation2 + $0x120] sm:$0xf] }
 0x345   :  { %v9522_v31 = vld [vmem:[#allocation2 + $0x2d4] sm:$0xf0]  ;;  %v8051_v9 = vld [vmem:[#allocation2 + $0x2d8] sm:$0xf0]  ;;  %3998 = vmatpush.bf16.msrb.mxu0 %v7786_v21  ;;  %4017 = vmatpush.bf16.msrb.mxu1 %v7790_v43  ;;  %v7858_v63 = vor.u32 %v9474_v57, %v7857_v20  ;;  %v7730_v4 = vor.u32 %v9442_v40, %v7729_v0  ;;  %v9483_v57 = vld [vmem:[#allocation2 + $0x1a4] sm:$0xf] }
 0x346   :  { %3268 = vst [vmem:[#allocation2 + $0x228] sm:$0xff] %v3236_v12  ;;  %v3223_v19 = vmax.f32 %v3032_v53, 0.0  ;;  %v3224_v32 = vmax.f32 %v3051_v28, 0.0  ;;  %v8050_v45 = vor.u32 %v9522_v31, %v8049_v7  ;;  %v8054_v58 = vor.u32 %v9514_v14, %v8051_v9  ;;  %v7795_v31 = vld [vmem:[#allocation2 + $0xd8] sm:$0xf0] }
 0x347   :  { %v3064_v38 = vpop.f32.mrf.mxu2  ;;  %v3083_v39 = vpop.f32.mrf.mxu3  ;;  %v7798_v41 = vor.u32 %v9450_v37, %v7795_v31  ;;  %v9435_v40 = vld [vmem:[#allocation2 + $0x24] sm:$0xf] }
 0x348   :  { %v3259_v49 = vpack.c.bf16 %v3224_v32, %v3223_v19  ;;  %v3065_v44 = vadd.f32 %v3064_v38, %v11371_v22  ;;  %v3084_v11 = vadd.f32 %v3083_v39, %v11371_v22  ;;  %4032 = vmatpush.bf16.msrb.mxu2 %v8050_v45  ;;  %4051 = vmatpush.bf16.msrb.mxu3 %v8054_v58  ;;  %v9507_v32 = vld [vmem:[#allocation2 + $0x25c] sm:$0xf0]  ;;  %v7995_v45 = vld [vmem:[#allocation2 + $0x260] sm:$0xf0]  ;;  %v7793_v58 = vld [vmem:[#allocation2 + $0x98] sm:$0xf] }
 0x349   :  { %3999 = vmatpush.bf16.msrb.mxu0 %v7722_v60  ;;  %4018 = vmatpush.bf16.msrb.mxu1 %v7726_v36  ;;  %v8057_v1 = vld [vmem:[#allocation2 + $0x2a0] sm:$0xf]  ;;  %v9515_v42 = vld [vmem:[#allocation2 + $0x2a4] sm:$0xf]  ;;  %v7794_v36 = vor.u32 %v9458_v5, %v7793_v58  ;;  %v7998_v17 = vor.u32 %v9499_v47, %v7995_v45 }
 0x34a   :  { %3291 = vst [vmem:[#allocation2 + $0x2e0] sm:$0xff] %v3259_v49  ;;  %v3193_v23 = vmax.f32 %v3065_v44, 0.0  ;;  %v3194_v33 = vmax.f32 %v3084_v11, 0.0  ;;  %v7993_v38 = vld [vmem:[#allocation2 + $0x220] sm:$0xf] }
 0x34b   :  { %v3100_v34 = vpop.f32.mrf.mxu0  ;;  %v3119_v48 = vpop.f32.mrf.mxu1  ;;  %v7994_v11 = vor.u32 %v9507_v32, %v7993_v38  ;;  %v7801_v5 = vld [vmem:[#allocation2 + $0xa0] sm:$0xf] }
 0x34c   :  { %v3244_v2 = vpack.c.bf16 %v3194_v33, %v3193_v23  ;;  %4033 = vmatpush.bf16.msrb.mxu2 %v7986_v51  ;;  %4052 = vmatpush.bf16.msrb.mxu3 %v7990_v46  ;;  %v3101_v54 = vadd.f32 %v3100_v34, %v11367_v16  ;;  %v3120_v3 = vadd.f32 %v3119_v48, %v11367_v16  ;;  %v7731_v23 = vld [vmem:[#allocation2 + $0x58] sm:$0xf0]  ;;  %v9491_v34 = vld [vmem:[#allocation2 + $0x1dc] sm:$0xf0]  ;;  %v7931_v48 = vld [vmem:[#allocation2 + $0x1e0] sm:$0xf0] }
 0x34d   :  { %8095 = vmatmul.msk.bf16.vlgmr.msrb.gmra.mxu0 %vm3909_vm6, %v11403_v59  ;;  %8097 = vmatmul.msk.bf16.vlgmr.msrb.gmra.mxu1 %vm3909_vm6, %v11403_v59  ;;  %v7734_v10 = vor.u32 %v9434_v55, %v7731_v23  ;;  %v7737_v38 = vld [vmem:[#allocation2 + $0x20] sm:$0xf] }
 0x34e   :  { %3276 = vst [vmem:[#allocation2 + $0x268] sm:$0xff] %v3244_v2  ;;  %v3179_v26 = vmax.f32 %v3101_v54, 0.0  ;;  %v3180_v61 = vmax.f32 %v3120_v3, 0.0  ;;  %v7929_v2 = vld [vmem:[#allocation2 + $0x1a0] sm:$0xf] }
 0x34f   :  { %v3067_v27 = vpop.f32.mrf.mxu2  ;;  %v3086_v8 = vpop.f32.mrf.mxu3  ;;  %8092 = vmatmul.msk.bf16.gmra.mxu2 %vm3909_vm6, %v11426_v24  ;;  %8094 = vmatmul.msk.bf16.gmra.mxu3 %vm3909_vm6, %v11426_v24 }
 0x350   :  { %v3237_v15 = vpack.c.bf16 %v3180_v61, %v3179_v26  ;;  %v3068_v29 = vadd.f32 %v3067_v27, %v11359_v50  ;;  %v3087_v18 = vadd.f32 %v3086_v8, %v11359_v50  ;;  %4034 = vmatpush.bf16.msrb.mxu2 %v7922_v25  ;;  %4053 = vmatpush.bf16.msrb.mxu3 %v7926_v52 }
 0x351   :  { %v9523_v21 = vld [vmem:[#allocation2 + $0x2dc] sm:$0xf0]  ;;  %v8059_v12 = vld [vmem:[#allocation2 + $0x2e0] sm:$0xf0]  ;;  %v7930_v25 = vor.u32 %v9491_v34, %v7929_v2  ;;  %v7934_v52 = vor.u32 %v9483_v57, %v7931_v48 }
 0x352   :  { %3269 = vst [vmem:[#allocation2 + $0x230] sm:$0xff] %v3237_v15  ;;  %v3209_v53 = vmax.f32 %v3068_v29, 0.0  ;;  %v3210_v28 = vmax.f32 %v3087_v18, 0.0  ;;  %v8058_v43 = vor.u32 %v9523_v21, %v8057_v1  ;;  %v8062_v7 = vor.u32 %v9515_v42, %v8059_v12  ;;  %v9475_v15 = vld [vmem:[#allocation2 + $0x15c] sm:$0xf0] }
 0x353   :  { %v3102_v13 = vpop.f32.mrf.mxu0  ;;  %v3121_v6 = vpop.f32.mrf.mxu1  ;;  %v7867_v29 = vld [vmem:[#allocation2 + $0x160] sm:$0xf0] }
 0x354   :  { %v3252_v14 = vpack.c.bf16 %v3210_v28, %v3209_v53  ;;  %4035 = vmatpush.bf16.msrb.mxu2 %v7858_v63  ;;  %4054 = vmatpush.bf16.msrb.mxu3 %v7862_v35  ;;  %v3103_v9 = vadd.f32 %v3102_v13, %v11371_v22  ;;  %v3122_v19 = vadd.f32 %v3121_v6, %v11371_v22  ;;  %v9467_v21 = vld [vmem:[#allocation2 + $0x124] sm:$0xf] }
 0x355   :  { %4070 = vmatpush.bf16.msra.mxu0 %v8058_v43  ;;  %4089 = vmatpush.bf16.msra.mxu1 %v8062_v7  ;;  %v7866_v35 = vor.u32 %v9475_v15, %v7865_v62  ;;  %v7870_v28 = vor.u32 %v9467_v21, %v7867_v29  ;;  %v9459_v43 = vld [vmem:[#allocation2 + $0xdc] sm:$0xf0]  ;;  %v7803_v7 = vld [vmem:[#allocation2 + $0xe0] sm:$0xf0]  ;;  %v9508_v34 = vld [vmem:[#allocation2 + $0x264] sm:$0xf0] }
 0x356   :  { %3284 = vst [vmem:[#allocation2 + $0x2a8] sm:$0xff] %v3252_v14  ;;  %v3195_v39 = vmax.f32 %v3103_v9, 0.0  ;;  %v3196_v60 = vmax.f32 %v3122_v19, 0.0  ;;  %v7802_v9 = vor.u32 %v9459_v43, %v7801_v5  ;;  %v9451_v19 = vld [vmem:[#allocation2 + $0xa4] sm:$0xf] }
 0x357   :  { %v3069_v49 = vpop.f32.mrf.mxu2  ;;  %v3088_v44 = vpop.f32.mrf.mxu3  ;;  %v7806_v37 = vor.u32 %v9451_v19, %v7803_v7  ;;  %v8003_v48 = vld [vmem:[#allocation2 + $0x268] sm:$0xf0]  ;;  %v9476_v15 = vld [vmem:[#allocation2 + $0x164] sm:$0xf0] }
 0x358   :  { %v3245_v33 = vpack.c.bf16 %v3196_v60, %v3195_v39  ;;  %v3070_v51 = vadd.f32 %v3069_v49, %v11361_v30  ;;  %v3089_v46 = vadd.f32 %v3088_v44, %v11361_v30  ;;  %4036 = vmatpush.bf16.msrb.mxu2 %v7794_v36  ;;  %4055 = vmatpush.bf16.msrb.mxu3 %v7798_v41  ;;  %v9443_v39 = vld [vmem:[#allocation2 + $0x5c] sm:$0xf0]  ;;  %v7739_v60 = vld [vmem:[#allocation2 + $0x60] sm:$0xf0]  ;;  %v7875_v29 = vld [vmem:[#allocation2 + $0x168] sm:$0xf0] }
 0x359   :  { %4071 = vmatpush.bf16.msra.mxu0 %v7994_v11  ;;  %4090 = vmatpush.bf16.msra.mxu1 %v7998_v17 }
 0x35a   :  { %3277 = vst [vmem:[#allocation2 + $0x270] sm:$0xff] %v3245_v33  ;;  %v3225_v54 = vmax.f32 %v3070_v51, 0.0  ;;  %v3226_v3 = vmax.f32 %v3089_v46, 0.0  ;;  %v7738_v51 = vor.u32 %v9443_v39, %v7737_v38  ;;  %v7742_v46 = vor.u32 %v9435_v40, %v7739_v60  ;;  %v9501_v38 = vld [vmem:[#allocation2 + $0x234] sm:$0xf] }
 0x35b   :  { %v3105_v26 = vpop.f32.mrf.mxu0  ;;  %v3124_v61 = vpop.f32.mrf.mxu1  ;;  %v9436_v40 = vld [vmem:[#allocation2 + $0x2c] sm:$0xf] }
 0x35c   :  { %v3260_v56 = vpack.c.bf16 %v3226_v3, %v3225_v54  ;;  %4037 = vmatpush.bf16.msrb.mxu2 %v7730_v4  ;;  %4056 = vmatpush.bf16.msrb.mxu3 %v7734_v10  ;;  %v3106_v27 = vadd.f32 %v3105_v26, %v11359_v50  ;;  %v3125_v8 = vadd.f32 %v3124_v61, %v11359_v50  ;;  %v8001_v54 = vld [vmem:[#allocation2 + $0x228] sm:$0xf]  ;;  %v9500_v3 = vld [vmem:[#allocation2 + $0x22c] sm:$0xf] }
 0x35d   :  { %8096 = vmatmul.msk.bf16.gmra.mxu0 %vm3909_vm6, %v11426_v24  ;;  %8098 = vmatmul.msk.bf16.gmra.mxu1 %vm3909_vm6, %v11426_v24  ;;  %v9516_v41 = vld [vmem:[#allocation2 + $0x2ac] sm:$0xf]  ;;  %v8002_v57 = vor.u32 %v9508_v34, %v8001_v54  ;;  %v8006_v26 = vor.u32 %v9500_v3, %v8003_v48  ;;  %v9492_v61 = vld [vmem:[#allocation2 + $0x1e4] sm:$0xf0] }
 0x35e   :  { %3292 = vst [vmem:[#allocation2 + $0x2e8] sm:$0xff] %v3260_v56  ;;  %v3211_v18 = vmax.f32 %v3106_v27, 0.0  ;;  %v3212_v20 = vmax.f32 %v3125_v8, 0.0  ;;  %4072 = vmatpush.bf16.msra.mxu0 %v7930_v25  ;;  %4091 = vmatpush.bf16.msra.mxu1 %v7934_v52  ;;  %v7939_v25 = vld [vmem:[#allocation2 + $0x1e8] sm:$0xf0] }
 0x35f   :  { %v3138_v1 = vpop.f32.mrf.mxu2  ;;  %v3157_v63 = vpop.f32.mrf.mxu3  ;;  %8099 = vmatmul.msk.bf16.vlgmr.msrb.gmra.mxu2 %vm3909_vm6, %v11403_v59  ;;  %8101 = vmatmul.msk.bf16.vlgmr.msrb.gmra.mxu3 %vm3909_vm6, %v11403_v59  ;;  %v9484_v56 = vld [vmem:[#allocation2 + $0x1ac] sm:$0xf] }
 0x360   :  { %v3253_v42 = vpack.c.bf16 %v3212_v20, %v3211_v18  ;;  %v3139_v12 = vadd.f32 %v3138_v1, %v11367_v16  ;;  %v3158_v53 = vadd.f32 %v3157_v63, %v11367_v16  ;;  %v8065_v16 = vld [vmem:[#allocation2 + $0x2a8] sm:$0xf]  ;;  %v7942_v8 = vor.u32 %v9484_v56, %v7939_v25  ;;  %v9461_v25 = vld [vmem:[#allocation2 + $0xec] sm:$0xf0]  ;;  %v9453_v56 = vld [vmem:[#allocation2 + $0xb4] sm:$0xf] }
 0x361   :  { %v7873_v63 = vld [vmem:[#allocation2 + $0x128] sm:$0xf]  ;;  %v8011_v19 = vld [vmem:[#allocation2 + $0x270] sm:$0xf0] }
 0x362   :  { %3285 = vst [vmem:[#allocation2 + $0x2b0] sm:$0xff] %v3253_v42  ;;  %v3181_v13 = vmax.f32 %v3139_v12, 0.0  ;;  %v3182_v6 = vmax.f32 %v3158_v53, 0.0  ;;  %4073 = vmatpush.bf16.msra.mxu0 %v7866_v35  ;;  %4092 = vmatpush.bf16.msra.mxu1 %v7870_v28  ;;  %v9468_v35 = vld [vmem:[#allocation2 + $0x12c] sm:$0xf]  ;;  %v7874_v42 = vor.u32 %v9476_v15, %v7873_v63 }
 0x363   :  { %v3107_v31 = vpop.f32.mrf.mxu0  ;;  %v3126_v14 = vpop.f32.mrf.mxu1  ;;  %v7878_v12 = vor.u32 %v9468_v35, %v7875_v29  ;;  %v9445_v29 = vld [vmem:[#allocation2 + $0x6c] sm:$0xf0] }
 0x364   :  { %v3238_v32 = vpack.c.bf16 %v3182_v6, %v3181_v13  ;;  %v3108_v45 = vadd.f32 %v3107_v31, %v11361_v30  ;;  %v3127_v58 = vadd.f32 %v3126_v14, %v11361_v30  ;;  %v9460_v31 = vld [vmem:[#allocation2 + $0xe4] sm:$0xf0]  ;;  %v7811_v14 = vld [vmem:[#allocation2 + $0xe8] sm:$0xf0] }
 0x365   :  { %v9524_v36 = vld [vmem:[#allocation2 + $0x2e4] sm:$0xf0]  ;;  %v8067_v47 = vld [vmem:[#allocation2 + $0x2e8] sm:$0xf0] }
 0x366   :  { %3270 = vst [vmem:[#allocation2 + $0x238] sm:$0xff] %v3238_v32  ;;  %v3227_v49 = vmax.f32 %v3108_v45, 0.0  ;;  %v3228_v44 = vmax.f32 %v3127_v58, 0.0  ;;  %4074 = vmatpush.bf16.msra.mxu0 %v7802_v9  ;;  %4093 = vmatpush.bf16.msra.mxu1 %v7806_v37  ;;  %v8066_v11 = vor.u32 %v9524_v36, %v8065_v16  ;;  %v8070_v17 = vor.u32 %v9516_v41, %v8067_v47  ;;  %v7809_v32 = vld [vmem:[#allocation2 + $0xa8] sm:$0xf] }
 0x367   :  { %v3140_v23 = vpop.f32.mrf.mxu2  ;;  %v3159_v33 = vpop.f32.mrf.mxu3  ;;  %v9452_v45 = vld [vmem:[#allocation2 + $0xac] sm:$0xf]  ;;  %v7810_v58 = vor.u32 %v9460_v31, %v7809_v32  ;;  %v8009_v16 = vld [vmem:[#allocation2 + $0x230] sm:$0xf]  ;;  %v8014_v41 = vor.u32 %v9501_v38, %v8011_v19  ;;  %v9444_v47 = vld [vmem:[#allocation2 + $0x64] sm:$0xf0] }
 0x368   :  { %v3261_v0 = vpack.c.bf16 %v3228_v44, %v3227_v49  ;;  %v3141_v55 = vadd.f32 %v3140_v23, %v11371_v22  ;;  %v3160_v2 = vadd.f32 %v3159_v33, %v11371_v22  ;;  %4108 = vmatpush.bf16.msra.mxu2 %v8066_v11  ;;  %4127 = vmatpush.bf16.msra.mxu3 %v8070_v17  ;;  %v7937_v22 = vld [vmem:[#allocation2 + $0x1a8] sm:$0xf]  ;;  %v7747_v49 = vld [vmem:[#allocation2 + $0x68] sm:$0xf0]  ;;  %v9493_v23 = vld [vmem:[#allocation2 + $0x1ec] sm:$0xf0] }
 0x369   :  { %v7938_v27 = vor.u32 %v9492_v61, %v7937_v22  ;;  %v8073_v21 = vld [vmem:[#allocation2 + $0x2b0] sm:$0xf]  ;;  %v9517_v28 = vld [vmem:[#allocation2 + $0x2b4] sm:$0xf]  ;;  %v7814_v37 = vor.u32 %v9452_v45, %v7811_v14  ;;  %v7745_v17 = vld [vmem:[#allocation2 + $0x28] sm:$0xf]  ;;  %v7750_v48 = vor.u32 %v9436_v40, %v7747_v49 }
 0x36a   :  { %3293 = vst [vmem:[#allocation2 + $0x2f0] sm:$0xff] %v3261_v0  ;;  %v3197_v4 = vmax.f32 %v3141_v55, 0.0  ;;  %v3198_v10 = vmax.f32 %v3160_v2, 0.0  ;;  %4075 = vmatpush.bf16.msra.mxu0 %v7738_v51  ;;  %4094 = vmatpush.bf16.msra.mxu1 %v7742_v46  ;;  %v7947_v33 = vld [vmem:[#allocation2 + $0x1f0] sm:$0xf0]  ;;  %v7746_v34 = vor.u32 %v9444_v47, %v7745_v17 }
 0x36b   :  { %v7945_v0 = vld [vmem:[#allocation2 + $0x1b0] sm:$0xf]  ;;  %v9485_v55 = vld [vmem:[#allocation2 + $0x1b4] sm:$0xf]  ;;  %v9494_v31 = vld [vmem:[#allocation2 + $0x1f4] sm:$0xf0] }
 0x36c   :  { %v3246_v52 = vpack.c.bf16 %v3198_v10, %v3197_v4  ;;  %4109 = vmatpush.bf16.msra.mxu2 %v8002_v57  ;;  %4128 = vmatpush.bf16.msra.mxu3 %v8006_v26  ;;  %v7946_v54 = vor.u32 %v9493_v23, %v7945_v0  ;;  %v7950_v3 = vor.u32 %v9485_v55, %v7947_v33  ;;  %v7883_v4 = vld [vmem:[#allocation2 + $0x170] sm:$0xf0]  ;;  %v7881_v10 = vld [vmem:[#allocation2 + $0x130] sm:$0xf]  ;;  %v7955_v14 = vld [vmem:[#allocation2 + $0x1f8] sm:$0xf0] }
 0x36d   :  { %8103 = vmatmul.msk.bf16.vlgmr.msra.gmra.mxu0 %vm3909_vm6, %v11403_v59  ;;  %8105 = vmatmul.msk.bf16.vlgmr.msra.gmra.mxu1 %vm3909_vm6, %v11403_v59  ;;  %v9469_v57 = vld [vmem:[#allocation2 + $0x134] sm:$0xf]  ;;  %v7817_v22 = vld [vmem:[#allocation2 + $0xb0] sm:$0xf]  ;;  %v9478_v45 = vld [vmem:[#allocation2 + $0x174] sm:$0xf0] }
 0x36e   :  { %3278 = vst [vmem:[#allocation2 + $0x278] sm:$0xff] %v3246_v52  ;;  %v7886_v61 = vor.u32 %v9469_v57, %v7883_v4  ;;  %v7819_v52 = vld [vmem:[#allocation2 + $0xf0] sm:$0xf0]  ;;  %v9454_v47 = vld [vmem:[#allocation2 + $0xbc] sm:$0xf] }
 0x36f   :  { %v3143_v18 = vpop.f32.mrf.mxu2  ;;  %v3162_v20 = vpop.f32.mrf.mxu3  ;;  %8100 = vmatmul.msk.bf16.gmra.mxu2 %vm3909_vm6, %v11426_v24  ;;  %8102 = vmatmul.msk.bf16.gmra.mxu3 %vm3909_vm6, %v11426_v24  ;;  %v7763_v17 = vld [vmem:[#allocation2 + $0x78] sm:$0xf0]  ;;  %v7761_v40 = vld [vmem:[#allocation2 + $0x38] sm:$0xf] }
 0x370   :  { %v3144_v62 = vadd.f32 %v3143_v18, %v11359_v50  ;;  %v3163_v1 = vadd.f32 %v3162_v20, %v11359_v50  ;;  %4110 = vmatpush.bf16.msra.mxu2 %v7938_v27  ;;  %4129 = vmatpush.bf16.msra.mxu3 %v7942_v8  ;;  %v9509_v50 = vld [vmem:[#allocation2 + $0x26c] sm:$0xf0]  ;;  %v7818_v27 = vor.u32 %v9461_v25, %v7817_v22  ;;  %v7755_v18 = vld [vmem:[#allocation2 + $0x70] sm:$0xf0]  ;;  %v9438_v23 = vld [vmem:[#allocation2 + $0x3c] sm:$0xf] }
 0x371   :  { %v9525_v53 = vld [vmem:[#allocation2 + $0x2ec] sm:$0xf0]  ;;  %v8075_v43 = vld [vmem:[#allocation2 + $0x2f0] sm:$0xf0]  ;;  %v8010_v36 = vor.u32 %v9509_v50, %v8009_v16  ;;  %v7822_v8 = vor.u32 %v9453_v56, %v7819_v52  ;;  %v9486_v50 = vld [vmem:[#allocation2 + $0x1bc] sm:$0xf] }
 0x372   :  { %v3213_v7 = vmax.f32 %v3144_v62, 0.0  ;;  %v3214_v13 = vmax.f32 %v3163_v1, 0.0  ;;  %v8074_v6 = vor.u32 %v9525_v53, %v8073_v21  ;;  %v8078_v5 = vor.u32 %v9517_v28, %v8075_v43  ;;  %v7753_v21 = vld [vmem:[#allocation2 + $0x30] sm:$0xf]  ;;  %v9470_v16 = vld [vmem:[#allocation2 + $0x13c] sm:$0xf] }
 0x373   :  { %v7754_v28 = vor.u32 %v9445_v29, %v7753_v21  ;;  %v7958_v32 = vor.u32 %v9486_v50, %v7955_v14 }
 0x374   :  { %v3254_v9 = vpack.c.bf16 %v3214_v13, %v3213_v7  ;;  %4111 = vmatpush.bf16.msra.mxu2 %v7874_v42  ;;  %4130 = vmatpush.bf16.msra.mxu3 %v7878_v12  ;;  %v9437_v42 = vld [vmem:[#allocation2 + $0x34] sm:$0xf]  ;;  %v8017_v7 = vld [vmem:[#allocation2 + $0x238] sm:$0xf]  ;;  %v9502_v13 = vld [vmem:[#allocation2 + $0x23c] sm:$0xf] }
 0x375   :  { %4146 = vmatpush.bf16.msrb.mxu0 %v8074_v6  ;;  %4165 = vmatpush.bf16.msrb.mxu1 %v8078_v5  ;;  %v9510_v12 = vld [vmem:[#allocation2 + $0x274] sm:$0xf0]  ;;  %v8019_v53 = vld [vmem:[#allocation2 + $0x278] sm:$0xf0]  ;;  %v7758_v43 = vor.u32 %v9437_v42, %v7755_v18 }
 0x376   :  { %3286 = vst [vmem:[#allocation2 + $0x2b8] sm:$0xff] %v3254_v9  ;;  %v8018_v6 = vor.u32 %v9510_v12, %v8017_v7  ;;  %v8022_v5 = vor.u32 %v9502_v13, %v8019_v53  ;;  %v7953_v9 = vld [vmem:[#allocation2 + $0x1b8] sm:$0xf] }
 0x377   :  { %v3145_v39 = vpop.f32.mrf.mxu2  ;;  %v3164_v60 = vpop.f32.mrf.mxu3  ;;  %v7954_v19 = vor.u32 %v9494_v31, %v7953_v9 }
 0x378   :  { %v3146_v44 = vadd.f32 %v3145_v39, %v11361_v30  ;;  %v3165_v11 = vadd.f32 %v3164_v60, %v11361_v30  ;;  %4112 = vmatpush.bf16.msra.mxu2 %v7810_v58  ;;  %4131 = vmatpush.bf16.msra.mxu3 %v7814_v37  ;;  %v9477_v30 = vld [vmem:[#allocation2 + $0x16c] sm:$0xf0]  ;;  %v7891_v58 = vld [vmem:[#allocation2 + $0x178] sm:$0xf0]  ;;  %v7889_v37 = vld [vmem:[#allocation2 + $0x138] sm:$0xf] }
 0x379   :  { %4147 = vmatpush.bf16.msrb.mxu0 %v8010_v36  ;;  %4166 = vmatpush.bf16.msrb.mxu1 %v8014_v41  ;;  %v7882_v26 = vor.u32 %v9477_v30, %v7881_v10  ;;  %v7890_v38 = vor.u32 %v9478_v45, %v7889_v37  ;;  %v7894_v39 = vor.u32 %v9470_v16, %v7891_v58  ;;  %v9462_v60 = vld [vmem:[#allocation2 + $0xf4] sm:$0xf0]  ;;  %v7827_v36 = vld [vmem:[#allocation2 + $0xf8] sm:$0xf0] }
 0x37a   :  { %v3229_v51 = vmax.f32 %v3146_v44, 0.0  ;;  %v3230_v46 = vmax.f32 %v3165_v11, 0.0  ;;  %v7825_v41 = vld [vmem:[#allocation2 + $0xb8] sm:$0xf]  ;;  %v7830_v44 = vor.u32 %v9454_v47, %v7827_v36 }
 0x37b   :  { %v7826_v49 = vor.u32 %v9462_v60, %v7825_v41  ;;  %v9446_v11 = vld [vmem:[#allocation2 + $0x74] sm:$0xf0] }
 0x37c   :  { %v3262_v2 = vpack.c.bf16 %v3230_v46, %v3229_v51  ;;  %4113 = vmatpush.bf16.msra.mxu2 %v7746_v34  ;;  %4132 = vmatpush.bf16.msra.mxu3 %v7750_v48  ;;  %v7762_v33 = vor.u32 %v9446_v11, %v7761_v40  ;;  %v7766_v51 = vor.u32 %v9438_v23, %v7763_v17 }
 0x37d   :  { %8104 = vmatmul.msk.bf16.gmra.mxu0 %vm3909_vm6, %v11426_v24  ;;  %8106 = vmatmul.msk.bf16.gmra.mxu1 %vm3909_vm6, %v11426_v24  ;;  %v8081_v15 = vld [vmem:[#allocation2 + $0x2b8] sm:$0xf]  ;;  %v9518_v62 = vld [vmem:[#allocation2 + $0x2bc] sm:$0xf] }
 0x37e   :  { %3294 = vst [vmem:[#allocation2 + $0x2f8] sm:$0xff] %v3262_v2  ;;  %4148 = vmatpush.bf16.msrb.mxu0 %v7946_v54  ;;  %4167 = vmatpush.bf16.msrb.mxu1 %v7950_v3 }
 0x37f   :  { %8107 = vmatmul.msk.bf16.vlgmr.msra.gmra.mxu2 %vm3909_vm6, %v11403_v59  ;;  %8109 = vmatmul.msk.bf16.vlgmr.msra.gmra.mxu3 %vm3909_vm6, %v11403_v59 }
 0x382   :  { %4149 = vmatpush.bf16.msrb.mxu0 %v7882_v26  ;;  %4168 = vmatpush.bf16.msrb.mxu1 %v7886_v61  ;;  %v11515_v46 = vpop.permute.xlu1 %3416 }
 0x385   :  { %v9526_v20 = vld [vmem:[#allocation2 + $0x2f4] sm:$0xf0]  ;;  %v8083_v1 = vld [vmem:[#allocation2 + $0x2f8] sm:$0xf0] }
 0x386   :  { %4150 = vmatpush.bf16.msrb.mxu0 %v7818_v27  ;;  %4169 = vmatpush.bf16.msrb.mxu1 %v7822_v8  ;;  %v8082_v63 = vor.u32 %v9526_v20, %v8081_v15  ;;  %v8086_v35 = vor.u32 %v9518_v62, %v8083_v1 }
 0x388   :  { %4184 = vmatpush.bf16.msrb.mxu2 %v8082_v63  ;;  %4203 = vmatpush.bf16.msrb.mxu3 %v8086_v35 }
 0x38a   :  { %4151 = vmatpush.bf16.msrb.mxu0 %v7754_v28  ;;  %4170 = vmatpush.bf16.msrb.mxu1 %v7758_v43  ;;  %v11525_v54 = vpop.permute.xlu1 %3406 }
 0x38c   :  { %4185 = vmatpush.bf16.msrb.mxu2 %v8018_v6  ;;  %4204 = vmatpush.bf16.msrb.mxu3 %v8022_v5 }
 0x38d   :  { %8111 = vmatmul.msk.bf16.vlgmr.msrb.gmra.mxu0 %vm3909_vm6, %v11403_v59  ;;  %8113 = vmatmul.msk.bf16.vlgmr.msrb.gmra.mxu1 %vm3909_vm6, %v11403_v59 }
 0x38f   :  { %8108 = vmatmul.msk.bf16.gmra.mxu2 %vm3909_vm6, %v11426_v24  ;;  %8110 = vmatmul.msk.bf16.gmra.mxu3 %vm3909_vm6, %v11426_v24 }
 0x390   :  { %4186 = vmatpush.bf16.msrb.mxu2 %v7954_v19  ;;  %4205 = vmatpush.bf16.msrb.mxu3 %v7958_v32 }
 0x391   :  { %v11517_v0 = vpop.permute.xlu2 %3401 }
 0x394   :  { %4187 = vmatpush.bf16.msrb.mxu2 %v7890_v38  ;;  %4206 = vmatpush.bf16.msrb.mxu3 %v7894_v39 }
 0x398   :  { %4188 = vmatpush.bf16.msrb.mxu2 %v7826_v49  ;;  %4207 = vmatpush.bf16.msrb.mxu3 %v7830_v44 }
 0x39c   :  { %4189 = vmatpush.bf16.msrb.mxu2 %v7762_v33  ;;  %4208 = vmatpush.bf16.msrb.mxu3 %v7766_v51 }
 0x39d   :  { %8112 = vmatmul.msk.bf16.gmra.mxu0 %vm3909_vm6, %v11426_v24  ;;  %8114 = vmatmul.msk.bf16.gmra.mxu1 %vm3909_vm6, %v11426_v24  ;;  %v11529_v52 = vpop.permute.xlu0 %3411 }
 0x39f   :  { %8115 = vmatmul.msk.bf16.vlgmr.msrb.gmra.mxu2 %vm3909_vm6, %v11403_v59  ;;  %8117 = vmatmul.msk.bf16.vlgmr.msrb.gmra.mxu3 %vm3909_vm6, %v11403_v59 }
 0x3a6   :  { %v3925_v34 = vpop.f32.mrf.mxu0  ;;  %v3944_v48 = vpop.f32.mrf.mxu1 }
 0x3a7   :  { %v3926_v55 = vadd.f32 %v3925_v34, %v11517_v0  ;;  %v3945_v2 = vadd.f32 %v3944_v48, %v11517_v0 }
 0x3a9   :  { %v4220_v30 = vmax.f32 %v3926_v55, 0.0  ;;  %v4221_v4 = vmax.f32 %v3945_v2, 0.0 }
 0x3ab   :  { %v4284_v26 = vpack.c.bf16 %v4221_v4, %v4220_v30 }
 0x3ad   :  { %4316 = vst [vmem:[#allocation2 + $0x300] sm:$0xff] %v4284_v26 }
 0x3ae   :  { %v3927_v3 = vpop.f32.mrf.mxu0  ;;  %v3946_v59 = vpop.f32.mrf.mxu1 }
 0x3af   :  { %8116 = vmatmul.msk.bf16.gmra.mxu2 %vm3909_vm6, %v11426_v24  ;;  %8118 = vmatmul.msk.bf16.gmra.mxu3 %vm3909_vm6, %v11426_v24  ;;  %v3928_v10 = vadd.f32 %v3927_v3, %v11525_v54  ;;  %v3947_v57 = vadd.f32 %v3946_v59, %v11525_v54 }
 0x3b1   :  { %v4236_v61 = vmax.f32 %v3928_v10, 0.0  ;;  %v4237_v25 = vmax.f32 %v3947_v57, 0.0 }
 0x3b3   :  { %v4292_v24 = vpack.c.bf16 %v4237_v25, %v4236_v61 }
 0x3b4   :  { %v8513_v59 = vld [vmem:[#allocation2 + $0x300] sm:$0xf]  ;;  %v9625_v30 = vld [vmem:[#allocation2 + $0x304] sm:$0xf] }
 0x3b5   :  { %4324 = vst [vmem:[#allocation2 + $0x340] sm:$0xff] %v4292_v24  ;;  %v9617_v24 = vld [vmem:[#allocation2 + $0x2bc] sm:$0xf0] }
 0x3b7   :  { %v3930_v22 = vpop.f32.mrf.mxu0  ;;  %v3949_v56 = vpop.f32.mrf.mxu1 }
 0x3b8   :  { %v3931_v27 = vadd.f32 %v3930_v22, %v11529_v52  ;;  %v3950_v8 = vadd.f32 %v3949_v56, %v11529_v52  ;;  %v8451_v22 = vld [vmem:[#allocation2 + $0x2c0] sm:$0xf0] }
 0x3ba   :  { %v4252_v15 = vmax.f32 %v3931_v27, 0.0  ;;  %v4253_v29 = vmax.f32 %v3950_v8, 0.0  ;;  %v8449_v8 = vld [vmem:[#allocation2 + $0x280] sm:$0xf] }
 0x3bc   :  { %v4300_v18 = vpack.c.bf16 %v4253_v29, %v4252_v15  ;;  %v9633_v23 = vld [vmem:[#allocation2 + $0x33c] sm:$0xf0]  ;;  %v8515_v33 = vld [vmem:[#allocation2 + $0x340] sm:$0xf0]  ;;  %v8450_v29 = vor.u32 %v9617_v24, %v8449_v8 }
 0x3bd   :  { %v8514_v57 = vor.u32 %v9633_v23, %v8513_v59  ;;  %v8518_v26 = vor.u32 %v9625_v30, %v8515_v33  ;;  %v9609_v15 = vld [vmem:[#allocation2 + $0x284] sm:$0xf]  ;;  %v8257_v23 = vld [vmem:[#allocation2 + $0x100] sm:$0xf] }
 0x3be   :  { %4332 = vst [vmem:[#allocation2 + $0x380] sm:$0xff] %v4300_v18  ;;  %v8454_v18 = vor.u32 %v9609_v15, %v8451_v22  ;;  %v9561_v33 = vld [vmem:[#allocation2 + $0x104] sm:$0xf]  ;;  %v9553_v59 = vld [vmem:[#allocation2 + $0xbc] sm:$0xf0] }
 0x3bf   :  { %v3932_v20 = vpop.f32.mrf.mxu0  ;;  %v3951_v62 = vpop.f32.mrf.mxu1  ;;  %v8195_v30 = vld [vmem:[#allocation2 + $0xc0] sm:$0xf0] }
 0x3c0   :  { %v3933_v1 = vadd.f32 %v3932_v20, %v11515_v46  ;;  %v3952_v63 = vadd.f32 %v3951_v62, %v11515_v46 }
 0x3c2   :  { %v3963_v35 = vpop.f32.mrf.mxu2  ;;  %v3982_v21 = vpop.f32.mrf.mxu3  ;;  %v4268_v53 = vmax.f32 %v3933_v1, 0.0  ;;  %v4269_v28 = vmax.f32 %v3952_v63, 0.0  ;;  %v9601_v1 = vld [vmem:[#allocation2 + $0x23c] sm:$0xf0]  ;;  %v8387_v63 = vld [vmem:[#allocation2 + $0x240] sm:$0xf0] }
 0x3c3   :  { %v3964_v42 = vadd.f32 %v3963_v35, %v11517_v0  ;;  %v3983_v12 = vadd.f32 %v3982_v21, %v11517_v0 }
 0x3c4   :  { %v4308_v13 = vpack.c.bf16 %v4269_v28, %v4268_v53 }
 0x3c5   :  { %v4222_v43 = vmax.f32 %v3964_v42, 0.0  ;;  %v4223_v7 = vmax.f32 %v3983_v12, 0.0  ;;  %v8577_v60 = vld [vmem:[#allocation2 + $0x380] sm:$0xf]  ;;  %v9641_v47 = vld [vmem:[#allocation2 + $0x384] sm:$0xf] }
 0x3c6   :  { %4340 = vst [vmem:[#allocation2 + $0x3c0] sm:$0xff] %v4308_v13 }
 0x3c7   :  { %v4285_v6 = vpack.c.bf16 %v4223_v7, %v4222_v43  ;;  %v8385_v43 = vld [vmem:[#allocation2 + $0x200] sm:$0xf]  ;;  %v9593_v7 = vld [vmem:[#allocation2 + $0x204] sm:$0xf] }
 0x3c9   :  { %4317 = vst [vmem:[#allocation2 + $0x308] sm:$0xff] %v4285_v6 }
 0x3ca   :  { %v4001_v5 = vpop.f32.mrf.mxu0  ;;  %v4020_v31 = vpop.f32.mrf.mxu1 }
 0x3cb   :  { %v3965_v14 = vpop.f32.mrf.mxu2  ;;  %v3984_v9 = vpop.f32.mrf.mxu3  ;;  %v4002_v50 = vadd.f32 %v4001_v5, %v11517_v0  ;;  %v4021_v19 = vadd.f32 %v4020_v31, %v11517_v0  ;;  %v8386_v5 = vor.u32 %v9601_v1, %v8385_v43  ;;  %v8390_v31 = vor.u32 %v9593_v7, %v8387_v63  ;;  %v8129_v43 = vld [vmem:[#allocation2] sm:$0xf]  ;;  %v9529_v7 = vld [vmem:[#allocation2 + $0x4] sm:$0xf] }
 0x3cc   :  { %v3966_v32 = vadd.f32 %v3965_v14, %v11525_v54  ;;  %v3985_v45 = vadd.f32 %v3984_v9, %v11525_v54 }
 0x3cd   :  { %v4224_v58 = vmax.f32 %v4002_v50, 0.0  ;;  %v4225_v37 = vmax.f32 %v4021_v19, 0.0  ;;  %v9649_v41 = vld [vmem:[#allocation2 + $0x3bc] sm:$0xf0]  ;;  %v8579_v49 = vld [vmem:[#allocation2 + $0x3c0] sm:$0xf0] }
 0x3ce   :  { %v4238_v16 = vmax.f32 %v3966_v32, 0.0  ;;  %v4239_v38 = vmax.f32 %v3985_v45, 0.0  ;;  %v8578_v44 = vor.u32 %v9649_v41, %v8577_v60  ;;  %v8582_v11 = vor.u32 %v9641_v47, %v8579_v49  ;;  %v9585_v50 = vld [vmem:[#allocation2 + $0x1bc] sm:$0xf0]  ;;  %v8323_v19 = vld [vmem:[#allocation2 + $0x1c0] sm:$0xf0] }
 0x3cf   :  { %v4286_v39 = vpack.c.bf16 %v4225_v37, %v4224_v58  ;;  %v8321_v58 = vld [vmem:[#allocation2 + $0x180] sm:$0xf]  ;;  %v9577_v37 = vld [vmem:[#allocation2 + $0x184] sm:$0xf] }
 0x3d0   :  { %v4293_v36 = vpack.c.bf16 %v4239_v38, %v4238_v16  ;;  %5156 = vmatpush.bf16.msra.mxu0 %v8578_v44  ;;  %5175 = vmatpush.bf16.msra.mxu1 %v8582_v11  ;;  %v8322_v16 = vor.u32 %v9585_v50, %v8321_v58  ;;  %v8326_v38 = vor.u32 %v9577_v37, %v8323_v19  ;;  %v8259_v41 = vld [vmem:[#allocation2 + $0x140] sm:$0xf0]  ;;  %v10075_v50 = vmov 4   ;;  %v11560_v37 = vld [vmem:[%s11852_s6] sm:$0xff] }
 0x3d1   :  { %4318 = vst [vmem:[#allocation2 + $0x310] sm:$0xff] %v4286_v39  ;;  %9967 = vset.pattern.permute.xlu1 %v10075_v50  ;;  %9966 = vset.pattern.permute.xlu0 %v10075_v50 }
 0x3d2   :  { %4325 = vst [vmem:[#allocation2 + $0x348] sm:$0xff] %v4293_v36  ;;  %v4003_v17 = vpop.f32.mrf.mxu0  ;;  %v4022_v40 = vpop.f32.mrf.mxu1  ;;  %v9569_v36 = vld [vmem:[#allocation2 + $0x13c] sm:$0xf0]  ;;  %9965 = vset.pattern.permute.xlu2 %v10075_v50 }
 0x3d3   :  { %v3968_v51 = vpop.f32.mrf.mxu2  ;;  %v3987_v34 = vpop.f32.mrf.mxu3  ;;  %v4004_v48 = vadd.f32 %v4003_v17, %v11525_v54  ;;  %v4023_v55 = vadd.f32 %v4022_v40, %v11525_v54 }
 0x3d4   :  { %v3969_v2 = vadd.f32 %v3968_v51, %v11529_v52  ;;  %v3988_v3 = vadd.f32 %v3987_v34, %v11529_v52  ;;  %5157 = vmatpush.bf16.msra.mxu0 %v8514_v57  ;;  %5176 = vmatpush.bf16.msra.mxu1 %v8518_v26  ;;  %v9545_v26 = vld [vmem:[#allocation2 + $0x84] sm:$0xf] }
 0x3d5   :  { %v4240_v4 = vmax.f32 %v4004_v48, 0.0  ;;  %v4241_v10 = vmax.f32 %v4023_v55, 0.0  ;;  %v8258_v48 = vor.u32 %v9569_v36, %v8257_v23  ;;  %v8262_v55 = vor.u32 %v9561_v33, %v8259_v41 }
 0x3d6   :  { %v4254_v61 = vmax.f32 %v3969_v2, 0.0  ;;  %v4255_v25 = vmax.f32 %v3988_v3, 0.0  ;;  %v8198_v22 = vor.u32 %v9545_v26, %v8195_v30 }
 0x3d7   :  { %v4294_v56 = vpack.c.bf16 %v4241_v10, %v4240_v4  ;;  %v8193_v10 = vld [vmem:[#allocation2 + $0x80] sm:$0xf] }
 0x3d8   :  { %v4301_v27 = vpack.c.bf16 %v4255_v25, %v4254_v61  ;;  %5158 = vmatpush.bf16.msra.mxu0 %v8450_v29  ;;  %5177 = vmatpush.bf16.msra.mxu1 %v8454_v18  ;;  %v8194_v24 = vor.u32 %v9553_v59, %v8193_v10  ;;  %v9602_v10 = vld [vmem:[#allocation2 + $0x244] sm:$0xf0] }
 0x3d9   :  { %4326 = vst [vmem:[#allocation2 + $0x350] sm:$0xff] %v4294_v56 }
 0x3da   :  { %4333 = vst [vmem:[#allocation2 + $0x388] sm:$0xff] %v4301_v27  ;;  %v4006_v20 = vpop.f32.mrf.mxu0  ;;  %v4025_v62 = vpop.f32.mrf.mxu1 }
 0x3db   :  { %v3970_v35 = vpop.f32.mrf.mxu2  ;;  %v3989_v21 = vpop.f32.mrf.mxu3  ;;  %v4007_v42 = vadd.f32 %v4006_v20, %v11529_v52  ;;  %v4026_v12 = vadd.f32 %v4025_v62, %v11529_v52  ;;  %v9537_v20 = vld [vmem:[#allocation2 + $0x3c] sm:$0xf0]  ;;  %v8131_v62 = vld [vmem:[#allocation2 + $0x40] sm:$0xf0] }
 0x3dc   :  { %v3971_v53 = vadd.f32 %v3970_v35, %v11515_v46  ;;  %v3990_v28 = vadd.f32 %v3989_v21, %v11515_v46  ;;  %5159 = vmatpush.bf16.msra.mxu0 %v8386_v5  ;;  %5178 = vmatpush.bf16.msra.mxu1 %v8390_v31  ;;  %v8130_v5 = vor.u32 %v9537_v20, %v8129_v43  ;;  %v9611_v43 = vld [vmem:[#allocation2 + $0x294] sm:$0xf] }
 0x3dd   :  { %v4256_v13 = vmax.f32 %v4007_v42, 0.0  ;;  %v4257_v6 = vmax.f32 %v4026_v12, 0.0  ;;  %v9634_v42 = vld [vmem:[#allocation2 + $0x344] sm:$0xf0]  ;;  %v8523_v12 = vld [vmem:[#allocation2 + $0x348] sm:$0xf0]  ;;  %v8134_v31 = vor.u32 %v9529_v7, %v8131_v62 }
 0x3de   :  { %v4270_v14 = vmax.f32 %v3971_v53, 0.0  ;;  %v4271_v9 = vmax.f32 %v3990_v28, 0.0  ;;  %v8329_v7 = vld [vmem:[#allocation2 + $0x188] sm:$0xf] }
 0x3df   :  { %v4302_v32 = vpack.c.bf16 %v4257_v6, %v4256_v13 }
 0x3e0   :  { %v4309_v45 = vpack.c.bf16 %v4271_v9, %v4270_v14  ;;  %5160 = vmatpush.bf16.msra.mxu0 %v8322_v16  ;;  %5179 = vmatpush.bf16.msra.mxu1 %v8326_v38  ;;  %v8521_v14 = vld [vmem:[#allocation2 + $0x308] sm:$0xf]  ;;  %v9626_v9 = vld [vmem:[#allocation2 + $0x30c] sm:$0xf] }
 0x3e1   :  { %4334 = vst [vmem:[#allocation2 + $0x390] sm:$0xff] %v4302_v32  ;;  %v8585_v61 = vld [vmem:[#allocation2 + $0x388] sm:$0xf]  ;;  %v9642_v25 = vld [vmem:[#allocation2 + $0x38c] sm:$0xf]  ;;  %v8526_v58 = vor.u32 %v9626_v9, %v8523_v12 }
 0x3e2   :  { %4341 = vst [vmem:[#allocation2 + $0x3c8] sm:$0xff] %v4309_v45  ;;  %v4008_v39 = vpop.f32.mrf.mxu0  ;;  %v4027_v60 = vpop.f32.mrf.mxu1  ;;  %v8522_v45 = vor.u32 %v9634_v42, %v8521_v14  ;;  %v9618_v38 = vld [vmem:[#allocation2 + $0x2c4] sm:$0xf0]  ;;  %v8331_v12 = vld [vmem:[#allocation2 + $0x1c8] sm:$0xf0] }
 0x3e3   :  { %v4009_v47 = vadd.f32 %v4008_v39, %v11515_v46  ;;  %v4028_v49 = vadd.f32 %v4027_v60, %v11515_v46  ;;  %v4039_v44 = vpop.f32.mrf.mxu2  ;;  %v4058_v11 = vpop.f32.mrf.mxu3  ;;  %v8459_v39 = vld [vmem:[#allocation2 + $0x2c8] sm:$0xf0]  ;;  %v9586_v42 = vld [vmem:[#allocation2 + $0x1c4] sm:$0xf0] }
 0x3e4   :  { %v4040_v17 = vadd.f32 %v4039_v44, %v11517_v0  ;;  %v4059_v40 = vadd.f32 %v4058_v11, %v11517_v0  ;;  %5161 = vmatpush.bf16.msra.mxu0 %v8258_v48  ;;  %5180 = vmatpush.bf16.msra.mxu1 %v8262_v55  ;;  %v8457_v44 = vld [vmem:[#allocation2 + $0x288] sm:$0xf]  ;;  %v9610_v11 = vld [vmem:[#allocation2 + $0x28c] sm:$0xf]  ;;  %v9635_v48 = vld [vmem:[#allocation2 + $0x34c] sm:$0xf0]  ;;  %v8330_v9 = vor.u32 %v9586_v42, %v8329_v7 }
 0x3e5   :  { %v4272_v51 = vmax.f32 %v4009_v47, 0.0  ;;  %v4273_v34 = vmax.f32 %v4028_v49, 0.0  ;;  %v8531_v55 = vld [vmem:[#allocation2 + $0x350] sm:$0xf0]  ;;  %v8273_v7 = vld [vmem:[#allocation2 + $0x110] sm:$0xf] }
 0x3e6   :  { %v4226_v2 = vmax.f32 %v4040_v17, 0.0  ;;  %v4227_v3 = vmax.f32 %v4059_v40, 0.0 }
 0x3e7   :  { %v4310_v4 = vpack.c.bf16 %v4273_v34, %v4272_v51  ;;  %v8458_v51 = vor.u32 %v9618_v38, %v8457_v44  ;;  %v8462_v34 = vor.u32 %v9610_v11, %v8459_v39  ;;  %v8401_v44 = vld [vmem:[#allocation2 + $0x210] sm:$0xf]  ;;  %v9595_v11 = vld [vmem:[#allocation2 + $0x214] sm:$0xf] }
 0x3e8   :  { %v4287_v57 = vpack.c.bf16 %v4227_v3, %v4226_v2  ;;  %5162 = vmatpush.bf16.msra.mxu0 %v8194_v24  ;;  %5181 = vmatpush.bf16.msra.mxu1 %v8198_v22  ;;  %v8593_v60 = vld [vmem:[#allocation2 + $0x390] sm:$0xf]  ;;  %v9643_v47 = vld [vmem:[#allocation2 + $0x394] sm:$0xf]  ;;  %v4480_v2 = vld [vmem:[%s11845_s8] sm:$0xff] }
 0x3e9   :  { %4342 = vst [vmem:[#allocation2 + $0x3d0] sm:$0xff] %v4310_v4  ;;  %v9650_v56 = vld [vmem:[#allocation2 + $0x3c4] sm:$0xf0]  ;;  %v8587_v27 = vld [vmem:[#allocation2 + $0x3c8] sm:$0xf0]  ;;  %4486 = vperm.xlu1 %9967, %v4480_v2  }
 0x3ea   :  { %4319 = vst [vmem:[#allocation2 + $0x318] sm:$0xff] %v4287_v57  ;;  %v4077_v8 = vpop.f32.mrf.mxu0  ;;  %v4096_v15 = vpop.f32.mrf.mxu1  ;;  %v8586_v29 = vor.u32 %v9650_v56, %v8585_v61  ;;  %v8590_v18 = vor.u32 %v9642_v25, %v8587_v27  ;;  %v8395_v57 = vld [vmem:[#allocation2 + $0x248] sm:$0xf0]  ;;  %v8529_v25 = vld [vmem:[#allocation2 + $0x310] sm:$0xf] }
 0x3eb   :  { %v4041_v1 = vpop.f32.mrf.mxu2  ;;  %v4060_v63 = vpop.f32.mrf.mxu3  ;;  %v4078_v35 = vadd.f32 %v4077_v8, %v11517_v0  ;;  %v4097_v21 = vadd.f32 %v4096_v15, %v11517_v0  ;;  %v9627_v24 = vld [vmem:[#allocation2 + $0x314] sm:$0xf]  ;;  %v8393_v27 = vld [vmem:[#allocation2 + $0x208] sm:$0xf]  ;;  %v9594_v8 = vld [vmem:[#allocation2 + $0x20c] sm:$0xf]  ;;  %v8530_v15 = vor.u32 %v9635_v48, %v8529_v25 }
 0x3ec   :  { %v4042_v53 = vadd.f32 %v4041_v1, %v11525_v54  ;;  %v4061_v28 = vadd.f32 %v4060_v63, %v11525_v54  ;;  %5194 = vmatpush.bf16.msra.mxu2 %v8586_v29  ;;  %5213 = vmatpush.bf16.msra.mxu3 %v8590_v18  ;;  %v8534_v29 = vor.u32 %v9627_v24, %v8531_v55  ;;  %v9619_v63 = vld [vmem:[#allocation2 + $0x2cc] sm:$0xf0]  ;;  %v9579_v25 = vld [vmem:[#allocation2 + $0x194] sm:$0xf]  ;;  %v8201_v24 = vld [vmem:[#allocation2 + $0x88] sm:$0xf] }
 0x3ed   :  { %v4228_v13 = vmax.f32 %v4078_v35, 0.0  ;;  %v4229_v6 = vmax.f32 %v4097_v21, 0.0  ;;  %5163 = vmatpush.bf16.msra.mxu0 %v8130_v5  ;;  %5182 = vmatpush.bf16.msra.mxu1 %v8134_v31  ;;  %v8394_v62 = vor.u32 %v9602_v10, %v8393_v27  ;;  %v8398_v1 = vor.u32 %v9594_v8, %v8395_v57  ;;  %v8467_v35 = vld [vmem:[#allocation2 + $0x2d0] sm:$0xf0]  ;;  %v9554_v10 = vld [vmem:[#allocation2 + $0xc4] sm:$0xf0] }
 0x3ee   :  { %v4242_v19 = vmax.f32 %v4042_v53, 0.0  ;;  %v4243_v32 = vmax.f32 %v4061_v28, 0.0  ;;  %v8465_v28 = vld [vmem:[#allocation2 + $0x290] sm:$0xf]  ;;  %v8470_v5 = vor.u32 %v9611_v43, %v8467_v35  ;;  %v8203_v57 = vld [vmem:[#allocation2 + $0xc8] sm:$0xf0] }
 0x3ef   :  { %v4288_v16 = vpack.c.bf16 %v4229_v6, %v4228_v13  ;;  %v9578_v13 = vld [vmem:[#allocation2 + $0x18c] sm:$0xf]  ;;  %v8466_v6 = vor.u32 %v9619_v63, %v8465_v28 }
 0x3f0   :  { %v4295_v36 = vpack.c.bf16 %v4243_v32, %v4242_v19  ;;  %5195 = vmatpush.bf16.msra.mxu2 %v8522_v45  ;;  %5214 = vmatpush.bf16.msra.mxu3 %v8526_v58  ;;  %v9651_v41 = vld [vmem:[#allocation2 + $0x3cc] sm:$0xf0]  ;;  %v8595_v49 = vld [vmem:[#allocation2 + $0x3d0] sm:$0xf0]  ;;  %v8334_v50 = vor.u32 %v9578_v13, %v8331_v12  ;;  %v9538_v12 = vld [vmem:[#allocation2 + $0x44] sm:$0xf0] }
 0x3f1   :  { %4320 = vst [vmem:[#allocation2 + $0x320] sm:$0xff] %v4288_v16  ;;  %v8594_v17 = vor.u32 %v9651_v41, %v8593_v60  ;;  %v8598_v40 = vor.u32 %v9643_v47, %v8595_v49  ;;  %5164 = vmatmul.bf16.vlgmr.msra.gmra.mxu0 %v11560_v37  ;;  %5183 = vmatmul.bf16.vlgmr.msra.gmra.mxu1 %v11560_v37  ;;  %v9603_v19 = vld [vmem:[#allocation2 + $0x24c] sm:$0xf0]  ;;  %v8403_v32 = vld [vmem:[#allocation2 + $0x250] sm:$0xf0] }
 0x3f2   :  { %4327 = vst [vmem:[#allocation2 + $0x358] sm:$0xff] %v4295_v36  ;;  %v4079_v23 = vpop.f32.mrf.mxu0  ;;  %v4098_v33 = vpop.f32.mrf.mxu1  ;;  %v4483_v45 = vld [vmem:[%s11845_s8 + $0x18] sm:$0xff]  ;;  %v9570_v60 = vld [vmem:[#allocation2 + $0x144] sm:$0xf0]  ;;  %v8267_v36 = vld [vmem:[#allocation2 + $0x148] sm:$0xf0] }
 0x3f3   :  { %v4044_v3 = vpop.f32.mrf.mxu2  ;;  %v4063_v59 = vpop.f32.mrf.mxu3  ;;  %v4080_v30 = vadd.f32 %v4079_v23, %v11525_v54  ;;  %v4099_v4 = vadd.f32 %v4098_v33, %v11525_v54  ;;  %5232 = vmatpush.bf16.msrb.mxu0 %v8594_v17  ;;  %5251 = vmatpush.bf16.msrb.mxu1 %v8598_v40  ;;  %v8265_v49 = vld [vmem:[#allocation2 + $0x108] sm:$0xf]  ;;  %v9562_v23 = vld [vmem:[#allocation2 + $0x10c] sm:$0xf]  ;;  %v8402_v33 = vor.u32 %v9603_v19, %v8401_v44  ;;  %v9563_v13 = vld [vmem:[#allocation2 + $0x114] sm:$0xf] }
 0x3f4   :  { %v4045_v26 = vadd.f32 %v4044_v3, %v11529_v52  ;;  %v4064_v61 = vadd.f32 %v4063_v59, %v11529_v52  ;;  %5196 = vmatpush.bf16.msra.mxu2 %v8458_v51  ;;  %5215 = vmatpush.bf16.msra.mxu3 %v8462_v34  ;;  %v8406_v51 = vor.u32 %v9595_v11, %v8403_v32  ;;  %v9587_v34 = vld [vmem:[#allocation2 + $0x1cc] sm:$0xf0]  ;;  %v11581_v59 = vld [vmem:[%s11852_s6 + $0x8] sm:$0xff] }
 0x3f5   :  { %v4244_v22 = vmax.f32 %v4080_v30, 0.0  ;;  %v4245_v56 = vmax.f32 %v4099_v4, 0.0  ;;  %4501 = vperm.xlu0 %9966, %v4483_v45   ;;  %v8266_v2 = vor.u32 %v9570_v60, %v8265_v49  ;;  %v8270_v3 = vor.u32 %v9562_v23, %v8267_v36  ;;  %v8339_v30 = vld [vmem:[#allocation2 + $0x1d0] sm:$0xf0] }
 0x3f6   :  { %v4258_v18 = vmax.f32 %v4045_v26, 0.0  ;;  %v4259_v20 = vmax.f32 %v4064_v61, 0.0  ;;  %v8337_v61 = vld [vmem:[#allocation2 + $0x190] sm:$0xf]  ;;  %v8342_v27 = vor.u32 %v9579_v25, %v8339_v30  ;;  %v8211_v60 = vld [vmem:[#allocation2 + $0xd0] sm:$0xf0] }
 0x3f7   :  { %v4296_v21 = vpack.c.bf16 %v4245_v56, %v4244_v22  ;;  %5233 = vmatpush.bf16.msrb.mxu0 %v8530_v15  ;;  %5252 = vmatpush.bf16.msrb.mxu1 %v8534_v29  ;;  %v9546_v22 = vld [vmem:[#allocation2 + $0x8c] sm:$0xf]  ;;  %v8338_v56 = vor.u32 %v9587_v34, %v8337_v61  ;;  %v8202_v29 = vor.u32 %v9554_v10, %v8201_v24  ;;  %v9539_v30 = vld [vmem:[#allocation2 + $0x4c] sm:$0xf0]  ;;  %v4481_v10 = vld [vmem:[%s11845_s8 + $0x8] sm:$0xff] }
 0x3f8   :  { %v4303_v53 = vpack.c.bf16 %v4259_v20, %v4258_v18  ;;  %5197 = vmatpush.bf16.msra.mxu2 %v8394_v62  ;;  %5216 = vmatpush.bf16.msra.mxu3 %v8398_v1  ;;  %v8206_v18 = vor.u32 %v9546_v22, %v8203_v57  ;;  %v9571_v20 = vld [vmem:[#allocation2 + $0x14c] sm:$0xf0]  ;;  %v8275_v62 = vld [vmem:[#allocation2 + $0x150] sm:$0xf0]  ;;  %v4482_v1 = vld [vmem:[%s11845_s8 + $0x10] sm:$0xff] }
 0x3f9   :  { %4328 = vst [vmem:[#allocation2 + $0x360] sm:$0xff] %v4296_v21  ;;  %4496 = vperm.xlu2 %9965, %v4482_v1   ;;  %v9636_v61 = vld [vmem:[#allocation2 + $0x354] sm:$0xf0]  ;;  %v8539_v25 = vld [vmem:[#allocation2 + $0x358] sm:$0xf0] }
 0x3fa   :  { %4335 = vst [vmem:[#allocation2 + $0x398] sm:$0xff] %v4303_v53  ;;  %v4082_v31 = vpop.f32.mrf.mxu0  ;;  %v4101_v14 = vpop.f32.mrf.mxu1  ;;  %v8139_v53 = vld [vmem:[#allocation2 + $0x48] sm:$0xf0] }
 0x3fb   :  { %v4046_v58 = vpop.f32.mrf.mxu2  ;;  %v4065_v16 = vpop.f32.mrf.mxu3  ;;  %v4083_v38 = vadd.f32 %v4082_v31, %v11529_v52  ;;  %v4102_v39 = vadd.f32 %v4101_v14, %v11529_v52  ;;  %5234 = vmatpush.bf16.msrb.mxu0 %v8466_v6  ;;  %5253 = vmatpush.bf16.msrb.mxu1 %v8470_v5  ;;  %v8137_v31 = vld [vmem:[#allocation2 + $0x8] sm:$0xf]  ;;  %v9530_v14 = vld [vmem:[#allocation2 + $0xc] sm:$0xf] }
 0x3fc   :  { %v4047_v41 = vadd.f32 %v4046_v58, %v11515_v46  ;;  %v4066_v47 = vadd.f32 %v4065_v16, %v11515_v46  ;;  %5198 = vmatpush.bf16.msra.mxu2 %v8330_v9  ;;  %5217 = vmatpush.bf16.msra.mxu3 %v8334_v50  ;;  %v8274_v9 = vor.u32 %v9571_v20, %v8273_v7  ;;  %v8537_v20 = vld [vmem:[#allocation2 + $0x318] sm:$0xf] }
 0x3fd   :  { %v4260_v17 = vmax.f32 %v4083_v38, 0.0  ;;  %v4261_v40 = vmax.f32 %v4102_v39, 0.0  ;;  %v8278_v50 = vor.u32 %v9563_v13, %v8275_v62  ;;  %v8138_v45 = vor.u32 %v9538_v12, %v8137_v31  ;;  %v8209_v38 = vld [vmem:[#allocation2 + $0x90] sm:$0xf]  ;;  %v9628_v62 = vld [vmem:[#allocation2 + $0x31c] sm:$0xf] }
 0x3fe   :  { %v4274_v48 = vmax.f32 %v4047_v41, 0.0  ;;  %v4275_v55 = vmax.f32 %v4066_v47, 0.0  ;;  %v8142_v58 = vor.u32 %v9530_v14, %v8139_v53  ;;  %v9555_v39 = vld [vmem:[#allocation2 + $0xcc] sm:$0xf0]  ;;  %v9547_v41 = vld [vmem:[#allocation2 + $0x94] sm:$0xf] }
 0x3ff   :  { %v4304_v4 = vpack.c.bf16 %v4261_v40, %v4260_v17  ;;  %5235 = vmatpush.bf16.msrb.mxu0 %v8402_v33  ;;  %5254 = vmatpush.bf16.msrb.mxu1 %v8406_v51  ;;  %v8210_v23 = vor.u32 %v9555_v39, %v8209_v38  ;;  %v8214_v33 = vor.u32 %v9547_v41, %v8211_v60  ;;  %v8473_v13 = vld [vmem:[#allocation2 + $0x298] sm:$0xf] }
 0x400   :  { %v4311_v26 = vpack.c.bf16 %v4275_v55, %v4274_v48  ;;  %5199 = vmatpush.bf16.msra.mxu2 %v8266_v2  ;;  %5218 = vmatpush.bf16.msra.mxu3 %v8270_v3  ;;  %v9637_v38 = vld [vmem:[#allocation2 + $0x35c] sm:$0xf0]  ;;  %v8547_v39 = vld [vmem:[#allocation2 + $0x360] sm:$0xf0]  ;;  %v9604_v41 = vld [vmem:[#allocation2 + $0x254] sm:$0xf0] }
 0x401   :  { %4336 = vst [vmem:[#allocation2 + $0x3a0] sm:$0xff] %v4304_v4  ;;  %5169 = vmatmul.bf16.gmra.mxu0 %v11581_v59  ;;  %5188 = vmatmul.bf16.gmra.mxu1 %v11581_v59  ;;  %v8601_v47 = vld [vmem:[#allocation2 + $0x398] sm:$0xf]  ;;  %v9644_v49 = vld [vmem:[#allocation2 + $0x39c] sm:$0xf] }
 0x402   :  { %4343 = vst [vmem:[#allocation2 + $0x3d8] sm:$0xff] %v4311_v26  ;;  %v4084_v8 = vpop.f32.mrf.mxu0  ;;  %v4103_v15 = vpop.f32.mrf.mxu1  ;;  %v8147_v4 = vld [vmem:[#allocation2 + $0x50] sm:$0xf0]  ;;  %4491 = vperm.xlu2 %9965, %v4481_v10   ;;  %v8483_v10 = vld [vmem:[#allocation2 + $0x2e0] sm:$0xf0] }
 0x403   :  { %v4085_v63 = vadd.f32 %v4084_v8, %v11515_v46  ;;  %v4104_v35 = vadd.f32 %v4103_v15, %v11515_v46  ;;  %v4115_v21 = vpop.f32.mrf.mxu2  ;;  %v4134_v42 = vpop.f32.mrf.mxu3  ;;  %5236 = vmatpush.bf16.msrb.mxu0 %v8338_v56  ;;  %5255 = vmatpush.bf16.msrb.mxu1 %v8342_v27  ;;  %v8145_v56 = vld [vmem:[#allocation2 + $0x10] sm:$0xf]  ;;  %v9531_v27 = vld [vmem:[#allocation2 + $0x14] sm:$0xf] }
 0x404   :  { %v4116_v28 = vadd.f32 %v4115_v21, %v11517_v0  ;;  %v4135_v43 = vadd.f32 %v4134_v42, %v11517_v0  ;;  %5200 = vmatpush.bf16.msra.mxu2 %v8202_v29  ;;  %5219 = vmatpush.bf16.msra.mxu3 %v8206_v18  ;;  %v8146_v29 = vor.u32 %v9539_v30, %v8145_v56  ;;  %v9620_v21 = vld [vmem:[#allocation2 + $0x2d4] sm:$0xf0]  ;;  %v8475_v42 = vld [vmem:[#allocation2 + $0x2d8] sm:$0xf0] }
 0x405   :  { %v4276_v6 = vmax.f32 %v4085_v63, 0.0  ;;  %v4277_v5 = vmax.f32 %v4104_v35, 0.0  ;;  %v8150_v18 = vor.u32 %v9531_v27, %v8147_v4  ;;  %v8538_v63 = vor.u32 %v9636_v61, %v8537_v20  ;;  %v9588_v30 = vld [vmem:[#allocation2 + $0x1d4] sm:$0xf0]  ;;  %v9621_v4 = vld [vmem:[#allocation2 + $0x2dc] sm:$0xf0] }
 0x406   :  { %v4230_v19 = vmax.f32 %v4116_v28, 0.0  ;;  %v4231_v32 = vmax.f32 %v4135_v43, 0.0  ;;  %v8542_v35 = vor.u32 %v9628_v62, %v8539_v25  ;;  %v8347_v61 = vld [vmem:[#allocation2 + $0x1d8] sm:$0xf0]  ;;  %v8481_v25 = vld [vmem:[#allocation2 + $0x2a0] sm:$0xf] }
 0x407   :  { %v4312_v16 = vpack.c.bf16 %v4277_v5, %v4276_v6  ;;  %5237 = vmatpush.bf16.msrb.mxu0 %v8274_v9  ;;  %5256 = vmatpush.bf16.msrb.mxu1 %v8278_v50  ;;  %v8474_v9 = vor.u32 %v9620_v21, %v8473_v13  ;;  %v9612_v50 = vld [vmem:[#allocation2 + $0x29c] sm:$0xf]  ;;  %v8419_v21 = vld [vmem:[#allocation2 + $0x260] sm:$0xf0]  ;;  %v8417_v13 = vld [vmem:[#allocation2 + $0x220] sm:$0xf] }
 0x408   :  { %v4289_v36 = vpack.c.bf16 %v4231_v32, %v4230_v19  ;;  %5201 = vmatpush.bf16.msra.mxu2 %v8138_v45  ;;  %5220 = vmatpush.bf16.msra.mxu3 %v8142_v58  ;;  %v8609_v12 = vld [vmem:[#allocation2 + $0x3a0] sm:$0xf]  ;;  %v9645_v43 = vld [vmem:[#allocation2 + $0x3a4] sm:$0xf] }
 0x409   :  { %4344 = vst [vmem:[#allocation2 + $0x3e0] sm:$0xff] %v4312_v16  ;;  %v9652_v44 = vld [vmem:[#allocation2 + $0x3d4] sm:$0xf0]  ;;  %v8603_v11 = vld [vmem:[#allocation2 + $0x3d8] sm:$0xf0]  ;;  %v8478_v16 = vor.u32 %v9612_v50, %v8475_v42 }
 0x40a   :  { %4321 = vst [vmem:[#allocation2 + $0x328] sm:$0xff] %v4289_v36  ;;  %v4153_v17 = vpop.f32.mrf.mxu0  ;;  %v4172_v40 = vpop.f32.mrf.mxu1  ;;  %v8602_v51 = vor.u32 %v9652_v44, %v8601_v47  ;;  %v8606_v34 = vor.u32 %v9644_v49, %v8603_v11  ;;  %v8411_v47 = vld [vmem:[#allocation2 + $0x258] sm:$0xf0]  ;;  %v8545_v11 = vld [vmem:[#allocation2 + $0x320] sm:$0xf] }
 0x40b   :  { %v4117_v48 = vpop.f32.mrf.mxu2  ;;  %v4136_v55 = vpop.f32.mrf.mxu3  ;;  %v4154_v2 = vadd.f32 %v4153_v17, %v11517_v0  ;;  %v4173_v3 = vadd.f32 %v4172_v40, %v11517_v0  ;;  %5202 = vmatmul.bf16.vlgmr.msra.gmra.mxu2 %v11560_v37  ;;  %5221 = vmatmul.bf16.vlgmr.msra.gmra.mxu3 %v11560_v37  ;;  %v9629_v17 = vld [vmem:[#allocation2 + $0x324] sm:$0xf] }
 0x40c   :  { %v4118_v57 = vadd.f32 %v4117_v48, %v11525_v54  ;;  %v4137_v26 = vadd.f32 %v4136_v55, %v11525_v54  ;;  %5238 = vmatpush.bf16.msrb.mxu0 %v8210_v23  ;;  %5257 = vmatpush.bf16.msrb.mxu1 %v8214_v33  ;;  %v8409_v33 = vld [vmem:[#allocation2 + $0x218] sm:$0xf]  ;;  %v8550_v48 = vor.u32 %v9629_v17, %v8547_v39  ;;  %v8355_v39 = vld [vmem:[#allocation2 + $0x1e0] sm:$0xf0] }
 0x40d   :  { %v4232_v24 = vmax.f32 %v4154_v2, 0.0  ;;  %v4233_v22 = vmax.f32 %v4173_v3, 0.0  ;;  %5270 = vmatpush.bf16.msrb.mxu2 %v8602_v51  ;;  %5289 = vmatpush.bf16.msrb.mxu3 %v8606_v34  ;;  %v9596_v51 = vld [vmem:[#allocation2 + $0x21c] sm:$0xf]  ;;  %v8546_v34 = vor.u32 %v9637_v38, %v8545_v11  ;;  %v8410_v2 = vor.u32 %v9604_v41, %v8409_v33  ;;  %v9589_v38 = vld [vmem:[#allocation2 + $0x1dc] sm:$0xf0] }
 0x40e   :  { %v4246_v8 = vmax.f32 %v4118_v57, 0.0  ;;  %v4247_v15 = vmax.f32 %v4137_v26, 0.0  ;;  %v8414_v3 = vor.u32 %v9596_v51, %v8411_v47  ;;  %v8345_v26 = vld [vmem:[#allocation2 + $0x198] sm:$0xf]  ;;  %v8219_v41 = vld [vmem:[#allocation2 + $0xd8] sm:$0xf0] }
 0x40f   :  { %v4290_v1 = vpack.c.bf16 %v4233_v22, %v4232_v24  ;;  %v9613_v24 = vld [vmem:[#allocation2 + $0x2a4] sm:$0xf]  ;;  %v8346_v27 = vor.u32 %v9588_v30, %v8345_v26  ;;  %v8353_v47 = vld [vmem:[#allocation2 + $0x1a0] sm:$0xf]  ;;  %v8155_v26 = vld [vmem:[#allocation2 + $0x58] sm:$0xf0] }
 0x410   :  { %v4297_v53 = vpack.c.bf16 %v4247_v15, %v4246_v8  ;;  %5239 = vmatpush.bf16.msrb.mxu0 %v8146_v29  ;;  %5258 = vmatpush.bf16.msrb.mxu1 %v8150_v18  ;;  %v9653_v28 = vld [vmem:[#allocation2 + $0x3dc] sm:$0xf0]  ;;  %v8611_v7 = vld [vmem:[#allocation2 + $0x3e0] sm:$0xf0]  ;;  %v9580_v8 = vld [vmem:[#allocation2 + $0x19c] sm:$0xf]  ;;  %v8482_v15 = vor.u32 %v9621_v4, %v8481_v25  ;;  %v8486_v29 = vor.u32 %v9613_v24, %v8483_v10 }
 0x411   :  { %4322 = vst [vmem:[#allocation2 + $0x330] sm:$0xff] %v4290_v1  ;;  %5271 = vmatpush.bf16.msrb.mxu2 %v8538_v63  ;;  %5290 = vmatpush.bf16.msrb.mxu3 %v8542_v35  ;;  %v8610_v6 = vor.u32 %v9653_v28, %v8609_v12  ;;  %v8614_v5 = vor.u32 %v9645_v43, %v8611_v7  ;;  %v9605_v35 = vld [vmem:[#allocation2 + $0x25c] sm:$0xf0]  ;;  %v8283_v28 = vld [vmem:[#allocation2 + $0x158] sm:$0xf0] }
 0x412   :  { %4329 = vst [vmem:[#allocation2 + $0x368] sm:$0xff] %v4297_v53  ;;  %v4155_v31 = vpop.f32.mrf.mxu0  ;;  %v4174_v14 = vpop.f32.mrf.mxu1  ;;  %v8350_v63 = vor.u32 %v9580_v8, %v8347_v61  ;;  %v9572_v53 = vld [vmem:[#allocation2 + $0x154] sm:$0xf0]  ;;  %v8418_v50 = vor.u32 %v9605_v35, %v8417_v13  ;;  %v8291_v30 = vld [vmem:[#allocation2 + $0x160] sm:$0xf0] }
 0x413   :  { %v4120_v19 = vpop.f32.mrf.mxu2  ;;  %v4139_v32 = vpop.f32.mrf.mxu3  ;;  %v4156_v45 = vadd.f32 %v4155_v31, %v11525_v54  ;;  %v4175_v58 = vadd.f32 %v4174_v14, %v11525_v54  ;;  %5240 = vmatmul.bf16.vlgmr.msrb.gmra.mxu0 %v11560_v37  ;;  %5259 = vmatmul.bf16.vlgmr.msrb.gmra.mxu1 %v11560_v37  ;;  %v8281_v14 = vld [vmem:[#allocation2 + $0x118] sm:$0xf]  ;;  %v8289_v24 = vld [vmem:[#allocation2 + $0x120] sm:$0xf]  ;;  %v8227_v35 = vld [vmem:[#allocation2 + $0xe0] sm:$0xf0] }
 0x414   :  { %v4121_v60 = vadd.f32 %v4120_v19, %v11529_v52  ;;  %v4140_v36 = vadd.f32 %v4139_v32, %v11529_v52  ;;  %5308 = vmatpush.bf16.msra.mxu0 %v8610_v6  ;;  %5327 = vmatpush.bf16.msra.mxu1 %v8614_v5  ;;  %v9597_v6 = vld [vmem:[#allocation2 + $0x224] sm:$0xf]  ;;  %v8153_v8 = vld [vmem:[#allocation2 + $0x18] sm:$0xf] }
 0x415   :  { %v4248_v49 = vmax.f32 %v4156_v45, 0.0  ;;  %v4249_v44 = vmax.f32 %v4175_v58, 0.0  ;;  %5272 = vmatpush.bf16.msrb.mxu2 %v8474_v9  ;;  %5291 = vmatpush.bf16.msrb.mxu3 %v8478_v16  ;;  %v9564_v9 = vld [vmem:[#allocation2 + $0x11c] sm:$0xf]  ;;  %v8422_v19 = vor.u32 %v9597_v6, %v8419_v21  ;;  %v8282_v45 = vor.u32 %v9572_v53, %v8281_v14  ;;  %v9556_v16 = vld [vmem:[#allocation2 + $0xd4] sm:$0xf0] }
 0x416   :  { %v4262_v40 = vmax.f32 %v4121_v60, 0.0  ;;  %v4263_v23 = vmax.f32 %v4140_v36, 0.0  ;;  %v8286_v58 = vor.u32 %v9564_v9, %v8283_v28  ;;  %v8217_v36 = vld [vmem:[#allocation2 + $0x98] sm:$0xf]  ;;  %v8225_v28 = vld [vmem:[#allocation2 + $0xa0] sm:$0xf] }
 0x417   :  { %v4298_v55 = vpack.c.bf16 %v4249_v44, %v4248_v49  ;;  %v9581_v49 = vld [vmem:[#allocation2 + $0x1a4] sm:$0xf]  ;;  %v8218_v17 = vor.u32 %v9556_v16, %v8217_v36  ;;  %v9622_v36 = vld [vmem:[#allocation2 + $0x2e4] sm:$0xf0] }
 0x418   :  { %v4305_v57 = vpack.c.bf16 %v4263_v23, %v4262_v40  ;;  %5309 = vmatpush.bf16.msra.mxu0 %v8546_v34  ;;  %5328 = vmatpush.bf16.msra.mxu1 %v8550_v48  ;;  %v9548_v40 = vld [vmem:[#allocation2 + $0x9c] sm:$0xf]  ;;  %v8354_v23 = vor.u32 %v9589_v38, %v8353_v47  ;;  %v8358_v33 = vor.u32 %v9581_v49, %v8355_v39  ;;  %v9630_v49 = vld [vmem:[#allocation2 + $0x32c] sm:$0xf] }
 0x419   :  { %4330 = vst [vmem:[#allocation2 + $0x370] sm:$0xff] %v4298_v55  ;;  %5273 = vmatpush.bf16.msrb.mxu2 %v8410_v2  ;;  %5292 = vmatpush.bf16.msrb.mxu3 %v8414_v3  ;;  %v8222_v2 = vor.u32 %v9548_v40, %v8219_v41  ;;  %v9573_v3 = vld [vmem:[#allocation2 + $0x15c] sm:$0xf0]  ;;  %v8555_v16 = vld [vmem:[#allocation2 + $0x368] sm:$0xf0] }
 0x41a   :  { %4337 = vst [vmem:[#allocation2 + $0x3a8] sm:$0xff] %v4305_v57  ;;  %v4158_v22 = vpop.f32.mrf.mxu0  ;;  %v4177_v56 = vpop.f32.mrf.mxu1  ;;  %v9540_v57 = vld [vmem:[#allocation2 + $0x54] sm:$0xf0]  ;;  %v8558_v40 = vor.u32 %v9630_v49, %v8555_v16  ;;  %v9574_v16 = vld [vmem:[#allocation2 + $0x164] sm:$0xf0] }
 0x41b   :  { %v4122_v18 = vpop.f32.mrf.mxu2  ;;  %v4141_v20 = vpop.f32.mrf.mxu3  ;;  %v4159_v62 = vadd.f32 %v4158_v22, %v11529_v52  ;;  %v4178_v1 = vadd.f32 %v4177_v56, %v11529_v52  ;;  %5207 = vmatmul.bf16.gmra.mxu2 %v11581_v59  ;;  %5226 = vmatmul.bf16.gmra.mxu3 %v11581_v59  ;;  %v9565_v22 = vld [vmem:[#allocation2 + $0x124] sm:$0xf]  ;;  %v8297_v49 = vld [vmem:[#allocation2 + $0x128] sm:$0xf] }
 0x41c   :  { %v4123_v42 = vadd.f32 %v4122_v18, %v11515_v46  ;;  %v4142_v12 = vadd.f32 %v4141_v20, %v11515_v46  ;;  %5310 = vmatpush.bf16.msra.mxu0 %v8482_v15  ;;  %5329 = vmatpush.bf16.msra.mxu1 %v8486_v29  ;;  %v9532_v15 = vld [vmem:[#allocation2 + $0x1c] sm:$0xf]  ;;  %v8290_v29 = vor.u32 %v9573_v3, %v8289_v24 }
 0x41d   :  { %v4264_v43 = vmax.f32 %v4159_v62, 0.0  ;;  %v4265_v7 = vmax.f32 %v4178_v1, 0.0  ;;  %5274 = vmatpush.bf16.msrb.mxu2 %v8346_v27  ;;  %5293 = vmatpush.bf16.msrb.mxu3 %v8350_v63  ;;  %v8294_v18 = vor.u32 %v9565_v22, %v8291_v30  ;;  %v8154_v62 = vor.u32 %v9540_v57, %v8153_v8  ;;  %v8561_v22 = vld [vmem:[#allocation2 + $0x330] sm:$0xf]  ;;  %v8427_v8 = vld [vmem:[#allocation2 + $0x268] sm:$0xf0] }
 0x41e   :  { %v4278_v5 = vmax.f32 %v4123_v42, 0.0  ;;  %v4279_v31 = vmax.f32 %v4142_v12, 0.0  ;;  %v8158_v1 = vor.u32 %v9532_v15, %v8155_v26  ;;  %v9614_v26 = vld [vmem:[#allocation2 + $0x2ac] sm:$0xf] }
 0x41f   :  { %v4306_v32 = vpack.c.bf16 %v4265_v7, %v4264_v43  ;;  %v9549_v43 = vld [vmem:[#allocation2 + $0xa4] sm:$0xf] }
 0x420   :  { %v4313_v60 = vpack.c.bf16 %v4279_v31, %v4278_v5  ;;  %5311 = vmatpush.bf16.msra.mxu0 %v8418_v50  ;;  %5330 = vmatpush.bf16.msra.mxu1 %v8422_v19  ;;  %v8230_v14 = vor.u32 %v9549_v43, %v8227_v35  ;;  %v9541_v19 = vld [vmem:[#allocation2 + $0x5c] sm:$0xf0]  ;;  %v9639_v3 = vld [vmem:[#allocation2 + $0x36c] sm:$0xf0]  ;;  %v8563_v30 = vld [vmem:[#allocation2 + $0x370] sm:$0xf0] }
 0x421   :  { %4338 = vst [vmem:[#allocation2 + $0x3b0] sm:$0xff] %v4306_v32  ;;  %5275 = vmatpush.bf16.msrb.mxu2 %v8282_v45  ;;  %5294 = vmatpush.bf16.msrb.mxu3 %v8286_v58  ;;  %v8617_v21 = vld [vmem:[#allocation2 + $0x3a8] sm:$0xf]  ;;  %v9646_v42 = vld [vmem:[#allocation2 + $0x3ac] sm:$0xf]  ;;  %v8562_v15 = vor.u32 %v9639_v3, %v8561_v22 }
 0x422   :  { %4345 = vst [vmem:[#allocation2 + $0x3e8] sm:$0xff] %v4313_v60  ;;  %v4160_v44 = vpop.f32.mrf.mxu0  ;;  %v4179_v11 = vpop.f32.mrf.mxu1  ;;  %v8163_v32 = vld [vmem:[#allocation2 + $0x60] sm:$0xf0]  ;;  %v8161_v45 = vld [vmem:[#allocation2 + $0x20] sm:$0xf] }
 0x423   :  { %v4161_v51 = vadd.f32 %v4160_v44, %v11515_v46  ;;  %v4180_v34 = vadd.f32 %v4179_v11, %v11515_v46  ;;  %v4191_v48 = vpop.f32.mrf.mxu2  ;;  %v4210_v55 = vpop.f32.mrf.mxu3  ;;  %5245 = vmatmul.bf16.gmra.mxu0 %v11581_v59  ;;  %5264 = vmatmul.bf16.gmra.mxu1 %v11581_v59  ;;  %v9638_v58 = vld [vmem:[#allocation2 + $0x364] sm:$0xf0]  ;;  %v9533_v60 = vld [vmem:[#allocation2 + $0x24] sm:$0xf]  ;;  %v8162_v41 = vor.u32 %v9541_v19, %v8161_v45  ;;  %v8433_v45 = vld [vmem:[#allocation2 + $0x230] sm:$0xf] }
 0x424   :  { %v4192_v4 = vadd.f32 %v4191_v48, %v11517_v0  ;;  %v4211_v10 = vadd.f32 %v4210_v55, %v11517_v0  ;;  %5312 = vmatpush.bf16.msra.mxu0 %v8354_v23  ;;  %5331 = vmatpush.bf16.msra.mxu1 %v8358_v33  ;;  %v9557_v0 = vld [vmem:[#allocation2 + $0xdc] sm:$0xf0]  ;;  %v8166_v47 = vor.u32 %v9533_v60, %v8163_v32  ;;  %v8491_v48 = vld [vmem:[#allocation2 + $0x2e8] sm:$0xf0]  ;;  %v8233_v3 = vld [vmem:[#allocation2 + $0xa8] sm:$0xf] }
 0x425   :  { %v4280_v61 = vmax.f32 %v4161_v51, 0.0  ;;  %v4281_v25 = vmax.f32 %v4180_v34, 0.0  ;;  %5276 = vmatpush.bf16.msrb.mxu2 %v8218_v17  ;;  %5295 = vmatpush.bf16.msrb.mxu3 %v8222_v2  ;;  %v8226_v31 = vor.u32 %v9557_v0, %v8225_v28  ;;  %v8489_v34 = vld [vmem:[#allocation2 + $0x2a8] sm:$0xf]  ;;  %v8494_v24 = vor.u32 %v9614_v26, %v8491_v48  ;;  %v8363_v28 = vld [vmem:[#allocation2 + $0x1e8] sm:$0xf0] }
 0x426   :  { %v4234_v56 = vmax.f32 %v4192_v4, 0.0  ;;  %v4235_v27 = vmax.f32 %v4211_v10, 0.0  ;;  %v8490_v57 = vor.u32 %v9622_v36, %v8489_v34  ;;  %v8425_v0 = vld [vmem:[#allocation2 + $0x228] sm:$0xf]  ;;  %v9567_v26 = vld [vmem:[#allocation2 + $0x134] sm:$0xf] }
 0x427   :  { %v4314_v20 = vpack.c.bf16 %v4281_v25, %v4280_v61 }
 0x428   :  { %v4291_v63 = vpack.c.bf16 %v4235_v27, %v4234_v56  ;;  %5313 = vmatpush.bf16.msra.mxu0 %v8290_v29  ;;  %5332 = vmatpush.bf16.msra.mxu1 %v8294_v18  ;;  %v8625_v44 = vld [vmem:[#allocation2 + $0x3b0] sm:$0xf]  ;;  %v9647_v33 = vld [vmem:[#allocation2 + $0x3b4] sm:$0xf]  ;;  %v9606_v27 = vld [vmem:[#allocation2 + $0x264] sm:$0xf0] }
 0x429   :  { %4346 = vst [vmem:[#allocation2 + $0x3f0] sm:$0xff] %v4314_v20  ;;  %5277 = vmatpush.bf16.msrb.mxu2 %v8154_v62  ;;  %5296 = vmatpush.bf16.msrb.mxu3 %v8158_v1  ;;  %v9654_v12 = vld [vmem:[#allocation2 + $0x3e4] sm:$0xf0]  ;;  %v8619_v53 = vld [vmem:[#allocation2 + $0x3e8] sm:$0xf0]  ;;  %v8426_v35 = vor.u32 %v9606_v27, %v8425_v0 }
 0x42a   :  { %4323 = vst [vmem:[#allocation2 + $0x338] sm:$0xff] %v4291_v63  ;;  %v8618_v7 = vor.u32 %v9654_v12, %v8617_v21  ;;  %v8622_v13 = vor.u32 %v9646_v42, %v8619_v53  ;;  %v9631_v56 = vld [vmem:[#allocation2 + $0x334] sm:$0xf]  ;;  %v9623_v62 = vld [vmem:[#allocation2 + $0x2ec] sm:$0xf0] }
 0x42b   :  { %v4193_v6 = vpop.f32.mrf.mxu2  ;;  %v4212_v5 = vpop.f32.mrf.mxu3  ;;  %v8566_v29 = vor.u32 %v9631_v56, %v8563_v30  ;;  %v8499_v1 = vld [vmem:[#allocation2 + $0x2f0] sm:$0xf0]  ;;  %v9598_v63 = vld [vmem:[#allocation2 + $0x22c] sm:$0xf]  ;;  %v9590_v21 = vld [vmem:[#allocation2 + $0x1e4] sm:$0xf0] }
 0x42c   :  { %v4194_v9 = vadd.f32 %v4193_v6, %v11525_v54  ;;  %v4213_v50 = vadd.f32 %v4212_v5, %v11525_v54  ;;  %5278 = vmatmul.bf16.vlgmr.msrb.gmra.mxu2 %v11560_v37  ;;  %5297 = vmatmul.bf16.vlgmr.msrb.gmra.mxu3 %v11560_v37  ;;  %v8553_v54 = vld [vmem:[#allocation2 + $0x328] sm:$0xf]  ;;  %v8497_v42 = vld [vmem:[#allocation2 + $0x2b0] sm:$0xf]  ;;  %v9615_v12 = vld [vmem:[#allocation2 + $0x2b4] sm:$0xf] }
 0x42d   :  { %5314 = vmatpush.bf16.msra.mxu0 %v8226_v31  ;;  %5333 = vmatpush.bf16.msra.mxu1 %v8230_v14  ;;  %v8554_v17 = vor.u32 %v9638_v58, %v8553_v54  ;;  %v8361_v53 = vld [vmem:[#allocation2 + $0x1a8] sm:$0xf]  ;;  %v8498_v43 = vor.u32 %v9623_v62, %v8497_v42  ;;  %v8435_v6 = vld [vmem:[#allocation2 + $0x270] sm:$0xf0]  ;;  %v9550_v30 = vld [vmem:[#allocation2 + $0xac] sm:$0xf] }
 0x42e   :  { %v4250_v38 = vmax.f32 %v4194_v9, 0.0  ;;  %v4251_v39 = vmax.f32 %v4213_v50, 0.0  ;;  %5346 = vmatpush.bf16.msra.mxu2 %v8618_v7  ;;  %5365 = vmatpush.bf16.msra.mxu3 %v8622_v13  ;;  %v8502_v7 = vor.u32 %v9615_v12, %v8499_v1  ;;  %v9607_v13 = vld [vmem:[#allocation2 + $0x26c] sm:$0xf0]  ;;  %v8362_v14 = vor.u32 %v9590_v21, %v8361_v53  ;;  %v9582_v9 = vld [vmem:[#allocation2 + $0x1ac] sm:$0xf] }
 0x42f   :  { %v8366_v32 = vor.u32 %v9582_v9, %v8363_v28  ;;  %v9599_v58 = vld [vmem:[#allocation2 + $0x234] sm:$0xf]  ;;  %v9559_v56 = vld [vmem:[#allocation2 + $0xec] sm:$0xf0] }
 0x430   :  { %v4299_v11 = vpack.c.bf16 %v4251_v39, %v4250_v38  ;;  %v9655_v23 = vld [vmem:[#allocation2 + $0x3ec] sm:$0xf0]  ;;  %v8627_v51 = vld [vmem:[#allocation2 + $0x3f0] sm:$0xf0]  ;;  %v8299_v38 = vld [vmem:[#allocation2 + $0x168] sm:$0xf0]  ;;  %v8434_v39 = vor.u32 %v9607_v13, %v8433_v45  ;;  %v8438_v60 = vor.u32 %v9599_v58, %v8435_v6 }
 0x431   :  { %5315 = vmatpush.bf16.msra.mxu0 %v8162_v41  ;;  %5334 = vmatpush.bf16.msra.mxu1 %v8166_v47  ;;  %v8626_v55 = vor.u32 %v9655_v23, %v8625_v44  ;;  %v8630_v2 = vor.u32 %v9647_v33, %v8627_v51  ;;  %v9591_v47 = vld [vmem:[#allocation2 + $0x1ec] sm:$0xf0]  ;;  %v8371_v54 = vld [vmem:[#allocation2 + $0x1f0] sm:$0xf0]  ;;  %v9566_v44 = vld [vmem:[#allocation2 + $0x12c] sm:$0xf] }
 0x432   :  { %4331 = vst [vmem:[#allocation2 + $0x378] sm:$0xff] %v4299_v11  ;;  %5347 = vmatpush.bf16.msra.mxu2 %v8554_v17  ;;  %5366 = vmatpush.bf16.msra.mxu3 %v8558_v40  ;;  %v8298_v11 = vor.u32 %v9574_v16, %v8297_v49  ;;  %v8302_v17 = vor.u32 %v9566_v44, %v8299_v38  ;;  %v8369_v40 = vld [vmem:[#allocation2 + $0x1b0] sm:$0xf]  ;;  %v9583_v23 = vld [vmem:[#allocation2 + $0x1b4] sm:$0xf] }
 0x433   :  { %v4196_v4 = vpop.f32.mrf.mxu2  ;;  %v4215_v10 = vpop.f32.mrf.mxu3  ;;  %v9558_v33 = vld [vmem:[#allocation2 + $0xe4] sm:$0xf0]  ;;  %v8235_v51 = vld [vmem:[#allocation2 + $0xe8] sm:$0xf0]  ;;  %v8370_v34 = vor.u32 %v9591_v47, %v8369_v40  ;;  %v8374_v48 = vor.u32 %v9583_v23, %v8371_v54  ;;  %v8243_v27 = vld [vmem:[#allocation2 + $0xf0] sm:$0xf0] }
 0x434   :  { %v4197_v61 = vadd.f32 %v4196_v4, %v11529_v52  ;;  %v4216_v25 = vadd.f32 %v4215_v10, %v11529_v52  ;;  %5316 = vmatmul.bf16.vlgmr.msra.gmra.mxu0 %v11560_v37  ;;  %5335 = vmatmul.bf16.vlgmr.msra.gmra.mxu1 %v11560_v37  ;;  %v8430_v37 = vor.u32 %v9598_v63, %v8427_v8  ;;  %v8169_v8 = vld [vmem:[#allocation2 + $0x28] sm:$0xf]  ;;  %v9551_v62 = vld [vmem:[#allocation2 + $0xb4] sm:$0xf]  ;;  %v9543_v12 = vld [vmem:[#allocation2 + $0x6c] sm:$0xf0] }
 0x435   :  { %5384 = vmatpush.bf16.msrb.mxu0 %v8626_v55  ;;  %5403 = vmatpush.bf16.msrb.mxu1 %v8630_v2  ;;  %v9575_v55 = vld [vmem:[#allocation2 + $0x16c] sm:$0xf0]  ;;  %v8307_v2 = vld [vmem:[#allocation2 + $0x170] sm:$0xf0]  ;;  %v8234_v4 = vor.u32 %v9558_v33, %v8233_v3  ;;  %v8238_v10 = vor.u32 %v9550_v30, %v8235_v51  ;;  %v8246_v63 = vor.u32 %v9551_v62, %v8243_v27  ;;  %v9777_v6 = vld [vmem:[#allocation2 + $0x3bc] sm:$0xf0] }
 0x436   :  { %v4266_v18 = vmax.f32 %v4197_v61, 0.0  ;;  %v4267_v20 = vmax.f32 %v4216_v25, 0.0  ;;  %5348 = vmatpush.bf16.msra.mxu2 %v8490_v57  ;;  %5367 = vmatpush.bf16.msra.mxu3 %v8494_v24  ;;  %v8305_v57 = vld [vmem:[#allocation2 + $0x130] sm:$0xf]  ;;  %v9542_v61 = vld [vmem:[#allocation2 + $0x64] sm:$0xf0]  ;;  %v8310_v22 = vor.u32 %v9567_v26, %v8307_v2 }
 0x437   :  { %v8171_v25 = vld [vmem:[#allocation2 + $0x68] sm:$0xf0]  ;;  %v8306_v24 = vor.u32 %v9575_v55, %v8305_v57  ;;  %v8179_v53 = vld [vmem:[#allocation2 + $0x70] sm:$0xf0]  ;;  %v8569_v9 = vld [vmem:[#allocation2 + $0x338] sm:$0xf] }
 0x438   :  { %v4307_v52 = vpack.c.bf16 %v4267_v20, %v4266_v18  ;;  %v8241_v20 = vld [vmem:[#allocation2 + $0xb0] sm:$0xf]  ;;  %v9535_v13 = vld [vmem:[#allocation2 + $0x34] sm:$0xf]  ;;  %v9089_v45 = vld [vmem:[#allocation2 + $0x380] sm:$0xf] }
 0x439   :  { %5385 = vmatpush.bf16.msrb.mxu0 %v8562_v15  ;;  %5404 = vmatpush.bf16.msrb.mxu1 %v8566_v29  ;;  %v9534_v15 = vld [vmem:[#allocation2 + $0x2c] sm:$0xf]  ;;  %v8170_v29 = vor.u32 %v9542_v61, %v8169_v8  ;;  %v8242_v0 = vor.u32 %v9559_v56, %v8241_v20  ;;  %v9640_v28 = vld [vmem:[#allocation2 + $0x374] sm:$0xf0]  ;;  %v9090_v58 = vor.u32 %v9777_v6, %v9089_v45  ;;  %v8507_v38 = vld [vmem:[#allocation2 + $0x2f8] sm:$0xf0] }
 0x43a   :  { %4339 = vst [vmem:[#allocation2 + $0x3b8] sm:$0xff] %v4307_v52  ;;  %5349 = vmatpush.bf16.msra.mxu2 %v8426_v35  ;;  %5368 = vmatpush.bf16.msra.mxu3 %v8430_v37  ;;  %v8174_v18 = vor.u32 %v9534_v15, %v8171_v25  ;;  %v9624_v16 = vld [vmem:[#allocation2 + $0x2f4] sm:$0xf0]  ;;  %v9025_v54 = vld [vmem:[#allocation2 + $0x300] sm:$0xf] }
 0x43b   :  { %v4198_v5 = vpop.f32.mrf.mxu2  ;;  %v4217_v31 = vpop.f32.mrf.mxu3  ;;  %v9608_v44 = vld [vmem:[#allocation2 + $0x274] sm:$0xf0]  ;;  %v9600_v40 = vld [vmem:[#allocation2 + $0x23c] sm:$0xf]  ;;  %v8961_v51 = vld [vmem:[#allocation2 + $0x280] sm:$0xf] }
 0x43c   :  { %v4199_v50 = vadd.f32 %v4198_v5, %v11515_v46  ;;  %v4218_v19 = vadd.f32 %v4217_v31, %v11515_v46  ;;  %5283 = vmatmul.bf16.gmra.mxu2 %v11581_v59  ;;  %5302 = vmatmul.bf16.gmra.mxu3 %v11581_v59  ;;  %v11636_v5 = vld [vmem:[%s11852_s6] sm:$0xff]  ;;  %v9729_v2 = vld [vmem:[#allocation2 + $0x23c] sm:$0xf0] }
 0x43d   :  { %5386 = vmatpush.bf16.msrb.mxu0 %v8498_v43  ;;  %5405 = vmatpush.bf16.msrb.mxu1 %v8502_v7  ;;  %v8571_v43 = vld [vmem:[#allocation2 + $0x378] sm:$0xf0]  ;;  %v8177_v7 = vld [vmem:[#allocation2 + $0x30] sm:$0xf]  ;;  %v8377_v3 = vld [vmem:[#allocation2 + $0x1b8] sm:$0xf] }
 0x43e   :  { %v4282_v36 = vmax.f32 %v4199_v50, 0.0  ;;  %v4283_v41 = vmax.f32 %v4218_v19, 0.0  ;;  %5350 = vmatpush.bf16.msra.mxu2 %v8362_v14  ;;  %5369 = vmatpush.bf16.msra.mxu3 %v8366_v32  ;;  %v8178_v31 = vor.u32 %v9543_v12, %v8177_v7  ;;  %v8182_v14 = vor.u32 %v9535_v13, %v8179_v53  ;;  %v9632_v50 = vld [vmem:[#allocation2 + $0x33c] sm:$0xf]  ;;  %v8897_v57 = vld [vmem:[#allocation2 + $0x200] sm:$0xf] }
 0x43f   :  { %v8570_v19 = vor.u32 %v9640_v28, %v8569_v9  ;;  %v8574_v32 = vor.u32 %v9632_v50, %v8571_v43  ;;  %v8379_v55 = vld [vmem:[#allocation2 + $0x1f8] sm:$0xf0]  ;;  %v8898_v26 = vor.u32 %v9729_v2, %v8897_v57  ;;  %v9576_v61 = vld [vmem:[#allocation2 + $0x174] sm:$0xf0]  ;;  %v8833_v15 = vld [vmem:[#allocation2 + $0x180] sm:$0xf] }
 0x440   :  { %v4315_v46 = vpack.c.bf16 %v4283_v41, %v4282_v36  ;;  %v9616_v36 = vld [vmem:[#allocation2 + $0x2bc] sm:$0xf]  ;;  %v9697_v62 = vld [vmem:[#allocation2 + $0x13c] sm:$0xf0]  ;;  %v9091_v53 = vld [vmem:[#allocation2 + $0x3c0] sm:$0xf0] }
 0x441   :  { %5387 = vmatpush.bf16.msrb.mxu0 %v8434_v39  ;;  %5406 = vmatpush.bf16.msrb.mxu1 %v8438_v60  ;;  %v8633_v1 = vld [vmem:[#allocation2 + $0x3b8] sm:$0xf]  ;;  %v9648_v35 = vld [vmem:[#allocation2 + $0x3bc] sm:$0xf]  ;;  %v9761_v39 = vld [vmem:[#allocation2 + $0x33c] sm:$0xf0]  ;;  %v8510_v47 = vor.u32 %v9616_v36, %v8507_v38 }
 0x442   :  { %4347 = vst [vmem:[#allocation2 + $0x3f8] sm:$0xff] %v4315_v46  ;;  %5351 = vmatpush.bf16.msra.mxu2 %v8298_v11  ;;  %5370 = vmatpush.bf16.msra.mxu3 %v8302_v17  ;;  %v8505_v60 = vld [vmem:[#allocation2 + $0x2b8] sm:$0xf]  ;;  %v9026_v49 = vor.u32 %v9761_v39, %v9025_v54  ;;  %v8443_v46 = vld [vmem:[#allocation2 + $0x278] sm:$0xf0] }
 0x443   :  { %v8506_v41 = vor.u32 %v9624_v16, %v8505_v60  ;;  %v9745_v11 = vld [vmem:[#allocation2 + $0x2bc] sm:$0xf0]  ;;  %v8441_v17 = vld [vmem:[#allocation2 + $0x238] sm:$0xf]  ;;  %v8446_v33 = vor.u32 %v9600_v40, %v8443_v46  ;;  %v9584_v30 = vld [vmem:[#allocation2 + $0x1bc] sm:$0xf] }
 0x444   :  { %5321 = vmatmul.bf16.gmra.mxu0 %v11581_v59  ;;  %5340 = vmatmul.bf16.gmra.mxu1 %v11581_v59  ;;  %v8442_v23 = vor.u32 %v9608_v44, %v8441_v17  ;;  %v8315_v25 = vld [vmem:[#allocation2 + $0x178] sm:$0xf0]  ;;  %v9681_v12 = vld [vmem:[#allocation2 + $0xbc] sm:$0xf0]  ;;  %v8185_v28 = vld [vmem:[#allocation2 + $0x38] sm:$0xf] }
 0x445   :  { %5388 = vmatpush.bf16.msrb.mxu0 %v8370_v34  ;;  %5407 = vmatpush.bf16.msrb.mxu1 %v8374_v48  ;;  %v8962_v34 = vor.u32 %v9745_v11, %v8961_v51  ;;  %v9592_v48 = vld [vmem:[#allocation2 + $0x1f4] sm:$0xf0]  ;;  %v9568_v56 = vld [vmem:[#allocation2 + $0x13c] sm:$0xf]  ;;  %v8705_v6 = vld [vmem:[#allocation2 + $0x80] sm:$0xf] }
 0x446   :  { %5352 = vmatpush.bf16.msra.mxu2 %v8234_v4  ;;  %5371 = vmatpush.bf16.msra.mxu3 %v8238_v10  ;;  %v8378_v4 = vor.u32 %v9592_v48, %v8377_v3  ;;  %v8382_v10 = vor.u32 %v9584_v30, %v8379_v55  ;;  %v8318_v8 = vor.u32 %v9568_v56, %v8315_v25  ;;  %v8251_v20 = vld [vmem:[#allocation2 + $0xf8] sm:$0xf0]  ;;  %v9665_v50 = vld [vmem:[#allocation2 + $0x3c] sm:$0xf0]  ;;  %v9097_v39 = vld [vmem:[#allocation2 + $0x388] sm:$0xf] }
 0x447   :  { %v9536_v43 = vld [vmem:[#allocation2 + $0x3c] sm:$0xf]  ;;  %v8641_v45 = vld [vmem:[#allocation2] sm:$0xf]  ;;  %v8963_v36 = vld [vmem:[#allocation2 + $0x2c0] sm:$0xf0] }
 0x448   :  { %v8642_v16 = vor.u32 %v9665_v50, %v8641_v45  ;;  %v9737_v44 = vld [vmem:[#allocation2 + $0x284] sm:$0xf]  ;;  %v9033_v11 = vld [vmem:[#allocation2 + $0x308] sm:$0xf]  ;;  %v9099_v50 = vld [vmem:[#allocation2 + $0x3c8] sm:$0xf0] }
 0x449   :  { %5389 = vmatpush.bf16.msrb.mxu0 %v8306_v24  ;;  %5408 = vmatpush.bf16.msrb.mxu1 %v8310_v22  ;;  %v9656_v52 = vld [vmem:[#allocation2 + $0x3f4] sm:$0xf0]  ;;  %v8635_v37 = vld [vmem:[#allocation2 + $0x3f8] sm:$0xf0]  ;;  %v9713_v24 = vld [vmem:[#allocation2 + $0x1bc] sm:$0xf0]  ;;  %v8966_v46 = vor.u32 %v9737_v44, %v8963_v36 }
 0x44a   :  { %5353 = vmatpush.bf16.msra.mxu2 %v8170_v29  ;;  %5372 = vmatpush.bf16.msra.mxu3 %v8174_v18  ;;  %v8634_v21 = vor.u32 %v9656_v52, %v8633_v1  ;;  %v8638_v42 = vor.u32 %v9648_v35, %v8635_v37  ;;  %v8313_v22 = vld [vmem:[#allocation2 + $0x138] sm:$0xf]  ;;  %v8834_v29 = vor.u32 %v9713_v24, %v8833_v15  ;;  %v9552_v1 = vld [vmem:[#allocation2 + $0xbc] sm:$0xf]  ;;  %v8769_v35 = vld [vmem:[#allocation2 + $0x100] sm:$0xf] }
 0x44b   :  { %v8314_v27 = vor.u32 %v9576_v61, %v8313_v22  ;;  %v9560_v18 = vld [vmem:[#allocation2 + $0xf4] sm:$0xf0]  ;;  %v8254_v52 = vor.u32 %v9552_v1, %v8251_v20  ;;  %v8770_v37 = vor.u32 %v9697_v62, %v8769_v35  ;;  %v8899_v17 = vld [vmem:[#allocation2 + $0x240] sm:$0xf0]  ;;  %v9714_v24 = vld [vmem:[#allocation2 + $0x1c4] sm:$0xf0] }
 0x44c   :  { %v8835_v55 = vld [vmem:[#allocation2 + $0x1c0] sm:$0xf0]  ;;  %v8841_v15 = vld [vmem:[#allocation2 + $0x188] sm:$0xf]  ;;  %v9035_v44 = vld [vmem:[#allocation2 + $0x348] sm:$0xf0] }
 0x44d   :  { %5390 = vmatpush.bf16.msrb.mxu0 %v8242_v0  ;;  %5409 = vmatpush.bf16.msrb.mxu1 %v8246_v63  ;;  %v11647_v0 = vld [vmem:[%s11852_s6 + $0x8] sm:$0xff]  ;;  %v9698_v1 = vld [vmem:[#allocation2 + $0x144] sm:$0xf0] }
 0x44e   :  { %5422 = vmatpush.bf16.msrb.mxu2 %v8634_v21  ;;  %5441 = vmatpush.bf16.msrb.mxu3 %v8638_v42  ;;  %v9544_v21 = vld [vmem:[#allocation2 + $0x74] sm:$0xf0]  ;;  %v8187_v42 = vld [vmem:[#allocation2 + $0x78] sm:$0xf0]  ;;  %v8771_v25 = vld [vmem:[#allocation2 + $0x140] sm:$0xf0] }
 0x44f   :  { %5354 = vmatmul.bf16.vlgmr.msra.gmra.mxu2 %v11636_v5  ;;  %5373 = vmatmul.bf16.vlgmr.msra.gmra.mxu3 %v11636_v5  ;;  %v8186_v7 = vor.u32 %v9544_v21, %v8185_v28  ;;  %v8190_v13 = vor.u32 %v9536_v43, %v8187_v42  ;;  %v9689_v22 = vld [vmem:[#allocation2 + $0x104] sm:$0xf] }
 0x451   :  { %5391 = vmatpush.bf16.msrb.mxu0 %v8178_v31  ;;  %5410 = vmatpush.bf16.msrb.mxu1 %v8182_v14  ;;  %v9769_v31 = vld [vmem:[#allocation2 + $0x384] sm:$0xf]  ;;  %v8706_v14 = vor.u32 %v9681_v12, %v8705_v6  ;;  %v8777_v12 = vld [vmem:[#allocation2 + $0x108] sm:$0xf] }
 0x452   :  { %5423 = vmatpush.bf16.msrb.mxu2 %v8570_v19  ;;  %5442 = vmatpush.bf16.msrb.mxu3 %v8574_v32  ;;  %v9094_v9 = vor.u32 %v9769_v31, %v9091_v53  ;;  %v9027_v19 = vld [vmem:[#allocation2 + $0x340] sm:$0xf0]  ;;  %v9778_v32 = vld [vmem:[#allocation2 + $0x3c4] sm:$0xf0]  ;;  %v8778_v31 = vor.u32 %v9698_v1, %v8777_v12 }
 0x453   :  { %v9098_v60 = vor.u32 %v9778_v32, %v9097_v39  ;;  %v11656_v40 = vpop.permute.xlu2 %4496  ;;  %v9770_v39 = vld [vmem:[#allocation2 + $0x38c] sm:$0xf] }
 0x454   :  { %5392 = vmatmul.bf16.vlgmr.msrb.gmra.mxu0 %v11636_v5  ;;  %5411 = vmatmul.bf16.vlgmr.msrb.gmra.mxu1 %v11636_v5 }
 0x455   :  { %6562 = vmatpush.bf16.msra.mxu0 %v9090_v58  ;;  %v9753_v58 = vld [vmem:[#allocation2 + $0x304] sm:$0xf] }
 0x456   :  { %5424 = vmatpush.bf16.msrb.mxu2 %v8506_v41  ;;  %5443 = vmatpush.bf16.msrb.mxu3 %v8510_v47  ;;  %v9030_v38 = vor.u32 %v9753_v58, %v9027_v19  ;;  %v5588_v41 = vld [vmem:[%s11853_s7] sm:$0xf]  ;;  %v9657_v58 = vld [vmem:[#allocation2 + $0x4] sm:$0xf] }
 0x457   :  { %5756 = vst [vmem:[#allocation1] ss:$4 sm:$0xff] %v5588_v41  ;;  %v9102_v41 = vor.u32 %v9770_v39, %v9099_v50 }
 0x459   :  { %6563 = vmatpush.bf16.msra.mxu0 %v9026_v49  ;;  %v9762_v49 = vld [vmem:[#allocation2 + $0x344] sm:$0xf0] }
 0x45a   :  { %5425 = vmatpush.bf16.msrb.mxu2 %v8442_v23  ;;  %5444 = vmatpush.bf16.msrb.mxu3 %v8446_v33  ;;  %v9746_v23 = vld [vmem:[#allocation2 + $0x2c4] sm:$0xf0]  ;;  %v9721_v33 = vld [vmem:[#allocation2 + $0x204] sm:$0xf] }
 0x45b   :  { %v8902_v51 = vor.u32 %v9721_v33, %v8899_v17  ;;  %v8649_v17 = vld [vmem:[#allocation2 + $0x8] sm:$0xf] }
 0x45c   :  { %v11661_v56 = vpop.permute.xlu2 %4491 }
 0x45d   :  { %6564 = vmatpush.bf16.msra.mxu0 %v8962_v34  ;;  %v8969_v34 = vld [vmem:[#allocation2 + $0x288] sm:$0xf] }
 0x45e   :  { %5426 = vmatpush.bf16.msrb.mxu2 %v8378_v4  ;;  %5445 = vmatpush.bf16.msrb.mxu3 %v8382_v10  ;;  %v8970_v48 = vor.u32 %v9746_v23, %v8969_v34  ;;  %v11658_v2 = vld.sshfl [vmem:[#allocation1] sm:$0xff pattern:$0x73625140]  ;;  %v9730_v4 = vld [vmem:[#allocation2 + $0x244] sm:$0xf0] }
 0x45f   :  { %5359 = vmatmul.bf16.gmra.mxu2 %v11581_v59  ;;  %5378 = vmatmul.bf16.gmra.mxu3 %v11581_v59  ;;  %v8249_v59 = vld [vmem:[#allocation2 + $0xb8] sm:$0xf]  ;;  %v9705_v10 = vld [vmem:[#allocation2 + $0x184] sm:$0xf]  ;;  %v9754_v23 = vld [vmem:[#allocation2 + $0x30c] sm:$0xf] }
 0x460   :  { %v8250_v63 = vor.u32 %v9560_v18, %v8249_v59  ;;  %v8838_v57 = vor.u32 %v9705_v10, %v8835_v55  ;;  %v8842_v18 = vor.u32 %v9714_v24, %v8841_v15  ;;  %v9673_v59 = vld [vmem:[#allocation2 + $0x84] sm:$0xf]  ;;  %v9771_v55 = vld [vmem:[#allocation2 + $0x394] sm:$0xf] }
 0x461   :  { %6565 = vmatpush.bf16.msra.mxu0 %v8898_v26  ;;  %v8905_v26 = vld [vmem:[#allocation2 + $0x208] sm:$0xf]  ;;  %v9043_v10 = vld [vmem:[#allocation2 + $0x350] sm:$0xf0] }
 0x462   :  { %5427 = vmatpush.bf16.msrb.mxu2 %v8314_v27  ;;  %5446 = vmatpush.bf16.msrb.mxu3 %v8318_v8  ;;  %v8906_v61 = vor.u32 %v9730_v4, %v8905_v26  ;;  %v11663_v27 = vpop.permute.xlu1 %4486  ;;  %v8774_v8 = vor.u32 %v9689_v22, %v8771_v25  ;;  %v9755_v24 = vld [vmem:[#allocation2 + $0x314] sm:$0xf] }
 0x463   :  { %v9046_v15 = vor.u32 %v9755_v24, %v9043_v10 }
 0x464   :  { %5397 = vmatmul.bf16.gmra.mxu0 %v11647_v0  ;;  %5416 = vmatmul.bf16.gmra.mxu1 %v11647_v0 }
 0x465   :  { %6566 = vmatpush.bf16.msra.mxu0 %v8834_v29  ;;  %v8707_v29 = vld [vmem:[#allocation2 + $0xc0] sm:$0xf0] }
 0x466   :  { %5428 = vmatpush.bf16.msrb.mxu2 %v8250_v63  ;;  %5447 = vmatpush.bf16.msrb.mxu3 %v8254_v52  ;;  %v8710_v42 = vor.u32 %v9673_v59, %v8707_v29  ;;  %v8907_v29 = vld [vmem:[#allocation2 + $0x248] sm:$0xf0] }
 0x469   :  { %6567 = vmatpush.bf16.msra.mxu0 %v8770_v37 }
 0x46a   :  { %5429 = vmatpush.bf16.msrb.mxu2 %v8186_v7  ;;  %5448 = vmatpush.bf16.msrb.mxu3 %v8190_v13 }
 0x46d   :  { %6568 = vmatpush.bf16.msra.mxu0 %v8706_v14  ;;  %v8643_v14 = vld [vmem:[#allocation2 + $0x40] sm:$0xf0] }
 0x46e   :  { %6588 = vmatpush.bf16.msra.mxu2 %v9094_v9  ;;  %v5165_v47 = vpop.f32.mrf.mxu0  ;;  %v5184_v54 = vpop.f32.mrf.mxu1  ;;  %v9682_v9 = vld [vmem:[#allocation2 + $0xc4] sm:$0xf0] }
 0x46f   :  { %5430 = vmatmul.bf16.vlgmr.msrb.gmra.mxu2 %v11636_v5  ;;  %5449 = vmatmul.bf16.vlgmr.msrb.gmra.mxu3 %v11636_v5  ;;  %v9034_v5 = vor.u32 %v9762_v49, %v9033_v11  ;;  %v5166_v63 = vadd.f32 %v5165_v47, %v11663_v27  ;;  %v5185_v35 = vadd.f32 %v5184_v54, %v11663_v27  ;;  %v9666_v49 = vld [vmem:[#allocation2 + $0x44] sm:$0xf0] }
 0x470   :  { %v8650_v34 = vor.u32 %v9666_v49, %v8649_v17 }
 0x471   :  { %6569 = vmatpush.bf16.msra.mxu0 %v8642_v16  ;;  %v5460_v53 = vmax.f32 %v5166_v63, 0.0  ;;  %v5461_v28 = vmax.f32 %v5185_v35, 0.0  ;;  %v8646_v16 = vor.u32 %v9657_v58, %v8643_v14  ;;  %v9722_v35 = vld [vmem:[#allocation2 + $0x20c] sm:$0xf] }
 0x472   :  { %6589 = vmatpush.bf16.msra.mxu2 %v9030_v38  ;;  %v8713_v38 = vld [vmem:[#allocation2 + $0x88] sm:$0xf] }
 0x473   :  { %v5524_v19 = vpack.c.bf16 %v5461_v28, %v5460_v53  ;;  %v8714_v36 = vor.u32 %v9682_v9, %v8713_v38  ;;  %v9706_v28 = vld [vmem:[#allocation2 + $0x18c] sm:$0xf] }
 0x474   :  { %6570 = vmatmul.bf16.vlgmr.msra.gmra.mxu0 %v11658_v2  ;;  %v8779_v38 = vld [vmem:[#allocation2 + $0x148] sm:$0xf0] }
 0x475   :  { %6614 = vmatpush.bf16.msrb.mxu0 %v9098_v60  ;;  %v11673_v60 = vpop.permute.xlu0 %4501  ;;  %5556 = vst [vmem:[#allocation2 + $0x400] sm:$0xff] %v5524_v19 }
 0x476   :  { %6590 = vmatpush.bf16.msra.mxu2 %v8966_v46  ;;  %v5167_v3 = vpop.f32.mrf.mxu0  ;;  %v5186_v30 = vpop.f32.mrf.mxu1 }
 0x477   :  { %v5168_v52 = vadd.f32 %v5167_v3, %v11661_v56  ;;  %v5187_v37 = vadd.f32 %v5186_v30, %v11661_v56  ;;  %v8971_v30 = vld [vmem:[#allocation2 + $0x2c8] sm:$0xf0] }
 0x479   :  { %6615 = vmatpush.bf16.msrb.mxu0 %v9034_v5  ;;  %v5476_v43 = vmax.f32 %v5168_v52, 0.0  ;;  %v5477_v7 = vmax.f32 %v5187_v37, 0.0  ;;  %v9107_v5 = vld [vmem:[#allocation2 + $0x3d0] sm:$0xf0]  ;;  %v8910_v37 = vor.u32 %v9722_v35, %v8907_v29 }
 0x47a   :  { %6591 = vmatpush.bf16.msra.mxu2 %v8902_v51  ;;  %v9110_v3 = vor.u32 %v9771_v55, %v9107_v5 }
 0x47b   :  { %v5532_v32 = vpack.c.bf16 %v5477_v7, %v5476_v43  ;;  %v8843_v43 = vld [vmem:[#allocation2 + $0x1c8] sm:$0xf0]  ;;  %v8915_v7 = vld [vmem:[#allocation2 + $0x250] sm:$0xf0] }
 0x47d   :  { %6616 = vmatpush.bf16.msrb.mxu0 %v8970_v48  ;;  %5564 = vst [vmem:[#allocation2 + $0x440] sm:$0xff] %v5532_v32  ;;  %v9038_v48 = vor.u32 %v9754_v23, %v9035_v44  ;;  %v8846_v32 = vor.u32 %v9706_v28, %v8843_v43  ;;  %v9675_v43 = vld [vmem:[#allocation2 + $0x94] sm:$0xf] }
 0x47e   :  { %6592 = vmatpush.bf16.msra.mxu2 %v8838_v57  ;;  %v5170_v20 = vpop.f32.mrf.mxu0  ;;  %v5189_v62 = vpop.f32.mrf.mxu1  ;;  %v9738_v57 = vld [vmem:[#allocation2 + $0x28c] sm:$0xf] }
 0x47f   :  { %5435 = vmatmul.bf16.gmra.mxu2 %v11647_v0  ;;  %5454 = vmatmul.bf16.gmra.mxu3 %v11647_v0  ;;  %v5171_v0 = vadd.f32 %v5170_v20, %v11656_v40  ;;  %v5190_v21 = vadd.f32 %v5189_v62, %v11656_v40  ;;  %v8974_v25 = vor.u32 %v9738_v57, %v8971_v30  ;;  %v8979_v62 = vld [vmem:[#allocation2 + $0x2d0] sm:$0xf0]  ;;  %v9785_v30 = vld [vmem:[#allocation2 + $0x404] sm:$0xf] }
 0x481   :  { %6617 = vmatpush.bf16.msrb.mxu0 %v8906_v61  ;;  %v5492_v13 = vmax.f32 %v5171_v0, 0.0  ;;  %v5493_v6 = vmax.f32 %v5190_v21, 0.0  ;;  %v9739_v0 = vld [vmem:[#allocation2 + $0x294] sm:$0xf] }
 0x482   :  { %6593 = vmatpush.bf16.msra.mxu2 %v8774_v8  ;;  %v8982_v53 = vor.u32 %v9739_v0, %v8979_v62 }
 0x483   :  { %v5540_v45 = vpack.c.bf16 %v5493_v6, %v5492_v13 }
 0x485   :  { %6618 = vmatpush.bf16.msrb.mxu0 %v8842_v18  ;;  %5572 = vst [vmem:[#allocation2 + $0x480] sm:$0xff] %v5540_v45  ;;  %v9723_v45 = vld [vmem:[#allocation2 + $0x214] sm:$0xf] }
 0x486   :  { %6594 = vmatpush.bf16.msra.mxu2 %v8710_v42  ;;  %v5172_v47 = vpop.f32.mrf.mxu0  ;;  %v5191_v54 = vpop.f32.mrf.mxu1 }
 0x487   :  { %v5173_v46 = vadd.f32 %v5172_v47, %v11673_v60  ;;  %v5192_v11 = vadd.f32 %v5191_v54, %v11673_v60  ;;  %v8851_v47 = vld [vmem:[#allocation2 + $0x1d0] sm:$0xf0]  ;;  %v9793_v54 = vld [vmem:[#allocation2 + $0x43c] sm:$0xf0] }
 0x489   :  { %6619 = vmatpush.bf16.msrb.mxu0 %v8778_v31  ;;  %v5508_v33 = vmax.f32 %v5173_v46, 0.0  ;;  %v5509_v51 = vmax.f32 %v5192_v11, 0.0  ;;  %v9690_v46 = vld [vmem:[#allocation2 + $0x10c] sm:$0xf]  ;;  %v9155_v11 = vld [vmem:[#allocation2 + $0x440] sm:$0xf0] }
 0x48a   :  { %6595 = vmatpush.bf16.msra.mxu2 %v8646_v16 }
 0x48b   :  { %v5548_v4 = vpack.c.bf16 %v5509_v51, %v5508_v33  ;;  %v9707_v51 = vld [vmem:[#allocation2 + $0x194] sm:$0xf] }
 0x48c   :  { %v9217_v13 = vld [vmem:[#allocation2 + $0x480] sm:$0xf]  ;;  %v9801_v6 = vld [vmem:[#allocation2 + $0x484] sm:$0xf]  ;;  %v8854_v55 = vor.u32 %v9707_v51, %v8851_v47 }
 0x48d   :  { %6620 = vmatpush.bf16.msrb.mxu0 %v8714_v36  ;;  %5580 = vst [vmem:[#allocation2 + $0x4c0] sm:$0xff] %v5548_v4 }
 0x48e   :  { %6640 = vmatpush.bf16.msrb.mxu2 %v9102_v41  ;;  %v5203_v26 = vpop.f32.mrf.mxu2  ;;  %v5222_v61 = vpop.f32.mrf.mxu3  ;;  %v8918_v41 = vor.u32 %v9723_v45, %v8915_v7 }
 0x48f   :  { %6596 = vmatmul.bf16.vlgmr.msra.gmra.mxu2 %v11658_v2  ;;  %v5204_v22 = vadd.f32 %v5203_v26, %v11663_v27  ;;  %v5223_v8 = vadd.f32 %v5222_v61, %v11663_v27  ;;  %v9158_v26 = vor.u32 %v9785_v30, %v9155_v11  ;;  %v8715_v61 = vld [vmem:[#allocation2 + $0xc8] sm:$0xf0] }
 0x490   :  { %v5241_v18 = vpop.f32.mrf.mxu0  ;;  %v5260_v20 = vpop.f32.mrf.mxu1 }
 0x491   :  { %6621 = vmatpush.bf16.msrb.mxu0 %v8650_v34  ;;  %v5462_v59 = vmax.f32 %v5204_v22, 0.0  ;;  %v5463_v1 = vmax.f32 %v5223_v8, 0.0  ;;  %v5242_v63 = vadd.f32 %v5241_v18, %v11663_v27  ;;  %v5261_v52 = vadd.f32 %v5260_v20, %v11663_v27  ;;  %v9153_v34 = vld [vmem:[#allocation2 + $0x400] sm:$0xf]  ;;  %v9674_v22 = vld [vmem:[#allocation2 + $0x8c] sm:$0xf] }
 0x492   :  { %6641 = vmatpush.bf16.msrb.mxu2 %v9038_v48  ;;  %v8782_v48 = vor.u32 %v9690_v46, %v8779_v38  ;;  %v11687_v8 = vld.sshfl [vmem:[#allocation1 + $0x8] sm:$0xff pattern:$0x73625140]  ;;  %v8718_v18 = vor.u32 %v9674_v22, %v8715_v61  ;;  %v9691_v20 = vld [vmem:[#allocation2 + $0x114] sm:$0xf] }
 0x493   :  { %v5525_v21 = vpack.c.bf16 %v5463_v1, %v5462_v59  ;;  %v5464_v42 = vmax.f32 %v5242_v63, 0.0  ;;  %v5465_v12 = vmax.f32 %v5261_v52, 0.0  ;;  %v8651_v63 = vld [vmem:[#allocation2 + $0x48] sm:$0xf0] }
 0x494   :  { %6622 = vmatmul.bf16.vlgmr.msrb.gmra.mxu0 %v11658_v2  ;;  %v9809_v14 = vld [vmem:[#allocation2 + $0x4bc] sm:$0xf0]  ;;  %v9219_v9 = vld [vmem:[#allocation2 + $0x4c0] sm:$0xf0] }
 0x495   :  { %6692 = vmatpush.bf16.msra.mxu0 %v9110_v3  ;;  %5557 = vst [vmem:[#allocation2 + $0x408] sm:$0xff] %v5525_v21  ;;  %v5526_v31 = vpack.c.bf16 %v5465_v12, %v5464_v42  ;;  %v9218_v58 = vor.u32 %v9809_v14, %v9217_v13  ;;  %v9222_v16 = vor.u32 %v9801_v6, %v9219_v9  ;;  %v8659_v14 = vld [vmem:[#allocation2 + $0x50] sm:$0xf0] }
 0x496   :  { %6642 = vmatpush.bf16.msrb.mxu2 %v8974_v25  ;;  %v5205_v50 = vpop.f32.mrf.mxu2  ;;  %v5224_v19 = vpop.f32.mrf.mxu3  ;;  %v9154_v3 = vor.u32 %v9793_v54, %v9153_v34  ;;  %v8787_v25 = vld [vmem:[#allocation2 + $0x150] sm:$0xf0] }
 0x497   :  { %5558 = vst [vmem:[#allocation2 + $0x410] sm:$0xff] %v5526_v31  ;;  %v5206_v39 = vadd.f32 %v5205_v50, %v11661_v56  ;;  %v5225_v36 = vadd.f32 %v5224_v19, %v11661_v56  ;;  %6581 = vmatpush.bf16.msra.mxu1 %v9218_v58  ;;  %6607 = vmatpush.bf16.msra.mxu3 %v9222_v16 }
 0x498   :  { %v5243_v49 = vpop.f32.mrf.mxu0  ;;  %v5262_v44 = vpop.f32.mrf.mxu1  ;;  %v8790_v1 = vor.u32 %v9691_v20, %v8787_v25 }
 0x499   :  { %6693 = vmatpush.bf16.msra.mxu0 %v9046_v15  ;;  %v5478_v5 = vmax.f32 %v5206_v39, 0.0  ;;  %v5479_v17 = vmax.f32 %v5225_v36, 0.0  ;;  %v5244_v23 = vadd.f32 %v5243_v49, %v11661_v56  ;;  %v5263_v33 = vadd.f32 %v5262_v44, %v11661_v56 }
 0x49a   :  { %6643 = vmatpush.bf16.msrb.mxu2 %v8910_v37  ;;  %v8723_v37 = vld [vmem:[#allocation2 + $0xd0] sm:$0xf0] }
 0x49b   :  { %v5533_v4 = vpack.c.bf16 %v5479_v17, %v5478_v5  ;;  %v5480_v10 = vmax.f32 %v5244_v23, 0.0  ;;  %v5481_v57 = vmax.f32 %v5263_v33, 0.0  ;;  %6582 = vmatpush.bf16.msra.mxu1 %v9154_v3  ;;  %6608 = vmatpush.bf16.msra.mxu3 %v9158_v26  ;;  %v8726_v31 = vor.u32 %v9675_v43, %v8723_v37 }
 0x49d   :  { %6694 = vmatpush.bf16.msra.mxu0 %v8982_v53  ;;  %5565 = vst [vmem:[#allocation2 + $0x448] sm:$0xff] %v5533_v4  ;;  %v5534_v24 = vpack.c.bf16 %v5481_v57, %v5480_v10  ;;  %v9658_v53 = vld [vmem:[#allocation2 + $0xc] sm:$0xf]  ;;  %v9779_v57 = vld [vmem:[#allocation2 + $0x3cc] sm:$0xf0] }
 0x49e   :  { %6644 = vmatpush.bf16.msrb.mxu2 %v8846_v32  ;;  %v5208_v15 = vpop.f32.mrf.mxu2  ;;  %v5227_v29 = vpop.f32.mrf.mxu3  ;;  %9279 = vmatmul.msk.bf16.vlgmr.msra.gmra.mxu1 %vm1995_vm0, %v11687_v8  ;;  %v8654_v28 = vor.u32 %v9658_v53, %v8651_v63  ;;  %v9659_v32 = vld [vmem:[#allocation2 + $0x14] sm:$0xf] }
 0x49f   :  { %5566 = vst [vmem:[#allocation2 + $0x450] sm:$0xff] %v5534_v24  ;;  %v5209_v62 = vadd.f32 %v5208_v15, %v11656_v40  ;;  %v5228_v59 = vadd.f32 %v5227_v29, %v11656_v40  ;;  %9280 = vmatmul.msk.bf16.vlgmr.msra.gmra.mxu3 %vm1995_vm0, %v11687_v8  ;;  %v8662_v16 = vor.u32 %v9659_v32, %v8659_v14  ;;  %v10076_v32 = vmov 5  }
 0x4a0   :  { %v5246_v52 = vpop.f32.mrf.mxu0  ;;  %v5265_v35 = vpop.f32.mrf.mxu1  ;;  %9968 = vset.pattern.permute.xlu1 %v10076_v32  ;;  %9969 = vset.pattern.permute.xlu0 %v10076_v32  ;;  %v9724_v32 = vld [vmem:[#allocation2 + $0x21c] sm:$0xf] }
 0x4a1   :  { %6695 = vmatpush.bf16.msra.mxu0 %v8918_v41  ;;  %v5494_v0 = vmax.f32 %v5209_v62, 0.0  ;;  %v5495_v21 = vmax.f32 %v5228_v59, 0.0  ;;  %v5247_v42 = vadd.f32 %v5246_v52, %v11656_v40  ;;  %v5266_v12 = vadd.f32 %v5265_v35, %v11656_v40  ;;  %v9105_v59 = vld [vmem:[#allocation2 + $0x390] sm:$0xf] }
 0x4a2   :  { %6645 = vmatpush.bf16.msrb.mxu2 %v8782_v48  ;;  %v9106_v43 = vor.u32 %v9779_v57, %v9105_v59  ;;  %v9756_v57 = vld [vmem:[#allocation2 + $0x31c] sm:$0xf] }
 0x4a3   :  { %v5541_v7 = vpack.c.bf16 %v5495_v21, %v5494_v0  ;;  %v5496_v13 = vmax.f32 %v5247_v42, 0.0  ;;  %v5497_v6 = vmax.f32 %v5266_v12, 0.0  ;;  %v9161_v21 = vld [vmem:[#allocation2 + $0x408] sm:$0xf]  ;;  %v9786_v42 = vld [vmem:[#allocation2 + $0x40c] sm:$0xf] }
 0x4a4   :  { %v9794_v20 = vld [vmem:[#allocation2 + $0x444] sm:$0xf0]  ;;  %v9163_v62 = vld [vmem:[#allocation2 + $0x448] sm:$0xf0] }
 0x4a5   :  { %6696 = vmatpush.bf16.msra.mxu0 %v8854_v55  ;;  %5573 = vst [vmem:[#allocation2 + $0x488] sm:$0xff] %v5541_v7  ;;  %v5542_v9 = vpack.c.bf16 %v5497_v6, %v5496_v13  ;;  %v5749_v13 = vld [vmem:[%s11845_s8] sm:$0xf]  ;;  %v9162_v14 = vor.u32 %v9794_v20, %v9161_v21  ;;  %v8987_v20 = vld [vmem:[#allocation2 + $0x2d8] sm:$0xf0] }
 0x4a6   :  { %6646 = vmatpush.bf16.msrb.mxu2 %v8718_v18  ;;  %v5210_v50 = vpop.f32.mrf.mxu2  ;;  %v5229_v19 = vpop.f32.mrf.mxu3  ;;  %v9171_v12 = vld [vmem:[#allocation2 + $0x450] sm:$0xf0]  ;;  %5752 = vperm.xlu1 %9968, %v5749_v13  }
 0x4a7   :  { %5574 = vst [vmem:[#allocation2 + $0x490] sm:$0xff] %v5542_v9  ;;  %v5211_v45 = vadd.f32 %v5210_v50, %v11673_v60  ;;  %v5230_v58 = vadd.f32 %v5229_v19, %v11673_v60  ;;  %v9166_v9 = vor.u32 %v9786_v42, %v9163_v62  ;;  %v9115_v19 = vld [vmem:[#allocation2 + $0x3d8] sm:$0xf0] }
 0x4a8   :  { %v5248_v38 = vpop.f32.mrf.mxu0  ;;  %v5267_v39 = vpop.f32.mrf.mxu1 }
 0x4a9   :  { %6697 = vmatpush.bf16.msra.mxu0 %v8790_v1  ;;  %v5510_v36 = vmax.f32 %v5211_v45, 0.0  ;;  %v5511_v41 = vmax.f32 %v5230_v58, 0.0  ;;  %v5249_v47 = vadd.f32 %v5248_v38, %v11673_v60  ;;  %v5268_v54 = vadd.f32 %v5267_v39, %v11673_v60  ;;  %v9787_v39 = vld [vmem:[#allocation2 + $0x414] sm:$0xf] }
 0x4aa   :  { %6647 = vmatpush.bf16.msrb.mxu2 %v8654_v28 }
 0x4ab   :  { %v5549_v49 = vpack.c.bf16 %v5511_v41, %v5510_v36  ;;  %v5512_v44 = vmax.f32 %v5249_v47, 0.0  ;;  %v5513_v46 = vmax.f32 %v5268_v54, 0.0  ;;  %v9174_v36 = vor.u32 %v9787_v39, %v9171_v12  ;;  %v9772_v41 = vld [vmem:[#allocation2 + $0x39c] sm:$0xf]  ;;  %v9763_v47 = vld [vmem:[#allocation2 + $0x34c] sm:$0xf0] }
 0x4ac   :  { %v9225_v4 = vld [vmem:[#allocation2 + $0x488] sm:$0xf]  ;;  %v9802_v10 = vld [vmem:[#allocation2 + $0x48c] sm:$0xf]  ;;  %v9795_v54 = vld [vmem:[#allocation2 + $0x44c] sm:$0xf0] }
 0x4ad   :  { %6698 = vmatpush.bf16.msra.mxu0 %v8726_v31  ;;  %6648 = vmatmul.bf16.vlgmr.msrb.gmra.mxu2 %v11658_v2  ;;  %5581 = vst [vmem:[#allocation2 + $0x4c8] sm:$0xff] %v5549_v49  ;;  %v5550_v11 = vpack.c.bf16 %v5513_v46, %v5512_v44  ;;  %v9732_v39 = vld [vmem:[#allocation2 + $0x254] sm:$0xf0] }
 0x4ae   :  { %v9803_v18 = vld [vmem:[#allocation2 + $0x494] sm:$0xf]  ;;  %v9233_v7 = vld [vmem:[#allocation2 + $0x490] sm:$0xf] }
 0x4af   :  { %5582 = vst [vmem:[#allocation2 + $0x4d0] sm:$0xff] %v5550_v11  ;;  %v5279_v5 = vpop.f32.mrf.mxu2  ;;  %v5298_v17 = vpop.f32.mrf.mxu3  ;;  %v9118_v11 = vor.u32 %v9772_v41, %v9115_v19 }
 0x4b0   :  { %v5280_v23 = vadd.f32 %v5279_v5, %v11663_v27  ;;  %v5299_v33 = vadd.f32 %v5298_v17, %v11663_v27  ;;  %v9780_v5 = vld [vmem:[#allocation2 + $0x3d4] sm:$0xf0]  ;;  %v9041_v17 = vld [vmem:[#allocation2 + $0x310] sm:$0xf] }
 0x4b1   :  { %6699 = vmatpush.bf16.msra.mxu0 %v8662_v16  ;;  %v5317_v51 = vpop.f32.mrf.mxu0  ;;  %v5336_v34 = vpop.f32.mrf.mxu1 }
 0x4b2   :  { %v5466_v48 = vmax.f32 %v5280_v23, 0.0  ;;  %v5467_v55 = vmax.f32 %v5299_v33, 0.0  ;;  %v5318_v3 = vadd.f32 %v5317_v51, %v11663_v27  ;;  %v5337_v30 = vadd.f32 %v5336_v34, %v11663_v27  ;;  %v9169_v23 = vld [vmem:[#allocation2 + $0x410] sm:$0xf]  ;;  %v9051_v33 = vld [vmem:[#allocation2 + $0x358] sm:$0xf0] }
 0x4b3   :  { %v9042_v34 = vor.u32 %v9763_v47, %v9041_v17 }
 0x4b4   :  { %6700 = vmatmul.bf16.vlgmr.msra.gmra.mxu0 %v11658_v2  ;;  %v5527_v26 = vpack.c.bf16 %v5467_v55, %v5466_v48  ;;  %v5468_v61 = vmax.f32 %v5318_v3, 0.0  ;;  %v5469_v25 = vmax.f32 %v5337_v30, 0.0  ;;  %v9810_v24 = vld [vmem:[#allocation2 + $0x4c4] sm:$0xf0]  ;;  %v9227_v22 = vld [vmem:[#allocation2 + $0x4c8] sm:$0xf0]  ;;  %v9170_v48 = vor.u32 %v9795_v54, %v9169_v23 }
 0x4b5   :  { %v9226_v15 = vor.u32 %v9810_v24, %v9225_v4  ;;  %v9230_v29 = vor.u32 %v9802_v10, %v9227_v22  ;;  %v9113_v55 = vld [vmem:[#allocation2 + $0x398] sm:$0xf]  ;;  %v9747_v3 = vld [vmem:[#allocation2 + $0x2cc] sm:$0xf0]  ;;  %v8859_v54 = vld [vmem:[#allocation2 + $0x1d8] sm:$0xf0] }
 0x4b6   :  { %5559 = vst [vmem:[#allocation2 + $0x418] sm:$0xff] %v5527_v26  ;;  %v5528_v1 = vpack.c.bf16 %v5469_v25, %v5468_v61  ;;  %v9235_v63 = vld [vmem:[#allocation2 + $0x4d0] sm:$0xf0]  ;;  %v9811_v52 = vld [vmem:[#allocation2 + $0x4cc] sm:$0xf0]  ;;  %v9114_v10 = vor.u32 %v9780_v5, %v9113_v55  ;;  %v9054_v25 = vor.u32 %v9756_v57, %v9051_v33 }
 0x4b7   :  { %v5281_v35 = vpop.f32.mrf.mxu2  ;;  %v5300_v37 = vpop.f32.mrf.mxu3  ;;  %6633 = vmatpush.bf16.msrb.mxu1 %v9226_v15  ;;  %6659 = vmatpush.bf16.msrb.mxu3 %v9230_v29  ;;  %v9238_v0 = vor.u32 %v9803_v18, %v9235_v63  ;;  %v9234_v50 = vor.u32 %v9811_v52, %v9233_v7  ;;  %v8977_v24 = vld [vmem:[#allocation2 + $0x290] sm:$0xf]  ;;  %v9764_v22 = vld [vmem:[#allocation2 + $0x354] sm:$0xf0]  ;;  %v8923_v7 = vld [vmem:[#allocation2 + $0x258] sm:$0xf0] }
 0x4b8   :  { %5560 = vst [vmem:[#allocation2 + $0x420] sm:$0xff] %v5528_v1  ;;  %v5282_v53 = vadd.f32 %v5281_v35, %v11661_v56  ;;  %v5301_v28 = vadd.f32 %v5300_v37, %v11661_v56  ;;  %v8978_v18 = vor.u32 %v9747_v3, %v8977_v24  ;;  %v9049_v52 = vld [vmem:[#allocation2 + $0x318] sm:$0xf]  ;;  %v9740_v37 = vld [vmem:[#allocation2 + $0x29c] sm:$0xf] }
 0x4b9   :  { %v5319_v6 = vpop.f32.mrf.mxu0  ;;  %v5338_v31 = vpop.f32.mrf.mxu1  ;;  %6711 = vmatpush.bf16.msra.mxu2 %v9238_v0  ;;  %v9050_v35 = vor.u32 %v9764_v22, %v9049_v52  ;;  %v9731_v0 = vld [vmem:[#allocation2 + $0x24c] sm:$0xf0]  ;;  %v8921_v5 = vld [vmem:[#allocation2 + $0x218] sm:$0xf]  ;;  %v9708_v23 = vld [vmem:[#allocation2 + $0x19c] sm:$0xf] }
 0x4ba   :  { %v5482_v45 = vmax.f32 %v5282_v53, 0.0  ;;  %v5483_v58 = vmax.f32 %v5301_v28, 0.0  ;;  %v5320_v16 = vadd.f32 %v5319_v6, %v11661_v56  ;;  %v5339_v38 = vadd.f32 %v5338_v31, %v11661_v56  ;;  %v9748_v28 = vld [vmem:[#allocation2 + $0x2d4] sm:$0xf0]  ;;  %v9699_v33 = vld [vmem:[#allocation2 + $0x14c] sm:$0xf0] }
 0x4bb   :  { %6634 = vmatpush.bf16.msrb.mxu1 %v9162_v14  ;;  %6660 = vmatpush.bf16.msrb.mxu3 %v9166_v9  ;;  %v8990_v53 = vor.u32 %v9740_v37, %v8987_v20  ;;  %v8985_v31 = vld [vmem:[#allocation2 + $0x298] sm:$0xf]  ;;  %v9715_v14 = vld [vmem:[#allocation2 + $0x1cc] sm:$0xf0]  ;;  %v8922_v17 = vor.u32 %v9732_v39, %v8921_v5  ;;  %v8862_v55 = vor.u32 %v9708_v23, %v8859_v54  ;;  %v8731_v52 = vld [vmem:[#allocation2 + $0xd8] sm:$0xf0] }
 0x4bc   :  { %v5535_v49 = vpack.c.bf16 %v5483_v58, %v5482_v45  ;;  %v5484_v44 = vmax.f32 %v5320_v16, 0.0  ;;  %v5485_v46 = vmax.f32 %v5339_v38, 0.0  ;;  %v8986_v19 = vor.u32 %v9748_v28, %v8985_v31  ;;  %v8849_v38 = vld [vmem:[#allocation2 + $0x190] sm:$0xf]  ;;  %v9716_v3 = vld [vmem:[#allocation2 + $0x1d4] sm:$0xf0] }
 0x4bd   :  { %6712 = vmatpush.bf16.msra.mxu2 %v9174_v36  ;;  %v8926_v16 = vor.u32 %v9724_v32, %v8923_v7  ;;  %v8850_v47 = vor.u32 %v9715_v14, %v8849_v38  ;;  %v9683_v24 = vld [vmem:[#allocation2 + $0xcc] sm:$0xf0]  ;;  %v9676_v28 = vld [vmem:[#allocation2 + $0x9c] sm:$0xf]  ;;  %v8729_v14 = vld [vmem:[#allocation2 + $0x98] sm:$0xf] }
 0x4be   :  { %5567 = vst [vmem:[#allocation2 + $0x458] sm:$0xff] %v5535_v49  ;;  %v5536_v51 = vpack.c.bf16 %v5485_v46, %v5484_v44  ;;  %9282 = vmatmul.msk.bf16.vlgmr.msrb.gmra.mxu3 %vm1995_vm0, %v11687_v8  ;;  %9281 = vmatmul.msk.bf16.vlgmr.msrb.gmra.mxu1 %vm1995_vm0, %v11687_v8  ;;  %v9667_v7 = vld [vmem:[#allocation2 + $0x4c] sm:$0xf0]  ;;  %v8734_v31 = vor.u32 %v9676_v28, %v8731_v52 }
 0x4bf   :  { %6666 = vmatpush.bf16.msra.mxu1 %v9106_v43  ;;  %6685 = vmatpush.bf16.msra.mxu3 %v9234_v50  ;;  %v5284_v30 = vpop.f32.mrf.mxu2  ;;  %v5303_v4 = vpop.f32.mrf.mxu3  ;;  %v8913_v43 = vld [vmem:[#allocation2 + $0x210] sm:$0xf] }
 0x4c0   :  { %5568 = vst [vmem:[#allocation2 + $0x460] sm:$0xff] %v5536_v51  ;;  %v5285_v26 = vadd.f32 %v5284_v30, %v11656_v40  ;;  %v5304_v61 = vadd.f32 %v5303_v4, %v11656_v40  ;;  %9284 = vmatmul.msk.bf16.vlgmr.msra.gmra.mxu2 %vm1995_vm0, %v11687_v8  ;;  %v8914_v6 = vor.u32 %v9731_v0, %v8913_v43  ;;  %v8785_v30 = vld [vmem:[#allocation2 + $0x110] sm:$0xf]  ;;  %v8795_v4 = vld [vmem:[#allocation2 + $0x158] sm:$0xf0] }
 0x4c1   :  { %6744 = vmatpush.bf16.msrb.mxu2 %v9118_v11  ;;  %v5322_v15 = vpop.f32.mrf.mxu0  ;;  %v5341_v29 = vpop.f32.mrf.mxu1  ;;  %v8786_v57 = vor.u32 %v9699_v33, %v8785_v30  ;;  %v8657_v43 = vld [vmem:[#allocation2 + $0x10] sm:$0xf]  ;;  %v9773_v33 = vld [vmem:[#allocation2 + $0x3a4] sm:$0xf] }
 0x4c2   :  { %v5498_v62 = vmax.f32 %v5285_v26, 0.0  ;;  %v5499_v59 = vmax.f32 %v5304_v61, 0.0  ;;  %v5323_v1 = vadd.f32 %v5322_v15, %v11656_v40  ;;  %v5342_v63 = vadd.f32 %v5341_v29, %v11656_v40  ;;  %v8857_v26 = vld [vmem:[#allocation2 + $0x198] sm:$0xf] }
 0x4c3   :  { %6667 = vmatpush.bf16.msra.mxu1 %v9042_v34  ;;  %6686 = vmatpush.bf16.msra.mxu3 %v9170_v48  ;;  %v8858_v61 = vor.u32 %v9716_v3, %v8857_v26  ;;  %v8658_v39 = vor.u32 %v9667_v7, %v8657_v43  ;;  %v9765_v7 = vld [vmem:[#allocation2 + $0x35c] sm:$0xf0] }
 0x4c4   :  { %v5543_v21 = vpack.c.bf16 %v5499_v59, %v5498_v62  ;;  %v5500_v42 = vmax.f32 %v5323_v1, 0.0  ;;  %v5501_v12 = vmax.f32 %v5342_v63, 0.0  ;;  %v8721_v63 = vld [vmem:[#allocation2 + $0x90] sm:$0xf] }
 0x4c5   :  { %6745 = vmatpush.bf16.msrb.mxu2 %v9054_v25  ;;  %v9692_v25 = vld [vmem:[#allocation2 + $0x11c] sm:$0xf]  ;;  %v8722_v0 = vor.u32 %v9683_v24, %v8721_v63  ;;  %v9177_v63 = vld [vmem:[#allocation2 + $0x418] sm:$0xf] }
 0x4c6   :  { %5575 = vst [vmem:[#allocation2 + $0x498] sm:$0xff] %v5543_v21  ;;  %v5544_v13 = vpack.c.bf16 %v5501_v12, %v5500_v42  ;;  %v8798_v29 = vor.u32 %v9692_v25, %v8795_v4  ;;  %v8793_v21 = vld [vmem:[#allocation2 + $0x118] sm:$0xf]  ;;  %v9788_v4 = vld [vmem:[#allocation2 + $0x41c] sm:$0xf] }
 0x4c7   :  { %6718 = vmatpush.bf16.msrb.mxu3 %v9114_v10  ;;  %6668 = vmatpush.bf16.msra.mxu1 %v8978_v18  ;;  %v5286_v9 = vpop.f32.mrf.mxu2  ;;  %v5305_v50 = vpop.f32.mrf.mxu3  ;;  %v9700_v18 = vld [vmem:[#allocation2 + $0x154] sm:$0xf0] }
 0x4c8   :  { %5576 = vst [vmem:[#allocation2 + $0x4a0] sm:$0xff] %v5544_v13  ;;  %v5287_v45 = vadd.f32 %v5286_v9, %v11673_v60  ;;  %v5306_v58 = vadd.f32 %v5305_v50, %v11673_v60  ;;  %v9684_v9 = vld [vmem:[#allocation2 + $0xd4] sm:$0xf0]  ;;  %v8667_v50 = vld [vmem:[#allocation2 + $0x58] sm:$0xf0] }
 0x4c9   :  { %6746 = vmatpush.bf16.msrb.mxu2 %v8990_v53  ;;  %v5324_v36 = vpop.f32.mrf.mxu0  ;;  %v5343_v41 = vpop.f32.mrf.mxu1  ;;  %v8794_v53 = vor.u32 %v9700_v18, %v8793_v21  ;;  %v8730_v54 = vor.u32 %v9684_v9, %v8729_v14  ;;  %v9059_v18 = vld [vmem:[#allocation2 + $0x360] sm:$0xf0]  ;;  %v9774_v14 = vld [vmem:[#allocation2 + $0x3ac] sm:$0xf]  ;;  %v9782_v9 = vld [vmem:[#allocation2 + $0x3e4] sm:$0xf0] }
 0x4ca   :  { %v5514_v49 = vmax.f32 %v5287_v45, 0.0  ;;  %v5515_v44 = vmax.f32 %v5306_v58, 0.0  ;;  %v5325_v46 = vadd.f32 %v5324_v36, %v11673_v60  ;;  %v5344_v11 = vadd.f32 %v5343_v41, %v11673_v60  ;;  %v9660_v41 = vld [vmem:[#allocation2 + $0x1c] sm:$0xf] }
 0x4cb   :  { %6719 = vmatpush.bf16.msrb.mxu3 %v9050_v35  ;;  %6669 = vmatpush.bf16.msra.mxu1 %v8914_v6 }
 0x4cc   :  { %v5551_v51 = vpack.c.bf16 %v5515_v44, %v5514_v49  ;;  %v5516_v34 = vmax.f32 %v5325_v46, 0.0  ;;  %v5517_v48 = vmax.f32 %v5344_v11, 0.0  ;;  %v9179_v44 = vld [vmem:[#allocation2 + $0x458] sm:$0xf0] }
 0x4cd   :  { %6747 = vmatpush.bf16.msrb.mxu2 %v8926_v16  ;;  %v9804_v32 = vld [vmem:[#allocation2 + $0x49c] sm:$0xf]  ;;  %v9241_v36 = vld [vmem:[#allocation2 + $0x498] sm:$0xf]  ;;  %v9182_v24 = vor.u32 %v9788_v4, %v9179_v44  ;;  %v8993_v4 = vld [vmem:[#allocation2 + $0x2a0] sm:$0xf] }
 0x4ce   :  { %5583 = vst [vmem:[#allocation2 + $0x4d8] sm:$0xff] %v5551_v51  ;;  %v5552_v10 = vpack.c.bf16 %v5517_v48, %v5516_v34  ;;  %9283 = vmatmul.msk.bf16.vlgmr.msra.gmra.mxu3 %vm1995_vm0, %v11687_v8  ;;  %v9123_v51 = vld [vmem:[#allocation2 + $0x3e0] sm:$0xf0]  ;;  %v8665_v34 = vld [vmem:[#allocation2 + $0x18] sm:$0xf] }
 0x4cf   :  { %6720 = vmatpush.bf16.msrb.mxu3 %v8986_v19  ;;  %6670 = vmatpush.bf16.msra.mxu1 %v8850_v47  ;;  %v9668_v47 = vld [vmem:[#allocation2 + $0x54] sm:$0xf0]  ;;  %v9805_v23 = vld [vmem:[#allocation2 + $0x4a4] sm:$0xf]  ;;  %v9249_v52 = vld [vmem:[#allocation2 + $0x4a0] sm:$0xf] }
 0x4d0   :  { %5584 = vst [vmem:[#allocation2 + $0x4e0] sm:$0xff] %v5552_v10 }
 0x4d1   :  { %6748 = vmatpush.bf16.msrb.mxu2 %v8862_v55  ;;  %v5393_v59 = vpop.f32.mrf.mxu0  ;;  %v5412_v1 = vpop.f32.mrf.mxu1 }
 0x4d2   :  { %v5355_v22 = vpop.f32.mrf.mxu2  ;;  %v5374_v15 = vpop.f32.mrf.mxu3  ;;  %v5394_v35 = vadd.f32 %v5393_v59, %v11663_v27  ;;  %v5413_v37 = vadd.f32 %v5412_v1, %v11663_v27  ;;  %v9126_v59 = vor.u32 %v9773_v33, %v9123_v51  ;;  %v8666_v1 = vor.u32 %v9668_v47, %v8665_v34  ;;  %v9129_v47 = vld [vmem:[#allocation2 + $0x3a8] sm:$0xf]  ;;  %v9758_v33 = vld [vmem:[#allocation2 + $0x32c] sm:$0xf]  ;;  %v9749_v51 = vld [vmem:[#allocation2 + $0x2dc] sm:$0xf0] }
 0x4d3   :  { %6721 = vmatpush.bf16.msrb.mxu3 %v8922_v17  ;;  %6671 = vmatpush.bf16.msra.mxu1 %v8786_v57  ;;  %v5356_v20 = vadd.f32 %v5355_v22, %v11663_v27  ;;  %v5375_v62 = vadd.f32 %v5374_v15, %v11663_v27  ;;  %v8670_v17 = vor.u32 %v9660_v41, %v8667_v50  ;;  %v9796_v57 = vld [vmem:[#allocation2 + $0x454] sm:$0xf0]  ;;  %v9121_v22 = vld [vmem:[#allocation2 + $0x3a0] sm:$0xf]  ;;  %v8995_v50 = vld [vmem:[#allocation2 + $0x2e0] sm:$0xf0] }
 0x4d4   :  { %v5472_v13 = vmax.f32 %v5394_v35, 0.0  ;;  %v5473_v6 = vmax.f32 %v5413_v37, 0.0  ;;  %v9781_v15 = vld [vmem:[#allocation2 + $0x3dc] sm:$0xf0]  ;;  %v9766_v34 = vld [vmem:[#allocation2 + $0x364] sm:$0xf0] }
 0x4d5   :  { %6749 = vmatpush.bf16.msrb.mxu2 %v8798_v29  ;;  %v5470_v42 = vmax.f32 %v5356_v20, 0.0  ;;  %v5471_v12 = vmax.f32 %v5375_v62, 0.0  ;;  %v9243_v45 = vld [vmem:[#allocation2 + $0x4d8] sm:$0xf0]  ;;  %v9812_v58 = vld [vmem:[#allocation2 + $0x4d4] sm:$0xf0]  ;;  %v9122_v28 = vor.u32 %v9781_v15, %v9121_v22  ;;  %v8994_v22 = vor.u32 %v9749_v51, %v8993_v4 }
 0x4d6   :  { %v5530_v16 = vpack.c.bf16 %v5473_v6, %v5472_v13  ;;  %v9246_v38 = vor.u32 %v9804_v32, %v9243_v45  ;;  %v9242_v49 = vor.u32 %v9812_v58, %v9241_v36  ;;  %v9187_v29 = vld [vmem:[#allocation2 + $0x460] sm:$0xf0]  ;;  %v9797_v13 = vld [vmem:[#allocation2 + $0x45c] sm:$0xf0] }
 0x4d7   :  { %6722 = vmatpush.bf16.msrb.mxu3 %v8858_v61  ;;  %6672 = vmatpush.bf16.msra.mxu1 %v8722_v0  ;;  %v5529_v19 = vpack.c.bf16 %v5471_v12, %v5470_v42  ;;  %v9251_v46 = vld [vmem:[#allocation2 + $0x4e0] sm:$0xf0]  ;;  %v9813_v26 = vld [vmem:[#allocation2 + $0x4dc] sm:$0xf0]  ;;  %v9178_v0 = vor.u32 %v9796_v57, %v9177_v63  ;;  %v9131_v12 = vld [vmem:[#allocation2 + $0x3e8] sm:$0xf0] }
 0x4d8   :  { %5562 = vst [vmem:[#allocation2 + $0x430] sm:$0xff] %v5530_v16  ;;  %6763 = vmatpush.bf16.msrb.mxu0 %v9246_v38  ;;  %v9254_v10 = vor.u32 %v9805_v23, %v9251_v46  ;;  %v9250_v21 = vor.u32 %v9813_v26, %v9249_v52  ;;  %v9789_v42 = vld [vmem:[#allocation2 + $0x424] sm:$0xf]  ;;  %v9134_v32 = vor.u32 %v9774_v14, %v9131_v12  ;;  %v9057_v45 = vld [vmem:[#allocation2 + $0x320] sm:$0xf] }
 0x4d9   :  { %6750 = vmatpush.bf16.msrb.mxu2 %v8734_v31  ;;  %5561 = vst [vmem:[#allocation2 + $0x428] sm:$0xff] %v5529_v19  ;;  %v5395_v3 = vpop.f32.mrf.mxu0  ;;  %v5414_v30 = vpop.f32.mrf.mxu1  ;;  %v9190_v43 = vor.u32 %v9789_v42, %v9187_v29  ;;  %v9757_v31 = vld [vmem:[#allocation2 + $0x324] sm:$0xf]  ;;  %v9185_v58 = vld [vmem:[#allocation2 + $0x420] sm:$0xf] }
 0x4da   :  { %v5357_v11 = vpop.f32.mrf.mxu2  ;;  %v5376_v5 = vpop.f32.mrf.mxu3  ;;  %v5396_v61 = vadd.f32 %v5395_v3, %v11661_v56  ;;  %v5415_v25 = vadd.f32 %v5414_v30, %v11661_v56  ;;  %v9062_v19 = vor.u32 %v9757_v31, %v9059_v18  ;;  %v9186_v36 = vor.u32 %v9797_v13, %v9185_v58  ;;  %v11740_v41 = vld.sshfl [vmem:[#allocation1] sm:$0xff pattern:$0x73625140]  ;;  %v9733_v29 = vld [vmem:[#allocation2 + $0x25c] sm:$0xf0] }
 0x4db   :  { %6723 = vmatpush.bf16.msrb.mxu3 %v8794_v53  ;;  %6673 = vmatpush.bf16.msra.mxu1 %v8658_v39  ;;  %v5358_v48 = vadd.f32 %v5357_v11, %v11661_v56  ;;  %v5377_v55 = vadd.f32 %v5376_v5, %v11661_v56  ;;  %v9058_v39 = vor.u32 %v9765_v7, %v9057_v45  ;;  %v8929_v52 = vld [vmem:[#allocation2 + $0x220] sm:$0xf]  ;;  %v9001_v42 = vld [vmem:[#allocation2 + $0x2a8] sm:$0xf]  ;;  %v8939_v12 = vld [vmem:[#allocation2 + $0x268] sm:$0xf0] }
 0x4dc   :  { %v5488_v35 = vmax.f32 %v5396_v61, 0.0  ;;  %v5489_v37 = vmax.f32 %v5415_v25, 0.0  ;;  %6764 = vmatpush.bf16.msrb.mxu0 %v9182_v24  ;;  %v9130_v5 = vor.u32 %v9782_v9, %v9129_v47  ;;  %v9065_v61 = vld [vmem:[#allocation2 + $0x328] sm:$0xf]  ;;  %v9003_v25 = vld [vmem:[#allocation2 + $0x2e8] sm:$0xf0] }
 0x4dd   :  { %6751 = vmatpush.bf16.msrb.mxu2 %v8670_v17  ;;  %v5486_v20 = vmax.f32 %v5358_v48, 0.0  ;;  %v5487_v62 = vmax.f32 %v5377_v55, 0.0  ;;  %v9741_v17 = vld [vmem:[#allocation2 + $0x2a4] sm:$0xf]  ;;  %v9066_v15 = vor.u32 %v9766_v34, %v9065_v61  ;;  %v9726_v9 = vld [vmem:[#allocation2 + $0x22c] sm:$0xf] }
 0x4de   :  { %6674 = vmatmul.bf16.vlgmr.msra.gmra.mxu1 %v11658_v2  ;;  %v5538_v6 = vpack.c.bf16 %v5489_v37, %v5488_v35  ;;  %v8998_v3 = vor.u32 %v9741_v17, %v8995_v50  ;;  %v8867_v35 = vld [vmem:[#allocation2 + $0x1e0] sm:$0xf0]  ;;  %v9717_v50 = vld [vmem:[#allocation2 + $0x1dc] sm:$0xf0] }
 0x4df   :  { %6724 = vmatpush.bf16.msrb.mxu3 %v8730_v54  ;;  %6737 = vmatpush.bf16.msrb.mxu1 %v9242_v49  ;;  %v5537_v53 = vpack.c.bf16 %v5487_v62, %v5486_v20  ;;  %v9067_v54 = vld [vmem:[#allocation2 + $0x368] sm:$0xf0]  ;;  %v9725_v20 = vld [vmem:[#allocation2 + $0x224] sm:$0xf] }
 0x4e0   :  { %6796 = vmatpush.bf16.msra.mxu0 %v9126_v59  ;;  %5570 = vst [vmem:[#allocation2 + $0x470] sm:$0xff] %v5538_v6  ;;  %6752 = vmatmul.bf16.vlgmr.msrb.gmra.mxu2 %v11658_v2  ;;  %v9070_v30 = vor.u32 %v9758_v33, %v9067_v54  ;;  %v9742_v62 = vld [vmem:[#allocation2 + $0x2ac] sm:$0xf]  ;;  %v9750_v59 = vld [vmem:[#allocation2 + $0x2e4] sm:$0xf0] }
 0x4e1   :  { %6815 = vmatpush.bf16.msra.mxu2 %v9254_v10  ;;  %5569 = vst [vmem:[#allocation2 + $0x468] sm:$0xff] %v5537_v53  ;;  %v5398_v46 = vpop.f32.mrf.mxu0  ;;  %v5417_v11 = vpop.f32.mrf.mxu1  ;;  %9286 = vmatmul.msk.bf16.vlgmr.msrb.gmra.mxu0 %vm1995_vm0, %v11687_v8  ;;  %v8931_v10 = vld [vmem:[#allocation2 + $0x260] sm:$0xf0]  ;;  %v9006_v63 = vor.u32 %v9742_v62, %v9003_v25  ;;  %v9002_v13 = vor.u32 %v9750_v59, %v9001_v42  ;;  %v8937_v54 = vld [vmem:[#allocation2 + $0x228] sm:$0xf] }
 0x4e2   :  { %v5360_v16 = vpop.f32.mrf.mxu2  ;;  %v5379_v38 = vpop.f32.mrf.mxu3  ;;  %v5399_v2 = vadd.f32 %v5398_v46, %v11656_v40  ;;  %v5418_v23 = vadd.f32 %v5417_v11, %v11656_v40  ;;  %v9709_v6 = vld [vmem:[#allocation2 + $0x1a4] sm:$0xf]  ;;  %v9718_v33 = vld [vmem:[#allocation2 + $0x1e4] sm:$0xf0]  ;;  %v9669_v42 = vld [vmem:[#allocation2 + $0x5c] sm:$0xf0] }
 0x4e3   :  { %6725 = vmatpush.bf16.msrb.mxu3 %v8666_v1  ;;  %6738 = vmatpush.bf16.msrb.mxu1 %v9178_v0  ;;  %v5361_v49 = vadd.f32 %v5360_v16, %v11656_v40  ;;  %v5380_v44 = vadd.f32 %v5379_v38, %v11656_v40  ;;  %v8934_v1 = vor.u32 %v9725_v20, %v8931_v10  ;;  %v8865_v38 = vld [vmem:[#allocation2 + $0x1a0] sm:$0xf]  ;;  %v8873_v10 = vld [vmem:[#allocation2 + $0x1a8] sm:$0xf] }
 0x4e4   :  { %6797 = vmatpush.bf16.msra.mxu0 %v9062_v19  ;;  %v5504_v57 = vmax.f32 %v5399_v2, 0.0  ;;  %v5505_v26 = vmax.f32 %v5418_v23, 0.0  ;;  %v9734_v19 = vld [vmem:[#allocation2 + $0x264] sm:$0xf0]  ;;  %v8870_v58 = vor.u32 %v9709_v6, %v8867_v35  ;;  %v8942_v16 = vor.u32 %v9726_v9, %v8939_v12  ;;  %v9693_v2 = vld [vmem:[#allocation2 + $0x124] sm:$0xf] }
 0x4e5   :  { %6816 = vmatpush.bf16.msra.mxu2 %v9190_v43  ;;  %v5502_v48 = vmax.f32 %v5361_v49, 0.0  ;;  %v5503_v55 = vmax.f32 %v5380_v44, 0.0  ;;  %v8875_v49 = vld [vmem:[#allocation2 + $0x1e8] sm:$0xf0]  ;;  %v8866_v46 = vor.u32 %v9717_v50, %v8865_v38  ;;  %v8938_v11 = vor.u32 %v9734_v19, %v8937_v54  ;;  %v8745_v19 = vld [vmem:[#allocation2 + $0xa8] sm:$0xf] }
 0x4e6   :  { %6726 = vmatmul.bf16.vlgmr.msrb.gmra.mxu3 %v11740_v41  ;;  %v5546_v18 = vpack.c.bf16 %v5505_v26, %v5504_v57  ;;  %v9710_v23 = vld [vmem:[#allocation2 + $0x1ac] sm:$0xf]  ;;  %v8874_v25 = vor.u32 %v9718_v33, %v8873_v10 }
 0x4e7   :  { %6789 = vmatpush.bf16.msra.mxu3 %v9250_v21  ;;  %6770 = vmatpush.bf16.msra.mxu1 %v9122_v28  ;;  %v5545_v24 = vpack.c.bf16 %v5503_v55, %v5502_v48  ;;  %v8930_v21 = vor.u32 %v9733_v29, %v8929_v52  ;;  %v8878_v34 = vor.u32 %v9710_v23, %v8875_v49  ;;  %v8801_v48 = vld [vmem:[#allocation2 + $0x120] sm:$0xf]  ;;  %v8739_v55 = vld [vmem:[#allocation2 + $0xe0] sm:$0xf0]  ;;  %v8811_v57 = vld [vmem:[#allocation2 + $0x168] sm:$0xf0] }
 0x4e8   :  { %6798 = vmatpush.bf16.msra.mxu0 %v8998_v3  ;;  %5578 = vst [vmem:[#allocation2 + $0x4b0] sm:$0xff] %v5546_v18  ;;  %v9702_v29 = vld [vmem:[#allocation2 + $0x164] sm:$0xf0]  ;;  %v8747_v52 = vld [vmem:[#allocation2 + $0xe8] sm:$0xf0] }
 0x4e9   :  { %6848 = vmatpush.bf16.msrb.mxu2 %v9134_v32  ;;  %5577 = vst [vmem:[#allocation2 + $0x4a8] sm:$0xff] %v5545_v24  ;;  %v5400_v43 = vpop.f32.mrf.mxu0  ;;  %v5419_v7 = vpop.f32.mrf.mxu1  ;;  %v9677_v24 = vld [vmem:[#allocation2 + $0xa4] sm:$0xf]  ;;  %v9678_v12 = vld [vmem:[#allocation2 + $0xac] sm:$0xf] }
 0x4ea   :  { %v5362_v37 = vpop.f32.mrf.mxu2  ;;  %v5381_v0 = vpop.f32.mrf.mxu3  ;;  %v5401_v31 = vadd.f32 %v5400_v43, %v11673_v60  ;;  %v5420_v14 = vadd.f32 %v5419_v7, %v11673_v60  ;;  %v8742_v62 = vor.u32 %v9677_v24, %v8739_v55  ;;  %v8750_v7 = vor.u32 %v9678_v12, %v8747_v52  ;;  %v9783_v55 = vld [vmem:[#allocation2 + $0x3ec] sm:$0xf0]  ;;  %v9776_v52 = vld [vmem:[#allocation2 + $0x3bc] sm:$0xf] }
 0x4eb   :  { %6790 = vmatpush.bf16.msra.mxu3 %v9186_v36  ;;  %6771 = vmatpush.bf16.msra.mxu1 %v9058_v39  ;;  %v5363_v53 = vadd.f32 %v5362_v37, %v11673_v60  ;;  %v5382_v28 = vadd.f32 %v5381_v0, %v11673_v60  ;;  %v8803_v39 = vld [vmem:[#allocation2 + $0x160] sm:$0xf0]  ;;  %v9137_v24 = vld [vmem:[#allocation2 + $0x3b0] sm:$0xf] }
 0x4ec   :  { %6799 = vmatpush.bf16.msra.mxu0 %v8934_v1  ;;  %v5520_v36 = vmax.f32 %v5401_v31, 0.0  ;;  %v5521_v47 = vmax.f32 %v5420_v14, 0.0  ;;  %v8806_v51 = vor.u32 %v9693_v2, %v8803_v39  ;;  %v8675_v1 = vld [vmem:[#allocation2 + $0x60] sm:$0xf0] }
 0x4ed   :  { %6849 = vmatpush.bf16.msrb.mxu2 %v9070_v30  ;;  %v5518_v32 = vmax.f32 %v5363_v53, 0.0  ;;  %v5519_v45 = vmax.f32 %v5382_v28, 0.0  ;;  %v9661_v0 = vld [vmem:[#allocation2 + $0x24] sm:$0xf]  ;;  %v9686_v28 = vld [vmem:[#allocation2 + $0xe4] sm:$0xf0] }
 0x4ee   :  { %9285 = vmatmul.msk.bf16.vlgmr.msrb.gmra.mxu1 %vm1995_vm0, %v11687_v8  ;;  %v5554_v17 = vpack.c.bf16 %v5521_v47, %v5520_v36  ;;  %v8678_v43 = vor.u32 %v9661_v0, %v8675_v1  ;;  %v8746_v39 = vor.u32 %v9686_v28, %v8745_v19  ;;  %v9195_v47 = vld [vmem:[#allocation2 + $0x468] sm:$0xf0]  ;;  %v9138_v1 = vor.u32 %v9783_v55, %v9137_v24  ;;  %v9767_v0 = vld [vmem:[#allocation2 + $0x36c] sm:$0xf0]  ;;  %v9083_v28 = vld [vmem:[#allocation2 + $0x378] sm:$0xf0] }
 0x4ef   :  { %6822 = vmatpush.bf16.msrb.mxu3 %v9130_v5  ;;  %6772 = vmatpush.bf16.msra.mxu1 %v8994_v22  ;;  %v5553_v44 = vpack.c.bf16 %v5519_v45, %v5518_v32  ;;  %v9701_v5 = vld [vmem:[#allocation2 + $0x15c] sm:$0xf0]  ;;  %v9694_v22 = vld [vmem:[#allocation2 + $0x12c] sm:$0xf]  ;;  %v9807_v33 = vld [vmem:[#allocation2 + $0x4b4] sm:$0xf] }
 0x4f0   :  { %6800 = vmatpush.bf16.msra.mxu0 %v8870_v58  ;;  %5586 = vst [vmem:[#allocation2 + $0x4f0] sm:$0xff] %v5554_v17  ;;  %v8802_v4 = vor.u32 %v9701_v5, %v8801_v48  ;;  %9288 = vmatmul.msk.bf16.vlgmr.msra.gmra.mxu2 %vm1995_vm0, %v11687_v8  ;;  %v8814_v59 = vor.u32 %v9694_v22, %v8811_v57  ;;  %v9662_v32 = vld [vmem:[#allocation2 + $0x2c] sm:$0xf]  ;;  %v9670_v58 = vld [vmem:[#allocation2 + $0x64] sm:$0xf0] }
 0x4f1   :  { %6850 = vmatpush.bf16.msrb.mxu2 %v9006_v63  ;;  %5585 = vst [vmem:[#allocation2 + $0x4e8] sm:$0xff] %v5553_v44  ;;  %v8737_v63 = vld [vmem:[#allocation2 + $0xa0] sm:$0xf]  ;;  %v8683_v45 = vld [vmem:[#allocation2 + $0x68] sm:$0xf0] }
 0x4f2   :  { %v5431_v3 = vpop.f32.mrf.mxu2  ;;  %v5450_v30 = vpop.f32.mrf.mxu3  ;;  %v9257_v36 = vld [vmem:[#allocation2 + $0x4a8] sm:$0xf]  ;;  %v9790_v44 = vld [vmem:[#allocation2 + $0x42c] sm:$0xf]  ;;  %v8686_v23 = vor.u32 %v9662_v32, %v8683_v45  ;;  %v9775_v48 = vld [vmem:[#allocation2 + $0x3b4] sm:$0xf] }
 0x4f3   :  { %6823 = vmatpush.bf16.msrb.mxu3 %v9066_v15  ;;  %6773 = vmatpush.bf16.msra.mxu1 %v8930_v21  ;;  %v5432_v26 = vadd.f32 %v5431_v3, %v11663_v27  ;;  %v5451_v61 = vadd.f32 %v5450_v30, %v11663_v27  ;;  %v9685_v15 = vld [vmem:[#allocation2 + $0xdc] sm:$0xf0]  ;;  %v9798_v5 = vld [vmem:[#allocation2 + $0x464] sm:$0xf0]  ;;  %v9075_v3 = vld [vmem:[#allocation2 + $0x370] sm:$0xf0] }
 0x4f4   :  { %6801 = vmatpush.bf16.msra.mxu0 %v8806_v51  ;;  %v8738_v27 = vor.u32 %v9685_v15, %v8737_v63  ;;  %v8673_v21 = vld [vmem:[#allocation2 + $0x20] sm:$0xf]  ;;  %v9193_v57 = vld [vmem:[#allocation2 + $0x428] sm:$0xf]  ;;  %v9759_v15 = vld [vmem:[#allocation2 + $0x334] sm:$0xf] }
 0x4f5   :  { %6851 = vmatpush.bf16.msrb.mxu2 %v8942_v16  ;;  %v5474_v18 = vmax.f32 %v5432_v26, 0.0  ;;  %v5475_v20 = vmax.f32 %v5451_v61, 0.0  ;;  %v8674_v50 = vor.u32 %v9669_v42, %v8673_v21  ;;  %v9265_v26 = vld [vmem:[#allocation2 + $0x4b0] sm:$0xf]  ;;  %v9203_v61 = vld [vmem:[#allocation2 + $0x470] sm:$0xf0] }
 0x4f6   :  { %9287 = vmatmul.msk.bf16.vlgmr.msra.gmra.mxu3 %vm1995_vm0, %v11687_v8  ;;  %v8809_v8 = vld [vmem:[#allocation2 + $0x128] sm:$0xf]  ;;  %v9201_v21 = vld [vmem:[#allocation2 + $0x430] sm:$0xf]  ;;  %v9784_v42 = vld [vmem:[#allocation2 + $0x3f4] sm:$0xf0] }
 0x4f7   :  { %6824 = vmatpush.bf16.msrb.mxu3 %v9002_v13  ;;  %6774 = vmatpush.bf16.msra.mxu1 %v8866_v46  ;;  %v5531_v35 = vpack.c.bf16 %v5475_v20, %v5474_v18  ;;  %v8810_v37 = vor.u32 %v9702_v29, %v8809_v8  ;;  %v9806_v13 = vld [vmem:[#allocation2 + $0x4ac] sm:$0xf]  ;;  %v9267_v54 = vld [vmem:[#allocation2 + $0x4f0] sm:$0xf0]  ;;  %v9815_v51 = vld [vmem:[#allocation2 + $0x4ec] sm:$0xf0]  ;;  %v9078_v8 = vor.u32 %v9759_v15, %v9075_v3 }
 0x4f8   :  { %6802 = vmatpush.bf16.msra.mxu0 %v8742_v62  ;;  %v9259_v53 = vld [vmem:[#allocation2 + $0x4e8] sm:$0xf0]  ;;  %v9814_v6 = vld [vmem:[#allocation2 + $0x4e4] sm:$0xf0]  ;;  %v9139_v46 = vld [vmem:[#allocation2 + $0x3f0] sm:$0xf0]  ;;  %v9266_v22 = vor.u32 %v9815_v51, %v9265_v26 }
 0x4f9   :  { %6852 = vmatpush.bf16.msrb.mxu2 %v8878_v34  ;;  %5563 = vst [vmem:[#allocation2 + $0x438] sm:$0xff] %v5531_v35  ;;  %v9262_v9 = vor.u32 %v9806_v13, %v9259_v53  ;;  %v9258_v49 = vor.u32 %v9814_v6, %v9257_v36  ;;  %v9270_v34 = vor.u32 %v9807_v33, %v9267_v54  ;;  %v9147_v29 = vld [vmem:[#allocation2 + $0x3f8] sm:$0xf0]  ;;  %v9791_v18 = vld [vmem:[#allocation2 + $0x434] sm:$0xf] }
 0x4fa   :  { %v5433_v31 = vpop.f32.mrf.mxu2  ;;  %v5452_v14 = vpop.f32.mrf.mxu3  ;;  %v9799_v20 = vld [vmem:[#allocation2 + $0x46c] sm:$0xf0]  ;;  %v9206_v63 = vor.u32 %v9791_v18, %v9203_v61  ;;  %v9011_v53 = vld [vmem:[#allocation2 + $0x2f0] sm:$0xf0]  ;;  %v9145_v6 = vld [vmem:[#allocation2 + $0x3b8] sm:$0xf] }
 0x4fb   :  { %6825 = vmatpush.bf16.msrb.mxu3 %v8938_v11  ;;  %6775 = vmatpush.bf16.msra.mxu1 %v8802_v4  ;;  %v5434_v16 = vadd.f32 %v5433_v31, %v11661_v56  ;;  %v5453_v38 = vadd.f32 %v5452_v14, %v11661_v56  ;;  %v8681_v11 = vld [vmem:[#allocation2 + $0x28] sm:$0xf]  ;;  %v9198_v56 = vor.u32 %v9790_v44, %v9195_v47  ;;  %v9073_v13 = vld [vmem:[#allocation2 + $0x330] sm:$0xf]  ;;  %v9743_v14 = vld [vmem:[#allocation2 + $0x2b4] sm:$0xf] }
 0x4fc   :  { %6803 = vmatpush.bf16.msra.mxu0 %v8678_v43  ;;  %v9142_v4 = vor.u32 %v9775_v48, %v9139_v46  ;;  %v8682_v10 = vor.u32 %v9670_v58, %v8681_v11  ;;  %v9202_v12 = vor.u32 %v9799_v20, %v9201_v21  ;;  %v9146_v31 = vor.u32 %v9784_v42, %v9145_v6  ;;  %v9751_v45 = vld [vmem:[#allocation2 + $0x2ec] sm:$0xf0]  ;;  %v9768_v58 = vld [vmem:[#allocation2 + $0x374] sm:$0xf0]  ;;  %v9727_v46 = vld [vmem:[#allocation2 + $0x234] sm:$0xf]  ;;  %v11781_v21 = vpop.f32.mrf.mxu0 }
 0x4fd   :  { %6853 = vmatpush.bf16.msrb.mxu2 %v8814_v59  ;;  %v5490_v17 = vmax.f32 %v5434_v16, 0.0  ;;  %v5491_v2 = vmax.f32 %v5453_v38, 0.0  ;;  %v9014_v19 = vor.u32 %v9743_v14, %v9011_v53  ;;  %v8947_v16 = vld [vmem:[#allocation2 + $0x270] sm:$0xf0]  ;;  %v9019_v38 = vld [vmem:[#allocation2 + $0x2f8] sm:$0xf0] }
 0x4fe   :  { %v9081_v36 = vld [vmem:[#allocation2 + $0x338] sm:$0xf]  ;;  %v9744_v11 = vld [vmem:[#allocation2 + $0x2bc] sm:$0xf]  ;;  %v9735_v33 = vld [vmem:[#allocation2 + $0x26c] sm:$0xf0] }
 0x4ff   :  { %6826 = vmatpush.bf16.msrb.mxu3 %v8874_v25  ;;  %6776 = vmatpush.bf16.msra.mxu1 %v8738_v27  ;;  %v5539_v30 = vpack.c.bf16 %v5491_v2, %v5490_v17  ;;  %v9194_v25 = vor.u32 %v9798_v5, %v9193_v57  ;;  %v9082_v44 = vor.u32 %v9768_v58, %v9081_v36  ;;  %v9752_v51 = vld [vmem:[#allocation2 + $0x2f4] sm:$0xf0]  ;;  %v8945_v3 = vld [vmem:[#allocation2 + $0x230] sm:$0xf]  ;;  %v9711_v57 = vld [vmem:[#allocation2 + $0x1b4] sm:$0xf] }
 0x500   :  { %6867 = vmatpush.bf16.msrb.mxu0 %v9262_v9  ;;  %v9760_v9 = vld [vmem:[#allocation2 + $0x33c] sm:$0xf]  ;;  %v8950_v2 = vor.u32 %v9727_v46, %v8947_v16  ;;  %v11771_v61 = vld.sshfl [vmem:[#allocation1 + $0x8] sm:$0xff pattern:$0x73625140] }
 0x501   :  { %6854 = vmatpush.bf16.msrb.mxu2 %v8750_v7  ;;  %6804 = vmatmul.bf16.vlgmr.msra.gmra.mxu0 %v11740_v41  ;;  %5571 = vst [vmem:[#allocation2 + $0x478] sm:$0xff] %v5539_v30  ;;  %v9086_v32 = vor.u32 %v9760_v9, %v9083_v28  ;;  %v9017_v30 = vld [vmem:[#allocation2 + $0x2b8] sm:$0xf]  ;;  %v9728_v26 = vld [vmem:[#allocation2 + $0x23c] sm:$0xf] }
 0x502   :  { %v5436_v62 = vpop.f32.mrf.mxu2  ;;  %v5455_v59 = vpop.f32.mrf.mxu3  ;;  %v9736_v15 = vld [vmem:[#allocation2 + $0x274] sm:$0xf0]  ;;  %v8891_v18 = vld [vmem:[#allocation2 + $0x1f8] sm:$0xf0]  ;;  %v8881_v20 = vld [vmem:[#allocation2 + $0x1b0] sm:$0xf] }
 0x503   :  { %6827 = vmatpush.bf16.msrb.mxu3 %v8810_v37  ;;  %6777 = vmatpush.bf16.msra.mxu1 %v8674_v50  ;;  %v5437_v35 = vadd.f32 %v5436_v62, %v11656_v40  ;;  %v5456_v27 = vadd.f32 %v5455_v59, %v11656_v40  ;;  %v9150_v37 = vor.u32 %v9776_v52, %v9147_v29  ;;  %v8819_v29 = vld [vmem:[#allocation2 + $0x170] sm:$0xf0]  ;;  %v8953_v62 = vld [vmem:[#allocation2 + $0x238] sm:$0xf]  ;;  %v8817_v53 = vld [vmem:[#allocation2 + $0x130] sm:$0xf] }
 0x504   :  { %6868 = vmatpush.bf16.msrb.mxu0 %v9198_v56  ;;  %v9074_v40 = vor.u32 %v9767_v0, %v9073_v13  ;;  %v8883_v56 = vld [vmem:[#allocation2 + $0x1f0] sm:$0xf0]  ;;  %v8889_v28 = vld [vmem:[#allocation2 + $0x1b8] sm:$0xf]  ;;  %v9696_v6 = vld [vmem:[#allocation2 + $0x13c] sm:$0xf] }
 0x505   :  { %6855 = vmatpush.bf16.msrb.mxu2 %v8686_v23  ;;  %v5506_v43 = vmax.f32 %v5437_v35, 0.0  ;;  %v5507_v7 = vmax.f32 %v5456_v27, 0.0  ;;  %v9022_v23 = vor.u32 %v9744_v11, %v9019_v38  ;;  %v9703_v27 = vld [vmem:[#allocation2 + $0x16c] sm:$0xf0]  ;;  %v8755_v42 = vld [vmem:[#allocation2 + $0xf0] sm:$0xf0] }
 0x506   :  { %6778 = vmatmul.bf16.vlgmr.msra.gmra.mxu1 %v11740_v41  ;;  %v9679_v13 = vld [vmem:[#allocation2 + $0xb4] sm:$0xf]  ;;  %v9687_v14 = vld [vmem:[#allocation2 + $0xec] sm:$0xf0]  ;;  %v9704_v9 = vld [vmem:[#allocation2 + $0x174] sm:$0xf0] }
 0x507   :  { %6828 = vmatpush.bf16.msrb.mxu3 %v8746_v39  ;;  %6841 = vmatpush.bf16.msrb.mxu1 %v9258_v49  ;;  %v5547_v50 = vpack.c.bf16 %v5507_v7, %v5506_v43  ;;  %v9009_v39 = vld [vmem:[#allocation2 + $0x2b0] sm:$0xf]  ;;  %v8818_v43 = vor.u32 %v9703_v27, %v8817_v53  ;;  %v9680_v36 = vld [vmem:[#allocation2 + $0xbc] sm:$0xf]  ;;  %v9688_v46 = vld [vmem:[#allocation2 + $0xf4] sm:$0xf0] }
 0x508   :  { %6900 = vmatpush.bf16.msra.mxu0 %v9142_v4  ;;  %6856 = vmatmul.bf16.vlgmr.msrb.gmra.mxu2 %v11740_v41  ;;  %v9010_v49 = vor.u32 %v9751_v45, %v9009_v39  ;;  %v8946_v4 = vor.u32 %v9735_v33, %v8945_v3  ;;  %v8825_v45 = vld [vmem:[#allocation2 + $0x138] sm:$0xf]  ;;  %v9663_v39 = vld [vmem:[#allocation2 + $0x34] sm:$0xf]  ;;  %v8689_v33 = vld [vmem:[#allocation2 + $0x30] sm:$0xf] }
 0x509   :  { %6919 = vmatpush.bf16.msra.mxu2 %v9270_v34  ;;  %5579 = vst [vmem:[#allocation2 + $0x4b8] sm:$0xff] %v5547_v50  ;;  %v8955_v34 = vld [vmem:[#allocation2 + $0x278] sm:$0xf0]  ;;  %v8691_v50 = vld [vmem:[#allocation2 + $0x70] sm:$0xf0]  ;;  %v8826_v38 = vor.u32 %v9704_v9, %v8825_v45 }
 0x50a   :  { %v5438_v47 = vpop.f32.mrf.mxu2  ;;  %v5457_v54 = vpop.f32.mrf.mxu3  ;;  %v8958_v24 = vor.u32 %v9728_v26, %v8955_v34  ;;  %v9664_v3 = vld [vmem:[#allocation2 + $0x3c] sm:$0xf]  ;;  %v9672_v26 = vld [vmem:[#allocation2 + $0x74] sm:$0xf0] }
 0x50b   :  { %6829 = vmatpush.bf16.msrb.mxu3 %v8682_v10  ;;  %6842 = vmatpush.bf16.msrb.mxu1 %v9194_v25  ;;  %v5439_v5 = vadd.f32 %v5438_v47, %v11673_v60  ;;  %v5458_v17 = vadd.f32 %v5457_v54, %v11673_v60  ;;  %v9018_v10 = vor.u32 %v9752_v51, %v9017_v30  ;;  %v8761_v51 = vld [vmem:[#allocation2 + $0xb8] sm:$0xf] }
 0x50c   :  { %6901 = vmatpush.bf16.msra.mxu0 %v9078_v8  ;;  %v8886_v25 = vor.u32 %v9711_v57, %v8883_v56  ;;  %v9712_v8 = vld [vmem:[#allocation2 + $0x1bc] sm:$0xf]  ;;  %v8694_v47 = vor.u32 %v9663_v39, %v8691_v50 }
 0x50d   :  { %6920 = vmatpush.bf16.msra.mxu2 %v9206_v63  ;;  %v5522_v48 = vmax.f32 %v5439_v5, 0.0  ;;  %v5523_v55 = vmax.f32 %v5458_v17, 0.0  ;;  %v9695_v63 = vld [vmem:[#allocation2 + $0x134] sm:$0xf]  ;;  %v8894_v35 = vor.u32 %v9712_v8, %v8891_v18  ;;  %v6573_v5 = vpop.f32.mrf.mxu0  ;;  %v9211_v56 = vld [vmem:[#allocation2 + $0x478] sm:$0xf0] }
 0x50e   :  { %6830 = vmatmul.bf16.vlgmr.msrb.gmra.mxu3 %v11740_v41  ;;  %v8822_v52 = vor.u32 %v9695_v63, %v8819_v29  ;;  %v9792_v57 = vld [vmem:[#allocation2 + $0x43c] sm:$0xf] }
 0x50f   :  { %6893 = vmatpush.bf16.msra.mxu3 %v9266_v22  ;;  %6874 = vmatpush.bf16.msra.mxu1 %v9138_v1  ;;  %v5555_v60 = vpack.c.bf16 %v5523_v55, %v5522_v48  ;;  %v9719_v22 = vld [vmem:[#allocation2 + $0x1ec] sm:$0xf0]  ;;  %v8954_v1 = vor.u32 %v9736_v15, %v8953_v62  ;;  %v8762_v48 = vor.u32 %v9688_v46, %v8761_v51  ;;  %v9209_v15 = vld [vmem:[#allocation2 + $0x438] sm:$0xf] }
 0x510   :  { %6902 = vmatpush.bf16.msra.mxu0 %v9014_v19  ;;  %v8882_v59 = vor.u32 %v9719_v22, %v8881_v20  ;;  %v8763_v19 = vld [vmem:[#allocation2 + $0xf8] sm:$0xf0]  ;;  %v9273_v55 = vld [vmem:[#allocation2 + $0x4b8] sm:$0xf] }
 0x511   :  { %6952 = vmatpush.bf16.msrb.mxu2 %v9150_v37  ;;  %9290 = vmatmul.msk.bf16.vlgmr.msrb.gmra.mxu0 %vm1995_vm0, %v11771_v61  ;;  %5587 = vst [vmem:[#allocation2 + $0x4f8] sm:$0xff] %v5555_v60  ;;  %v9720_v37 = vld [vmem:[#allocation2 + $0x1f4] sm:$0xf0]  ;;  %v8766_v54 = vor.u32 %v9680_v36, %v8763_v19  ;;  %v9214_v60 = vor.u32 %v9792_v57, %v9211_v56 }
 0x512   :  { %v11779_v0 = vpop.f32.mrf.mxu2  ;;  %v8890_v7 = vor.u32 %v9720_v37, %v8889_v28 }
 0x513   :  { %6894 = vmatpush.bf16.msra.mxu3 %v9202_v12  ;;  %6875 = vmatpush.bf16.msra.mxu1 %v9074_v40  ;;  %v8827_v12 = vld [vmem:[#allocation2 + $0x178] sm:$0xf0]  ;;  %v8758_v40 = vor.u32 %v9679_v13, %v8755_v42 }
 0x514   :  { %6903 = vmatpush.bf16.msra.mxu0 %v8950_v2 }
 0x515   :  { %6953 = vmatpush.bf16.msrb.mxu2 %v9086_v32  ;;  %v8753_v32 = vld [vmem:[#allocation2 + $0xb0] sm:$0xf] }
 0x516   :  { %9289 = vmatmul.msk.bf16.vlgmr.msrb.gmra.mxu1 %vm1995_vm0, %v11771_v61  ;;  %v8754_v16 = vor.u32 %v9687_v14, %v8753_v32 }
 0x517   :  { %6926 = vmatpush.bf16.msrb.mxu3 %v9146_v31  ;;  %6876 = vmatpush.bf16.msra.mxu1 %v9010_v49  ;;  %v8830_v31 = vor.u32 %v9696_v6, %v8827_v12  ;;  %v9808_v49 = vld [vmem:[#allocation2 + $0x4bc] sm:$0xf] }
 0x518   :  { %6904 = vmatpush.bf16.msra.mxu0 %v8886_v25  ;;  %9292 = vmatmul.msk.bf16.vlgmr.msra.gmra.mxu2 %vm1995_vm0, %v11771_v61  ;;  %v9275_v58 = vld [vmem:[#allocation2 + $0x4f8] sm:$0xf0]  ;;  %v9816_v2 = vld [vmem:[#allocation2 + $0x4f4] sm:$0xf0]  ;;  %v11789_v63 = vpop.permute.xlu1 %5752 }
 0x519   :  { %6954 = vmatpush.bf16.msrb.mxu2 %v9022_v23  ;;  %v9278_v17 = vor.u32 %v9808_v49, %v9275_v58  ;;  %v8699_v23 = vld [vmem:[#allocation2 + $0x78] sm:$0xf0]  ;;  %v9800_v25 = vld [vmem:[#allocation2 + $0x474] sm:$0xf0]  ;;  %v6572_v8 = vadd.f32 %v11781_v21, %v11789_v63 }
 0x51a   :  { %v6599_v11 = vpop.f32.mrf.mxu2  ;;  %v9210_v29 = vor.u32 %v9800_v25, %v9209_v15 }
 0x51b   :  { %6927 = vmatpush.bf16.msrb.mxu3 %v9082_v44  ;;  %6877 = vmatpush.bf16.msra.mxu1 %v8946_v4  ;;  %v9671_v44 = vld [vmem:[#allocation2 + $0x6c] sm:$0xf0]  ;;  %v6584_v30 = vpop.f32.mrf.mxu1  ;;  %v9274_v4 = vor.u32 %v9816_v2, %v9273_v55 }
 0x51c   :  { %6905 = vmatpush.bf16.msra.mxu0 %v8822_v52  ;;  %v8690_v34 = vor.u32 %v9671_v44, %v8689_v33  ;;  %v6598_v52 = vadd.f32 %v11779_v0, %v11789_v63 }
 0x51d   :  { %6955 = vmatpush.bf16.msrb.mxu2 %v8958_v24  ;;  %v8697_v24 = vld [vmem:[#allocation2 + $0x38] sm:$0xf] }
 0x51e   :  { %9291 = vmatmul.msk.bf16.vlgmr.msra.gmra.mxu3 %vm1995_vm0, %v11771_v61  ;;  %v8698_v22 = vor.u32 %v9672_v26, %v8697_v24 }
 0x51f   :  { %6928 = vmatpush.bf16.msrb.mxu3 %v9018_v10  ;;  %6878 = vmatpush.bf16.msra.mxu1 %v8882_v59  ;;  %v8702_v10 = vor.u32 %v9664_v3, %v8699_v23 }
 0x520   :  { %6906 = vmatpush.bf16.msra.mxu0 %v8758_v40 }
 0x521   :  { %6956 = vmatpush.bf16.msrb.mxu2 %v8894_v35  ;;  %v6585_v35 = vadd.f32 %v6584_v30, %v6572_v8 }
 0x522   :  { %v6610_v18 = vpop.f32.mrf.mxu3 }
 0x523   :  { %6929 = vmatpush.bf16.msrb.mxu3 %v8954_v1  ;;  %6879 = vmatpush.bf16.msra.mxu1 %v8818_v43  ;;  %v6586_v20 = vpop.f32.mrf.mxu1  ;;  %v6623_v1 = vpop.f32.mrf.mxu0  ;;  %v6611_v27 = vadd.f32 %v6610_v18, %v6598_v52  ;;  %10034 = vtanh.f32 %v6585_v35 }
 0x524   :  { %6907 = vmatpush.bf16.msra.mxu0 %v8694_v47  ;;  %v6624_v21 = vadd.f32 %v6623_v1, %v11789_v63 }
 0x525   :  { %6957 = vmatpush.bf16.msrb.mxu2 %v8830_v31  ;;  %10036 = vtanh.f32 %v6611_v27 }
 0x527   :  { %6930 = vmatpush.bf16.msrb.mxu3 %v8890_v7  ;;  %6880 = vmatpush.bf16.msra.mxu1 %v8754_v16 }
 0x528   :  { %6971 = vmatpush.bf16.msrb.mxu0 %v9278_v17 }
 0x529   :  { %6958 = vmatpush.bf16.msrb.mxu2 %v8766_v54  ;;  %6908 = vmatmul.bf16.vlgmr.msra.gmra.mxu0 %v11740_v41  ;;  %v10035_v42 = vpop.eup %10034 }
 0x52a   :  { %v6612_v59 = vpop.f32.mrf.mxu3 }
 0x52b   :  { %6931 = vmatpush.bf16.msrb.mxu3 %v8826_v38  ;;  %6881 = vmatpush.bf16.msra.mxu1 %v8690_v34  ;;  %v6625_v37 = vpop.f32.mrf.mxu0  ;;  %v10037_v12 = vpop.eup %10036 }
 0x52c   :  { %6972 = vmatpush.bf16.msrb.mxu0 %v9214_v60  ;;  %v7010_v53 = vrot.slane %v10037_v12, 4 }
 0x52d   :  { %6959 = vmatpush.bf16.msrb.mxu2 %v8702_v10 }
 0x52e   :  { %6882 = vmatmul.bf16.vlgmr.msra.gmra.mxu1 %v11740_v41  ;;  %v7019_v0 = vsel %vm7018_vm9, %v10035_v42, %v7010_v53 }
 0x52f   :  { %6932 = vmatpush.bf16.msrb.mxu3 %v8762_v48  ;;  %6945 = vmatpush.bf16.msrb.mxu1 %v9274_v4  ;;  %7035 = vst [vmem:[%s11854_s9] sm:$0xff] %v7019_v0 }
 0x530   :  { %6960 = vmatmul.bf16.vlgmr.msrb.gmra.mxu2 %v11740_v41  ;;  %v6649_v62 = vpop.f32.mrf.mxu2 }
 0x533   :  { %6933 = vmatpush.bf16.msrb.mxu3 %v8698_v22  ;;  %6946 = vmatpush.bf16.msrb.mxu1 %v9210_v29  ;;  %v6701_v28 = vpop.f32.mrf.mxu0 }
 0x534   :  { %v6702_v16 = vadd.f32 %v6701_v28, %v11789_v63 }
 0x536   :  { %6934 = vmatmul.bf16.vlgmr.msrb.gmra.mxu3 %v11740_v41 }
 0x538   :  { %v6651_v41 = vpop.f32.mrf.mxu2 }
 0x539   :  { %9294 = vmatmul.msk.bf16.vlgmr.msrb.gmra.mxu0 %vm1995_vm0, %v11771_v61 }
 0x53b   :  { %v6636_v43 = vpop.f32.mrf.mxu1  ;;  %v6703_v40 = vpop.f32.mrf.mxu0 }
 0x53c   :  { %v6637_v7 = vadd.f32 %v6636_v43, %v6624_v21 }
 0x53e   :  { %9293 = vmatmul.msk.bf16.vlgmr.msrb.gmra.mxu1 %vm1995_vm0, %v11771_v61  ;;  %v6650_v61 = vadd.f32 %v6649_v62, %v11789_v63  ;;  %10038 = vtanh.f32 %v6637_v7 }
 0x541   :  { %v6662_v13 = vpop.f32.mrf.mxu3 }
 0x542   :  { %v6663_v6 = vadd.f32 %v6662_v13, %v6650_v61 }
 0x543   :  { %v6638_v31 = vpop.f32.mrf.mxu1  ;;  %v6714_v14 = vpop.f32.mrf.mxu2 }
 0x544   :  { %10040 = vtanh.f32 %v6663_v6  ;;  %v10039_v9 = vpop.eup %10038  ;;  %v6715_v39 = vadd.f32 %v6714_v14, %v6702_v16 }
 0x546   :  { %10042 = vtanh.f32 %v6715_v39 }
 0x549   :  { %v6664_v50 = vpop.f32.mrf.mxu3 }
 0x54a   :  { %v10041_v19 = vpop.eup %10040 }
 0x54b   :  { %v7011_v32 = vrot.slane %v10041_v19, 4  ;;  %v6716_v45 = vpop.f32.mrf.mxu2 }
 0x54c   :  { %v10043_v44 = vpop.eup %10042 }
 0x54d   :  { %v7020_v58 = vsel %vm7018_vm9, %v10039_v9, %v7011_v32  ;;  %v7012_v11 = vrot.slane %v10043_v44, 4 }
 0x54e   :  { %7036 = vst [vmem:[%s11854_s9 + $0x8] sm:$0xff] %v7020_v58 }
 0x551   :  { %v6688_v38 = vpop.f32.mrf.mxu3 }
 0x559   :  { %v6690_v54 = vpop.f32.mrf.mxu3 }
 0x55b   :  { %v6675_v36 = vpop.f32.mrf.mxu1 }
 0x55c   :  { %v6676_v47 = vadd.f32 %v6675_v36, %v11789_v63 }
 0x55e   :  { %v6689_v49 = vadd.f32 %v6688_v38, %v6676_v47  ;;  %v6766_v46 = vpop.f32.mrf.mxu0 }
 0x560   :  { %10044 = vtanh.f32 %v6689_v49 }
 0x563   :  { %v6677_v5 = vpop.f32.mrf.mxu1  ;;  %v6753_v2 = vpop.f32.mrf.mxu2 }
 0x564   :  { %v6754_v51 = vadd.f32 %v6753_v2, %v11789_v63 }
 0x566   :  { %v10045_v17 = vpop.eup %10044  ;;  %v6767_v34 = vadd.f32 %v6766_v46, %v6754_v51  ;;  %v6768_v48 = vpop.f32.mrf.mxu0 }
 0x567   :  { %v7021_v33 = vsel %vm7018_vm9, %v10045_v17, %v7012_v11 }
 0x568   :  { %7037 = vst [vmem:[%s11854_s9 + $0x10] sm:$0xff] %v7021_v33  ;;  %10046 = vtanh.f32 %v6767_v34 }
 0x569   :  { %v6727_v23 = vpop.f32.mrf.mxu3 }
 0x56a   :  { %v6728_v56 = vadd.f32 %v6727_v23, %v11789_v63 }
 0x56b   :  { %v6740_v55 = vpop.f32.mrf.mxu1  ;;  %v6755_v30 = vpop.f32.mrf.mxu2 }
 0x56c   :  { %v6741_v3 = vadd.f32 %v6740_v55, %v6728_v56 }
 0x56e   :  { %10048 = vtanh.f32 %v6741_v3  ;;  %v10047_v10 = vpop.eup %10046 }
 0x56f   :  { %v7013_v57 = vrot.slane %v10047_v10, 4 }
 0x571   :  { %v6729_v4 = vpop.f32.mrf.mxu3 }
 0x573   :  { %v6742_v26 = vpop.f32.mrf.mxu1  ;;  %v6818_v24 = vpop.f32.mrf.mxu2 }
 0x574   :  { %v10049_v60 = vpop.eup %10048 }
 0x575   :  { %v7022_v25 = vsel %vm7018_vm9, %v10049_v60, %v7013_v57 }
 0x576   :  { %7038 = vst [vmem:[%s11854_s9 + $0x18] sm:$0xff] %v7022_v25 }
 0x579   :  { %v6792_v22 = vpop.f32.mrf.mxu3 }
 0x57b   :  { %v6820_v18 = vpop.f32.mrf.mxu2 }
 0x57e   :  { %v6805_v15 = vpop.f32.mrf.mxu0 }
 0x57f   :  { %v6806_v29 = vadd.f32 %v6805_v15, %v11789_v63 }
 0x581   :  { %v6794_v20 = vpop.f32.mrf.mxu3  ;;  %v6819_v62 = vadd.f32 %v6818_v24, %v6806_v29 }
 0x583   :  { %10050 = vtanh.f32 %v6819_v62  ;;  %v6779_v59 = vpop.f32.mrf.mxu1 }
 0x584   :  { %v6780_v1 = vadd.f32 %v6779_v59, %v11789_v63 }
 0x586   :  { %v6793_v8 = vadd.f32 %v6792_v22, %v6780_v1  ;;  %v6807_v52 = vpop.f32.mrf.mxu0 }
 0x588   :  { %10052 = vtanh.f32 %v6793_v8 }
 0x589   :  { %v10051_v35 = vpop.eup %10050 }
 0x58a   :  { %v7014_v41 = vrot.slane %v10051_v35, 4 }
 0x58b   :  { %v6857_v27 = vpop.f32.mrf.mxu2  ;;  %v6781_v37 = vpop.f32.mrf.mxu1 }
 0x58c   :  { %v6858_v42 = vadd.f32 %v6857_v27, %v11789_v63 }
 0x58e   :  { %v10053_v53 = vpop.eup %10052  ;;  %v6870_v21 = vpop.f32.mrf.mxu0 }
 0x58f   :  { %v7023_v0 = vsel %vm7018_vm9, %v10053_v53, %v7014_v41  ;;  %v6871_v28 = vadd.f32 %v6870_v21, %v6858_v42 }
 0x590   :  { %7039 = vst [vmem:[%s11854_s9 + $0x20] sm:$0xff] %v7023_v0 }
 0x591   :  { %v6831_v12 = vpop.f32.mrf.mxu3  ;;  %10054 = vtanh.f32 %v6871_v28 }
 0x592   :  { %v6832_v43 = vadd.f32 %v6831_v12, %v11789_v63 }
 0x593   :  { %v6859_v61 = vpop.f32.mrf.mxu2  ;;  %v6844_v7 = vpop.f32.mrf.mxu1 }
 0x594   :  { %v6845_v13 = vadd.f32 %v6844_v7, %v6832_v43 }
 0x596   :  { %10056 = vtanh.f32 %v6845_v13  ;;  %v6872_v40 = vpop.f32.mrf.mxu0 }
 0x597   :  { %v10055_v31 = vpop.eup %10054 }
 0x598   :  { %v7015_v14 = vrot.slane %v10055_v31, 4 }
 0x599   :  { %v6833_v6 = vpop.f32.mrf.mxu3 }
 0x59b   :  { %v6922_v9 = vpop.f32.mrf.mxu2  ;;  %v6846_v50 = vpop.f32.mrf.mxu1 }
 0x59c   :  { %v10057_v19 = vpop.eup %10056 }
 0x59d   :  { %v7024_v32 = vsel %vm7018_vm9, %v10057_v19, %v7015_v14 }
 0x59e   :  { %7040 = vst [vmem:[%s11854_s9 + $0x28] sm:$0xff] %v7024_v32 }
 0x5a1   :  { %v6896_v45 = vpop.f32.mrf.mxu3 }
 0x5a3   :  { %v6924_v58 = vpop.f32.mrf.mxu2 }
 0x5a6   :  { %v6909_v16 = vpop.f32.mrf.mxu0 }
 0x5a7   :  { %v6910_v39 = vadd.f32 %v6909_v16, %v11789_v63 }
 0x5a9   :  { %v6898_v47 = vpop.f32.mrf.mxu3  ;;  %v6923_v54 = vadd.f32 %v6922_v9, %v6910_v39 }
 0x5ab   :  { %v6883_v38 = vpop.f32.mrf.mxu1  ;;  %10058 = vtanh.f32 %v6923_v54 }
 0x5ac   :  { %v6884_v36 = vadd.f32 %v6883_v38, %v11789_v63 }
 0x5ae   :  { %v6897_v49 = vadd.f32 %v6896_v45, %v6884_v36  ;;  %v6911_v46 = vpop.f32.mrf.mxu0 }
 0x5b0   :  { %10060 = vtanh.f32 %v6897_v49 }
 0x5b1   :  { %v10059_v17 = vpop.eup %10058 }
 0x5b2   :  { %v7016_v23 = vrot.slane %v10059_v17, 4 }
 0x5b3   :  { %v6961_v44 = vpop.f32.mrf.mxu2  ;;  %v6885_v11 = vpop.f32.mrf.mxu1 }
 0x5b4   :  { %v6962_v33 = vadd.f32 %v6961_v44, %v11789_v63 }
 0x5b6   :  { %v10061_v2 = vpop.eup %10060  ;;  %v6974_v48 = vpop.f32.mrf.mxu0 }
 0x5b7   :  { %v7025_v51 = vsel %vm7018_vm9, %v10061_v2, %v7016_v23  ;;  %v6975_v3 = vadd.f32 %v6974_v48, %v6962_v33 }
 0x5b8   :  { %7041 = vst [vmem:[%s11854_s9 + $0x30] sm:$0xff] %v7025_v51 }
 0x5b9   :  { %v6935_v5 = vpop.f32.mrf.mxu3  ;;  %10062 = vtanh.f32 %v6975_v3 }
 0x5ba   :  { %v6936_v56 = vadd.f32 %v6935_v5, %v11789_v63 }
 0x5bb   :  { %v6963_v34 = vpop.f32.mrf.mxu2  ;;  %v6948_v55 = vpop.f32.mrf.mxu1 }
 0x5bc   :  { %v6949_v30 = vadd.f32 %v6948_v55, %v6936_v56 }
 0x5be   :  { %10064 = vtanh.f32 %v6949_v30  ;;  %v6976_v10 = vpop.f32.mrf.mxu0 }
 0x5bf   :  { %v10063_v26 = vpop.eup %10062 }
 0x5c0   :  { %v7017_v25 = vrot.slane %v10063_v26, 4 }
 0x5c1   :  { %v6937_v4 = vpop.f32.mrf.mxu3 }
 0x5c3   :  { %v6950_v57 = vpop.f32.mrf.mxu1 }
 0x5c4   :  { %v10065_v60 = vpop.eup %10064 }
 0x5c5   :  { %v7026_v24 = vsel %vm7018_vm9, %v10065_v60, %v7017_v25 }
 0x5c6   :  { %7042 = vst [vmem:[%s11854_s9 + $0x38] sm:$0xff] %v7026_v24 }

</bundles_post_ra>
